<compile_context>
chip_gen: v5e
topology: v5e:2x2
jax: 0.10.0
libtpu: 0.0.40
codegen_flags: <defaults>
</compile_context>

<pallas_src>
import jax
import jax.numpy as jnp
from jax.experimental import pallas as pl
from jax.experimental.pallas import tpu as pltpu


# --------------------------------------------------------------------------
# Network configuration (matches the PyTorch ECGNet module)
# --------------------------------------------------------------------------
CONV_CFG = [
    # (Cin, Cout, K, stride, padding)
    (1, 8, 16, 2, 7),
    (8, 12, 12, 2, 5),
    (12, 32, 9, 1, 4),
    (32, 64, 7, 1, 3),
    (64, 64, 5, 1, 2),
    (64, 64, 3, 1, 1),
    (64, 72, 3, 1, 1),
]
POOL_CFG = [(8, 4), (4, 2), (5, 2), (4, 2), (2, 2), (2, 2), (2, 2)]
FC_CFG = [(216, 64), (64, 17)]  # (in_features, out_features)
IN_LEN = 3600                   # input length required so flatten -> 216 feats


def _seq_lengths(lin):
    """Static per-stage lengths: conv outputs and pool outputs."""
    conv_out, pool_out = [], []
    L = lin
    for (_, _, k, s, p), (pk, ps) in zip(CONV_CFG, POOL_CFG):
        L = (L + 2 * p - k) // s + 1
        conv_out.append(L)
        L = (L - pk) // ps + 1
        pool_out.append(L)
    return conv_out, pool_out


# --------------------------------------------------------------------------
# Fused Pallas kernel (one grid step == one batch sample)
# --------------------------------------------------------------------------
def _build_kernel(conv_out, pool_out):
    n_conv = len(CONV_CFG)

    def kernel(*refs):
        f32 = jnp.float32
        bf16 = jnp.bfloat16

        # ---- unpack refs: inputs | output | scratch ----
        it = iter(refs)
        patches_ref = next(it)                        # (1, L1, Cin*K1) bf16
        conv_w, conv_b = [], []
        for _ in range(n_conv):
            conv_w.append(next(it))                   # (K, Cin, Cout) bf16 (layer0: (K,Cout))
            conv_b.append(next(it))                   # (1, Cout) f32
        fc1_w = next(it)                              # (3, 72, 64) bf16
        fc1_b = next(it)                              # (1, 64) f32
        fc2_w = next(it)                              # (64, 17) bf16
        fc2_b = next(it)                              # (1, 17) f32
        out_ref = next(it)                            # (1, 1, 17) f32
        c_scr = [next(it)]                            # conv-output scratches
        x_scr = []                                    # zero-padded conv-input scratches
        for _ in range(1, n_conv):
            x_scr.append(next(it))
            c_scr.append(next(it))

        # ---- stage 1: conv1 via a single matmul on pre-gathered patches ----
        acc = jnp.dot(patches_ref[0], conv_w[0][...], preferred_element_type=f32)
        c_scr[0][...] = jnp.maximum(acc + conv_b[0][...], 0.0)

        # ---- stages 2..7: maxpool (strided reads) -> conv (shifted matmuls) ----
        for li in range(1, n_conv):
            _, cout, K, stride, pad = CONV_CFG[li]
            pk, ps = POOL_CFG[li - 1]
            Lp = pool_out[li - 1]
            Lc = conv_out[li]

            # MaxPool1d(kernel=pk, stride=ps) of the previous conv output.
            src = c_scr[li - 1]
            pooled = src[pl.ds(0, Lp, ps), :]
            for k in range(1, pk):
                pooled = jnp.maximum(pooled, src[pl.ds(k, Lp, ps), :])

            # Zero-padded conv input held in VMEM scratch.
            xp = x_scr[li - 1]
            xp[...] = jnp.zeros(xp.shape, xp.dtype)
            xp[pad:pad + Lp, :] = pooled

            # Conv as K accumulated shifted/strided matmuls on the MXU.
            acc = jnp.zeros((Lc, cout), f32)
            for k in range(K):
                sl = pl.ds(k, Lc) if stride == 1 else pl.ds(k, Lc, stride)
                acc = acc + jnp.dot(xp[sl, :].astype(bf16), conv_w[li][k],
                                    preferred_element_type=f32)
            c_scr[li][...] = jnp.maximum(acc + conv_b[li][...], 0.0)

        # ---- final maxpool -> (3, 72) feature map ----
        pk, ps = POOL_CFG[-1]
        Lp = pool_out[-1]
        src = c_scr[-1]
        feat = src[pl.ds(0, Lp, ps), :]
        for k in range(1, pk):
            feat = jnp.maximum(feat, src[pl.ds(k, Lp, ps), :])

        # ---- classifier: flatten folded into FC1's weight layout ----
        y = fc1_b[...]
        for l in range(Lp):
            y = y + jnp.dot(feat[l:l + 1, :].astype(bf16), fc1_w[l],
                            preferred_element_type=f32)
        y = jnp.maximum(y, 0.0)
        # TODO(synk): nn.Dropout(p=0.1) is identity in eval-mode forward; no RNG mask applied.
        logits = jnp.dot(y.astype(bf16), fc2_w[...],
                         preferred_element_type=f32) + fc2_b[...]
        out_ref[0] = logits.astype(out_ref.dtype)

    return kernel


# --------------------------------------------------------------------------
# Wrapper: weight re-layout + single pallas_call
# --------------------------------------------------------------------------
def ecgnet_forward(params, x):
    """x: (B, 1, 3600) float32 -> logits (B, 17) float32."""
    B, cin0, Lin = x.shape
    conv_out, pool_out = _seq_lengths(Lin)
    assert CONV_CFG[-1][1] * pool_out[-1] == FC_CFG[0][0], "bad input length"
    f32, bf16 = jnp.float32, jnp.bfloat16

    # conv1 im2col on the raw input only (Cin=1, K=16) -- one cheap gather.
    _, c1out, K1, s1, p1 = CONV_CFG[0]
    L1 = conv_out[0]
    xpad = jnp.pad(x[:, 0, :], ((0, 0), (p1, p1)))
    gidx = jnp.arange(L1)[:, None] * s1 + jnp.arange(K1)[None, :]
    patches = xpad[:, gidx].astype(bf16)                       # (B, L1, K1)

    # Weights rearranged for the (length-on-sublanes, channels-on-lanes) layout.
    inputs = [patches]
    w0, b0 = params["convs"][0]
    inputs += [jnp.transpose(w0.reshape(c1out, K1)).astype(bf16),   # (K1, Cout)
               b0.reshape(1, c1out).astype(f32)]
    for (w, b), (_, cout, _, _, _) in zip(params["convs"][1:], CONV_CFG[1:]):
        inputs += [jnp.transpose(w, (2, 1, 0)).astype(bf16),        # (K, Cin, Cout)
                   b.reshape(1, cout).astype(f32)]
    (w_fc1, b_fc1), (w_fc2, b_fc2) = params["fcs"]
    c_last, l_last = CONV_CFG[-1][1], pool_out[-1]
    # torch flatten order is feature = channel*3 + pos  ->  (pos, channel, out)
    wr1 = jnp.transpose(w_fc1.reshape(FC_CFG[0][1], c_last, l_last), (2, 1, 0))
    inputs += [wr1.astype(bf16),
               b_fc1.reshape(1, FC_CFG[0][1]).astype(f32),
               jnp.transpose(w_fc2).astype(bf16),                   # (64, 17)
               b_fc2.reshape(1, FC_CFG[1][1]).astype(f32)]

    def _const_spec(a):
        return pl.BlockSpec(a.shape, lambda b, _n=a.ndim: (0,) * _n)

    in_specs = [pl.BlockSpec((1, L1, K1), lambda b: (b, 0, 0))]
    in_specs += [_const_spec(a) for a in inputs[1:]]

    # VMEM scratch: conv outputs + zero-padded conv inputs (all tiny, ~1.5 MiB).
    scratch = [pltpu.VMEM((conv_out[0], CONV_CFG[0][1]), f32)]
    for li in range(1, len(CONV_CFG)):
        cin, cout, _, _, pad = CONV_CFG[li]
        scratch.append(pltpu.VMEM((pool_out[li - 1] + 2 * pad, cin), f32))
        scratch.append(pltpu.VMEM((conv_out[li], cout), f32))

    n_cls = FC_CFG[1][1]
    out = pl.pallas_call(
        _build_kernel(conv_out, pool_out),
        out_shape=jax.ShapeDtypeStruct((B, 1, n_cls), f32),
        grid_spec=pltpu.PrefetchScalarGridSpec(
            num_scalar_prefetch=0,
            grid=(B,),
            in_specs=in_specs,
            out_specs=pl.BlockSpec((1, 1, n_cls), lambda b: (b, 0, 0)),
            scratch_shapes=scratch,
        ),
        compiler_params=pltpu.CompilerParams(
            dimension_semantics=("parallel",)),
    )(*inputs)
    return out.reshape(B, n_cls)


# --------------------------------------------------------------------------
# Parameter construction (deterministic, synthetic; PyTorch shapes)
# --------------------------------------------------------------------------
def init_params(key):
    params = {"convs": [], "fcs": []}
    for (cin, cout, k, _, _) in CONV_CFG:
        key, kw, kb = jax.random.split(key, 3)
        scale = 1.0 / jnp.sqrt(cin * k)
        w = jax.random.normal(kw, (cout, cin, k), jnp.float32) * scale
        b = jax.random.normal(kb, (cout,), jnp.float32) * scale
        params["convs"].append((w, b))
    for (fin, fout) in FC_CFG:
        key, kw, kb = jax.random.split(key, 3)
        scale = 1.0 / jnp.sqrt(fin)
        w = jax.random.normal(kw, (fout, fin), jnp.float32) * scale
        b = jax.random.normal(kb, (fout,), jnp.float32) * scale
        params["fcs"].append((w, b))
    return params


# --------------------------------------------------------------------------
if __name__ == "__main__":
    key = jax.random.PRNGKey(0)
    pkey, xkey = jax.random.split(key)
    params = init_params(pkey)

    # ECG signal: batch=2, 1 channel, length 3600 (so flatten -> 216 features)
    x = jax.random.normal(xkey, (2, 1, IN_LEN), jnp.float32)

    fwd = jax.jit(ecgnet_forward)
    out = jax.block_until_ready(fwd(params, x))
    assert out.shape == (2, 17), out.shape
    assert bool(jnp.all(jnp.isfinite(out)))
    print("KERNEL_OK")
</pallas_src>

<mosaic_0001>
module attributes {stable_mosaic.version = 11 : i64} {
  func.func @kernel(%arg0: i32, %arg1: memref<1x1800x16xbf16, #tpu.memory_space<vmem>>, %arg2: memref<16x8xbf16, #tpu.memory_space<vmem>>, %arg3: memref<1x8xf32, #tpu.memory_space<vmem>>, %arg4: memref<12x8x12xbf16, #tpu.memory_space<vmem>>, %arg5: memref<1x12xf32, #tpu.memory_space<vmem>>, %arg6: memref<9x12x32xbf16, #tpu.memory_space<vmem>>, %arg7: memref<1x32xf32, #tpu.memory_space<vmem>>, %arg8: memref<7x32x64xbf16, #tpu.memory_space<vmem>>, %arg9: memref<1x64xf32, #tpu.memory_space<vmem>>, %arg10: memref<5x64x64xbf16, #tpu.memory_space<vmem>>, %arg11: memref<1x64xf32, #tpu.memory_space<vmem>>, %arg12: memref<3x64x64xbf16, #tpu.memory_space<vmem>>, %arg13: memref<1x64xf32, #tpu.memory_space<vmem>>, %arg14: memref<3x64x72xbf16, #tpu.memory_space<vmem>>, %arg15: memref<1x72xf32, #tpu.memory_space<vmem>>, %arg16: memref<3x72x64xbf16, #tpu.memory_space<vmem>>, %arg17: memref<1x64xf32, #tpu.memory_space<vmem>>, %arg18: memref<64x17xbf16, #tpu.memory_space<vmem>>, %arg19: memref<1x17xf32, #tpu.memory_space<vmem>>, %arg20: memref<1x1x17xf32, #tpu.memory_space<vmem>>, %arg21: memref<1800x8xf32, #tpu.memory_space<vmem>>, %arg22: memref<459x8xf32, #tpu.memory_space<vmem>>, %arg23: memref<224x12xf32, #tpu.memory_space<vmem>>, %arg24: memref<119x12xf32, #tpu.memory_space<vmem>>, %arg25: memref<111x32xf32, #tpu.memory_space<vmem>>, %arg26: memref<60x32xf32, #tpu.memory_space<vmem>>, %arg27: memref<54x64xf32, #tpu.memory_space<vmem>>, %arg28: memref<30x64xf32, #tpu.memory_space<vmem>>, %arg29: memref<26x64xf32, #tpu.memory_space<vmem>>, %arg30: memref<15x64xf32, #tpu.memory_space<vmem>>, %arg31: memref<13x64xf32, #tpu.memory_space<vmem>>, %arg32: memref<8x64xf32, #tpu.memory_space<vmem>>, %arg33: memref<6x72xf32, #tpu.memory_space<vmem>>) attributes {dimension_semantics = [#tpu.dimension_semantics<parallel>], iteration_bounds = array<i64: 2>, scalar_prefetch = 0 : i64, scratch_operands = 13 : i64, tpu.core_type = #tpu.core_type<tc>, window_params = [{transform_indices = @transform_0, window_bounds = array<i64: 1, 1800, 16>}, {pipeline_mode = #tpu.pipeline_mode<synchronous>, transform_indices = @transform_1, window_bounds = array<i64: 16, 8>}, {pipeline_mode = #tpu.pipeline_mode<synchronous>, transform_indices = @transform_2, window_bounds = array<i64: 1, 8>}, {pipeline_mode = #tpu.pipeline_mode<synchronous>, transform_indices = @transform_3, window_bounds = array<i64: 12, 8, 12>}, {pipeline_mode = #tpu.pipeline_mode<synchronous>, transform_indices = @transform_4, window_bounds = array<i64: 1, 12>}, {pipeline_mode = #tpu.pipeline_mode<synchronous>, transform_indices = @transform_5, window_bounds = array<i64: 9, 12, 32>}, {pipeline_mode = #tpu.pipeline_mode<synchronous>, transform_indices = @transform_6, window_bounds = array<i64: 1, 32>}, {pipeline_mode = #tpu.pipeline_mode<synchronous>, transform_indices = @transform_7, window_bounds = array<i64: 7, 32, 64>}, {pipeline_mode = #tpu.pipeline_mode<synchronous>, transform_indices = @transform_8, window_bounds = array<i64: 1, 64>}, {pipeline_mode = #tpu.pipeline_mode<synchronous>, transform_indices = @transform_9, window_bounds = array<i64: 5, 64, 64>}, {pipeline_mode = #tpu.pipeline_mode<synchronous>, transform_indices = @transform_10, window_bounds = array<i64: 1, 64>}, {pipeline_mode = #tpu.pipeline_mode<synchronous>, transform_indices = @transform_11, window_bounds = array<i64: 3, 64, 64>}, {pipeline_mode = #tpu.pipeline_mode<synchronous>, transform_indices = @transform_12, window_bounds = array<i64: 1, 64>}, {pipeline_mode = #tpu.pipeline_mode<synchronous>, transform_indices = @transform_13, window_bounds = array<i64: 3, 64, 72>}, {pipeline_mode = #tpu.pipeline_mode<synchronous>, transform_indices = @transform_14, window_bounds = array<i64: 1, 72>}, {pipeline_mode = #tpu.pipeline_mode<synchronous>, transform_indices = @transform_15, window_bounds = array<i64: 3, 72, 64>}, {pipeline_mode = #tpu.pipeline_mode<synchronous>, transform_indices = @transform_16, window_bounds = array<i64: 1, 64>}, {pipeline_mode = #tpu.pipeline_mode<synchronous>, transform_indices = @transform_17, window_bounds = array<i64: 64, 17>}, {pipeline_mode = #tpu.pipeline_mode<synchronous>, transform_indices = @transform_18, window_bounds = array<i64: 1, 17>}, {transform_indices = @transform_19, window_bounds = array<i64: 1, 1, 17>}]} {
    %c0 = arith.constant 0 : index
    %c0_0 = arith.constant 0 : index
    %c0_1 = arith.constant 0 : index
    %0 = vector.load %arg1[%c0, %c0_0, %c0_1] : memref<1x1800x16xbf16, #tpu.memory_space<vmem>>, vector<1x1800x16xbf16>
    %1 = vector.shape_cast %0 : vector<1x1800x16xbf16> to vector<1800x16xbf16>
    %c0_2 = arith.constant 0 : index
    %c0_3 = arith.constant 0 : index
    %2 = vector.load %arg2[%c0_2, %c0_3] : memref<16x8xbf16, #tpu.memory_space<vmem>>, vector<16x8xbf16>
    %cst = arith.constant dense<0.000000e+00> : vector<1800x8xf32>
    %3 = tpu.matmul %1, %2, %cst {dimension_numbers = #tpu.dot_dimension_numbers<[1], [0], [0], [1], [0, 0, 1, 1], [], []>} : vector<1800x16xbf16>, vector<16x8xbf16>, vector<1800x8xf32> -> vector<1800x8xf32>
    %c0_4 = arith.constant 0 : index
    %c0_5 = arith.constant 0 : index
    %4 = vector.load %arg3[%c0_4, %c0_5] : memref<1x8xf32, #tpu.memory_space<vmem>>, vector<1x8xf32>
    %5 = vector.broadcast %4 : vector<1x8xf32> to vector<1800x8xf32>
    %6 = arith.addf %3, %5 : vector<1800x8xf32>
    %cst_6 = arith.constant 0.000000e+00 : f32
    %7 = vector.broadcast %cst_6 : f32 to vector<1800x8xf32>
    %8 = arith.maximumf %6, %7 : vector<1800x8xf32>
    %c0_7 = arith.constant 0 : index
    %c0_8 = arith.constant 0 : index
    %9 = vector.load %arg21[%c0_7, %c0_8] : memref<1800x8xf32, #tpu.memory_space<vmem>>, vector<1800x8xf32>
    tpu.vector_store %arg21[%c0_7, %c0_8], %8 {strides = array<i32>} : memref<1800x8xf32, #tpu.memory_space<vmem>>, vector<1800x8xf32>,
    %c0_9 = arith.constant 0 : index
    %c0_10 = arith.constant 0 : index
    %10 = tpu.strided_load %arg21[%c0_9, %c0_10] {strides = array<i32: 4, 1>} : memref<1800x8xf32, #tpu.memory_space<vmem>>, vector<449x8xf32>
    %c1 = arith.constant 1 : index
    %c0_11 = arith.constant 0 : index
    %11 = tpu.strided_load %arg21[%c1, %c0_11] {strides = array<i32: 4, 1>} : memref<1800x8xf32, #tpu.memory_space<vmem>>, vector<449x8xf32>
    %12 = arith.maximumf %10, %11 : vector<449x8xf32>
    %c2 = arith.constant 2 : index
    %c0_12 = arith.constant 0 : index
    %13 = tpu.strided_load %arg21[%c2, %c0_12] {strides = array<i32: 4, 1>} : memref<1800x8xf32, #tpu.memory_space<vmem>>, vector<449x8xf32>
    %14 = arith.maximumf %12, %13 : vector<449x8xf32>
    %c3 = arith.constant 3 : index
    %c0_13 = arith.constant 0 : index
    %15 = tpu.strided_load %arg21[%c3, %c0_13] {strides = array<i32: 4, 1>} : memref<1800x8xf32, #tpu.memory_space<vmem>>, vector<449x8xf32>
    %16 = arith.maximumf %14, %15 : vector<449x8xf32>
    %c4 = arith.constant 4 : index
    %c0_14 = arith.constant 0 : index
    %17 = tpu.strided_load %arg21[%c4, %c0_14] {strides = array<i32: 4, 1>} : memref<1800x8xf32, #tpu.memory_space<vmem>>, vector<449x8xf32>
    %18 = arith.maximumf %16, %17 : vector<449x8xf32>
    %c5 = arith.constant 5 : index
    %c0_15 = arith.constant 0 : index
    %19 = tpu.strided_load %arg21[%c5, %c0_15] {strides = array<i32: 4, 1>} : memref<1800x8xf32, #tpu.memory_space<vmem>>, vector<449x8xf32>
    %20 = arith.maximumf %18, %19 : vector<449x8xf32>
    %c6 = arith.constant 6 : index
    %c0_16 = arith.constant 0 : index
    %21 = tpu.strided_load %arg21[%c6, %c0_16] {strides = array<i32: 4, 1>} : memref<1800x8xf32, #tpu.memory_space<vmem>>, vector<449x8xf32>
    %22 = arith.maximumf %20, %21 : vector<449x8xf32>
    %c7 = arith.constant 7 : index
    %c0_17 = arith.constant 0 : index
    %23 = tpu.strided_load %arg21[%c7, %c0_17] {strides = array<i32: 4, 1>} : memref<1800x8xf32, #tpu.memory_space<vmem>>, vector<449x8xf32>
    %24 = arith.maximumf %22, %23 : vector<449x8xf32>
    %cst_18 = arith.constant 0.000000e+00 : f32
    %25 = vector.broadcast %cst_18 : f32 to vector<459x8xf32>
    %c0_19 = arith.constant 0 : index
    %c0_20 = arith.constant 0 : index
    %26 = vector.load %arg22[%c0_19, %c0_20] : memref<459x8xf32, #tpu.memory_space<vmem>>, vector<459x8xf32>
    tpu.vector_store %arg22[%c0_19, %c0_20], %25 {strides = array<i32>} : memref<459x8xf32, #tpu.memory_space<vmem>>, vector<459x8xf32>,
    %c5_21 = arith.constant 5 : index
    %c0_22 = arith.constant 0 : index
    %27 = vector.load %arg22[%c5_21, %c0_22] : memref<459x8xf32, #tpu.memory_space<vmem>>, vector<449x8xf32>
    tpu.vector_store %arg22[%c5_21, %c0_22], %24 {strides = array<i32>} : memref<459x8xf32, #tpu.memory_space<vmem>>, vector<449x8xf32>,
    %cst_23 = arith.constant 0.000000e+00 : f32
    %28 = vector.broadcast %cst_23 : f32 to vector<224x12xf32>
    %c0_24 = arith.constant 0 : index
    %c0_25 = arith.constant 0 : index
    %29 = tpu.strided_load %arg22[%c0_24, %c0_25] {strides = array<i32: 2, 1>} : memref<459x8xf32, #tpu.memory_space<vmem>>, vector<224x8xf32>
    %30 = arith.truncf %29 : vector<224x8xf32> to vector<224x8xbf16>
    %c0_26 = arith.constant 0 : index
    %c0_27 = arith.constant 0 : index
    %c0_28 = arith.constant 0 : index
    %31 = vector.load %arg4[%c0_26, %c0_27, %c0_28] : memref<12x8x12xbf16, #tpu.memory_space<vmem>>, vector<1x8x12xbf16>
    %32 = vector.shape_cast %31 : vector<1x8x12xbf16> to vector<8x12xbf16>
    %cst_29 = arith.constant dense<0.000000e+00> : vector<224x12xf32>
    %33 = tpu.matmul %30, %32, %cst_29 {dimension_numbers = #tpu.dot_dimension_numbers<[1], [0], [0], [1], [0, 0, 1, 1], [], []>} : vector<224x8xbf16>, vector<8x12xbf16>, vector<224x12xf32> -> vector<224x12xf32>
    %34 = arith.addf %28, %33 : vector<224x12xf32>
    %c1_30 = arith.constant 1 : index
    %c0_31 = arith.constant 0 : index
    %35 = tpu.strided_load %arg22[%c1_30, %c0_31] {strides = array<i32: 2, 1>} : memref<459x8xf32, #tpu.memory_space<vmem>>, vector<224x8xf32>
    %36 = arith.truncf %35 : vector<224x8xf32> to vector<224x8xbf16>
    %c1_32 = arith.constant 1 : index
    %c0_33 = arith.constant 0 : index
    %c0_34 = arith.constant 0 : index
    %37 = vector.load %arg4[%c1_32, %c0_33, %c0_34] : memref<12x8x12xbf16, #tpu.memory_space<vmem>>, vector<1x8x12xbf16>
    %38 = vector.shape_cast %37 : vector<1x8x12xbf16> to vector<8x12xbf16>
    %cst_35 = arith.constant dense<0.000000e+00> : vector<224x12xf32>
    %39 = tpu.matmul %36, %38, %cst_35 {dimension_numbers = #tpu.dot_dimension_numbers<[1], [0], [0], [1], [0, 0, 1, 1], [], []>} : vector<224x8xbf16>, vector<8x12xbf16>, vector<224x12xf32> -> vector<224x12xf32>
    %40 = arith.addf %34, %39 : vector<224x12xf32>
    %c2_36 = arith.constant 2 : index
    %c0_37 = arith.constant 0 : index
    %41 = tpu.strided_load %arg22[%c2_36, %c0_37] {strides = array<i32: 2, 1>} : memref<459x8xf32, #tpu.memory_space<vmem>>, vector<224x8xf32>
    %42 = arith.truncf %41 : vector<224x8xf32> to vector<224x8xbf16>
    %c2_38 = arith.constant 2 : index
    %c0_39 = arith.constant 0 : index
    %c0_40 = arith.constant 0 : index
    %43 = vector.load %arg4[%c2_38, %c0_39, %c0_40] : memref<12x8x12xbf16, #tpu.memory_space<vmem>>, vector<1x8x12xbf16>
    %44 = vector.shape_cast %43 : vector<1x8x12xbf16> to vector<8x12xbf16>
    %cst_41 = arith.constant dense<0.000000e+00> : vector<224x12xf32>
    %45 = tpu.matmul %42, %44, %cst_41 {dimension_numbers = #tpu.dot_dimension_numbers<[1], [0], [0], [1], [0, 0, 1, 1], [], []>} : vector<224x8xbf16>, vector<8x12xbf16>, vector<224x12xf32> -> vector<224x12xf32>
    %46 = arith.addf %40, %45 : vector<224x12xf32>
    %c3_42 = arith.constant 3 : index
    %c0_43 = arith.constant 0 : index
    %47 = tpu.strided_load %arg22[%c3_42, %c0_43] {strides = array<i32: 2, 1>} : memref<459x8xf32, #tpu.memory_space<vmem>>, vector<224x8xf32>
    %48 = arith.truncf %47 : vector<224x8xf32> to vector<224x8xbf16>
    %c3_44 = arith.constant 3 : index
    %c0_45 = arith.constant 0 : index
    %c0_46 = arith.constant 0 : index
    %49 = vector.load %arg4[%c3_44, %c0_45, %c0_46] : memref<12x8x12xbf16, #tpu.memory_space<vmem>>, vector<1x8x12xbf16>
    %50 = vector.shape_cast %49 : vector<1x8x12xbf16> to vector<8x12xbf16>
    %cst_47 = arith.constant dense<0.000000e+00> : vector<224x12xf32>
    %51 = tpu.matmul %48, %50, %cst_47 {dimension_numbers = #tpu.dot_dimension_numbers<[1], [0], [0], [1], [0, 0, 1, 1], [], []>} : vector<224x8xbf16>, vector<8x12xbf16>, vector<224x12xf32> -> vector<224x12xf32>
    %52 = arith.addf %46, %51 : vector<224x12xf32>
    %c4_48 = arith.constant 4 : index
    %c0_49 = arith.constant 0 : index
    %53 = tpu.strided_load %arg22[%c4_48, %c0_49] {strides = array<i32: 2, 1>} : memref<459x8xf32, #tpu.memory_space<vmem>>, vector<224x8xf32>
    %54 = arith.truncf %53 : vector<224x8xf32> to vector<224x8xbf16>
    %c4_50 = arith.constant 4 : index
    %c0_51 = arith.constant 0 : index
    %c0_52 = arith.constant 0 : index
    %55 = vector.load %arg4[%c4_50, %c0_51, %c0_52] : memref<12x8x12xbf16, #tpu.memory_space<vmem>>, vector<1x8x12xbf16>
    %56 = vector.shape_cast %55 : vector<1x8x12xbf16> to vector<8x12xbf16>
    %cst_53 = arith.constant dense<0.000000e+00> : vector<224x12xf32>
    %57 = tpu.matmul %54, %56, %cst_53 {dimension_numbers = #tpu.dot_dimension_numbers<[1], [0], [0], [1], [0, 0, 1, 1], [], []>} : vector<224x8xbf16>, vector<8x12xbf16>, vector<224x12xf32> -> vector<224x12xf32>
    %58 = arith.addf %52, %57 : vector<224x12xf32>
    %c5_54 = arith.constant 5 : index
    %c0_55 = arith.constant 0 : index
    %59 = tpu.strided_load %arg22[%c5_54, %c0_55] {strides = array<i32: 2, 1>} : memref<459x8xf32, #tpu.memory_space<vmem>>, vector<224x8xf32>
    %60 = arith.truncf %59 : vector<224x8xf32> to vector<224x8xbf16>
    %c5_56 = arith.constant 5 : index
    %c0_57 = arith.constant 0 : index
    %c0_58 = arith.constant 0 : index
    %61 = vector.load %arg4[%c5_56, %c0_57, %c0_58] : memref<12x8x12xbf16, #tpu.memory_space<vmem>>, vector<1x8x12xbf16>
    %62 = vector.shape_cast %61 : vector<1x8x12xbf16> to vector<8x12xbf16>
    %cst_59 = arith.constant dense<0.000000e+00> : vector<224x12xf32>
    %63 = tpu.matmul %60, %62, %cst_59 {dimension_numbers = #tpu.dot_dimension_numbers<[1], [0], [0], [1], [0, 0, 1, 1], [], []>} : vector<224x8xbf16>, vector<8x12xbf16>, vector<224x12xf32> -> vector<224x12xf32>
    %64 = arith.addf %58, %63 : vector<224x12xf32>
    %c6_60 = arith.constant 6 : index
    %c0_61 = arith.constant 0 : index
    %65 = tpu.strided_load %arg22[%c6_60, %c0_61] {strides = array<i32: 2, 1>} : memref<459x8xf32, #tpu.memory_space<vmem>>, vector<224x8xf32>
    %66 = arith.truncf %65 : vector<224x8xf32> to vector<224x8xbf16>
    %c6_62 = arith.constant 6 : index
    %c0_63 = arith.constant 0 : index
    %c0_64 = arith.constant 0 : index
    %67 = vector.load %arg4[%c6_62, %c0_63, %c0_64] : memref<12x8x12xbf16, #tpu.memory_space<vmem>>, vector<1x8x12xbf16>
    %68 = vector.shape_cast %67 : vector<1x8x12xbf16> to vector<8x12xbf16>
    %cst_65 = arith.constant dense<0.000000e+00> : vector<224x12xf32>
    %69 = tpu.matmul %66, %68, %cst_65 {dimension_numbers = #tpu.dot_dimension_numbers<[1], [0], [0], [1], [0, 0, 1, 1], [], []>} : vector<224x8xbf16>, vector<8x12xbf16>, vector<224x12xf32> -> vector<224x12xf32>
    %70 = arith.addf %64, %69 : vector<224x12xf32>
    %c7_66 = arith.constant 7 : index
    %c0_67 = arith.constant 0 : index
    %71 = tpu.strided_load %arg22[%c7_66, %c0_67] {strides = array<i32: 2, 1>} : memref<459x8xf32, #tpu.memory_space<vmem>>, vector<224x8xf32>
    %72 = arith.truncf %71 : vector<224x8xf32> to vector<224x8xbf16>
    %c7_68 = arith.constant 7 : index
    %c0_69 = arith.constant 0 : index
    %c0_70 = arith.constant 0 : index
    %73 = vector.load %arg4[%c7_68, %c0_69, %c0_70] : memref<12x8x12xbf16, #tpu.memory_space<vmem>>, vector<1x8x12xbf16>
    %74 = vector.shape_cast %73 : vector<1x8x12xbf16> to vector<8x12xbf16>
    %cst_71 = arith.constant dense<0.000000e+00> : vector<224x12xf32>
    %75 = tpu.matmul %72, %74, %cst_71 {dimension_numbers = #tpu.dot_dimension_numbers<[1], [0], [0], [1], [0, 0, 1, 1], [], []>} : vector<224x8xbf16>, vector<8x12xbf16>, vector<224x12xf32> -> vector<224x12xf32>
    %76 = arith.addf %70, %75 : vector<224x12xf32>
    %c8 = arith.constant 8 : index
    %c0_72 = arith.constant 0 : index
    %77 = tpu.strided_load %arg22[%c8, %c0_72] {strides = array<i32: 2, 1>} : memref<459x8xf32, #tpu.memory_space<vmem>>, vector<224x8xf32>
    %78 = arith.truncf %77 : vector<224x8xf32> to vector<224x8xbf16>
    %c8_73 = arith.constant 8 : index
    %c0_74 = arith.constant 0 : index
    %c0_75 = arith.constant 0 : index
    %79 = vector.load %arg4[%c8_73, %c0_74, %c0_75] : memref<12x8x12xbf16, #tpu.memory_space<vmem>>, vector<1x8x12xbf16>
    %80 = vector.shape_cast %79 : vector<1x8x12xbf16> to vector<8x12xbf16>
    %cst_76 = arith.constant dense<0.000000e+00> : vector<224x12xf32>
    %81 = tpu.matmul %78, %80, %cst_76 {dimension_numbers = #tpu.dot_dimension_numbers<[1], [0], [0], [1], [0, 0, 1, 1], [], []>} : vector<224x8xbf16>, vector<8x12xbf16>, vector<224x12xf32> -> vector<224x12xf32>
    %82 = arith.addf %76, %81 : vector<224x12xf32>
    %c9 = arith.constant 9 : index
    %c0_77 = arith.constant 0 : index
    %83 = tpu.strided_load %arg22[%c9, %c0_77] {strides = array<i32: 2, 1>} : memref<459x8xf32, #tpu.memory_space<vmem>>, vector<224x8xf32>
    %84 = arith.truncf %83 : vector<224x8xf32> to vector<224x8xbf16>
    %c9_78 = arith.constant 9 : index
    %c0_79 = arith.constant 0 : index
    %c0_80 = arith.constant 0 : index
    %85 = vector.load %arg4[%c9_78, %c0_79, %c0_80] : memref<12x8x12xbf16, #tpu.memory_space<vmem>>, vector<1x8x12xbf16>
    %86 = vector.shape_cast %85 : vector<1x8x12xbf16> to vector<8x12xbf16>
    %cst_81 = arith.constant dense<0.000000e+00> : vector<224x12xf32>
    %87 = tpu.matmul %84, %86, %cst_81 {dimension_numbers = #tpu.dot_dimension_numbers<[1], [0], [0], [1], [0, 0, 1, 1], [], []>} : vector<224x8xbf16>, vector<8x12xbf16>, vector<224x12xf32> -> vector<224x12xf32>
    %88 = arith.addf %82, %87 : vector<224x12xf32>
    %c10 = arith.constant 10 : index
    %c0_82 = arith.constant 0 : index
    %89 = tpu.strided_load %arg22[%c10, %c0_82] {strides = array<i32: 2, 1>} : memref<459x8xf32, #tpu.memory_space<vmem>>, vector<224x8xf32>
    %90 = arith.truncf %89 : vector<224x8xf32> to vector<224x8xbf16>
    %c10_83 = arith.constant 10 : index
    %c0_84 = arith.constant 0 : index
    %c0_85 = arith.constant 0 : index
    %91 = vector.load %arg4[%c10_83, %c0_84, %c0_85] : memref<12x8x12xbf16, #tpu.memory_space<vmem>>, vector<1x8x12xbf16>
    %92 = vector.shape_cast %91 : vector<1x8x12xbf16> to vector<8x12xbf16>
    %cst_86 = arith.constant dense<0.000000e+00> : vector<224x12xf32>
    %93 = tpu.matmul %90, %92, %cst_86 {dimension_numbers = #tpu.dot_dimension_numbers<[1], [0], [0], [1], [0, 0, 1, 1], [], []>} : vector<224x8xbf16>, vector<8x12xbf16>, vector<224x12xf32> -> vector<224x12xf32>
    %94 = arith.addf %88, %93 : vector<224x12xf32>
    %c11 = arith.constant 11 : index
    %c0_87 = arith.constant 0 : index
    %95 = tpu.strided_load %arg22[%c11, %c0_87] {strides = array<i32: 2, 1>} : memref<459x8xf32, #tpu.memory_space<vmem>>, vector<224x8xf32>
    %96 = arith.truncf %95 : vector<224x8xf32> to vector<224x8xbf16>
    %c11_88 = arith.constant 11 : index
    %c0_89 = arith.constant 0 : index
    %c0_90 = arith.constant 0 : index
    %97 = vector.load %arg4[%c11_88, %c0_89, %c0_90] : memref<12x8x12xbf16, #tpu.memory_space<vmem>>, vector<1x8x12xbf16>
    %98 = vector.shape_cast %97 : vector<1x8x12xbf16> to vector<8x12xbf16>
    %cst_91 = arith.constant dense<0.000000e+00> : vector<224x12xf32>
    %99 = tpu.matmul %96, %98, %cst_91 {dimension_numbers = #tpu.dot_dimension_numbers<[1], [0], [0], [1], [0, 0, 1, 1], [], []>} : vector<224x8xbf16>, vector<8x12xbf16>, vector<224x12xf32> -> vector<224x12xf32>
    %100 = arith.addf %94, %99 : vector<224x12xf32>
    %c0_92 = arith.constant 0 : index
    %c0_93 = arith.constant 0 : index
    %101 = vector.load %arg5[%c0_92, %c0_93] : memref<1x12xf32, #tpu.memory_space<vmem>>, vector<1x12xf32>
    %102 = vector.broadcast %101 : vector<1x12xf32> to vector<224x12xf32>
    %103 = arith.addf %100, %102 : vector<224x12xf32>
    %cst_94 = arith.constant 0.000000e+00 : f32
    %104 = vector.broadcast %cst_94 : f32 to vector<224x12xf32>
    %105 = arith.maximumf %103, %104 : vector<224x12xf32>
    %c0_95 = arith.constant 0 : index
    %c0_96 = arith.constant 0 : index
    %106 = vector.load %arg23[%c0_95, %c0_96] : memref<224x12xf32, #tpu.memory_space<vmem>>, vector<224x12xf32>
    tpu.vector_store %arg23[%c0_95, %c0_96], %105 {strides = array<i32>} : memref<224x12xf32, #tpu.memory_space<vmem>>, vector<224x12xf32>,
    %c0_97 = arith.constant 0 : index
    %c0_98 = arith.constant 0 : index
    %107 = tpu.strided_load %arg23[%c0_97, %c0_98] {strides = array<i32: 2, 1>} : memref<224x12xf32, #tpu.memory_space<vmem>>, vector<111x12xf32>
    %c1_99 = arith.constant 1 : index
    %c0_100 = arith.constant 0 : index
    %108 = tpu.strided_load %arg23[%c1_99, %c0_100] {strides = array<i32: 2, 1>} : memref<224x12xf32, #tpu.memory_space<vmem>>, vector<111x12xf32>
    %109 = arith.maximumf %107, %108 : vector<111x12xf32>
    %c2_101 = arith.constant 2 : index
    %c0_102 = arith.constant 0 : index
    %110 = tpu.strided_load %arg23[%c2_101, %c0_102] {strides = array<i32: 2, 1>} : memref<224x12xf32, #tpu.memory_space<vmem>>, vector<111x12xf32>
    %111 = arith.maximumf %109, %110 : vector<111x12xf32>
    %c3_103 = arith.constant 3 : index
    %c0_104 = arith.constant 0 : index
    %112 = tpu.strided_load %arg23[%c3_103, %c0_104] {strides = array<i32: 2, 1>} : memref<224x12xf32, #tpu.memory_space<vmem>>, vector<111x12xf32>
    %113 = arith.maximumf %111, %112 : vector<111x12xf32>
    %cst_105 = arith.constant 0.000000e+00 : f32
    %114 = vector.broadcast %cst_105 : f32 to vector<119x12xf32>
    %c0_106 = arith.constant 0 : index
    %c0_107 = arith.constant 0 : index
    %115 = vector.load %arg24[%c0_106, %c0_107] : memref<119x12xf32, #tpu.memory_space<vmem>>, vector<119x12xf32>
    tpu.vector_store %arg24[%c0_106, %c0_107], %114 {strides = array<i32>} : memref<119x12xf32, #tpu.memory_space<vmem>>, vector<119x12xf32>,
    %c4_108 = arith.constant 4 : index
    %c0_109 = arith.constant 0 : index
    %116 = vector.load %arg24[%c4_108, %c0_109] : memref<119x12xf32, #tpu.memory_space<vmem>>, vector<111x12xf32>
    tpu.vector_store %arg24[%c4_108, %c0_109], %113 {strides = array<i32>} : memref<119x12xf32, #tpu.memory_space<vmem>>, vector<111x12xf32>,
    %cst_110 = arith.constant 0.000000e+00 : f32
    %117 = vector.broadcast %cst_110 : f32 to vector<111x32xf32>
    %c0_111 = arith.constant 0 : index
    %c0_112 = arith.constant 0 : index
    %118 = vector.load %arg24[%c0_111, %c0_112] : memref<119x12xf32, #tpu.memory_space<vmem>>, vector<111x12xf32>
    %119 = arith.truncf %118 : vector<111x12xf32> to vector<111x12xbf16>
    %c0_113 = arith.constant 0 : index
    %c0_114 = arith.constant 0 : index
    %c0_115 = arith.constant 0 : index
    %120 = vector.load %arg6[%c0_113, %c0_114, %c0_115] : memref<9x12x32xbf16, #tpu.memory_space<vmem>>, vector<1x12x32xbf16>
    %121 = vector.shape_cast %120 : vector<1x12x32xbf16> to vector<12x32xbf16>
    %cst_116 = arith.constant dense<0.000000e+00> : vector<111x32xf32>
    %122 = tpu.matmul %119, %121, %cst_116 {dimension_numbers = #tpu.dot_dimension_numbers<[1], [0], [0], [1], [0, 0, 1, 1], [], []>} : vector<111x12xbf16>, vector<12x32xbf16>, vector<111x32xf32> -> vector<111x32xf32>
    %123 = arith.addf %117, %122 : vector<111x32xf32>
    %c1_117 = arith.constant 1 : index
    %c0_118 = arith.constant 0 : index
    %124 = vector.load %arg24[%c1_117, %c0_118] : memref<119x12xf32, #tpu.memory_space<vmem>>, vector<111x12xf32>
    %125 = arith.truncf %124 : vector<111x12xf32> to vector<111x12xbf16>
    %c1_119 = arith.constant 1 : index
    %c0_120 = arith.constant 0 : index
    %c0_121 = arith.constant 0 : index
    %126 = vector.load %arg6[%c1_119, %c0_120, %c0_121] : memref<9x12x32xbf16, #tpu.memory_space<vmem>>, vector<1x12x32xbf16>
    %127 = vector.shape_cast %126 : vector<1x12x32xbf16> to vector<12x32xbf16>
    %cst_122 = arith.constant dense<0.000000e+00> : vector<111x32xf32>
    %128 = tpu.matmul %125, %127, %cst_122 {dimension_numbers = #tpu.dot_dimension_numbers<[1], [0], [0], [1], [0, 0, 1, 1], [], []>} : vector<111x12xbf16>, vector<12x32xbf16>, vector<111x32xf32> -> vector<111x32xf32>
    %129 = arith.addf %123, %128 : vector<111x32xf32>
    %c2_123 = arith.constant 2 : index
    %c0_124 = arith.constant 0 : index
    %130 = vector.load %arg24[%c2_123, %c0_124] : memref<119x12xf32, #tpu.memory_space<vmem>>, vector<111x12xf32>
    %131 = arith.truncf %130 : vector<111x12xf32> to vector<111x12xbf16>
    %c2_125 = arith.constant 2 : index
    %c0_126 = arith.constant 0 : index
    %c0_127 = arith.constant 0 : index
    %132 = vector.load %arg6[%c2_125, %c0_126, %c0_127] : memref<9x12x32xbf16, #tpu.memory_space<vmem>>, vector<1x12x32xbf16>
    %133 = vector.shape_cast %132 : vector<1x12x32xbf16> to vector<12x32xbf16>
    %cst_128 = arith.constant dense<0.000000e+00> : vector<111x32xf32>
    %134 = tpu.matmul %131, %133, %cst_128 {dimension_numbers = #tpu.dot_dimension_numbers<[1], [0], [0], [1], [0, 0, 1, 1], [], []>} : vector<111x12xbf16>, vector<12x32xbf16>, vector<111x32xf32> -> vector<111x32xf32>
    %135 = arith.addf %129, %134 : vector<111x32xf32>
    %c3_129 = arith.constant 3 : index
    %c0_130 = arith.constant 0 : index
    %136 = vector.load %arg24[%c3_129, %c0_130] : memref<119x12xf32, #tpu.memory_space<vmem>>, vector<111x12xf32>
    %137 = arith.truncf %136 : vector<111x12xf32> to vector<111x12xbf16>
    %c3_131 = arith.constant 3 : index
    %c0_132 = arith.constant 0 : index
    %c0_133 = arith.constant 0 : index
    %138 = vector.load %arg6[%c3_131, %c0_132, %c0_133] : memref<9x12x32xbf16, #tpu.memory_space<vmem>>, vector<1x12x32xbf16>
    %139 = vector.shape_cast %138 : vector<1x12x32xbf16> to vector<12x32xbf16>
    %cst_134 = arith.constant dense<0.000000e+00> : vector<111x32xf32>
    %140 = tpu.matmul %137, %139, %cst_134 {dimension_numbers = #tpu.dot_dimension_numbers<[1], [0], [0], [1], [0, 0, 1, 1], [], []>} : vector<111x12xbf16>, vector<12x32xbf16>, vector<111x32xf32> -> vector<111x32xf32>
    %141 = arith.addf %135, %140 : vector<111x32xf32>
    %c4_135 = arith.constant 4 : index
    %c0_136 = arith.constant 0 : index
    %142 = vector.load %arg24[%c4_135, %c0_136] : memref<119x12xf32, #tpu.memory_space<vmem>>, vector<111x12xf32>
    %143 = arith.truncf %142 : vector<111x12xf32> to vector<111x12xbf16>
    %c4_137 = arith.constant 4 : index
    %c0_138 = arith.constant 0 : index
    %c0_139 = arith.constant 0 : index
    %144 = vector.load %arg6[%c4_137, %c0_138, %c0_139] : memref<9x12x32xbf16, #tpu.memory_space<vmem>>, vector<1x12x32xbf16>
    %145 = vector.shape_cast %144 : vector<1x12x32xbf16> to vector<12x32xbf16>
    %cst_140 = arith.constant dense<0.000000e+00> : vector<111x32xf32>
    %146 = tpu.matmul %143, %145, %cst_140 {dimension_numbers = #tpu.dot_dimension_numbers<[1], [0], [0], [1], [0, 0, 1, 1], [], []>} : vector<111x12xbf16>, vector<12x32xbf16>, vector<111x32xf32> -> vector<111x32xf32>
    %147 = arith.addf %141, %146 : vector<111x32xf32>
    %c5_141 = arith.constant 5 : index
    %c0_142 = arith.constant 0 : index
    %148 = vector.load %arg24[%c5_141, %c0_142] : memref<119x12xf32, #tpu.memory_space<vmem>>, vector<111x12xf32>
    %149 = arith.truncf %148 : vector<111x12xf32> to vector<111x12xbf16>
    %c5_143 = arith.constant 5 : index
    %c0_144 = arith.constant 0 : index
    %c0_145 = arith.constant 0 : index
    %150 = vector.load %arg6[%c5_143, %c0_144, %c0_145] : memref<9x12x32xbf16, #tpu.memory_space<vmem>>, vector<1x12x32xbf16>
    %151 = vector.shape_cast %150 : vector<1x12x32xbf16> to vector<12x32xbf16>
    %cst_146 = arith.constant dense<0.000000e+00> : vector<111x32xf32>
    %152 = tpu.matmul %149, %151, %cst_146 {dimension_numbers = #tpu.dot_dimension_numbers<[1], [0], [0], [1], [0, 0, 1, 1], [], []>} : vector<111x12xbf16>, vector<12x32xbf16>, vector<111x32xf32> -> vector<111x32xf32>
    %153 = arith.addf %147, %152 : vector<111x32xf32>
    %c6_147 = arith.constant 6 : index
    %c0_148 = arith.constant 0 : index
    %154 = vector.load %arg24[%c6_147, %c0_148] : memref<119x12xf32, #tpu.memory_space<vmem>>, vector<111x12xf32>
    %155 = arith.truncf %154 : vector<111x12xf32> to vector<111x12xbf16>
    %c6_149 = arith.constant 6 : index
    %c0_150 = arith.constant 0 : index
    %c0_151 = arith.constant 0 : index
    %156 = vector.load %arg6[%c6_149, %c0_150, %c0_151] : memref<9x12x32xbf16, #tpu.memory_space<vmem>>, vector<1x12x32xbf16>
    %157 = vector.shape_cast %156 : vector<1x12x32xbf16> to vector<12x32xbf16>
    %cst_152 = arith.constant dense<0.000000e+00> : vector<111x32xf32>
    %158 = tpu.matmul %155, %157, %cst_152 {dimension_numbers = #tpu.dot_dimension_numbers<[1], [0], [0], [1], [0, 0, 1, 1], [], []>} : vector<111x12xbf16>, vector<12x32xbf16>, vector<111x32xf32> -> vector<111x32xf32>
    %159 = arith.addf %153, %158 : vector<111x32xf32>
    %c7_153 = arith.constant 7 : index
    %c0_154 = arith.constant 0 : index
    %160 = vector.load %arg24[%c7_153, %c0_154] : memref<119x12xf32, #tpu.memory_space<vmem>>, vector<111x12xf32>
    %161 = arith.truncf %160 : vector<111x12xf32> to vector<111x12xbf16>
    %c7_155 = arith.constant 7 : index
    %c0_156 = arith.constant 0 : index
    %c0_157 = arith.constant 0 : index
    %162 = vector.load %arg6[%c7_155, %c0_156, %c0_157] : memref<9x12x32xbf16, #tpu.memory_space<vmem>>, vector<1x12x32xbf16>
    %163 = vector.shape_cast %162 : vector<1x12x32xbf16> to vector<12x32xbf16>
    %cst_158 = arith.constant dense<0.000000e+00> : vector<111x32xf32>
    %164 = tpu.matmul %161, %163, %cst_158 {dimension_numbers = #tpu.dot_dimension_numbers<[1], [0], [0], [1], [0, 0, 1, 1], [], []>} : vector<111x12xbf16>, vector<12x32xbf16>, vector<111x32xf32> -> vector<111x32xf32>
    %165 = arith.addf %159, %164 : vector<111x32xf32>
    %c8_159 = arith.constant 8 : index
    %c0_160 = arith.constant 0 : index
    %166 = vector.load %arg24[%c8_159, %c0_160] : memref<119x12xf32, #tpu.memory_space<vmem>>, vector<111x12xf32>
    %167 = arith.truncf %166 : vector<111x12xf32> to vector<111x12xbf16>
    %c8_161 = arith.constant 8 : index
    %c0_162 = arith.constant 0 : index
    %c0_163 = arith.constant 0 : index
    %168 = vector.load %arg6[%c8_161, %c0_162, %c0_163] : memref<9x12x32xbf16, #tpu.memory_space<vmem>>, vector<1x12x32xbf16>
    %169 = vector.shape_cast %168 : vector<1x12x32xbf16> to vector<12x32xbf16>
    %cst_164 = arith.constant dense<0.000000e+00> : vector<111x32xf32>
    %170 = tpu.matmul %167, %169, %cst_164 {dimension_numbers = #tpu.dot_dimension_numbers<[1], [0], [0], [1], [0, 0, 1, 1], [], []>} : vector<111x12xbf16>, vector<12x32xbf16>, vector<111x32xf32> -> vector<111x32xf32>
    %171 = arith.addf %165, %170 : vector<111x32xf32>
    %c0_165 = arith.constant 0 : index
    %c0_166 = arith.constant 0 : index
    %172 = vector.load %arg7[%c0_165, %c0_166] : memref<1x32xf32, #tpu.memory_space<vmem>>, vector<1x32xf32>
    %173 = vector.broadcast %172 : vector<1x32xf32> to vector<111x32xf32>
    %174 = arith.addf %171, %173 : vector<111x32xf32>
    %cst_167 = arith.constant 0.000000e+00 : f32
    %175 = vector.broadcast %cst_167 : f32 to vector<111x32xf32>
    %176 = arith.maximumf %174, %175 : vector<111x32xf32>
    %c0_168 = arith.constant 0 : index
    %c0_169 = arith.constant 0 : index
    %177 = vector.load %arg25[%c0_168, %c0_169] : memref<111x32xf32, #tpu.memory_space<vmem>>, vector<111x32xf32>
    tpu.vector_store %arg25[%c0_168, %c0_169], %176 {strides = array<i32>} : memref<111x32xf32, #tpu.memory_space<vmem>>, vector<111x32xf32>,
    %c0_170 = arith.constant 0 : index
    %c0_171 = arith.constant 0 : index
    %178 = tpu.strided_load %arg25[%c0_170, %c0_171] {strides = array<i32: 2, 1>} : memref<111x32xf32, #tpu.memory_space<vmem>>, vector<54x32xf32>
    %c1_172 = arith.constant 1 : index
    %c0_173 = arith.constant 0 : index
    %179 = tpu.strided_load %arg25[%c1_172, %c0_173] {strides = array<i32: 2, 1>} : memref<111x32xf32, #tpu.memory_space<vmem>>, vector<54x32xf32>
    %180 = arith.maximumf %178, %179 : vector<54x32xf32>
    %c2_174 = arith.constant 2 : index
    %c0_175 = arith.constant 0 : index
    %181 = tpu.strided_load %arg25[%c2_174, %c0_175] {strides = array<i32: 2, 1>} : memref<111x32xf32, #tpu.memory_space<vmem>>, vector<54x32xf32>
    %182 = arith.maximumf %180, %181 : vector<54x32xf32>
    %c3_176 = arith.constant 3 : index
    %c0_177 = arith.constant 0 : index
    %183 = tpu.strided_load %arg25[%c3_176, %c0_177] {strides = array<i32: 2, 1>} : memref<111x32xf32, #tpu.memory_space<vmem>>, vector<54x32xf32>
    %184 = arith.maximumf %182, %183 : vector<54x32xf32>
    %c4_178 = arith.constant 4 : index
    %c0_179 = arith.constant 0 : index
    %185 = tpu.strided_load %arg25[%c4_178, %c0_179] {strides = array<i32: 2, 1>} : memref<111x32xf32, #tpu.memory_space<vmem>>, vector<54x32xf32>
    %186 = arith.maximumf %184, %185 : vector<54x32xf32>
    %cst_180 = arith.constant 0.000000e+00 : f32
    %187 = vector.broadcast %cst_180 : f32 to vector<60x32xf32>
    %c0_181 = arith.constant 0 : index
    %c0_182 = arith.constant 0 : index
    %188 = vector.load %arg26[%c0_181, %c0_182] : memref<60x32xf32, #tpu.memory_space<vmem>>, vector<60x32xf32>
    tpu.vector_store %arg26[%c0_181, %c0_182], %187 {strides = array<i32>} : memref<60x32xf32, #tpu.memory_space<vmem>>, vector<60x32xf32>,
    %c3_183 = arith.constant 3 : index
    %c0_184 = arith.constant 0 : index
    %189 = vector.load %arg26[%c3_183, %c0_184] : memref<60x32xf32, #tpu.memory_space<vmem>>, vector<54x32xf32>
    tpu.vector_store %arg26[%c3_183, %c0_184], %186 {strides = array<i32>} : memref<60x32xf32, #tpu.memory_space<vmem>>, vector<54x32xf32>,
    %cst_185 = arith.constant 0.000000e+00 : f32
    %190 = vector.broadcast %cst_185 : f32 to vector<54x64xf32>
    %c0_186 = arith.constant 0 : index
    %c0_187 = arith.constant 0 : index
    %191 = vector.load %arg26[%c0_186, %c0_187] : memref<60x32xf32, #tpu.memory_space<vmem>>, vector<54x32xf32>
    %192 = arith.truncf %191 : vector<54x32xf32> to vector<54x32xbf16>
    %c0_188 = arith.constant 0 : index
    %c0_189 = arith.constant 0 : index
    %c0_190 = arith.constant 0 : index
    %193 = vector.load %arg8[%c0_188, %c0_189, %c0_190] : memref<7x32x64xbf16, #tpu.memory_space<vmem>>, vector<1x32x64xbf16>
    %194 = vector.shape_cast %193 : vector<1x32x64xbf16> to vector<32x64xbf16>
    %cst_191 = arith.constant dense<0.000000e+00> : vector<54x64xf32>
    %195 = tpu.matmul %192, %194, %cst_191 {dimension_numbers = #tpu.dot_dimension_numbers<[1], [0], [0], [1], [0, 0, 1, 1], [], []>} : vector<54x32xbf16>, vector<32x64xbf16>, vector<54x64xf32> -> vector<54x64xf32>
    %196 = arith.addf %190, %195 : vector<54x64xf32>
    %c1_192 = arith.constant 1 : index
    %c0_193 = arith.constant 0 : index
    %197 = vector.load %arg26[%c1_192, %c0_193] : memref<60x32xf32, #tpu.memory_space<vmem>>, vector<54x32xf32>
    %198 = arith.truncf %197 : vector<54x32xf32> to vector<54x32xbf16>
    %c1_194 = arith.constant 1 : index
    %c0_195 = arith.constant 0 : index
    %c0_196 = arith.constant 0 : index
    %199 = vector.load %arg8[%c1_194, %c0_195, %c0_196] : memref<7x32x64xbf16, #tpu.memory_space<vmem>>, vector<1x32x64xbf16>
    %200 = vector.shape_cast %199 : vector<1x32x64xbf16> to vector<32x64xbf16>
    %cst_197 = arith.constant dense<0.000000e+00> : vector<54x64xf32>
    %201 = tpu.matmul %198, %200, %cst_197 {dimension_numbers = #tpu.dot_dimension_numbers<[1], [0], [0], [1], [0, 0, 1, 1], [], []>} : vector<54x32xbf16>, vector<32x64xbf16>, vector<54x64xf32> -> vector<54x64xf32>
    %202 = arith.addf %196, %201 : vector<54x64xf32>
    %c2_198 = arith.constant 2 : index
    %c0_199 = arith.constant 0 : index
    %203 = vector.load %arg26[%c2_198, %c0_199] : memref<60x32xf32, #tpu.memory_space<vmem>>, vector<54x32xf32>
    %204 = arith.truncf %203 : vector<54x32xf32> to vector<54x32xbf16>
    %c2_200 = arith.constant 2 : index
    %c0_201 = arith.constant 0 : index
    %c0_202 = arith.constant 0 : index
    %205 = vector.load %arg8[%c2_200, %c0_201, %c0_202] : memref<7x32x64xbf16, #tpu.memory_space<vmem>>, vector<1x32x64xbf16>
    %206 = vector.shape_cast %205 : vector<1x32x64xbf16> to vector<32x64xbf16>
    %cst_203 = arith.constant dense<0.000000e+00> : vector<54x64xf32>
    %207 = tpu.matmul %204, %206, %cst_203 {dimension_numbers = #tpu.dot_dimension_numbers<[1], [0], [0], [1], [0, 0, 1, 1], [], []>} : vector<54x32xbf16>, vector<32x64xbf16>, vector<54x64xf32> -> vector<54x64xf32>
    %208 = arith.addf %202, %207 : vector<54x64xf32>
    %c3_204 = arith.constant 3 : index
    %c0_205 = arith.constant 0 : index
    %209 = vector.load %arg26[%c3_204, %c0_205] : memref<60x32xf32, #tpu.memory_space<vmem>>, vector<54x32xf32>
    %210 = arith.truncf %209 : vector<54x32xf32> to vector<54x32xbf16>
    %c3_206 = arith.constant 3 : index
    %c0_207 = arith.constant 0 : index
    %c0_208 = arith.constant 0 : index
    %211 = vector.load %arg8[%c3_206, %c0_207, %c0_208] : memref<7x32x64xbf16, #tpu.memory_space<vmem>>, vector<1x32x64xbf16>
    %212 = vector.shape_cast %211 : vector<1x32x64xbf16> to vector<32x64xbf16>
    %cst_209 = arith.constant dense<0.000000e+00> : vector<54x64xf32>
    %213 = tpu.matmul %210, %212, %cst_209 {dimension_numbers = #tpu.dot_dimension_numbers<[1], [0], [0], [1], [0, 0, 1, 1], [], []>} : vector<54x32xbf16>, vector<32x64xbf16>, vector<54x64xf32> -> vector<54x64xf32>
    %214 = arith.addf %208, %213 : vector<54x64xf32>
    %c4_210 = arith.constant 4 : index
    %c0_211 = arith.constant 0 : index
    %215 = vector.load %arg26[%c4_210, %c0_211] : memref<60x32xf32, #tpu.memory_space<vmem>>, vector<54x32xf32>
    %216 = arith.truncf %215 : vector<54x32xf32> to vector<54x32xbf16>
    %c4_212 = arith.constant 4 : index
    %c0_213 = arith.constant 0 : index
    %c0_214 = arith.constant 0 : index
    %217 = vector.load %arg8[%c4_212, %c0_213, %c0_214] : memref<7x32x64xbf16, #tpu.memory_space<vmem>>, vector<1x32x64xbf16>
    %218 = vector.shape_cast %217 : vector<1x32x64xbf16> to vector<32x64xbf16>
    %cst_215 = arith.constant dense<0.000000e+00> : vector<54x64xf32>
    %219 = tpu.matmul %216, %218, %cst_215 {dimension_numbers = #tpu.dot_dimension_numbers<[1], [0], [0], [1], [0, 0, 1, 1], [], []>} : vector<54x32xbf16>, vector<32x64xbf16>, vector<54x64xf32> -> vector<54x64xf32>
    %220 = arith.addf %214, %219 : vector<54x64xf32>
    %c5_216 = arith.constant 5 : index
    %c0_217 = arith.constant 0 : index
    %221 = vector.load %arg26[%c5_216, %c0_217] : memref<60x32xf32, #tpu.memory_space<vmem>>, vector<54x32xf32>
    %222 = arith.truncf %221 : vector<54x32xf32> to vector<54x32xbf16>
    %c5_218 = arith.constant 5 : index
    %c0_219 = arith.constant 0 : index
    %c0_220 = arith.constant 0 : index
    %223 = vector.load %arg8[%c5_218, %c0_219, %c0_220] : memref<7x32x64xbf16, #tpu.memory_space<vmem>>, vector<1x32x64xbf16>
    %224 = vector.shape_cast %223 : vector<1x32x64xbf16> to vector<32x64xbf16>
    %cst_221 = arith.constant dense<0.000000e+00> : vector<54x64xf32>
    %225 = tpu.matmul %222, %224, %cst_221 {dimension_numbers = #tpu.dot_dimension_numbers<[1], [0], [0], [1], [0, 0, 1, 1], [], []>} : vector<54x32xbf16>, vector<32x64xbf16>, vector<54x64xf32> -> vector<54x64xf32>
    %226 = arith.addf %220, %225 : vector<54x64xf32>
    %c6_222 = arith.constant 6 : index
    %c0_223 = arith.constant 0 : index
    %227 = vector.load %arg26[%c6_222, %c0_223] : memref<60x32xf32, #tpu.memory_space<vmem>>, vector<54x32xf32>
    %228 = arith.truncf %227 : vector<54x32xf32> to vector<54x32xbf16>
    %c6_224 = arith.constant 6 : index
    %c0_225 = arith.constant 0 : index
    %c0_226 = arith.constant 0 : index
    %229 = vector.load %arg8[%c6_224, %c0_225, %c0_226] : memref<7x32x64xbf16, #tpu.memory_space<vmem>>, vector<1x32x64xbf16>
    %230 = vector.shape_cast %229 : vector<1x32x64xbf16> to vector<32x64xbf16>
    %cst_227 = arith.constant dense<0.000000e+00> : vector<54x64xf32>
    %231 = tpu.matmul %228, %230, %cst_227 {dimension_numbers = #tpu.dot_dimension_numbers<[1], [0], [0], [1], [0, 0, 1, 1], [], []>} : vector<54x32xbf16>, vector<32x64xbf16>, vector<54x64xf32> -> vector<54x64xf32>
    %232 = arith.addf %226, %231 : vector<54x64xf32>
    %c0_228 = arith.constant 0 : index
    %c0_229 = arith.constant 0 : index
    %233 = vector.load %arg9[%c0_228, %c0_229] : memref<1x64xf32, #tpu.memory_space<vmem>>, vector<1x64xf32>
    %234 = vector.broadcast %233 : vector<1x64xf32> to vector<54x64xf32>
    %235 = arith.addf %232, %234 : vector<54x64xf32>
    %cst_230 = arith.constant 0.000000e+00 : f32
    %236 = vector.broadcast %cst_230 : f32 to vector<54x64xf32>
    %237 = arith.maximumf %235, %236 : vector<54x64xf32>
    %c0_231 = arith.constant 0 : index
    %c0_232 = arith.constant 0 : index
    %238 = vector.load %arg27[%c0_231, %c0_232] : memref<54x64xf32, #tpu.memory_space<vmem>>, vector<54x64xf32>
    tpu.vector_store %arg27[%c0_231, %c0_232], %237 {strides = array<i32>} : memref<54x64xf32, #tpu.memory_space<vmem>>, vector<54x64xf32>,
    %c0_233 = arith.constant 0 : index
    %c0_234 = arith.constant 0 : index
    %239 = tpu.strided_load %arg27[%c0_233, %c0_234] {strides = array<i32: 2, 1>} : memref<54x64xf32, #tpu.memory_space<vmem>>, vector<26x64xf32>
    %c1_235 = arith.constant 1 : index
    %c0_236 = arith.constant 0 : index
    %240 = tpu.strided_load %arg27[%c1_235, %c0_236] {strides = array<i32: 2, 1>} : memref<54x64xf32, #tpu.memory_space<vmem>>, vector<26x64xf32>
    %241 = arith.maximumf %239, %240 : vector<26x64xf32>
    %c2_237 = arith.constant 2 : index
    %c0_238 = arith.constant 0 : index
    %242 = tpu.strided_load %arg27[%c2_237, %c0_238] {strides = array<i32: 2, 1>} : memref<54x64xf32, #tpu.memory_space<vmem>>, vector<26x64xf32>
    %243 = arith.maximumf %241, %242 : vector<26x64xf32>
    %c3_239 = arith.constant 3 : index
    %c0_240 = arith.constant 0 : index
    %244 = tpu.strided_load %arg27[%c3_239, %c0_240] {strides = array<i32: 2, 1>} : memref<54x64xf32, #tpu.memory_space<vmem>>, vector<26x64xf32>
    %245 = arith.maximumf %243, %244 : vector<26x64xf32>
    %cst_241 = arith.constant 0.000000e+00 : f32
    %246 = vector.broadcast %cst_241 : f32 to vector<30x64xf32>
    %c0_242 = arith.constant 0 : index
    %c0_243 = arith.constant 0 : index
    %247 = vector.load %arg28[%c0_242, %c0_243] : memref<30x64xf32, #tpu.memory_space<vmem>>, vector<30x64xf32>
    tpu.vector_store %arg28[%c0_242, %c0_243], %246 {strides = array<i32>} : memref<30x64xf32, #tpu.memory_space<vmem>>, vector<30x64xf32>,
    %c2_244 = arith.constant 2 : index
    %c0_245 = arith.constant 0 : index
    %248 = vector.load %arg28[%c2_244, %c0_245] : memref<30x64xf32, #tpu.memory_space<vmem>>, vector<26x64xf32>
    tpu.vector_store %arg28[%c2_244, %c0_245], %245 {strides = array<i32>} : memref<30x64xf32, #tpu.memory_space<vmem>>, vector<26x64xf32>,
    %cst_246 = arith.constant 0.000000e+00 : f32
    %249 = vector.broadcast %cst_246 : f32 to vector<26x64xf32>
    %c0_247 = arith.constant 0 : index
    %c0_248 = arith.constant 0 : index
    %250 = vector.load %arg28[%c0_247, %c0_248] : memref<30x64xf32, #tpu.memory_space<vmem>>, vector<26x64xf32>
    %251 = arith.truncf %250 : vector<26x64xf32> to vector<26x64xbf16>
    %c0_249 = arith.constant 0 : index
    %c0_250 = arith.constant 0 : index
    %c0_251 = arith.constant 0 : index
    %252 = vector.load %arg10[%c0_249, %c0_250, %c0_251] : memref<5x64x64xbf16, #tpu.memory_space<vmem>>, vector<1x64x64xbf16>
    %253 = vector.shape_cast %252 : vector<1x64x64xbf16> to vector<64x64xbf16>
    %cst_252 = arith.constant dense<0.000000e+00> : vector<26x64xf32>
    %254 = tpu.matmul %251, %253, %cst_252 {dimension_numbers = #tpu.dot_dimension_numbers<[1], [0], [0], [1], [0, 0, 1, 1], [], []>} : vector<26x64xbf16>, vector<64x64xbf16>, vector<26x64xf32> -> vector<26x64xf32>
    %255 = arith.addf %249, %254 : vector<26x64xf32>
    %c1_253 = arith.constant 1 : index
    %c0_254 = arith.constant 0 : index
    %256 = vector.load %arg28[%c1_253, %c0_254] : memref<30x64xf32, #tpu.memory_space<vmem>>, vector<26x64xf32>
    %257 = arith.truncf %256 : vector<26x64xf32> to vector<26x64xbf16>
    %c1_255 = arith.constant 1 : index
    %c0_256 = arith.constant 0 : index
    %c0_257 = arith.constant 0 : index
    %258 = vector.load %arg10[%c1_255, %c0_256, %c0_257] : memref<5x64x64xbf16, #tpu.memory_space<vmem>>, vector<1x64x64xbf16>
    %259 = vector.shape_cast %258 : vector<1x64x64xbf16> to vector<64x64xbf16>
    %cst_258 = arith.constant dense<0.000000e+00> : vector<26x64xf32>
    %260 = tpu.matmul %257, %259, %cst_258 {dimension_numbers = #tpu.dot_dimension_numbers<[1], [0], [0], [1], [0, 0, 1, 1], [], []>} : vector<26x64xbf16>, vector<64x64xbf16>, vector<26x64xf32> -> vector<26x64xf32>
    %261 = arith.addf %255, %260 : vector<26x64xf32>
    %c2_259 = arith.constant 2 : index
    %c0_260 = arith.constant 0 : index
    %262 = vector.load %arg28[%c2_259, %c0_260] : memref<30x64xf32, #tpu.memory_space<vmem>>, vector<26x64xf32>
    %263 = arith.truncf %262 : vector<26x64xf32> to vector<26x64xbf16>
    %c2_261 = arith.constant 2 : index
    %c0_262 = arith.constant 0 : index
    %c0_263 = arith.constant 0 : index
    %264 = vector.load %arg10[%c2_261, %c0_262, %c0_263] : memref<5x64x64xbf16, #tpu.memory_space<vmem>>, vector<1x64x64xbf16>
    %265 = vector.shape_cast %264 : vector<1x64x64xbf16> to vector<64x64xbf16>
    %cst_264 = arith.constant dense<0.000000e+00> : vector<26x64xf32>
    %266 = tpu.matmul %263, %265, %cst_264 {dimension_numbers = #tpu.dot_dimension_numbers<[1], [0], [0], [1], [0, 0, 1, 1], [], []>} : vector<26x64xbf16>, vector<64x64xbf16>, vector<26x64xf32> -> vector<26x64xf32>
    %267 = arith.addf %261, %266 : vector<26x64xf32>
    %c3_265 = arith.constant 3 : index
    %c0_266 = arith.constant 0 : index
    %268 = vector.load %arg28[%c3_265, %c0_266] : memref<30x64xf32, #tpu.memory_space<vmem>>, vector<26x64xf32>
    %269 = arith.truncf %268 : vector<26x64xf32> to vector<26x64xbf16>
    %c3_267 = arith.constant 3 : index
    %c0_268 = arith.constant 0 : index
    %c0_269 = arith.constant 0 : index
    %270 = vector.load %arg10[%c3_267, %c0_268, %c0_269] : memref<5x64x64xbf16, #tpu.memory_space<vmem>>, vector<1x64x64xbf16>
    %271 = vector.shape_cast %270 : vector<1x64x64xbf16> to vector<64x64xbf16>
    %cst_270 = arith.constant dense<0.000000e+00> : vector<26x64xf32>
    %272 = tpu.matmul %269, %271, %cst_270 {dimension_numbers = #tpu.dot_dimension_numbers<[1], [0], [0], [1], [0, 0, 1, 1], [], []>} : vector<26x64xbf16>, vector<64x64xbf16>, vector<26x64xf32> -> vector<26x64xf32>
    %273 = arith.addf %267, %272 : vector<26x64xf32>
    %c4_271 = arith.constant 4 : index
    %c0_272 = arith.constant 0 : index
    %274 = vector.load %arg28[%c4_271, %c0_272] : memref<30x64xf32, #tpu.memory_space<vmem>>, vector<26x64xf32>
    %275 = arith.truncf %274 : vector<26x64xf32> to vector<26x64xbf16>
    %c4_273 = arith.constant 4 : index
    %c0_274 = arith.constant 0 : index
    %c0_275 = arith.constant 0 : index
    %276 = vector.load %arg10[%c4_273, %c0_274, %c0_275] : memref<5x64x64xbf16, #tpu.memory_space<vmem>>, vector<1x64x64xbf16>
    %277 = vector.shape_cast %276 : vector<1x64x64xbf16> to vector<64x64xbf16>
    %cst_276 = arith.constant dense<0.000000e+00> : vector<26x64xf32>
    %278 = tpu.matmul %275, %277, %cst_276 {dimension_numbers = #tpu.dot_dimension_numbers<[1], [0], [0], [1], [0, 0, 1, 1], [], []>} : vector<26x64xbf16>, vector<64x64xbf16>, vector<26x64xf32> -> vector<26x64xf32>
    %279 = arith.addf %273, %278 : vector<26x64xf32>
    %c0_277 = arith.constant 0 : index
    %c0_278 = arith.constant 0 : index
    %280 = vector.load %arg11[%c0_277, %c0_278] : memref<1x64xf32, #tpu.memory_space<vmem>>, vector<1x64xf32>
    %281 = vector.broadcast %280 : vector<1x64xf32> to vector<26x64xf32>
    %282 = arith.addf %279, %281 : vector<26x64xf32>
    %cst_279 = arith.constant 0.000000e+00 : f32
    %283 = vector.broadcast %cst_279 : f32 to vector<26x64xf32>
    %284 = arith.maximumf %282, %283 : vector<26x64xf32>
    %c0_280 = arith.constant 0 : index
    %c0_281 = arith.constant 0 : index
    %285 = vector.load %arg29[%c0_280, %c0_281] : memref<26x64xf32, #tpu.memory_space<vmem>>, vector<26x64xf32>
    tpu.vector_store %arg29[%c0_280, %c0_281], %284 {strides = array<i32>} : memref<26x64xf32, #tpu.memory_space<vmem>>, vector<26x64xf32>,
    %c0_282 = arith.constant 0 : index
    %c0_283 = arith.constant 0 : index
    %286 = tpu.strided_load %arg29[%c0_282, %c0_283] {strides = array<i32: 2, 1>} : memref<26x64xf32, #tpu.memory_space<vmem>>, vector<13x64xf32>
    %c1_284 = arith.constant 1 : index
    %c0_285 = arith.constant 0 : index
    %287 = tpu.strided_load %arg29[%c1_284, %c0_285] {strides = array<i32: 2, 1>} : memref<26x64xf32, #tpu.memory_space<vmem>>, vector<13x64xf32>
    %288 = arith.maximumf %286, %287 : vector<13x64xf32>
    %cst_286 = arith.constant 0.000000e+00 : f32
    %289 = vector.broadcast %cst_286 : f32 to vector<15x64xf32>
    %c0_287 = arith.constant 0 : index
    %c0_288 = arith.constant 0 : index
    %290 = vector.load %arg30[%c0_287, %c0_288] : memref<15x64xf32, #tpu.memory_space<vmem>>, vector<15x64xf32>
    tpu.vector_store %arg30[%c0_287, %c0_288], %289 {strides = array<i32>} : memref<15x64xf32, #tpu.memory_space<vmem>>, vector<15x64xf32>,
    %c1_289 = arith.constant 1 : index
    %c0_290 = arith.constant 0 : index
    %291 = vector.load %arg30[%c1_289, %c0_290] : memref<15x64xf32, #tpu.memory_space<vmem>>, vector<13x64xf32>
    tpu.vector_store %arg30[%c1_289, %c0_290], %288 {strides = array<i32>} : memref<15x64xf32, #tpu.memory_space<vmem>>, vector<13x64xf32>,
    %cst_291 = arith.constant 0.000000e+00 : f32
    %292 = vector.broadcast %cst_291 : f32 to vector<13x64xf32>
    %c0_292 = arith.constant 0 : index
    %c0_293 = arith.constant 0 : index
    %293 = vector.load %arg30[%c0_292, %c0_293] : memref<15x64xf32, #tpu.memory_space<vmem>>, vector<13x64xf32>
    %294 = arith.truncf %293 : vector<13x64xf32> to vector<13x64xbf16>
    %c0_294 = arith.constant 0 : index
    %c0_295 = arith.constant 0 : index
    %c0_296 = arith.constant 0 : index
    %295 = vector.load %arg12[%c0_294, %c0_295, %c0_296] : memref<3x64x64xbf16, #tpu.memory_space<vmem>>, vector<1x64x64xbf16>
    %296 = vector.shape_cast %295 : vector<1x64x64xbf16> to vector<64x64xbf16>
    %cst_297 = arith.constant dense<0.000000e+00> : vector<13x64xf32>
    %297 = tpu.matmul %294, %296, %cst_297 {dimension_numbers = #tpu.dot_dimension_numbers<[1], [0], [0], [1], [0, 0, 1, 1], [], []>} : vector<13x64xbf16>, vector<64x64xbf16>, vector<13x64xf32> -> vector<13x64xf32>
    %298 = arith.addf %292, %297 : vector<13x64xf32>
    %c1_298 = arith.constant 1 : index
    %c0_299 = arith.constant 0 : index
    %299 = vector.load %arg30[%c1_298, %c0_299] : memref<15x64xf32, #tpu.memory_space<vmem>>, vector<13x64xf32>
    %300 = arith.truncf %299 : vector<13x64xf32> to vector<13x64xbf16>
    %c1_300 = arith.constant 1 : index
    %c0_301 = arith.constant 0 : index
    %c0_302 = arith.constant 0 : index
    %301 = vector.load %arg12[%c1_300, %c0_301, %c0_302] : memref<3x64x64xbf16, #tpu.memory_space<vmem>>, vector<1x64x64xbf16>
    %302 = vector.shape_cast %301 : vector<1x64x64xbf16> to vector<64x64xbf16>
    %cst_303 = arith.constant dense<0.000000e+00> : vector<13x64xf32>
    %303 = tpu.matmul %300, %302, %cst_303 {dimension_numbers = #tpu.dot_dimension_numbers<[1], [0], [0], [1], [0, 0, 1, 1], [], []>} : vector<13x64xbf16>, vector<64x64xbf16>, vector<13x64xf32> -> vector<13x64xf32>
    %304 = arith.addf %298, %303 : vector<13x64xf32>
    %c2_304 = arith.constant 2 : index
    %c0_305 = arith.constant 0 : index
    %305 = vector.load %arg30[%c2_304, %c0_305] : memref<15x64xf32, #tpu.memory_space<vmem>>, vector<13x64xf32>
    %306 = arith.truncf %305 : vector<13x64xf32> to vector<13x64xbf16>
    %c2_306 = arith.constant 2 : index
    %c0_307 = arith.constant 0 : index
    %c0_308 = arith.constant 0 : index
    %307 = vector.load %arg12[%c2_306, %c0_307, %c0_308] : memref<3x64x64xbf16, #tpu.memory_space<vmem>>, vector<1x64x64xbf16>
    %308 = vector.shape_cast %307 : vector<1x64x64xbf16> to vector<64x64xbf16>
    %cst_309 = arith.constant dense<0.000000e+00> : vector<13x64xf32>
    %309 = tpu.matmul %306, %308, %cst_309 {dimension_numbers = #tpu.dot_dimension_numbers<[1], [0], [0], [1], [0, 0, 1, 1], [], []>} : vector<13x64xbf16>, vector<64x64xbf16>, vector<13x64xf32> -> vector<13x64xf32>
    %310 = arith.addf %304, %309 : vector<13x64xf32>
    %c0_310 = arith.constant 0 : index
    %c0_311 = arith.constant 0 : index
    %311 = vector.load %arg13[%c0_310, %c0_311] : memref<1x64xf32, #tpu.memory_space<vmem>>, vector<1x64xf32>
    %312 = vector.broadcast %311 : vector<1x64xf32> to vector<13x64xf32>
    %313 = arith.addf %310, %312 : vector<13x64xf32>
    %cst_312 = arith.constant 0.000000e+00 : f32
    %314 = vector.broadcast %cst_312 : f32 to vector<13x64xf32>
    %315 = arith.maximumf %313, %314 : vector<13x64xf32>
    %c0_313 = arith.constant 0 : index
    %c0_314 = arith.constant 0 : index
    %316 = vector.load %arg31[%c0_313, %c0_314] : memref<13x64xf32, #tpu.memory_space<vmem>>, vector<13x64xf32>
    tpu.vector_store %arg31[%c0_313, %c0_314], %315 {strides = array<i32>} : memref<13x64xf32, #tpu.memory_space<vmem>>, vector<13x64xf32>,
    %c0_315 = arith.constant 0 : index
    %c0_316 = arith.constant 0 : index
    %317 = tpu.strided_load %arg31[%c0_315, %c0_316] {strides = array<i32: 2, 1>} : memref<13x64xf32, #tpu.memory_space<vmem>>, vector<6x64xf32>
    %c1_317 = arith.constant 1 : index
    %c0_318 = arith.constant 0 : index
    %318 = tpu.strided_load %arg31[%c1_317, %c0_318] {strides = array<i32: 2, 1>} : memref<13x64xf32, #tpu.memory_space<vmem>>, vector<6x64xf32>
    %319 = arith.maximumf %317, %318 : vector<6x64xf32>
    %cst_319 = arith.constant 0.000000e+00 : f32
    %320 = vector.broadcast %cst_319 : f32 to vector<8x64xf32>
    %c0_320 = arith.constant 0 : index
    %c0_321 = arith.constant 0 : index
    %321 = vector.load %arg32[%c0_320, %c0_321] : memref<8x64xf32, #tpu.memory_space<vmem>>, vector<8x64xf32>
    tpu.vector_store %arg32[%c0_320, %c0_321], %320 {strides = array<i32>} : memref<8x64xf32, #tpu.memory_space<vmem>>, vector<8x64xf32>,
    %c1_322 = arith.constant 1 : index
    %c0_323 = arith.constant 0 : index
    %322 = vector.load %arg32[%c1_322, %c0_323] : memref<8x64xf32, #tpu.memory_space<vmem>>, vector<6x64xf32>
    tpu.vector_store %arg32[%c1_322, %c0_323], %319 {strides = array<i32>} : memref<8x64xf32, #tpu.memory_space<vmem>>, vector<6x64xf32>,
    %cst_324 = arith.constant 0.000000e+00 : f32
    %323 = vector.broadcast %cst_324 : f32 to vector<6x72xf32>
    %c0_325 = arith.constant 0 : index
    %c0_326 = arith.constant 0 : index
    %324 = vector.load %arg32[%c0_325, %c0_326] : memref<8x64xf32, #tpu.memory_space<vmem>>, vector<6x64xf32>
    %325 = arith.truncf %324 : vector<6x64xf32> to vector<6x64xbf16>
    %c0_327 = arith.constant 0 : index
    %c0_328 = arith.constant 0 : index
    %c0_329 = arith.constant 0 : index
    %326 = vector.load %arg14[%c0_327, %c0_328, %c0_329] : memref<3x64x72xbf16, #tpu.memory_space<vmem>>, vector<1x64x72xbf16>
    %327 = vector.shape_cast %326 : vector<1x64x72xbf16> to vector<64x72xbf16>
    %cst_330 = arith.constant dense<0.000000e+00> : vector<6x72xf32>
    %328 = tpu.matmul %325, %327, %cst_330 {dimension_numbers = #tpu.dot_dimension_numbers<[1], [0], [0], [1], [0, 0, 1, 1], [], []>} : vector<6x64xbf16>, vector<64x72xbf16>, vector<6x72xf32> -> vector<6x72xf32>
    %329 = arith.addf %323, %328 : vector<6x72xf32>
    %c1_331 = arith.constant 1 : index
    %c0_332 = arith.constant 0 : index
    %330 = vector.load %arg32[%c1_331, %c0_332] : memref<8x64xf32, #tpu.memory_space<vmem>>, vector<6x64xf32>
    %331 = arith.truncf %330 : vector<6x64xf32> to vector<6x64xbf16>
    %c1_333 = arith.constant 1 : index
    %c0_334 = arith.constant 0 : index
    %c0_335 = arith.constant 0 : index
    %332 = vector.load %arg14[%c1_333, %c0_334, %c0_335] : memref<3x64x72xbf16, #tpu.memory_space<vmem>>, vector<1x64x72xbf16>
    %333 = vector.shape_cast %332 : vector<1x64x72xbf16> to vector<64x72xbf16>
    %cst_336 = arith.constant dense<0.000000e+00> : vector<6x72xf32>
    %334 = tpu.matmul %331, %333, %cst_336 {dimension_numbers = #tpu.dot_dimension_numbers<[1], [0], [0], [1], [0, 0, 1, 1], [], []>} : vector<6x64xbf16>, vector<64x72xbf16>, vector<6x72xf32> -> vector<6x72xf32>
    %335 = arith.addf %329, %334 : vector<6x72xf32>
    %c2_337 = arith.constant 2 : index
    %c0_338 = arith.constant 0 : index
    %336 = vector.load %arg32[%c2_337, %c0_338] : memref<8x64xf32, #tpu.memory_space<vmem>>, vector<6x64xf32>
    %337 = arith.truncf %336 : vector<6x64xf32> to vector<6x64xbf16>
    %c2_339 = arith.constant 2 : index
    %c0_340 = arith.constant 0 : index
    %c0_341 = arith.constant 0 : index
    %338 = vector.load %arg14[%c2_339, %c0_340, %c0_341] : memref<3x64x72xbf16, #tpu.memory_space<vmem>>, vector<1x64x72xbf16>
    %339 = vector.shape_cast %338 : vector<1x64x72xbf16> to vector<64x72xbf16>
    %cst_342 = arith.constant dense<0.000000e+00> : vector<6x72xf32>
    %340 = tpu.matmul %337, %339, %cst_342 {dimension_numbers = #tpu.dot_dimension_numbers<[1], [0], [0], [1], [0, 0, 1, 1], [], []>} : vector<6x64xbf16>, vector<64x72xbf16>, vector<6x72xf32> -> vector<6x72xf32>
    %341 = arith.addf %335, %340 : vector<6x72xf32>
    %c0_343 = arith.constant 0 : index
    %c0_344 = arith.constant 0 : index
    %342 = vector.load %arg15[%c0_343, %c0_344] : memref<1x72xf32, #tpu.memory_space<vmem>>, vector<1x72xf32>
    %343 = vector.broadcast %342 : vector<1x72xf32> to vector<6x72xf32>
    %344 = arith.addf %341, %343 : vector<6x72xf32>
    %cst_345 = arith.constant 0.000000e+00 : f32
    %345 = vector.broadcast %cst_345 : f32 to vector<6x72xf32>
    %346 = arith.maximumf %344, %345 : vector<6x72xf32>
    %c0_346 = arith.constant 0 : index
    %c0_347 = arith.constant 0 : index
    %347 = vector.load %arg33[%c0_346, %c0_347] : memref<6x72xf32, #tpu.memory_space<vmem>>, vector<6x72xf32>
    tpu.vector_store %arg33[%c0_346, %c0_347], %346 {strides = array<i32>} : memref<6x72xf32, #tpu.memory_space<vmem>>, vector<6x72xf32>,
    %c0_348 = arith.constant 0 : index
    %c0_349 = arith.constant 0 : index
    %348 = tpu.strided_load %arg33[%c0_348, %c0_349] {strides = array<i32: 2, 1>} : memref<6x72xf32, #tpu.memory_space<vmem>>, vector<3x72xf32>
    %c1_350 = arith.constant 1 : index
    %c0_351 = arith.constant 0 : index
    %349 = tpu.strided_load %arg33[%c1_350, %c0_351] {strides = array<i32: 2, 1>} : memref<6x72xf32, #tpu.memory_space<vmem>>, vector<3x72xf32>
    %350 = arith.maximumf %348, %349 : vector<3x72xf32>
    %c0_352 = arith.constant 0 : index
    %c0_353 = arith.constant 0 : index
    %351 = vector.load %arg17[%c0_352, %c0_353] : memref<1x64xf32, #tpu.memory_space<vmem>>, vector<1x64xf32>
    %352 = vector.extract_strided_slice %350 {offsets = [0, 0], sizes = [1, 72], strides = [1, 1]} : vector<3x72xf32> to vector<1x72xf32>
    %353 = arith.truncf %352 : vector<1x72xf32> to vector<1x72xbf16>
    %c0_354 = arith.constant 0 : index
    %c0_355 = arith.constant 0 : index
    %c0_356 = arith.constant 0 : index
    %354 = vector.load %arg16[%c0_354, %c0_355, %c0_356] : memref<3x72x64xbf16, #tpu.memory_space<vmem>>, vector<1x72x64xbf16>
    %355 = vector.shape_cast %354 : vector<1x72x64xbf16> to vector<72x64xbf16>
    %cst_357 = arith.constant dense<0.000000e+00> : vector<1x64xf32>
    %356 = tpu.matmul %353, %355, %cst_357 {dimension_numbers = #tpu.dot_dimension_numbers<[1], [0], [0], [1], [0, 0, 1, 1], [], []>} : vector<1x72xbf16>, vector<72x64xbf16>, vector<1x64xf32> -> vector<1x64xf32>
    %357 = arith.addf %351, %356 : vector<1x64xf32>
    %358 = vector.extract_strided_slice %350 {offsets = [1, 0], sizes = [1, 72], strides = [1, 1]} : vector<3x72xf32> to vector<1x72xf32>
    %359 = arith.truncf %358 : vector<1x72xf32> to vector<1x72xbf16>
    %c1_358 = arith.constant 1 : index
    %c0_359 = arith.constant 0 : index
    %c0_360 = arith.constant 0 : index
    %360 = vector.load %arg16[%c1_358, %c0_359, %c0_360] : memref<3x72x64xbf16, #tpu.memory_space<vmem>>, vector<1x72x64xbf16>
    %361 = vector.shape_cast %360 : vector<1x72x64xbf16> to vector<72x64xbf16>
    %cst_361 = arith.constant dense<0.000000e+00> : vector<1x64xf32>
    %362 = tpu.matmul %359, %361, %cst_361 {dimension_numbers = #tpu.dot_dimension_numbers<[1], [0], [0], [1], [0, 0, 1, 1], [], []>} : vector<1x72xbf16>, vector<72x64xbf16>, vector<1x64xf32> -> vector<1x64xf32>
    %363 = arith.addf %357, %362 : vector<1x64xf32>
    %364 = vector.extract_strided_slice %350 {offsets = [2, 0], sizes = [1, 72], strides = [1, 1]} : vector<3x72xf32> to vector<1x72xf32>
    %365 = arith.truncf %364 : vector<1x72xf32> to vector<1x72xbf16>
    %c2_362 = arith.constant 2 : index
    %c0_363 = arith.constant 0 : index
    %c0_364 = arith.constant 0 : index
    %366 = vector.load %arg16[%c2_362, %c0_363, %c0_364] : memref<3x72x64xbf16, #tpu.memory_space<vmem>>, vector<1x72x64xbf16>
    %367 = vector.shape_cast %366 : vector<1x72x64xbf16> to vector<72x64xbf16>
    %cst_365 = arith.constant dense<0.000000e+00> : vector<1x64xf32>
    %368 = tpu.matmul %365, %367, %cst_365 {dimension_numbers = #tpu.dot_dimension_numbers<[1], [0], [0], [1], [0, 0, 1, 1], [], []>} : vector<1x72xbf16>, vector<72x64xbf16>, vector<1x64xf32> -> vector<1x64xf32>
    %369 = arith.addf %363, %368 : vector<1x64xf32>
    %cst_366 = arith.constant 0.000000e+00 : f32
    %370 = vector.broadcast %cst_366 : f32 to vector<1x64xf32>
    %371 = arith.maximumf %369, %370 : vector<1x64xf32>
    %372 = arith.truncf %371 : vector<1x64xf32> to vector<1x64xbf16>
    %c0_367 = arith.constant 0 : index
    %c0_368 = arith.constant 0 : index
    %373 = vector.load %arg18[%c0_367, %c0_368] : memref<64x17xbf16, #tpu.memory_space<vmem>>, vector<64x17xbf16>
    %cst_369 = arith.constant dense<0.000000e+00> : vector<1x17xf32>
    %374 = tpu.matmul %372, %373, %cst_369 {dimension_numbers = #tpu.dot_dimension_numbers<[1], [0], [0], [1], [0, 0, 1, 1], [], []>} : vector<1x64xbf16>, vector<64x17xbf16>, vector<1x17xf32> -> vector<1x17xf32>
    %c0_370 = arith.constant 0 : index
    %c0_371 = arith.constant 0 : index
    %375 = vector.load %arg19[%c0_370, %c0_371] : memref<1x17xf32, #tpu.memory_space<vmem>>, vector<1x17xf32>
    %376 = arith.addf %374, %375 : vector<1x17xf32>
    %c0_372 = arith.constant 0 : index
    %c0_373 = arith.constant 0 : index
    %c0_374 = arith.constant 0 : index
    %377 = vector.load %arg20[%c0_372, %c0_373, %c0_374] : memref<1x1x17xf32, #tpu.memory_space<vmem>>, vector<1x1x17xf32>
    %378 = vector.shape_cast %377 : vector<1x1x17xf32> to vector<1x17xf32>
    %379 = vector.shape_cast %376 : vector<1x17xf32> to vector<1x1x17xf32>
    tpu.vector_store %arg20[%c0_372, %c0_373, %c0_374], %379 {strides = array<i32>} : memref<1x1x17xf32, #tpu.memory_space<vmem>>, vector<1x1x17xf32>,
    return
  }
  func.func @transform_0(%arg0: i32) -> (i32, i32, i32) {
    %c0_i32 = arith.constant 0 : i32
    %c0_i32_0 = arith.constant 0 : i32
    %c0_i32_1 = arith.constant 0 : i32
    return %arg0, %c0_i32, %c0_i32_0 : i32, i32, i32
  }
  func.func @transform_1(%arg0: i32) -> (i32, i32) {
    %c0_i32 = arith.constant 0 : i32
    %c0_i32_0 = arith.constant 0 : i32
    %c0_i32_1 = arith.constant 0 : i32
    return %c0_i32, %c0_i32_0 : i32, i32
  }
  func.func @transform_2(%arg0: i32) -> (i32, i32) {
    %c0_i32 = arith.constant 0 : i32
    %c0_i32_0 = arith.constant 0 : i32
    %c0_i32_1 = arith.constant 0 : i32
    return %c0_i32, %c0_i32_0 : i32, i32
  }
  func.func @transform_3(%arg0: i32) -> (i32, i32, i32) {
    %c0_i32 = arith.constant 0 : i32
    %c0_i32_0 = arith.constant 0 : i32
    %c0_i32_1 = arith.constant 0 : i32
    %c0_i32_2 = arith.constant 0 : i32
    return %c0_i32, %c0_i32_0, %c0_i32_1 : i32, i32, i32
  }
  func.func @transform_4(%arg0: i32) -> (i32, i32) {
    %c0_i32 = arith.constant 0 : i32
    %c0_i32_0 = arith.constant 0 : i32
    %c0_i32_1 = arith.constant 0 : i32
    return %c0_i32, %c0_i32_0 : i32, i32
  }
  func.func @transform_5(%arg0: i32) -> (i32, i32, i32) {
    %c0_i32 = arith.constant 0 : i32
    %c0_i32_0 = arith.constant 0 : i32
    %c0_i32_1 = arith.constant 0 : i32
    %c0_i32_2 = arith.constant 0 : i32
    return %c0_i32, %c0_i32_0, %c0_i32_1 : i32, i32, i32
  }
  func.func @transform_6(%arg0: i32) -> (i32, i32) {
    %c0_i32 = arith.constant 0 : i32
    %c0_i32_0 = arith.constant 0 : i32
    %c0_i32_1 = arith.constant 0 : i32
    return %c0_i32, %c0_i32_0 : i32, i32
  }
  func.func @transform_7(%arg0: i32) -> (i32, i32, i32) {
    %c0_i32 = arith.constant 0 : i32
    %c0_i32_0 = arith.constant 0 : i32
    %c0_i32_1 = arith.constant 0 : i32
    %c0_i32_2 = arith.constant 0 : i32
    return %c0_i32, %c0_i32_0, %c0_i32_1 : i32, i32, i32
  }
  func.func @transform_8(%arg0: i32) -> (i32, i32) {
    %c0_i32 = arith.constant 0 : i32
    %c0_i32_0 = arith.constant 0 : i32
    %c0_i32_1 = arith.constant 0 : i32
    return %c0_i32, %c0_i32_0 : i32, i32
  }
  func.func @transform_9(%arg0: i32) -> (i32, i32, i32) {
    %c0_i32 = arith.constant 0 : i32
    %c0_i32_0 = arith.constant 0 : i32
    %c0_i32_1 = arith.constant 0 : i32
    %c0_i32_2 = arith.constant 0 : i32
    return %c0_i32, %c0_i32_0, %c0_i32_1 : i32, i32, i32
  }
  func.func @transform_10(%arg0: i32) -> (i32, i32) {
    %c0_i32 = arith.constant 0 : i32
    %c0_i32_0 = arith.constant 0 : i32
    %c0_i32_1 = arith.constant 0 : i32
    return %c0_i32, %c0_i32_0 : i32, i32
  }
  func.func @transform_11(%arg0: i32) -> (i32, i32, i32) {
    %c0_i32 = arith.constant 0 : i32
    %c0_i32_0 = arith.constant 0 : i32
    %c0_i32_1 = arith.constant 0 : i32
    %c0_i32_2 = arith.constant 0 : i32
    return %c0_i32, %c0_i32_0, %c0_i32_1 : i32, i32, i32
  }
  func.func @transform_12(%arg0: i32) -> (i32, i32) {
    %c0_i32 = arith.constant 0 : i32
    %c0_i32_0 = arith.constant 0 : i32
    %c0_i32_1 = arith.constant 0 : i32
    return %c0_i32, %c0_i32_0 : i32, i32
  }
  func.func @transform_13(%arg0: i32) -> (i32, i32, i32) {
    %c0_i32 = arith.constant 0 : i32
    %c0_i32_0 = arith.constant 0 : i32
    %c0_i32_1 = arith.constant 0 : i32
    %c0_i32_2 = arith.constant 0 : i32
    return %c0_i32, %c0_i32_0, %c0_i32_1 : i32, i32, i32
  }
  func.func @transform_14(%arg0: i32) -> (i32, i32) {
    %c0_i32 = arith.constant 0 : i32
    %c0_i32_0 = arith.constant 0 : i32
    %c0_i32_1 = arith.constant 0 : i32
    return %c0_i32, %c0_i32_0 : i32, i32
  }
  func.func @transform_15(%arg0: i32) -> (i32, i32, i32) {
    %c0_i32 = arith.constant 0 : i32
    %c0_i32_0 = arith.constant 0 : i32
    %c0_i32_1 = arith.constant 0 : i32
    %c0_i32_2 = arith.constant 0 : i32
    return %c0_i32, %c0_i32_0, %c0_i32_1 : i32, i32, i32
  }
  func.func @transform_16(%arg0: i32) -> (i32, i32) {
    %c0_i32 = arith.constant 0 : i32
    %c0_i32_0 = arith.constant 0 : i32
    %c0_i32_1 = arith.constant 0 : i32
    return %c0_i32, %c0_i32_0 : i32, i32
  }
  func.func @transform_17(%arg0: i32) -> (i32, i32) {
    %c0_i32 = arith.constant 0 : i32
    %c0_i32_0 = arith.constant 0 : i32
    %c0_i32_1 = arith.constant 0 : i32
    return %c0_i32, %c0_i32_0 : i32, i32
  }
  func.func @transform_18(%arg0: i32) -> (i32, i32) {
    %c0_i32 = arith.constant 0 : i32
    %c0_i32_0 = arith.constant 0 : i32
    %c0_i32_1 = arith.constant 0 : i32
    return %c0_i32, %c0_i32_0 : i32, i32
  }
  func.func @transform_19(%arg0: i32) -> (i32, i32, i32) {
    %c0_i32 = arith.constant 0 : i32
    %c0_i32_0 = arith.constant 0 : i32
    %c0_i32_1 = arith.constant 0 : i32
    return %arg0, %c0_i32, %c0_i32_0 : i32, i32, i32
  }
}

</mosaic_0001>

<bundles_post_ra>
// kernel: ecgnet_forward.1
= control target key start
LH: loop header
LB: loop body
LE: loop exit
PB: predicated region body
PF: predicated region fallthrough
CT: control target
= control target key end

     0   :  { %s14109_s0 = inlined_call_operand.vmem [shape: bf16[2,1800,16], index: 0, kind: input, shape index: {}]   ;;  %s14110_s1 = inlined_call_operand.vmem [shape: bf16[16,8], index: 1, kind: input, shape index: {}]   ;;  %s14111_s2 = inlined_call_operand.vmem [shape: f32[1,8], index: 2, kind: input, shape index: {}]   ;;  %s14112_s3 = inlined_call_operand.vmem [shape: bf16[12,8,12], index: 3, kind: input, shape index: {}]   ;;  %s14113_s4 = inlined_call_operand.vmem [shape: f32[1,12], index: 4, kind: input, shape index: {}]   ;;  %s14114_s5 = inlined_call_operand.vmem [shape: bf16[9,12,32], index: 5, kind: input, shape index: {}]   ;;  %s14115_s6 = inlined_call_operand.vmem [shape: f32[1,32], index: 6, kind: input, shape index: {}]   ;;  %s14116_s7 = inlined_call_operand.vmem [shape: bf16[7,32,64], index: 7, kind: input, shape index: {}]   ;;  %s14117_s8 = inlined_call_operand.vmem [shape: f32[1,64], index: 8, kind: input, shape index: {}]   ;;  %s14118_s9 = inlined_call_operand.vmem [shape: bf16[5,64,64], index: 9, kind: input, shape index: {}]   ;;  %s14119_s10 = inlined_call_operand.vmem [shape: f32[1,64], index: 10, kind: input, shape index: {}]   ;;  %s14120_s11 = inlined_call_operand.vmem [shape: bf16[3,64,64], index: 11, kind: input, shape index: {}]   ;;  %s14121_s12 = inlined_call_operand.vmem [shape: f32[1,64], index: 12, kind: input, shape index: {}]   ;;  %s14122_s13 = inlined_call_operand.vmem [shape: bf16[3,64,72], index: 13, kind: input, shape index: {}]   ;;  %s14123_s14 = inlined_call_operand.vmem [shape: f32[1,72], index: 14, kind: input, shape index: {}]   ;;  %s14124_s15 = inlined_call_operand.vmem [shape: bf16[3,72,64], index: 15, kind: input, shape index: {}]   ;;  %s14125_s16 = inlined_call_operand.vmem [shape: f32[1,64], index: 16, kind: input, shape index: {}]   ;;  %s14126_s17 = inlined_call_operand.vmem [shape: bf16[64,17], index: 17, kind: input, shape index: {}]   ;;  %s14127_s18 = inlined_call_operand.vmem [shape: f32[1,17], index: 18, kind: input, shape index: {}]   ;;  %s14128_s19 = inlined_call_operand.hbm [shape: f32[2,1,17], index: 19, kind: output, shape index: {}]  }
   0x1   :  { %14137 = sst [smem:[#allocation36_spill]] %s14109_s0 }
   0x2   :  { %14138 = sst [smem:[#allocation37_spill]] %s14110_s1 }
   0x3   :  { %14139 = sst [smem:[#allocation38_spill]] %s14111_s2 }
   0x4   :  { %14140 = sst [smem:[#allocation39_spill]] %s14112_s3 }
   0x5   :  { %14141 = sst [smem:[#allocation40_spill]] %s14113_s4 }
   0x6   :  { %14142 = sst [smem:[#allocation41_spill]] %s14114_s5 }
   0x7   :  { %14143 = sst [smem:[#allocation42_spill]] %s14115_s6 }
   0x8   :  { %14144 = sst [smem:[#allocation43_spill]] %s14116_s7 }
   0x9   :  { %14145 = sst [smem:[#allocation44_spill]] %s14117_s8 }
   0xa   :  { %24 = vsyncpa [#allocation16], 0 }
   0xb   :  { %26 = vsyncpa [#allocation16 + $0x1], 0  ;;  %s11549_s0 = smov 0   ;;  %s11551_s30 = smov 0  }
   0xc   :  { %s11553_s20 = smov 0   ;;  %s11555_s21 = smov 0  }
   0xd LB: > { %14146 = sst [smem:[#allocation18_spill]] %s11442_s20  ;;  %s11570_s1 = sadd.s32 4294967295, %s11446_s21   ;;  %s11446_s21 = sphi %s11555_s21, %s14200_s21   ;;  %s11442_s20 = sphi %s11553_s20, %s14202_s20   ;;  %s11438_s30 = sphi %s11551_s30, %s14204_s30   ;;  %s11434_s0 = sphi %s11549_s0, %s14203_s0  }
   0xe   : > { %s9818_s22 = sadd.s32 4294967294, %s11446_s21   ;;  %s11574_s2 = sadd.s32 1, %s11446_s21  }
   0xf   : > { %14147 = sst [smem:[#allocation19_spill]] %s11574_s2  ;;  %s443_s23 = sadd.s32 1, %s11442_s20 }
  0x10   : > { %s440_s24 = ssub.s32 %s11446_s21, %s11574_s2  ;;  %p453_p0 = scmp.ne.s32.totalorder %s11442_s20, %s11438_s30 }
  0x11   : > { %p441_p1 = scmp.eq.s32.totalorder %s440_s24, 0  ;;  %p454_p2 = scmp.eq.s32.totalorder %s11570_s1, 1 }
  0x12   : > { %p459_p3 = scmp.ne.s32.totalorder %s11438_s30, %s11434_s0  ;;  %p460_p4 = scmp.eq.s32.totalorder %s9818_s22, 1 }
  0x13   : > { %s11585_s25 = scalar_select %p441_p1, %s11442_s20, %s443_s23  }
  0x14   : > { %p11587_p5 = por %p454_p2, %p453_p0  ;;  %p11591_p6 = por %p460_p4, %p459_p3 }
  0x15   : > { %14148 = sst [smem:[#allocation20_spill]] %s11585_s25  ;;  %p9821_p7 = scmp.ge.s32.totalorder %s11446_s21, 1 }
  0x16   : > { %p540_p8 = scmp.lt.s32.totalorder %s11446_s21, 3 }
  0x18   : > { %p541_p9 = pnand %p9821_p7, %p540_p8 }
  0x1a   : > { %544 = sbr.rel (%p541_p9) target bundleno = 4294 (0x10c6), region = 96 }
  0x1f   : > { %s14151_s29 = sld [smem:[#allocation37_spill]]  ;;  %p595_p10 = scmp.lt.s32.totalorder %s11570_s1, 1  ;;  %vm1401_vm0 = vcmask 130048   ;;  %vm2539_vm1 = vcmask 64512   ;;  %v14134_v28 = vmov 0.0   ;;  %vm4376_vm2 = vcmask 1043456  }
  0x20   : > { %s14152_s20 = sld [smem:[#allocation36_spill]]  ;;  %4075 = vst.msk [vmem:[#allocation3] sm:$0xff] %vm2539_vm1, %v14134_v28  ;;  %vm4190_vm3 = vcmask 57344   ;;  %vm4132_vm4 = vcmask 59392   ;;  %vm7168_vm5 = vcmask 1045504   ;;  %vm6883_vm6 = vcmask 97280  }
  0x21   : > { %s596_s22 = scalar_select %p595_p10, %s11570_s1, 1  ;;  %4076 = vst.msk [vmem:[#allocation3 + $0x8] sm:$0xff] %vm2539_vm1, %v14134_v28  ;;  %vm7079_vm7 = vcmask 96256   ;;  %vm8098_vm8 = vcmask 261120   ;;  %vm8218_vm9 = vcmask 257024   ;;  %vm8112_vm10 = vcmask 260096  }
  0x22   : > { %s14153_s27 = sld [smem:[#allocation38_spill]]  ;;  %4077 = vst.msk [vmem:[#allocation3 + $0x10] sm:$0xff] %vm2539_vm1, %v14134_v28  ;;  %vm8226_vm11 = vcmask 259072   ;;  %vm8756_vm12 = vcmask 523264   ;;  %vm8763_vm13 = vcmask 521216   ;;  %vm8815_vm14 = vcmask 517120  }
  0x23   : > { %s11332_s23 = smul.u32 900, %s596_s22  ;;  %4078 = vst.msk [vmem:[#allocation3 + $0x18] sm:$0xff] %vm2539_vm1, %v14134_v28  ;;  %s14154_s22 = sld [smem:[#allocation39_spill]]  ;;  %vm9174_vm15 = vcmask 522240  }
  0x24   : > { %4079 = vst.msk [vmem:[#allocation3 + $0x20] sm:$0xff] %vm2539_vm1, %v14134_v28  ;;  %s14185_s5 = sld [smem:[#allocation41_spill]] }
  0x25   : > { %v11246_v0 = vld [vmem:[%s14151_s29] sm:$0xff]  ;;  %4080 = vst.msk [vmem:[#allocation3 + $0x28] sm:$0xff] %vm2539_vm1, %v14134_v28  ;;  %s14187_s4 = sld [smem:[#allocation40_spill]]  ;;  %s11404_s29 = scalar_lea.hbm %s14128_s19, 2 }
  0x26   : > { %1748 = vmatpush.bf16.msra.mxu0 %v11246_v0  ;;  %11330 = vmatpush.bf16.msra.mxu1 %v11246_v0  ;;  %s11605_s2 = scalar_lea.vmem %s14152_s20, %s11332_s23  ;;  %4081 = vst.msk [vmem:[#allocation3 + $0x30] sm:$0xff] %vm2539_vm1, %v14134_v28  ;;  %s14188_s7 = sld [smem:[#allocation43_spill]] }
  0x27   : > { %v11134_v1 = vld [vmem:[%s11605_s2] sm:$0xff]  ;;  %v11135_v2 = vld [vmem:[%s11605_s2 + $0x8] sm:$0xff]  ;;  %v11233_v3 = vld [vmem:[%s11605_s2 + $0x318] sm:$0xff]  ;;  %4082 = vst.msk [vmem:[#allocation3 + $0x38] sm:$0xff] %vm2539_vm1, %v14134_v28  ;;  %s14193_s6 = sld [smem:[#allocation42_spill]]  ;;  %s9759_s23 = scalar_lea.hbm %s14128_s19, %s11570_s1 }
  0x28   : > { %v11136_v4 = vld [vmem:[%s11605_s2 + $0x10] sm:$0xff]  ;;  %v11234_v5 = vld [vmem:[%s11605_s2 + $0x320] sm:$0xff]  ;;  %v11137_v6 = vld [vmem:[%s11605_s2 + $0x18] sm:$0xff]  ;;  %4083 = vst.msk [vmem:[#allocation3 + $0x40] sm:$0xff] %vm2539_vm1, %v14134_v28  ;;  %s14199_s8 = sld [smem:[#allocation44_spill]] }
  0x29   : > { %10275 = vmatmul.msk.bf16.vlgmr.msra.gmra.mxu0 %vm1401_vm0, %v11134_v1  ;;  %10374 = vmatmul.msk.bf16.vlgmr.msra.gmra.mxu1 %vm1401_vm0, %v11233_v3  ;;  %v11235_v7 = vld [vmem:[%s11605_s2 + $0x328] sm:$0xff]  ;;  %v11138_v8 = vld [vmem:[%s11605_s2 + $0x20] sm:$0xff]  ;;  %v11236_v9 = vld [vmem:[%s11605_s2 + $0x330] sm:$0xff]  ;;  %4084 = vst.msk [vmem:[#allocation3 + $0x48] sm:$0xff] %vm2539_vm1, %v14134_v28 }
  0x2a   : > { %v11139_v10 = vld [vmem:[%s11605_s2 + $0x28] sm:$0xff]  ;;  %v11237_v11 = vld [vmem:[%s11605_s2 + $0x338] sm:$0xff]  ;;  %v11140_v12 = vld [vmem:[%s11605_s2 + $0x30] sm:$0xff]  ;;  %4085 = vst.msk [vmem:[#allocation3 + $0x50] sm:$0xff] %vm2539_vm1, %v14134_v28 }
  0x2b   : > { %v11238_v13 = vld [vmem:[%s11605_s2 + $0x340] sm:$0xff]  ;;  %v11141_v14 = vld [vmem:[%s11605_s2 + $0x38] sm:$0xff]  ;;  %v11239_v16 = vld [vmem:[%s11605_s2 + $0x348] sm:$0xff]  ;;  %4086 = vst.msk [vmem:[#allocation3 + $0x58] sm:$0xff] %vm2539_vm1, %v14134_v28 }
  0x2c   : > { %v11638_v15 = vld [vmem:[%s14153_s27] ss:$0 sm:$0xff]  ;;  %v11143_v24 = vld [vmem:[%s11605_s2 + $0x48] sm:$0xff]  ;;  %v11144_v32 = vld [vmem:[%s11605_s2 + $0x50] sm:$0xff]  ;;  %4087 = vst.msk [vmem:[#allocation3 + $0x60] sm:$0xff] %vm2539_vm1, %v14134_v28 }
  0x2d   : > { %v11142_v17 = vld [vmem:[%s11605_s2 + $0x40] sm:$0xff]  ;;  %4088 = vst.msk [vmem:[#allocation3 + $0x68] sm:$0xff] %vm2539_vm1, %v14134_v28  ;;  %v11240_v52 = vld [vmem:[%s11605_s2 + $0x350] sm:$0xff]  ;;  %v11145_v54 = vld [vmem:[%s11605_s2 + $0x58] sm:$0xff] }
  0x2e   : > { %4089 = vst.msk [vmem:[#allocation3 + $0x70] sm:$0xff] %vm2539_vm1, %v14134_v28  ;;  %v11241_v57 = vld [vmem:[%s11605_s2 + $0x358] sm:$0xff]  ;;  %v11146_v59 = vld [vmem:[%s11605_s2 + $0x60] sm:$0xff] }
  0x2f   : > { %4090 = vst.msk [vmem:[#allocation3 + $0x78] sm:$0xff] %vm2539_vm1, %v14134_v28 }
  0x30   : > { %4091 = vst.msk [vmem:[#allocation3 + $0x80] sm:$0xff] %vm2539_vm1, %v14134_v28 }
  0x31   : > { %4092 = vst.msk [vmem:[#allocation3 + $0x88] sm:$0xff] %vm2539_vm1, %v14134_v28 }
  0x32   : > { %4093 = vst.msk [vmem:[#allocation3 + $0x90] sm:$0xff] %vm2539_vm1, %v14134_v28 }
  0x33   : > { %4094 = vst.msk [vmem:[#allocation3 + $0x98] sm:$0xff] %vm2539_vm1, %v14134_v28 }
  0x34   : > { %4095 = vst.msk [vmem:[#allocation3 + $0xa0] sm:$0xff] %vm2539_vm1, %v14134_v28 }
  0x35   : > { %4096 = vst.msk [vmem:[#allocation3 + $0xa8] sm:$0xff] %vm2539_vm1, %v14134_v28 }
  0x36   : > { %4097 = vst.msk [vmem:[#allocation3 + $0xb0] sm:$0xff] %vm2539_vm1, %v14134_v28 }
  0x37   : > { %4098 = vst.msk [vmem:[#allocation3 + $0xb8] sm:$0xff] %vm2539_vm1, %v14134_v28 }
  0x38   : > { %4099 = vst.msk [vmem:[#allocation3 + $0xc0] sm:$0xff] %vm2539_vm1, %v14134_v28 }
  0x39   : > { %10276 = vmatmul.msk.bf16.gmra.mxu0 %vm1401_vm0, %v11135_v2  ;;  %10375 = vmatmul.msk.bf16.gmra.mxu1 %vm1401_vm0, %v11234_v5  ;;  %4100 = vst.msk [vmem:[#allocation3 + $0xc8] sm:$0xff] %vm2539_vm1, %v14134_v28 }
  0x3a   : > { %4101 = vst.msk [vmem:[#allocation3 + $0xd0] sm:$0xff] %vm2539_vm1, %v14134_v28 }
  0x3b   : > { %4102 = vst.msk [vmem:[#allocation3 + $0xd8] sm:$0xff] %vm2539_vm1, %v14134_v28 }
  0x3c   : > { %4103 = vst.msk [vmem:[#allocation3 + $0xe0] sm:$0xff] %vm2539_vm1, %v14134_v28 }
  0x3d   : > { %4104 = vst.msk [vmem:[#allocation3 + $0xe8] sm:$0xff] %vm2539_vm1, %v14134_v28 }
  0x3e   : > { %4105 = vst.msk [vmem:[#allocation3 + $0xf0] sm:$0xff] %vm2539_vm1, %v14134_v28 }
  0x3f   : > { %4106 = vst.msk [vmem:[#allocation3 + $0xf8] sm:$0xff] %vm2539_vm1, %v14134_v28 }
  0x40   : > { %4107 = vst.msk [vmem:[#allocation3 + $0x100] sm:$0xff] %vm2539_vm1, %v14134_v28 }
  0x41   : > { %4108 = vst.msk [vmem:[#allocation3 + $0x108] sm:$0xff] %vm2539_vm1, %v14134_v28 }
  0x42   : > { %4109 = vst.msk [vmem:[#allocation3 + $0x110] sm:$0xff] %vm2539_vm1, %v14134_v28 }
  0x43   : > { %4110 = vst.msk [vmem:[#allocation3 + $0x118] sm:$0xff] %vm2539_vm1, %v14134_v28 }
  0x44   : > { %4111 = vst.msk [vmem:[#allocation3 + $0x120] sm:$0xff] %vm2539_vm1, %v14134_v28 }
  0x45   : > { %4112 = vst.msk [vmem:[#allocation3 + $0x128] sm:$0xff] %vm2539_vm1, %v14134_v28 }
  0x46   : > { %4113 = vst.msk [vmem:[#allocation3 + $0x130] sm:$0xff] %vm2539_vm1, %v14134_v28 }
  0x47   : > { %4114 = vst.msk [vmem:[#allocation3 + $0x138] sm:$0xff] %vm2539_vm1, %v14134_v28 }
  0x48   : > { %4115 = vst.msk [vmem:[#allocation3 + $0x140] sm:$0xff] %vm2539_vm1, %v14134_v28 }
  0x49   : > { %10277 = vmatmul.msk.bf16.gmra.mxu0 %vm1401_vm0, %v11136_v4  ;;  %10376 = vmatmul.msk.bf16.gmra.mxu1 %vm1401_vm0, %v11235_v7  ;;  %4116 = vst.msk [vmem:[#allocation3 + $0x148] sm:$0xff] %vm2539_vm1, %v14134_v28 }
  0x4a   : > { %4117 = vst.msk [vmem:[#allocation3 + $0x150] sm:$0xff] %vm2539_vm1, %v14134_v28 }
  0x4b   : > { %4118 = vst.msk [vmem:[#allocation3 + $0x158] sm:$0xff] %vm2539_vm1, %v14134_v28 }
  0x4c   : > { %4119 = vst.msk [vmem:[#allocation3 + $0x160] sm:$0xff] %vm2539_vm1, %v14134_v28 }
  0x4d   : > { %4120 = vst.msk [vmem:[#allocation3 + $0x168] sm:$0xff] %vm2539_vm1, %v14134_v28 }
  0x4e   : > { %4121 = vst.msk [vmem:[#allocation3 + $0x170] sm:$0xff] %vm2539_vm1, %v14134_v28 }
  0x4f   : > { %4122 = vst.msk [vmem:[#allocation3 + $0x178] sm:$0xff] %vm2539_vm1, %v14134_v28 }
  0x50   : > { %4123 = vst.msk [vmem:[#allocation3 + $0x180] sm:$0xff] %vm2539_vm1, %v14134_v28 }
  0x51   : > { %4124 = vst.msk [vmem:[#allocation3 + $0x188] sm:$0xff] %vm2539_vm1, %v14134_v28 }
  0x52   : > { %4125 = vst.msk [vmem:[#allocation3 + $0x190] sm:$0xff] %vm2539_vm1, %v14134_v28 }
  0x53   : > { %4126 = vst.msk [vmem:[#allocation3 + $0x198] sm:$0xff] %vm2539_vm1, %v14134_v28 }
  0x54   : > { %4127 = vst.msk [vmem:[#allocation3 + $0x1a0] sm:$0xff] %vm2539_vm1, %v14134_v28 }
  0x55   : > { %4128 = vst.msk [vmem:[#allocation3 + $0x1a8] sm:$0xff] %vm2539_vm1, %v14134_v28 }
  0x56   : > { %4129 = vst.msk [vmem:[#allocation3 + $0x1b0] sm:$0xff] %vm2539_vm1, %v14134_v28 }
  0x57   : > { %4130 = vst.msk [vmem:[#allocation3 + $0x1b8] sm:$0xff] %vm2539_vm1, %v14134_v28 }
  0x58   : > { %4131 = vst.msk [vmem:[#allocation3 + $0x1c0] sm:$0xff] %vm2539_vm1, %v14134_v28 }
  0x59   : > { %10278 = vmatmul.msk.bf16.gmra.mxu0 %vm1401_vm0, %v11137_v6  ;;  %10377 = vmatmul.msk.bf16.gmra.mxu1 %vm1401_vm0, %v11236_v9  ;;  %4133 = vst.msk [vmem:[#allocation3 + $0x1c8] sm:$0x7] %vm4132_vm4, %v14134_v28 }
  0x69   : > { %10279 = vmatmul.msk.bf16.gmra.mxu0 %vm1401_vm0, %v11138_v8  ;;  %10378 = vmatmul.msk.bf16.gmra.mxu1 %vm1401_vm0, %v11237_v11  ;;  %v11242_v8 = vld [vmem:[%s11605_s2 + $0x360] sm:$0xff] }
  0x79   : > { %10280 = vmatmul.msk.bf16.gmra.mxu0 %vm1401_vm0, %v11139_v10  ;;  %10379 = vmatmul.msk.bf16.gmra.mxu1 %vm1401_vm0, %v11238_v13 }
  0x89   : > { %10281 = vmatmul.msk.bf16.gmra.mxu0 %vm1401_vm0, %v11140_v12  ;;  %10380 = vmatmul.msk.bf16.gmra.mxu1 %vm1401_vm0, %v11239_v16 }
  0x99   : > { %10282 = vmatmul.msk.bf16.gmra.mxu0 %vm1401_vm0, %v11141_v14  ;;  %10381 = vmatmul.msk.bf16.gmra.mxu1 %vm1401_vm0, %v11240_v52 }
  0xa6   : > { %v1750_v18 = vpop.f32.mrf.mxu0  ;;  %v2245_v56 = vpop.f32.mrf.mxu1 }
  0xa7   : > { %v1751_v19 = vadd.f32 %v11638_v15, %v1750_v18  ;;  %v2246_v1 = vadd.f32 %v11638_v15, %v2245_v56  ;;  %v11147_v18 = vld [vmem:[%s11605_s2 + $0x68] sm:$0xff] }
  0xa9   : > { %v2314_v20 = vmax.f32 %v1751_v19, 0.0  ;;  %10283 = vmatmul.msk.bf16.gmra.mxu0 %vm1401_vm0, %v11142_v17  ;;  %10382 = vmatmul.msk.bf16.gmra.mxu1 %vm1401_vm0, %v11241_v57  ;;  %v2512_v9 = vmax.f32 %v2246_v1, 0.0 }
  0xab   : > { %2540 = vst.msk [vmem:[#allocation2] sm:$0xff] %vm2539_vm1, %v2314_v20 }
  0xac   : > { %2738 = vst.msk [vmem:[#allocation2 + $0x630] sm:$0xff] %vm2539_vm1, %v2512_v9 }
  0xae   : > { %v1752_v21 = vpop.f32.mrf.mxu0  ;;  %v2247_v60 = vpop.f32.mrf.mxu1 }
  0xaf   : > { %v1753_v22 = vadd.f32 %v11638_v15, %v1752_v21  ;;  %v2248_v5 = vadd.f32 %v11638_v15, %v2247_v60 }
  0xb1   : > { %v2315_v23 = vmax.f32 %v1753_v22, 0.0  ;;  %v2513_v14 = vmax.f32 %v2248_v5, 0.0 }
  0xb3   : > { %2541 = vst.msk [vmem:[#allocation2 + $0x8] sm:$0xff] %vm2539_vm1, %v2315_v23 }
  0xb4   : > { %2739 = vst.msk [vmem:[#allocation2 + $0x638] sm:$0xff] %vm2539_vm1, %v2513_v14 }
  0xb6   : > { %v1755_v25 = vpop.f32.mrf.mxu0  ;;  %v2250_v10 = vpop.f32.mrf.mxu1 }
  0xb7   : > { %v1756_v26 = vadd.f32 %v11638_v15, %v1755_v25  ;;  %v2251_v12 = vadd.f32 %v11638_v15, %v2250_v10 }
  0xb9   : > { %v2316_v27 = vmax.f32 %v1756_v26, 0.0  ;;  %10284 = vmatmul.msk.bf16.gmra.mxu0 %vm1401_vm0, %v11143_v24  ;;  %10383 = vmatmul.msk.bf16.gmra.mxu1 %vm1401_vm0, %v11242_v8  ;;  %v2514_v19 = vmax.f32 %v2251_v12, 0.0 }
  0xbb   : > { %2542 = vst.msk [vmem:[#allocation2 + $0x10] sm:$0xff] %vm2539_vm1, %v2316_v27 }
  0xbc   : > { %2740 = vst.msk [vmem:[#allocation2 + $0x640] sm:$0xff] %vm2539_vm1, %v2514_v19 }
  0xbe   : > { %v1757_v29 = vpop.f32.mrf.mxu0  ;;  %v2252_v21 = vpop.f32.mrf.mxu1 }
  0xbf   : > { %v1758_v30 = vadd.f32 %v11638_v15, %v1757_v29  ;;  %v2253_v22 = vadd.f32 %v11638_v15, %v2252_v21 }
  0xc1   : > { %v2317_v31 = vmax.f32 %v1758_v30, 0.0  ;;  %v2515_v29 = vmax.f32 %v2253_v22, 0.0 }
  0xc3   : > { %2543 = vst.msk [vmem:[#allocation2 + $0x18] sm:$0xff] %vm2539_vm1, %v2317_v31 }
  0xc4   : > { %2741 = vst.msk [vmem:[#allocation2 + $0x648] sm:$0xff] %vm2539_vm1, %v2515_v29 }
  0xc6   : > { %v1760_v33 = vpop.f32.mrf.mxu0 }
  0xc7   : > { %v1761_v34 = vadd.f32 %v11638_v15, %v1760_v33 }
  0xc9   : > { %v2318_v35 = vmax.f32 %v1761_v34, 0.0  ;;  %10285 = vmatmul.msk.bf16.gmra.mxu0 %vm1401_vm0, %v11144_v32 }
  0xca   : > { %v2765_v36 = vld [vmem:[#allocation2] ss:$4 sm:$0xff]  ;;  %v2879_v37 = vld [vmem:[#allocation2 + $0x1] ss:$4 sm:$0xff]  ;;  %v3050_v39 = vld [vmem:[#allocation2 + $0x2] ss:$4 sm:$0xff] }
  0xcb   : > { %v2992_v38 = vmax.f32 %v2765_v36, %v2879_v37  ;;  %2544 = vst.msk [vmem:[#allocation2 + $0x20] sm:$0xff] %vm2539_vm1, %v2318_v35  ;;  %v3221_v42 = vld [vmem:[#allocation2 + $0x3] ss:$4 sm:$0xff]  ;;  %v2255_v37 = vpop.f32.mrf.mxu1 }
  0xcc   : > { %v11243_v36 = vld [vmem:[%s11605_s2 + $0x368] sm:$0xff] }
  0xcd   : > { %v3163_v40 = vmax.f32 %v2992_v38, %v3050_v39  ;;  %v2256_v39 = vadd.f32 %v11638_v15, %v2255_v37  ;;  %10384 = vmatmul.msk.bf16.gmra.mxu1 %vm1401_vm0, %v11243_v36  ;;  %v11245_v36 = vld [vmem:[%s11605_s2 + $0x378] sm:$0xff] }
  0xce   : > { %v1762_v41 = vpop.f32.mrf.mxu0 }
  0xcf   : > { %v3334_v43 = vmax.f32 %v3163_v40, %v3221_v42  ;;  %v1763_v61 = vadd.f32 %v11638_v15, %v1762_v41 }
  0xd1   : > { %v2319_v2 = vmax.f32 %v1763_v61, 0.0 }
  0xd2   : > { %v3392_v44 = vld [vmem:[#allocation2 + $0x4] ss:$4 sm:$0xff]  ;;  %v3563_v46 = vld [vmem:[#allocation2 + $0x5] ss:$4 sm:$0xff]  ;;  %v3734_v48 = vld [vmem:[#allocation2 + $0x6] ss:$4 sm:$0xff] }
  0xd3   : > { %v3505_v45 = vmax.f32 %v3334_v43, %v3392_v44  ;;  %v3905_v50 = vld [vmem:[#allocation2 + $0x7] ss:$4 sm:$0xff]  ;;  %2545 = vst.msk [vmem:[#allocation2 + $0x28] sm:$0xff] %vm2539_vm1, %v2319_v2  ;;  %v2516_v44 = vmax.f32 %v2256_v39, 0.0 }
  0xd4   : > { %v11244_v2 = vld [vmem:[%s11605_s2 + $0x370] sm:$0xff] }
  0xd5   : > { %v3676_v47 = vmax.f32 %v3505_v45, %v3563_v46  ;;  %v11148_v45 = vld [vmem:[%s11605_s2 + $0x70] sm:$0xff]  ;;  %2742 = vst.msk [vmem:[#allocation2 + $0x650] sm:$0xff] %vm2539_vm1, %v2516_v44 }
  0xd6   : > { %v1765_v53 = vpop.f32.mrf.mxu0 }
  0xd7   : > { %v3847_v49 = vmax.f32 %v3676_v47, %v3734_v48  ;;  %v1766_v63 = vadd.f32 %v11638_v15, %v1765_v53 }
  0xd9   : > { %v4018_v51 = vmax.f32 %v3847_v49, %v3905_v50  ;;  %10286 = vmatmul.msk.bf16.gmra.mxu0 %vm1401_vm0, %v11145_v54  ;;  %v2320_v4 = vmax.f32 %v1766_v63, 0.0 }
  0xdb   : > { %4134 = vst.msk [vmem:[#allocation3 + $0x5] sm:$0xff] %vm2539_vm1, %v4018_v51 }
  0xdc   : > { %2546 = vst.msk [vmem:[#allocation2 + $0x30] sm:$0xff] %vm2539_vm1, %v2320_v4 }
  0xdd   : > { %10385 = vmatmul.msk.bf16.gmra.mxu1 %vm1401_vm0, %v11244_v2 }
  0xde   : > { %v1767_v55 = vpop.f32.mrf.mxu0 }
  0xdf   : > { %v1768_v0 = vadd.f32 %v11638_v15, %v1767_v55  ;;  %v2257_v55 = vpop.f32.mrf.mxu1 }
  0xe0   : > { %v2258_v57 = vadd.f32 %v11638_v15, %v2257_v55 }
  0xe1   : > { %v2321_v6 = vmax.f32 %v1768_v0, 0.0 }
  0xe2   : > { %v2517_v60 = vmax.f32 %v2258_v57, 0.0 }
  0xe3   : > { %2547 = vst.msk [vmem:[#allocation2 + $0x38] sm:$0xff] %vm2539_vm1, %v2321_v6 }
  0xe4   : > { %2743 = vst.msk [vmem:[#allocation2 + $0x658] sm:$0xff] %vm2539_vm1, %v2517_v60  ;;  %v10417_v60 = vld [vmem:[%s14154_s22 + $0x8] sm:$0xf] }
  0xe6   : > { %v1770_v58 = vpop.f32.mrf.mxu0 }
  0xe7   : > { %v1771_v3 = vadd.f32 %v11638_v15, %v1770_v58  ;;  %v2260_v4 = vpop.f32.mrf.mxu1 }
  0xe8   : > { %v2261_v6 = vadd.f32 %v11638_v15, %v2260_v4 }
  0xe9   : > { %10287 = vmatmul.msk.bf16.gmra.mxu0 %vm1401_vm0, %v11146_v59  ;;  %v2322_v11 = vmax.f32 %v1771_v3, 0.0 }
  0xea   : > { %v2767_v24 = vld [vmem:[#allocation2 + $0x20] ss:$4 sm:$0xff]  ;;  %v2881_v25 = vld [vmem:[#allocation2 + $0x21] ss:$4 sm:$0xff]  ;;  %v3052_v30 = vld [vmem:[#allocation2 + $0x22] ss:$4 sm:$0xff] }
  0xeb   : > { %2548 = vst.msk [vmem:[#allocation2 + $0x40] sm:$0xff] %vm2539_vm1, %v2322_v11  ;;  %v2993_v27 = vmax.f32 %v2767_v24, %v2881_v25  ;;  %v3223_v33 = vld [vmem:[#allocation2 + $0x23] ss:$4 sm:$0xff]  ;;  %v2518_v12 = vmax.f32 %v2261_v6, 0.0  ;;  %v2865_v14 = vld [vmem:[#allocation2 + $0x640] ss:$4 sm:$0xff] }
  0xec   : > { %v3321_v21 = vld [vmem:[#allocation2 + $0x643] ss:$4 sm:$0xff] }
  0xed   : > { %v3164_v31 = vmax.f32 %v2993_v27, %v3052_v30  ;;  %2744 = vst.msk [vmem:[#allocation2 + $0x660] sm:$0xff] %vm2539_vm1, %v2518_v12  ;;  %10386 = vmatmul.msk.bf16.gmra.mxu1 %vm1401_vm0, %v11245_v36 }
  0xee   : > { %v1772_v62 = vpop.f32.mrf.mxu0 }
  0xef   : > { %v1773_v7 = vadd.f32 %v11638_v15, %v1772_v62  ;;  %v3335_v35 = vmax.f32 %v3164_v31, %v3223_v33 }
  0xf1   : > { %v2323_v17 = vmax.f32 %v1773_v7, 0.0 }
  0xf2   : > { %v3394_v34 = vld [vmem:[#allocation2 + $0x24] ss:$4 sm:$0xff]  ;;  %v3565_v41 = vld [vmem:[#allocation2 + $0x25] ss:$4 sm:$0xff]  ;;  %v3736_v46 = vld [vmem:[#allocation2 + $0x26] ss:$4 sm:$0xff] }
  0xf3   : > { %2549 = vst.msk [vmem:[#allocation2 + $0x48] sm:$0xff] %vm2539_vm1, %v2323_v17  ;;  %v3506_v38 = vmax.f32 %v3335_v35, %v3394_v34  ;;  %v3907_v49 = vld [vmem:[#allocation2 + $0x27] ss:$4 sm:$0xff]  ;;  %v3150_v17 = vld [vmem:[#allocation2 + $0x642] ss:$4 sm:$0xff] }
  0xf4   : > { %v3492_v30 = vld [vmem:[#allocation2 + $0x644] ss:$4 sm:$0xff]  ;;  %v3663_v31 = vld [vmem:[#allocation2 + $0x645] ss:$4 sm:$0xff]  ;;  %v3834_v34 = vld [vmem:[#allocation2 + $0x646] ss:$4 sm:$0xff] }
  0xf5   : > { %v3677_v43 = vmax.f32 %v3506_v38, %v3565_v41  ;;  %v4005_v37 = vld [vmem:[#allocation2 + $0x647] ss:$4 sm:$0xff] }
  0xf6   : > { %v1775_v13 = vpop.f32.mrf.mxu0 }
  0xf7   : > { %v1776_v16 = vadd.f32 %v11638_v15, %v1775_v13  ;;  %v3848_v48 = vmax.f32 %v3677_v43, %v3736_v46  ;;  %v11149_v13 = vld [vmem:[%s11605_s2 + $0x78] sm:$0xff] }
  0xf9   : > { %v2324_v20 = vmax.f32 %v1776_v16, 0.0  ;;  %10288 = vmatmul.msk.bf16.gmra.mxu0 %vm1401_vm0, %v11147_v18  ;;  %v4019_v52 = vmax.f32 %v3848_v48, %v3907_v49  ;;  %v2979_v16 = vld [vmem:[#allocation2 + $0x641] ss:$4 sm:$0xff] }
  0xfa   : > { %v3042_v19 = vmax.f32 %v2865_v14, %v2979_v16 }
  0xfb   : > { %2550 = vst.msk [vmem:[#allocation2 + $0x50] sm:$0xff] %vm2539_vm1, %v2324_v20 }
  0xfc   : > { %4135 = vst.msk [vmem:[#allocation3 + $0xd] sm:$0xff] %vm2539_vm1, %v4019_v52  ;;  %v3213_v22 = vmax.f32 %v3042_v19, %v3150_v17 }
  0xfe   : > { %v1777_v23 = vpop.f32.mrf.mxu0  ;;  %v3384_v24 = vmax.f32 %v3213_v22, %v3321_v21 }
  0xff   : > { %v1778_v26 = vadd.f32 %v11638_v15, %v1777_v23  ;;  %v2262_v23 = vpop.f32.mrf.mxu1 }
 0x100   : > { %v2263_v25 = vadd.f32 %v11638_v15, %v2262_v23 }
 0x101   : > { %v2325_v32 = vmax.f32 %v1778_v26, 0.0 }
 0x102   : > { %v2519_v29 = vmax.f32 %v2263_v25, 0.0 }
 0x103   : > { %2551 = vst.msk [vmem:[#allocation2 + $0x58] sm:$0xff] %vm2539_vm1, %v2325_v32  ;;  %v3555_v32 = vmax.f32 %v3384_v24, %v3492_v30 }
 0x104   : > { %2745 = vst.msk [vmem:[#allocation2 + $0x668] sm:$0xff] %vm2539_vm1, %v2519_v29 }
 0x105   : > { %v3726_v35 = vmax.f32 %v3555_v32, %v3663_v31 }
 0x106   : > { %v1780_v40 = vpop.f32.mrf.mxu0 }
 0x107   : > { %v1781_v42 = vadd.f32 %v11638_v15, %v1780_v40  ;;  %v2265_v38 = vpop.f32.mrf.mxu1  ;;  %v3897_v39 = vmax.f32 %v3726_v35, %v3834_v34 }
 0x108   : > { %v2266_v40 = vadd.f32 %v11638_v15, %v2265_v38  ;;  %v4584_v38 = vld [vmem:[#allocation3 + $0x2] ss:$2 sm:$0xff] }
 0x109   : > { %v2326_v47 = vmax.f32 %v1781_v42, 0.0  ;;  %10289 = vmatmul.msk.bf16.gmra.mxu0 %vm1401_vm0, %v11148_v45  ;;  %v4068_v43 = vmax.f32 %v3897_v39, %v4005_v37  ;;  %v11150_v45 = vld [vmem:[%s11605_s2 + $0x80] sm:$0xff]  ;;  %v4263_v37 = vld [vmem:[#allocation3 + $0x1] ss:$2 sm:$0xff] }
 0x10a   : > { %v2769_v50 = vld [vmem:[#allocation2 + $0x40] ss:$4 sm:$0xff]  ;;  %v2883_v51 = vld [vmem:[#allocation2 + $0x41] ss:$4 sm:$0xff]  ;;  %v3054_v54 = vld [vmem:[#allocation2 + $0x42] ss:$4 sm:$0xff] }
 0x10b   : > { %v2994_v53 = vmax.f32 %v2769_v50, %v2883_v51  ;;  %2552 = vst.msk [vmem:[#allocation2 + $0x60] sm:$0xff] %vm2539_vm1, %v2326_v47  ;;  %v3225_v61 = vld [vmem:[#allocation2 + $0x43] ss:$4 sm:$0xff]  ;;  %v2520_v44 = vmax.f32 %v2266_v40, 0.0 }
 0x10c   : > { %4184 = vst.msk [vmem:[#allocation3 + $0x195] sm:$0xff] %vm2539_vm1, %v4068_v43  ;;  %v825_v51 = vld [vmem:[%s11605_s2 + $0x380] sm:$0xf] }
 0x10d   : > { %v3165_v56 = vmax.f32 %v2994_v53, %v3054_v54  ;;  %2746 = vst.msk [vmem:[#allocation2 + $0x670] sm:$0xff] %vm2539_vm1, %v2520_v44 }
 0x10e   : > { %v1782_v58 = vpop.f32.mrf.mxu0 }
 0x10f   : > { %v1783_v59 = vadd.f32 %v11638_v15, %v1782_v58  ;;  %v3336_v63 = vmax.f32 %v3165_v56, %v3225_v61  ;;  %v2267_v50 = vpop.f32.mrf.mxu1  ;;  %v1281_v58 = vunpack.c.l.b16 %v825_v51 }
 0x110   : > { %v2268_v53 = vadd.f32 %v11638_v15, %v2267_v50 }
 0x111   : > { %v2327_v62 = vmax.f32 %v1783_v59, 0.0  ;;  %v10388_v59 = vld [vmem:[%s14154_s22 + $0x4] sm:$0xf] }
 0x112   : > { %v3396_v0 = vld [vmem:[#allocation2 + $0x44] ss:$4 sm:$0xff]  ;;  %v3567_v3 = vld [vmem:[#allocation2 + $0x45] ss:$4 sm:$0xff]  ;;  %v3738_v8 = vld [vmem:[#allocation2 + $0x46] ss:$4 sm:$0xff] }
 0x113   : > { %v3507_v1 = vmax.f32 %v3336_v63, %v3396_v0  ;;  %2553 = vst.msk [vmem:[#allocation2 + $0x68] sm:$0xff] %vm2539_vm1, %v2327_v62  ;;  %v3909_v11 = vld [vmem:[#allocation2 + $0x47] ss:$4 sm:$0xff]  ;;  %v2521_v57 = vmax.f32 %v2268_v53, 0.0  ;;  %v4378_v62 = vsel %vm4376_vm2, %v10388_v59, 0  ;;  %v4698_v63 = vsel %vm4376_vm2, %v10417_v60, 0 }
 0x114   : > { %4387 = vmatpush.bf16.msrb.mxu1 %v4378_v62  ;;  %4707 = vmatpush.bf16.msra.mxu3 %v4698_v63 }
 0x115   : > { %v3678_v5 = vmax.f32 %v3507_v1, %v3567_v3  ;;  %2747 = vst.msk [vmem:[#allocation2 + $0x678] sm:$0xff] %vm2539_vm1, %v2521_v57  ;;  %v1394_v3 = vpack.c.b16 %v1281_v58, %v1281_v58 }
 0x116   : > { %v1785_v7 = vpop.f32.mrf.mxu0 }
 0x117   : > { %v1786_v9 = vadd.f32 %v11638_v15, %v1785_v7  ;;  %v3849_v10 = vmax.f32 %v3678_v5, %v3738_v8  ;;  %v2270_v5 = vpop.f32.mrf.mxu1  ;;  %10387 = vmatmul.msk.bf16.gmra.mxu1 %vm1401_vm0, %v1394_v3 }
 0x118   : > { %v2271_v7 = vadd.f32 %v11638_v15, %v2270_v5 }
 0x119   : > { %v4020_v18 = vmax.f32 %v3849_v10, %v3909_v11  ;;  %v2328_v20 = vmax.f32 %v1786_v9, 0.0  ;;  %10290 = vmatmul.msk.bf16.gmra.mxu0 %vm1401_vm0, %v11149_v13  ;;  %v11151_v13 = vld [vmem:[%s11605_s2 + $0x88] sm:$0xff] }
 0x11a   : > { %v2522_v12 = vmax.f32 %v2271_v7, 0.0 }
 0x11b   : > { %4136 = vst.msk [vmem:[#allocation3 + $0x15] sm:$0xff] %vm2539_vm1, %v4020_v18 }
 0x11c   : > { %2554 = vst.msk [vmem:[#allocation2 + $0x70] sm:$0xff] %vm2539_vm1, %v2328_v20  ;;  %v2867_v16 = vld [vmem:[#allocation2 + $0x660] ss:$4 sm:$0xff]  ;;  %v2981_v17 = vld [vmem:[#allocation2 + $0x661] ss:$4 sm:$0xff] }
 0x11d   : > { %v3152_v18 = vld [vmem:[#allocation2 + $0x662] ss:$4 sm:$0xff]  ;;  %v3043_v20 = vmax.f32 %v2867_v16, %v2981_v17  ;;  %2748 = vst.msk [vmem:[#allocation2 + $0x680] sm:$0xff] %vm2539_vm1, %v2522_v12  ;;  %v3323_v23 = vld [vmem:[#allocation2 + $0x663] ss:$4 sm:$0xff] }
 0x11e   : > { %v1787_v26 = vpop.f32.mrf.mxu0 }
 0x11f   : > { %v1788_v27 = vadd.f32 %v11638_v15, %v1787_v26  ;;  %v3214_v24 = vmax.f32 %v3043_v20, %v3152_v18  ;;  %v2272_v25 = vpop.f32.mrf.mxu1 }
 0x121   : > { %v2329_v33 = vmax.f32 %v1788_v27, 0.0  ;;  %v3385_v26 = vmax.f32 %v3214_v24, %v3323_v23  ;;  %v2273_v27 = vadd.f32 %v11638_v15, %v2272_v25 }
 0x123   : > { %2555 = vst.msk [vmem:[#allocation2 + $0x78] sm:$0xff] %vm2539_vm1, %v2329_v33  ;;  %v2523_v31 = vmax.f32 %v2273_v27, 0.0 }
 0x124   : > { %v3494_v32 = vld [vmem:[#allocation2 + $0x664] ss:$4 sm:$0xff]  ;;  %v3665_v33 = vld [vmem:[#allocation2 + $0x665] ss:$4 sm:$0xff]  ;;  %v3836_v36 = vld [vmem:[#allocation2 + $0x666] ss:$4 sm:$0xff] }
 0x125   : > { %v3556_v34 = vmax.f32 %v3385_v26, %v3494_v32  ;;  %2749 = vst.msk [vmem:[#allocation2 + $0x688] sm:$0xff] %vm2539_vm1, %v2523_v31 }
 0x126   : > { %v1790_v41 = vpop.f32.mrf.mxu0 }
 0x127   : > { %v1791_v42 = vadd.f32 %v11638_v15, %v1790_v41  ;;  %v3727_v39 = vmax.f32 %v3556_v34, %v3665_v33  ;;  %v2275_v43 = vpop.f32.mrf.mxu1 }
 0x129   : > { %v2330_v46 = vmax.f32 %v1791_v42, 0.0  ;;  %10291 = vmatmul.msk.bf16.gmra.mxu0 %vm1401_vm0, %v11150_v45  ;;  %v4007_v42 = vld [vmem:[#allocation2 + $0x667] ss:$4 sm:$0xff] }
 0x12a   : > { %v2771_v47 = vld [vmem:[#allocation2 + $0x60] ss:$4 sm:$0xff]  ;;  %v2885_v48 = vld [vmem:[#allocation2 + $0x61] ss:$4 sm:$0xff]  ;;  %v3056_v52 = vld [vmem:[#allocation2 + $0x62] ss:$4 sm:$0xff] }
 0x12b   : > { %v2995_v49 = vmax.f32 %v2771_v47, %v2885_v48  ;;  %2556 = vst.msk [vmem:[#allocation2 + $0x80] sm:$0xff] %vm2539_vm1, %v2330_v46  ;;  %v3227_v0 = vld [vmem:[#allocation2 + $0x63] ss:$4 sm:$0xff]  ;;  %v3898_v46 = vmax.f32 %v3727_v39, %v3836_v36  ;;  %v2276_v47 = vadd.f32 %v11638_v15, %v2275_v43 }
 0x12d   : > { %v3166_v55 = vmax.f32 %v2995_v49, %v3056_v52  ;;  %v4069_v50 = vmax.f32 %v3898_v46, %v4007_v42  ;;  %v2524_v51 = vmax.f32 %v2276_v47, 0.0  ;;  %v11152_v52 = vld [vmem:[%s11605_s2 + $0x90] sm:$0xff] }
 0x12e   : > { %v1792_v54 = vpop.f32.mrf.mxu0 }
 0x12f   : > { %v1793_v56 = vadd.f32 %v11638_v15, %v1792_v54  ;;  %v3337_v1 = vmax.f32 %v3166_v55, %v3227_v0  ;;  %4185 = vst.msk [vmem:[#allocation3 + $0x19d] sm:$0xff] %vm2539_vm1, %v4069_v50  ;;  %v2277_v57 = vpop.f32.mrf.mxu1 }
 0x130   : > { %2750 = vst.msk [vmem:[#allocation2 + $0x690] sm:$0xff] %vm2539_vm1, %v2524_v51  ;;  %v2278_v59 = vadd.f32 %v11638_v15, %v2277_v57 }
 0x131   : > { %v2331_v61 = vmax.f32 %v1793_v56, 0.0 }
 0x132   : > { %v3398_v2 = vld [vmem:[#allocation2 + $0x64] ss:$4 sm:$0xff]  ;;  %v3569_v6 = vld [vmem:[#allocation2 + $0x65] ss:$4 sm:$0xff]  ;;  %v3740_v11 = vld [vmem:[#allocation2 + $0x66] ss:$4 sm:$0xff] }
 0x133   : > { %2557 = vst.msk [vmem:[#allocation2 + $0x88] sm:$0xff] %vm2539_vm1, %v2331_v61  ;;  %v3508_v4 = vmax.f32 %v3337_v1, %v3398_v2  ;;  %v3911_v19 = vld [vmem:[#allocation2 + $0x67] ss:$4 sm:$0xff]  ;;  %v2525_v63 = vmax.f32 %v2278_v59, 0.0 }
 0x135   : > { %v3679_v9 = vmax.f32 %v3508_v4, %v3569_v6  ;;  %2751 = vst.msk [vmem:[#allocation2 + $0x698] sm:$0xff] %vm2539_vm1, %v2525_v63 }
 0x136   : > { %v1795_v8 = vpop.f32.mrf.mxu0 }
 0x137   : > { %v1796_v10 = vadd.f32 %v11638_v15, %v1795_v8  ;;  %v3850_v14 = vmax.f32 %v3679_v9, %v3740_v11  ;;  %v2280_v5 = vpop.f32.mrf.mxu1 }
 0x138   : > { %v2281_v7 = vadd.f32 %v11638_v15, %v2280_v5  ;;  %v11155_v5 = vld [vmem:[%s11605_s2 + $0xa8] sm:$0xff] }
 0x139   : > { %v2332_v21 = vmax.f32 %v1796_v10, 0.0  ;;  %v4021_v22 = vmax.f32 %v3850_v14, %v3911_v19  ;;  %10292 = vmatmul.msk.bf16.gmra.mxu0 %vm1401_vm0, %v11151_v13  ;;  %v11153_v13 = vld [vmem:[%s11605_s2 + $0x98] sm:$0xff] }
 0x13a   : > { %v2526_v12 = vmax.f32 %v2281_v7, 0.0 }
 0x13b   : > { %2558 = vst.msk [vmem:[#allocation2 + $0x90] sm:$0xff] %vm2539_vm1, %v2332_v21 }
 0x13c   : > { %4137 = vst.msk [vmem:[#allocation3 + $0x1d] sm:$0xff] %vm2539_vm1, %v4021_v22  ;;  %v2869_v16 = vld [vmem:[#allocation2 + $0x680] ss:$4 sm:$0xff]  ;;  %v2983_v17 = vld [vmem:[#allocation2 + $0x681] ss:$4 sm:$0xff] }
 0x13d   : > { %v3154_v18 = vld [vmem:[#allocation2 + $0x682] ss:$4 sm:$0xff]  ;;  %v3044_v20 = vmax.f32 %v2869_v16, %v2983_v17  ;;  %2752 = vst.msk [vmem:[#allocation2 + $0x6a0] sm:$0xff] %vm2539_vm1, %v2526_v12  ;;  %v3325_v23 = vld [vmem:[#allocation2 + $0x683] ss:$4 sm:$0xff] }
 0x13e   : > { %v1797_v29 = vpop.f32.mrf.mxu0 }
 0x13f   : > { %v1798_v30 = vadd.f32 %v11638_v15, %v1797_v29  ;;  %v3215_v24 = vmax.f32 %v3044_v20, %v3154_v18  ;;  %v2282_v25 = vpop.f32.mrf.mxu1 }
 0x140   : > { %v2283_v27 = vadd.f32 %v11638_v15, %v2282_v25 }
 0x141   : > { %v2333_v35 = vmax.f32 %v1798_v30, 0.0  ;;  %v3386_v26 = vmax.f32 %v3215_v24, %v3325_v23 }
 0x142   : > { %v2527_v31 = vmax.f32 %v2283_v27, 0.0 }
 0x143   : > { %2559 = vst.msk [vmem:[#allocation2 + $0x98] sm:$0xff] %vm2539_vm1, %v2333_v35  ;;  %v4265_v40 = vld [vmem:[#allocation3 + $0x11] ss:$2 sm:$0xff]  ;;  %v4586_v41 = vld [vmem:[#allocation3 + $0x12] ss:$2 sm:$0xff] }
 0x144   : > { %v4318_v44 = vpack.c.bf16 %v4265_v40, %v4263_v37  ;;  %v4639_v45 = vpack.c.bf16 %v4586_v41, %v4584_v38  ;;  %v3496_v32 = vld [vmem:[#allocation2 + $0x684] ss:$4 sm:$0xff]  ;;  %v3667_v33 = vld [vmem:[#allocation2 + $0x685] ss:$4 sm:$0xff]  ;;  %2753 = vst.msk [vmem:[#allocation2 + $0x6a8] sm:$0xff] %vm2539_vm1, %v2527_v31 }
 0x145   : > { %v3557_v34 = vmax.f32 %v3386_v26, %v3496_v32  ;;  %v3838_v36 = vld [vmem:[#allocation2 + $0x686] ss:$4 sm:$0xff]  ;;  %v4009_v38 = vld [vmem:[#allocation2 + $0x687] ss:$4 sm:$0xff] }
 0x146   : > { %v1800_v48 = vpop.f32.mrf.mxu0  ;;  %10418 = vmatmul.msk.bf16.vlgmr.msra.gmra.mxu3 %vm2539_vm1, %v4639_v45  ;;  %10389 = vmatmul.msk.bf16.vlgmr.msrb.gmra.mxu1 %vm2539_vm1, %v4318_v44  ;;  %v11154_v44 = vld [vmem:[%s11605_s2 + $0xa0] sm:$0xff] }
 0x147   : > { %v1801_v49 = vadd.f32 %v11638_v15, %v1800_v48  ;;  %v3728_v37 = vmax.f32 %v3557_v34, %v3667_v33  ;;  %v2285_v39 = vpop.f32.mrf.mxu1 }
 0x148   : > { %v2286_v41 = vadd.f32 %v11638_v15, %v2285_v39 }
 0x149   : > { %v2334_v53 = vmax.f32 %v1801_v49, 0.0  ;;  %10293 = vmatmul.msk.bf16.gmra.mxu0 %vm1401_vm0, %v11152_v52  ;;  %v3899_v40 = vmax.f32 %v3728_v37, %v3838_v36 }
 0x14a   : > { %v2773_v54 = vld [vmem:[#allocation2 + $0x80] ss:$4 sm:$0xff]  ;;  %v2887_v55 = vld [vmem:[#allocation2 + $0x81] ss:$4 sm:$0xff]  ;;  %v3058_v58 = vld [vmem:[#allocation2 + $0x82] ss:$4 sm:$0xff] }
 0x14b   : > { %v2996_v56 = vmax.f32 %v2773_v54, %v2887_v55  ;;  %2560 = vst.msk [vmem:[#allocation2 + $0xa0] sm:$0xff] %vm2539_vm1, %v2334_v53  ;;  %v3229_v1 = vld [vmem:[#allocation2 + $0x83] ss:$4 sm:$0xff]  ;;  %v4070_v42 = vmax.f32 %v3899_v40, %v4009_v38  ;;  %v2528_v43 = vmax.f32 %v2286_v41, 0.0 }
 0x14c   : > { %v11156_v38 = vld [vmem:[%s11605_s2 + $0xb0] sm:$0xff] }
 0x14d   : > { %v3167_v61 = vmax.f32 %v2996_v56, %v3058_v58  ;;  %4186 = vst.msk [vmem:[#allocation3 + $0x1a5] sm:$0xff] %vm2539_vm1, %v4070_v42 }
 0x14e   : > { %v1802_v60 = vpop.f32.mrf.mxu0  ;;  %2754 = vst.msk [vmem:[#allocation2 + $0x6b0] sm:$0xff] %vm2539_vm1, %v2528_v43 }
 0x14f   : > { %v1803_v62 = vadd.f32 %v11638_v15, %v1802_v60  ;;  %v3338_v2 = vmax.f32 %v3167_v61, %v3229_v1  ;;  %v2287_v51 = vpop.f32.mrf.mxu1 }
 0x150   : > { %v2288_v52 = vadd.f32 %v11638_v15, %v2287_v51 }
 0x151   : > { %v2335_v0 = vmax.f32 %v1803_v62, 0.0 }
 0x152   : > { %v3400_v3 = vld [vmem:[#allocation2 + $0x84] ss:$4 sm:$0xff]  ;;  %v3571_v6 = vld [vmem:[#allocation2 + $0x85] ss:$4 sm:$0xff]  ;;  %v3742_v11 = vld [vmem:[#allocation2 + $0x86] ss:$4 sm:$0xff] }
 0x153   : > { %2561 = vst.msk [vmem:[#allocation2 + $0xa8] sm:$0xff] %vm2539_vm1, %v2335_v0  ;;  %v3509_v4 = vmax.f32 %v3338_v2, %v3400_v3  ;;  %v3913_v19 = vld [vmem:[#allocation2 + $0x87] ss:$4 sm:$0xff]  ;;  %v2529_v55 = vmax.f32 %v2288_v52, 0.0 }
 0x155   : > { %v3680_v9 = vmax.f32 %v3509_v4, %v3571_v6  ;;  %2755 = vst.msk [vmem:[#allocation2 + $0x6b8] sm:$0xff] %vm2539_vm1, %v2529_v55 }
 0x156   : > { %v1805_v8 = vpop.f32.mrf.mxu0 }
 0x157   : > { %v1806_v10 = vadd.f32 %v11638_v15, %v1805_v8  ;;  %v3851_v14 = vmax.f32 %v3680_v9, %v3742_v11  ;;  %v2290_v62 = vpop.f32.mrf.mxu1 }
 0x158   : > { %v2291_v0 = vadd.f32 %v11638_v15, %v2290_v62 }
 0x159   : > { %v2336_v21 = vmax.f32 %v1806_v10, 0.0  ;;  %v4022_v22 = vmax.f32 %v3851_v14, %v3913_v19  ;;  %10294 = vmatmul.msk.bf16.gmra.mxu0 %vm1401_vm0, %v11153_v13 }
 0x15a   : > { %v2530_v4 = vmax.f32 %v2291_v0, 0.0 }
 0x15b   : > { %2562 = vst.msk [vmem:[#allocation2 + $0xb0] sm:$0xff] %vm2539_vm1, %v2336_v21 }
 0x15c   : > { %4138 = vst.msk [vmem:[#allocation3 + $0x25] sm:$0xff] %vm2539_vm1, %v4022_v22  ;;  %v2871_v6 = vld [vmem:[#allocation2 + $0x6a0] ss:$4 sm:$0xff]  ;;  %v2985_v7 = vld [vmem:[#allocation2 + $0x6a1] ss:$4 sm:$0xff] }
 0x15d   : > { %v3156_v8 = vld [vmem:[#allocation2 + $0x6a2] ss:$4 sm:$0xff]  ;;  %v3045_v11 = vmax.f32 %v2871_v6, %v2985_v7  ;;  %2756 = vst.msk [vmem:[#allocation2 + $0x6c0] sm:$0xff] %vm2539_vm1, %v2530_v4  ;;  %v3327_v14 = vld [vmem:[#allocation2 + $0x6a3] ss:$4 sm:$0xff] }
 0x15e   : > { %v1807_v29 = vpop.f32.mrf.mxu0  ;;  %v11930_v6 = vld [vmem:[%s14153_s27] ss:$0 sm:$0xff] }
 0x15f   : > { %v1808_v30 = vadd.f32 %v11638_v15, %v1807_v29  ;;  %v3216_v17 = vmax.f32 %v3045_v11, %v3156_v8  ;;  %v2292_v19 = vpop.f32.mrf.mxu1 }
 0x160   : > { %v2293_v21 = vadd.f32 %v11638_v15, %v2292_v19 }
 0x161   : > { %v2337_v35 = vmax.f32 %v1808_v30, 0.0  ;;  %v3387_v20 = vmax.f32 %v3216_v17, %v3327_v14 }
 0x162   : > { %v2531_v22 = vmax.f32 %v2293_v21, 0.0 }
 0x163   : > { %2563 = vst.msk [vmem:[#allocation2 + $0xb8] sm:$0xff] %vm2539_vm1, %v2337_v35 }
 0x164   : > { %v3498_v23 = vld [vmem:[#allocation2 + $0x6a4] ss:$4 sm:$0xff]  ;;  %v3669_v24 = vld [vmem:[#allocation2 + $0x6a5] ss:$4 sm:$0xff]  ;;  %2757 = vst.msk [vmem:[#allocation2 + $0x6c8] sm:$0xff] %vm2539_vm1, %v2531_v22 }
 0x165   : > { %v3558_v26 = vmax.f32 %v3387_v20, %v3498_v23  ;;  %v3840_v29 = vld [vmem:[#allocation2 + $0x6a6] ss:$4 sm:$0xff]  ;;  %v4011_v32 = vld [vmem:[#allocation2 + $0x6a7] ss:$4 sm:$0xff] }
 0x166   : > { %v1810_v45 = vpop.f32.mrf.mxu0 }
 0x167   : > { %v1811_v46 = vadd.f32 %v11638_v15, %v1810_v45  ;;  %v3729_v30 = vmax.f32 %v3558_v26, %v3669_v24  ;;  %v2295_v33 = vpop.f32.mrf.mxu1 }
 0x168   : > { %v2296_v35 = vadd.f32 %v11638_v15, %v2295_v33 }
 0x169   : > { %v2338_v50 = vmax.f32 %v1811_v46, 0.0  ;;  %10295 = vmatmul.msk.bf16.gmra.mxu0 %vm1401_vm0, %v11154_v44  ;;  %v3900_v34 = vmax.f32 %v3729_v30, %v3840_v29 }
 0x16a   : > { %v2775_v47 = vld [vmem:[#allocation2 + $0xa0] ss:$4 sm:$0xff]  ;;  %v2889_v48 = vld [vmem:[#allocation2 + $0xa1] ss:$4 sm:$0xff]  ;;  %v3060_v53 = vld [vmem:[#allocation2 + $0xa2] ss:$4 sm:$0xff] }
 0x16b   : > { %v2997_v49 = vmax.f32 %v2775_v47, %v2889_v48  ;;  %2564 = vst.msk [vmem:[#allocation2 + $0xc0] sm:$0xff] %vm2539_vm1, %v2338_v50  ;;  %v3231_v58 = vld [vmem:[#allocation2 + $0xa3] ss:$4 sm:$0xff]  ;;  %v4071_v36 = vmax.f32 %v3900_v34, %v4011_v32  ;;  %v2532_v37 = vmax.f32 %v2296_v35, 0.0 }
 0x16c   : > { %v11158_v32 = vld [vmem:[%s11605_s2 + $0xc0] sm:$0xff] }
 0x16d   : > { %v3168_v54 = vmax.f32 %v2997_v49, %v3060_v53  ;;  %4187 = vst.msk [vmem:[#allocation3 + $0x1ad] sm:$0xff] %vm2539_vm1, %v4071_v36 }
 0x16e   : > { %v1812_v56 = vpop.f32.mrf.mxu0  ;;  %2758 = vst.msk [vmem:[#allocation2 + $0x6d0] sm:$0xff] %vm2539_vm1, %v2532_v37 }
 0x16f   : > { %v1813_v57 = vadd.f32 %v11638_v15, %v1812_v56  ;;  %v3339_v59 = vmax.f32 %v3168_v54, %v3231_v58  ;;  %v2297_v44 = vpop.f32.mrf.mxu1 }
 0x170   : > { %v2298_v46 = vadd.f32 %v11638_v15, %v2297_v44 }
 0x171   : > { %v2339_v60 = vmax.f32 %v1813_v57, 0.0 }
 0x172   : > { %v3402_v61 = vld [vmem:[#allocation2 + $0xa4] ss:$4 sm:$0xff]  ;;  %v3573_v1 = vld [vmem:[#allocation2 + $0xa5] ss:$4 sm:$0xff]  ;;  %v3744_v3 = vld [vmem:[#allocation2 + $0xa6] ss:$4 sm:$0xff] }
 0x173   : > { %v3510_v63 = vmax.f32 %v3339_v59, %v3402_v61  ;;  %2565 = vst.msk [vmem:[#allocation2 + $0xc8] sm:$0xff] %vm2539_vm1, %v2339_v60  ;;  %v3915_v13 = vld [vmem:[#allocation2 + $0xa7] ss:$4 sm:$0xff]  ;;  %v2533_v49 = vmax.f32 %v2298_v46, 0.0 }
 0x175   : > { %v3681_v2 = vmax.f32 %v3510_v63, %v3573_v1  ;;  %2759 = vst.msk [vmem:[#allocation2 + $0x6d8] sm:$0xff] %vm2539_vm1, %v2533_v49  ;;  %v11157_v63 = vld [vmem:[%s11605_s2 + $0xb8] sm:$0xff] }
 0x176   : > { %v1815_v9 = vpop.f32.mrf.mxu0 }
 0x177   : > { %v3852_v10 = vmax.f32 %v3681_v2, %v3744_v3  ;;  %v1816_v12 = vadd.f32 %v11638_v15, %v1815_v9  ;;  %v2300_v56 = vpop.f32.mrf.mxu1 }
 0x178   : > { %v2301_v58 = vadd.f32 %v11638_v15, %v2300_v56 }
 0x179   : > { %v4023_v16 = vmax.f32 %v3852_v10, %v3915_v13  ;;  %v2340_v18 = vmax.f32 %v1816_v12, 0.0  ;;  %10296 = vmatmul.msk.bf16.gmra.mxu0 %vm1401_vm0, %v11155_v5 }
 0x17a   : > { %v2534_v62 = vmax.f32 %v2301_v58, 0.0 }
 0x17b   : > { %4139 = vst.msk [vmem:[#allocation3 + $0x2d] sm:$0xff] %vm2539_vm1, %v4023_v16 }
 0x17c   : > { %2566 = vst.msk [vmem:[#allocation2 + $0xd0] sm:$0xff] %vm2539_vm1, %v2340_v18  ;;  %v2873_v0 = vld [vmem:[#allocation2 + $0x6c0] ss:$4 sm:$0xff]  ;;  %v2987_v1 = vld [vmem:[#allocation2 + $0x6c1] ss:$4 sm:$0xff] }
 0x17d   : > { %v3158_v2 = vld [vmem:[#allocation2 + $0x6c2] ss:$4 sm:$0xff]  ;;  %v3046_v5 = vmax.f32 %v2873_v0, %v2987_v1  ;;  %2760 = vst.msk [vmem:[#allocation2 + $0x6e0] sm:$0xff] %vm2539_vm1, %v2534_v62  ;;  %v3329_v8 = vld [vmem:[#allocation2 + $0x6c3] ss:$4 sm:$0xff] }
 0x17e   : > { %v1817_v25 = vpop.f32.mrf.mxu0 }
 0x17f   : > { %v1818_v27 = vadd.f32 %v11638_v15, %v1817_v25  ;;  %v3217_v10 = vmax.f32 %v3046_v5, %v3158_v2  ;;  %v2302_v12 = vpop.f32.mrf.mxu1 }
 0x180   : > { %v2303_v14 = vadd.f32 %v11930_v6, %v2302_v12 }
 0x181   : > { %v2341_v31 = vmax.f32 %v1818_v27, 0.0  ;;  %v3388_v13 = vmax.f32 %v3217_v10, %v3329_v8 }
 0x182   : > { %v2535_v16 = vmax.f32 %v2303_v14, 0.0 }
 0x183   : > { %2567 = vst.msk [vmem:[#allocation2 + $0xd8] sm:$0xff] %vm2539_vm1, %v2341_v31 }
 0x184   : > { %v3500_v17 = vld [vmem:[#allocation2 + $0x6c4] ss:$4 sm:$0xff]  ;;  %v3671_v18 = vld [vmem:[#allocation2 + $0x6c5] ss:$4 sm:$0xff]  ;;  %2761 = vst.msk [vmem:[#allocation2 + $0x6e8] sm:$0xff] %vm2539_vm1, %v2535_v16 }
 0x185   : > { %v3559_v20 = vmax.f32 %v3388_v13, %v3500_v17  ;;  %v3842_v22 = vld [vmem:[#allocation2 + $0x6c6] ss:$4 sm:$0xff]  ;;  %v4013_v25 = vld [vmem:[#allocation2 + $0x6c7] ss:$4 sm:$0xff] }
 0x186   : > { %v1820_v39 = vpop.f32.mrf.mxu0  ;;  %v4267_v17 = vld [vmem:[#allocation3 + $0x21] ss:$2 sm:$0xff] }
 0x187   : > { %v1821_v40 = vadd.f32 %v11638_v15, %v1820_v39  ;;  %v3730_v23 = vmax.f32 %v3559_v20, %v3671_v18  ;;  %v2305_v26 = vpop.f32.mrf.mxu1  ;;  %v4588_v18 = vld [vmem:[#allocation3 + $0x22] ss:$2 sm:$0xff] }
 0x188   : > { %v2306_v29 = vadd.f32 %v11930_v6, %v2305_v26 }
 0x189   : > { %v2342_v41 = vmax.f32 %v1821_v40, 0.0  ;;  %10297 = vmatmul.msk.bf16.gmra.mxu0 %vm1401_vm0, %v11156_v38  ;;  %v3901_v27 = vmax.f32 %v3730_v23, %v3842_v22 }
 0x18a   : > { %v2777_v42 = vld [vmem:[#allocation2 + $0xc0] ss:$4 sm:$0xff]  ;;  %v2891_v43 = vld [vmem:[#allocation2 + $0xc1] ss:$4 sm:$0xff]  ;;  %v3062_v47 = vld [vmem:[#allocation2 + $0xc2] ss:$4 sm:$0xff] }
 0x18b   : > { %v2998_v45 = vmax.f32 %v2777_v42, %v2891_v43  ;;  %2568 = vst.msk [vmem:[#allocation2 + $0xe0] sm:$0xff] %vm2539_vm1, %v2342_v41  ;;  %v3233_v52 = vld [vmem:[#allocation2 + $0xc3] ss:$4 sm:$0xff]  ;;  %v4072_v30 = vmax.f32 %v3901_v27, %v4013_v25  ;;  %v2536_v31 = vmax.f32 %v2306_v29, 0.0 }
 0x18c   : > { %v11160_v25 = vld [vmem:[%s11605_s2 + $0xd0] sm:$0xff] }
 0x18d   : > { %v3169_v48 = vmax.f32 %v2998_v45, %v3062_v47  ;;  %4188 = vst.msk [vmem:[#allocation3 + $0x1b5] sm:$0xff] %vm2539_vm1, %v4072_v30 }
 0x18e   : > { %v1822_v50 = vpop.f32.mrf.mxu0  ;;  %2762 = vst.msk [vmem:[#allocation2 + $0x6f0] sm:$0xff] %vm2539_vm1, %v2536_v31 }
 0x18f   : > { %v1823_v51 = vadd.f32 %v11638_v15, %v1822_v50  ;;  %v3340_v53 = vmax.f32 %v3169_v48, %v3233_v52  ;;  %v2307_v38 = vpop.f32.mrf.mxu1 }
 0x190   : > { %v2308_v40 = vadd.f32 %v11930_v6, %v2307_v38 }
 0x191   : > { %v2343_v54 = vmax.f32 %v1823_v51, 0.0 }
 0x192   : > { %v3404_v55 = vld [vmem:[#allocation2 + $0xc4] ss:$4 sm:$0xff]  ;;  %v3575_v59 = vld [vmem:[#allocation2 + $0xc5] ss:$4 sm:$0xff]  ;;  %v3746_v61 = vld [vmem:[#allocation2 + $0xc6] ss:$4 sm:$0xff] }
 0x193   : > { %v3511_v57 = vmax.f32 %v3340_v53, %v3404_v55  ;;  %2569 = vst.msk [vmem:[#allocation2 + $0xe8] sm:$0xff] %vm2539_vm1, %v2343_v54  ;;  %v3917_v7 = vld [vmem:[#allocation2 + $0xc7] ss:$4 sm:$0xff]  ;;  %v2537_v43 = vmax.f32 %v2308_v40, 0.0 }
 0x195   : > { %v3682_v60 = vmax.f32 %v3511_v57, %v3575_v59  ;;  %2763 = vst.msk [vmem:[#allocation2 + $0x6f8] sm:$0xff] %vm2539_vm1, %v2537_v43  ;;  %v11159_v57 = vld [vmem:[%s11605_s2 + $0xc8] sm:$0xff] }
 0x196   : > { %v1825_v3 = vpop.f32.mrf.mxu0 }
 0x197   : > { %v3853_v4 = vmax.f32 %v3682_v60, %v3746_v61  ;;  %v1826_v15 = vadd.f32 %v11930_v6, %v1825_v3  ;;  %v2310_v50 = vpop.f32.mrf.mxu1 }
 0x198   : > { %v2311_v52 = vadd.f32 %v11930_v6, %v2310_v50 }
 0x199   : > { %v4024_v9 = vmax.f32 %v3853_v4, %v3917_v7  ;;  %v2344_v11 = vmax.f32 %v1826_v15, 0.0  ;;  %10298 = vmatmul.msk.bf16.gmra.mxu0 %vm1401_vm0, %v11157_v63 }
 0x19a   : > { %v2538_v56 = vmax.f32 %v2311_v52, 0.0 }
 0x19b   : > { %4140 = vst.msk [vmem:[#allocation3 + $0x35] sm:$0xff] %vm2539_vm1, %v4024_v9 }
 0x19c   : > { %2570 = vst.msk [vmem:[#allocation2 + $0xf0] sm:$0xff] %vm2539_vm1, %v2344_v11  ;;  %v2875_v58 = vld [vmem:[#allocation2 + $0x6e0] ss:$4 sm:$0xff]  ;;  %v2989_v59 = vld [vmem:[#allocation2 + $0x6e1] ss:$4 sm:$0xff] }
 0x19d   : > { %v3160_v60 = vld [vmem:[#allocation2 + $0x6e2] ss:$4 sm:$0xff]  ;;  %v3047_v63 = vmax.f32 %v2875_v58, %v2989_v59  ;;  %2764 = vst.msk [vmem:[#allocation2 + $0x700] sm:$0xff] %vm2539_vm1, %v2538_v56  ;;  %v3331_v5 = vld [vmem:[#allocation2 + $0x6e3] ss:$4 sm:$0xff] }
 0x19e   : > { %v1827_v19 = vpop.f32.mrf.mxu0  ;;  %v11162_v56 = vld [vmem:[%s11605_s2 + $0xe0] sm:$0xff] }
 0x19f   : > { %v1828_v21 = vadd.f32 %v11930_v6, %v1827_v19  ;;  %v3218_v3 = vmax.f32 %v3047_v63, %v3160_v60  ;;  %v2312_v15 = vpop.f32.mrf.mxu1 }
 0x1a1   : > { %v2345_v24 = vmax.f32 %v1828_v21, 0.0  ;;  %v3389_v7 = vmax.f32 %v3218_v3, %v3331_v5 }
 0x1a3   : > { %2571 = vst.msk [vmem:[#allocation2 + $0xf8] sm:$0xff] %vm2539_vm1, %v2345_v24 }
 0x1a4   : > { %v3502_v10 = vld [vmem:[#allocation2 + $0x6e4] ss:$4 sm:$0xff]  ;;  %v3673_v12 = vld [vmem:[#allocation2 + $0x6e5] ss:$4 sm:$0xff]  ;;  %v3844_v14 = vld [vmem:[#allocation2 + $0x6e6] ss:$4 sm:$0xff] }
 0x1a5   : > { %v3560_v11 = vmax.f32 %v3389_v7, %v3502_v10  ;;  %v4015_v19 = vld [vmem:[#allocation2 + $0x6e7] ss:$4 sm:$0xff] }
 0x1a6   : > { %v1830_v33 = vpop.f32.mrf.mxu0  ;;  %v11163_v10 = vld [vmem:[%s11605_s2 + $0xe8] sm:$0xff] }
 0x1a7   : > { %v1831_v34 = vadd.f32 %v11930_v6, %v1830_v33  ;;  %v3731_v16 = vmax.f32 %v3560_v11, %v3673_v12 }
 0x1a9   : > { %v2346_v35 = vmax.f32 %v1831_v34, 0.0  ;;  %10299 = vmatmul.msk.bf16.gmra.mxu0 %vm1401_vm0, %v11158_v32  ;;  %v3902_v22 = vmax.f32 %v3731_v16, %v3844_v14 }
 0x1aa   : > { %v2779_v36 = vld [vmem:[#allocation2 + $0xe0] ss:$4 sm:$0xff]  ;;  %v2893_v37 = vld [vmem:[#allocation2 + $0xe1] ss:$4 sm:$0xff]  ;;  %v3064_v41 = vld [vmem:[#allocation2 + $0xe2] ss:$4 sm:$0xff] }
 0x1ab   : > { %v2999_v39 = vmax.f32 %v2779_v36, %v2893_v37  ;;  %2572 = vst.msk [vmem:[#allocation2 + $0x100] sm:$0xff] %vm2539_vm1, %v2346_v35  ;;  %v3235_v46 = vld [vmem:[#allocation2 + $0xe3] ss:$4 sm:$0xff]  ;;  %v4073_v27 = vmax.f32 %v3902_v22, %v4015_v19 }
 0x1ac   : > { %v11164_v22 = vld [vmem:[%s11605_s2 + $0xf0] sm:$0xff] }
 0x1ad   : > { %v3170_v42 = vmax.f32 %v2999_v39, %v3064_v41  ;;  %4189 = vst.msk [vmem:[#allocation3 + $0x1bd] sm:$0xff] %vm2539_vm1, %v4073_v27 }
 0x1ae   : > { %v1832_v44 = vpop.f32.mrf.mxu0 }
 0x1af   : > { %v1833_v45 = vadd.f32 %v11930_v6, %v1832_v44  ;;  %v3341_v47 = vmax.f32 %v3170_v42, %v3235_v46 }
 0x1b1   : > { %v2347_v48 = vmax.f32 %v1833_v45, 0.0  ;;  %v11161_v45 = vld [vmem:[%s11605_s2 + $0xd8] sm:$0xff] }
 0x1b2   : > { %v3406_v49 = vld [vmem:[#allocation2 + $0xe4] ss:$4 sm:$0xff]  ;;  %v3577_v53 = vld [vmem:[#allocation2 + $0xe5] ss:$4 sm:$0xff]  ;;  %v3748_v55 = vld [vmem:[#allocation2 + $0xe6] ss:$4 sm:$0xff] }
 0x1b3   : > { %v3512_v51 = vmax.f32 %v3341_v47, %v3406_v49  ;;  %2573 = vst.msk [vmem:[#allocation2 + $0x108] sm:$0xff] %vm2539_vm1, %v2347_v48  ;;  %v3919_v1 = vld [vmem:[#allocation2 + $0xe7] ss:$4 sm:$0xff] }
 0x1b5   : > { %v3683_v54 = vmax.f32 %v3512_v51, %v3577_v53 }
 0x1b6   : > { %v1835_v61 = vpop.f32.mrf.mxu0 }
 0x1b7   : > { %v3854_v62 = vmax.f32 %v3683_v54, %v3748_v55  ;;  %v1836_v0 = vadd.f32 %v11930_v6, %v1835_v61 }
 0x1b9   : > { %v4025_v2 = vmax.f32 %v3854_v62, %v3919_v1  ;;  %v2348_v4 = vmax.f32 %v1836_v0, 0.0  ;;  %10300 = vmatmul.msk.bf16.gmra.mxu0 %vm1401_vm0, %v11159_v57 }
 0x1bb   : > { %4141 = vst.msk [vmem:[#allocation3 + $0x3d] sm:$0xff] %vm2539_vm1, %v4025_v2 }
 0x1bc   : > { %2574 = vst.msk [vmem:[#allocation2 + $0x110] sm:$0xff] %vm2539_vm1, %v2348_v4 }
 0x1be   : > { %v1837_v8 = vpop.f32.mrf.mxu0 }
 0x1bf   : > { %v1838_v9 = vadd.f32 %v11930_v6, %v1837_v8 }
 0x1c1   : > { %v2349_v13 = vmax.f32 %v1838_v9, 0.0 }
 0x1c2   : > { %v4269_v20 = vld [vmem:[#allocation3 + $0x31] ss:$2 sm:$0xff]  ;;  %v4590_v21 = vld [vmem:[#allocation3 + $0x32] ss:$2 sm:$0xff] }
 0x1c3   : > { %2575 = vst.msk [vmem:[#allocation2 + $0x118] sm:$0xff] %vm2539_vm1, %v2349_v13  ;;  %v4319_v23 = vpack.c.bf16 %v4269_v20, %v4267_v17  ;;  %v4640_v24 = vpack.c.bf16 %v4590_v21, %v4588_v18 }
 0x1c5   : > { %10390 = vmatmul.msk.bf16.gmra.mxu1 %vm2539_vm1, %v4319_v23  ;;  %10419 = vmatmul.msk.bf16.gmra.mxu3 %vm2539_vm1, %v4640_v24 }
 0x1c6   : > { %v1840_v26 = vpop.f32.mrf.mxu0 }
 0x1c7   : > { %v1841_v29 = vadd.f32 %v11930_v6, %v1840_v26 }
 0x1c9   : > { %v2350_v30 = vmax.f32 %v1841_v29, 0.0  ;;  %10301 = vmatmul.msk.bf16.gmra.mxu0 %vm1401_vm0, %v11160_v25 }
 0x1ca   : > { %v2781_v31 = vld [vmem:[#allocation2 + $0x100] ss:$4 sm:$0xff]  ;;  %v2895_v32 = vld [vmem:[#allocation2 + $0x101] ss:$4 sm:$0xff]  ;;  %v3066_v34 = vld [vmem:[#allocation2 + $0x102] ss:$4 sm:$0xff] }
 0x1cb   : > { %v3000_v33 = vmax.f32 %v2781_v31, %v2895_v32  ;;  %2576 = vst.msk [vmem:[#allocation2 + $0x120] sm:$0xff] %vm2539_vm1, %v2350_v30  ;;  %v3237_v38 = vld [vmem:[#allocation2 + $0x103] ss:$4 sm:$0xff] }
 0x1cd   : > { %v3171_v35 = vmax.f32 %v3000_v33, %v3066_v34 }
 0x1ce   : > { %v1842_v36 = vpop.f32.mrf.mxu0 }
 0x1cf   : > { %v1843_v37 = vadd.f32 %v11930_v6, %v1842_v36  ;;  %v3342_v39 = vmax.f32 %v3171_v35, %v3237_v38 }
 0x1d1   : > { %v2351_v40 = vmax.f32 %v1843_v37, 0.0 }
 0x1d2   : > { %v3408_v41 = vld [vmem:[#allocation2 + $0x104] ss:$4 sm:$0xff]  ;;  %v3579_v43 = vld [vmem:[#allocation2 + $0x105] ss:$4 sm:$0xff]  ;;  %v3750_v46 = vld [vmem:[#allocation2 + $0x106] ss:$4 sm:$0xff] }
 0x1d3   : > { %v3513_v42 = vmax.f32 %v3342_v39, %v3408_v41  ;;  %2577 = vst.msk [vmem:[#allocation2 + $0x128] sm:$0xff] %vm2539_vm1, %v2351_v40  ;;  %v3921_v50 = vld [vmem:[#allocation2 + $0x107] ss:$4 sm:$0xff] }
 0x1d4   : > { %v11165_v41 = vld [vmem:[%s11605_s2 + $0xf8] sm:$0xff] }
 0x1d5   : > { %v3684_v44 = vmax.f32 %v3513_v42, %v3579_v43 }
 0x1d6   : > { %v1845_v47 = vpop.f32.mrf.mxu0 }
 0x1d7   : > { %v3855_v48 = vmax.f32 %v3684_v44, %v3750_v46  ;;  %v1846_v49 = vadd.f32 %v11930_v6, %v1845_v47 }
 0x1d9   : > { %v4026_v51 = vmax.f32 %v3855_v48, %v3921_v50  ;;  %v2352_v52 = vmax.f32 %v1846_v49, 0.0  ;;  %10302 = vmatmul.msk.bf16.gmra.mxu0 %vm1401_vm0, %v11161_v45 }
 0x1db   : > { %4142 = vst.msk [vmem:[#allocation3 + $0x45] sm:$0xff] %vm2539_vm1, %v4026_v51 }
 0x1dc   : > { %2578 = vst.msk [vmem:[#allocation2 + $0x130] sm:$0xff] %vm2539_vm1, %v2352_v52  ;;  %v11166_v52 = vld [vmem:[%s11605_s2 + $0x100] sm:$0xff] }
 0x1de   : > { %v1847_v53 = vpop.f32.mrf.mxu0 }
 0x1df   : > { %v1848_v54 = vadd.f32 %v11930_v6, %v1847_v53 }
 0x1e1   : > { %v2353_v55 = vmax.f32 %v1848_v54, 0.0 }
 0x1e3   : > { %2579 = vst.msk [vmem:[#allocation2 + $0x138] sm:$0xff] %vm2539_vm1, %v2353_v55 }
 0x1e6   : > { %v1850_v57 = vpop.f32.mrf.mxu0 }
 0x1e7   : > { %v1851_v58 = vadd.f32 %v11930_v6, %v1850_v57 }
 0x1e9   : > { %v2354_v59 = vmax.f32 %v1851_v58, 0.0  ;;  %10303 = vmatmul.msk.bf16.gmra.mxu0 %vm1401_vm0, %v11162_v56 }
 0x1ea   : > { %v2783_v60 = vld [vmem:[#allocation2 + $0x120] ss:$4 sm:$0xff]  ;;  %v2897_v61 = vld [vmem:[#allocation2 + $0x121] ss:$4 sm:$0xff]  ;;  %v3068_v63 = vld [vmem:[#allocation2 + $0x122] ss:$4 sm:$0xff] }
 0x1eb   : > { %v3001_v62 = vmax.f32 %v2783_v60, %v2897_v61  ;;  %2580 = vst.msk [vmem:[#allocation2 + $0x140] sm:$0xff] %vm2539_vm1, %v2354_v59  ;;  %v3239_v3 = vld [vmem:[#allocation2 + $0x123] ss:$4 sm:$0xff] }
 0x1ed   : > { %v3172_v0 = vmax.f32 %v3001_v62, %v3068_v63  ;;  %v4261_v63 = vld [vmem:[%s14154_s22] sm:$0xf] }
 0x1ee   : > { %v1852_v1 = vpop.f32.mrf.mxu0 }
 0x1ef   : > { %v1853_v2 = vadd.f32 %v11930_v6, %v1852_v1  ;;  %v3343_v4 = vmax.f32 %v3172_v0, %v3239_v3  ;;  %v4502_v1 = vsel %vm4376_vm2, %v4261_v63, 0 }
 0x1f0   : > { %11331 = vmatpush.bf16.msra.mxu2 %v4502_v1  ;;  %4511 = vmatpush.bf16.msra.mxu1 %v4502_v1 }
 0x1f1   : > { %v2355_v5 = vmax.f32 %v1853_v2, 0.0 }
 0x1f2   : > { %v3410_v15 = vld [vmem:[#allocation2 + $0x124] ss:$4 sm:$0xff]  ;;  %v3581_v8 = vld [vmem:[#allocation2 + $0x125] ss:$4 sm:$0xff]  ;;  %v3752_v11 = vld [vmem:[#allocation2 + $0x126] ss:$4 sm:$0xff] }
 0x1f3   : > { %v3514_v7 = vmax.f32 %v3343_v4, %v3410_v15  ;;  %2581 = vst.msk [vmem:[#allocation2 + $0x148] sm:$0xff] %vm2539_vm1, %v2355_v5  ;;  %v3923_v16 = vld [vmem:[#allocation2 + $0x127] ss:$4 sm:$0xff] }
 0x1f5   : > { %v3685_v9 = vmax.f32 %v3514_v7, %v3581_v8  ;;  %v11167_v8 = vld [vmem:[%s11605_s2 + $0x108] sm:$0xff] }
 0x1f6   : > { %v1855_v12 = vpop.f32.mrf.mxu0 }
 0x1f7   : > { %v3856_v13 = vmax.f32 %v3685_v9, %v3752_v11  ;;  %v1856_v14 = vadd.f32 %v11930_v6, %v1855_v12 }
 0x1f9   : > { %v4027_v17 = vmax.f32 %v3856_v13, %v3923_v16  ;;  %v2356_v18 = vmax.f32 %v1856_v14, 0.0  ;;  %10304 = vmatmul.msk.bf16.gmra.mxu0 %vm1401_vm0, %v11163_v10 }
 0x1fb   : > { %4143 = vst.msk [vmem:[#allocation3 + $0x4d] sm:$0xff] %vm2539_vm1, %v4027_v17 }
 0x1fc   : > { %2582 = vst.msk [vmem:[#allocation2 + $0x150] sm:$0xff] %vm2539_vm1, %v2356_v18 }
 0x1fe   : > { %v1857_v19 = vpop.f32.mrf.mxu0 }
 0x1ff   : > { %v1858_v20 = vadd.f32 %v11930_v6, %v1857_v19 }
 0x201   : > { %v2357_v21 = vmax.f32 %v1858_v20, 0.0 }
 0x202   : > { %v4271_v19 = vld [vmem:[#allocation3 + $0x41] ss:$2 sm:$0xff] }
 0x203   : > { %2583 = vst.msk [vmem:[#allocation2 + $0x158] sm:$0xff] %vm2539_vm1, %v2357_v21  ;;  %v4200_v21 = vld [vmem:[#allocation3 + $0x40] ss:$2 sm:$0xff] }
 0x206   : > { %v1860_v23 = vpop.f32.mrf.mxu0 }
 0x207   : > { %v1861_v24 = vadd.f32 %v11930_v6, %v1860_v23 }
 0x209   : > { %v2358_v25 = vmax.f32 %v1861_v24, 0.0  ;;  %10305 = vmatmul.msk.bf16.gmra.mxu0 %vm1401_vm0, %v11164_v22  ;;  %v4592_v22 = vld [vmem:[#allocation3 + $0x42] ss:$2 sm:$0xff] }
 0x20a   : > { %v2785_v26 = vld [vmem:[#allocation2 + $0x140] ss:$4 sm:$0xff]  ;;  %v2899_v27 = vld [vmem:[#allocation2 + $0x141] ss:$4 sm:$0xff]  ;;  %v3070_v30 = vld [vmem:[#allocation2 + $0x142] ss:$4 sm:$0xff] }
 0x20b   : > { %v3002_v29 = vmax.f32 %v2785_v26, %v2899_v27  ;;  %2584 = vst.msk [vmem:[#allocation2 + $0x160] sm:$0xff] %vm2539_vm1, %v2358_v25  ;;  %v3241_v34 = vld [vmem:[#allocation2 + $0x143] ss:$4 sm:$0xff] }
 0x20d   : > { %v3173_v31 = vmax.f32 %v3002_v29, %v3070_v30  ;;  %v11168_v30 = vld [vmem:[%s11605_s2 + $0x110] sm:$0xff] }
 0x20e   : > { %v1862_v32 = vpop.f32.mrf.mxu0 }
 0x20f   : > { %v1863_v33 = vadd.f32 %v11930_v6, %v1862_v32  ;;  %v3344_v35 = vmax.f32 %v3173_v31, %v3241_v34 }
 0x211   : > { %v2359_v36 = vmax.f32 %v1863_v33, 0.0 }
 0x212   : > { %v3412_v37 = vld [vmem:[#allocation2 + $0x144] ss:$4 sm:$0xff]  ;;  %v3583_v39 = vld [vmem:[#allocation2 + $0x145] ss:$4 sm:$0xff]  ;;  %v3754_v42 = vld [vmem:[#allocation2 + $0x146] ss:$4 sm:$0xff] }
 0x213   : > { %v3515_v38 = vmax.f32 %v3344_v35, %v3412_v37  ;;  %2585 = vst.msk [vmem:[#allocation2 + $0x168] sm:$0xff] %vm2539_vm1, %v2359_v36  ;;  %v3925_v46 = vld [vmem:[#allocation2 + $0x147] ss:$4 sm:$0xff] }
 0x215   : > { %v3686_v40 = vmax.f32 %v3515_v38, %v3583_v39 }
 0x216   : > { %v1865_v43 = vpop.f32.mrf.mxu0 }
 0x217   : > { %v3857_v44 = vmax.f32 %v3686_v40, %v3754_v42  ;;  %v1866_v45 = vadd.f32 %v11930_v6, %v1865_v43 }
 0x219   : > { %v4028_v47 = vmax.f32 %v3857_v44, %v3925_v46  ;;  %v2360_v48 = vmax.f32 %v1866_v45, 0.0  ;;  %10306 = vmatmul.msk.bf16.gmra.mxu0 %vm1401_vm0, %v11165_v41 }
 0x21b   : > { %4144 = vst.msk [vmem:[#allocation3 + $0x55] sm:$0xff] %vm2539_vm1, %v4028_v47 }
 0x21c   : > { %2586 = vst.msk [vmem:[#allocation2 + $0x170] sm:$0xff] %vm2539_vm1, %v2360_v48  ;;  %v11169_v48 = vld [vmem:[%s11605_s2 + $0x118] sm:$0xff] }
 0x21e   : > { %v1867_v49 = vpop.f32.mrf.mxu0 }
 0x21f   : > { %v1868_v50 = vadd.f32 %v11930_v6, %v1867_v49 }
 0x221   : > { %v2361_v51 = vmax.f32 %v1868_v50, 0.0 }
 0x223   : > { %2587 = vst.msk [vmem:[#allocation2 + $0x178] sm:$0xff] %vm2539_vm1, %v2361_v51 }
 0x226   : > { %v1870_v53 = vpop.f32.mrf.mxu0 }
 0x227   : > { %v1871_v54 = vadd.f32 %v11930_v6, %v1870_v53 }
 0x229   : > { %v2362_v55 = vmax.f32 %v1871_v54, 0.0  ;;  %10307 = vmatmul.msk.bf16.gmra.mxu0 %vm1401_vm0, %v11166_v52 }
 0x22a   : > { %v2787_v56 = vld [vmem:[#allocation2 + $0x160] ss:$4 sm:$0xff]  ;;  %v2901_v57 = vld [vmem:[#allocation2 + $0x161] ss:$4 sm:$0xff]  ;;  %v3072_v59 = vld [vmem:[#allocation2 + $0x162] ss:$4 sm:$0xff] }
 0x22b   : > { %v3003_v58 = vmax.f32 %v2787_v56, %v2901_v57  ;;  %2588 = vst.msk [vmem:[#allocation2 + $0x180] sm:$0xff] %vm2539_vm1, %v2362_v55  ;;  %v3243_v0 = vld [vmem:[#allocation2 + $0x163] ss:$4 sm:$0xff] }
 0x22d   : > { %v3174_v60 = vmax.f32 %v3003_v58, %v3072_v59  ;;  %v11170_v59 = vld [vmem:[%s11605_s2 + $0x120] sm:$0xff] }
 0x22e   : > { %v1872_v61 = vpop.f32.mrf.mxu0 }
 0x22f   : > { %v1873_v62 = vadd.f32 %v11930_v6, %v1872_v61  ;;  %v3345_v2 = vmax.f32 %v3174_v60, %v3243_v0 }
 0x231   : > { %v2363_v3 = vmax.f32 %v1873_v62, 0.0 }
 0x232   : > { %v3414_v4 = vld [vmem:[#allocation2 + $0x164] ss:$4 sm:$0xff]  ;;  %v3585_v15 = vld [vmem:[#allocation2 + $0x165] ss:$4 sm:$0xff]  ;;  %v3756_v9 = vld [vmem:[#allocation2 + $0x166] ss:$4 sm:$0xff] }
 0x233   : > { %v3516_v5 = vmax.f32 %v3345_v2, %v3414_v4  ;;  %2589 = vst.msk [vmem:[#allocation2 + $0x188] sm:$0xff] %vm2539_vm1, %v2363_v3  ;;  %v3927_v13 = vld [vmem:[#allocation2 + $0x167] ss:$4 sm:$0xff] }
 0x235   : > { %v3687_v7 = vmax.f32 %v3516_v5, %v3585_v15 }
 0x236   : > { %v1875_v10 = vpop.f32.mrf.mxu0 }
 0x237   : > { %v3858_v11 = vmax.f32 %v3687_v7, %v3756_v9  ;;  %v1876_v12 = vadd.f32 %v11930_v6, %v1875_v10 }
 0x239   : > { %v4029_v14 = vmax.f32 %v3858_v11, %v3927_v13  ;;  %v2364_v16 = vmax.f32 %v1876_v12, 0.0  ;;  %10308 = vmatmul.msk.bf16.gmra.mxu0 %vm1401_vm0, %v11167_v8  ;;  %v11171_v13 = vld [vmem:[%s11605_s2 + $0x128] sm:$0xff] }
 0x23b   : > { %4145 = vst.msk [vmem:[#allocation3 + $0x5d] sm:$0xff] %vm2539_vm1, %v4029_v14 }
 0x23c   : > { %2590 = vst.msk [vmem:[#allocation2 + $0x190] sm:$0xff] %vm2539_vm1, %v2364_v16 }
 0x23e   : > { %v1877_v17 = vpop.f32.mrf.mxu0 }
 0x23f   : > { %v1878_v18 = vadd.f32 %v11930_v6, %v1877_v17 }
 0x241   : > { %v2365_v20 = vmax.f32 %v1878_v18, 0.0 }
 0x242   : > { %v4273_v23 = vld [vmem:[#allocation3 + $0x51] ss:$2 sm:$0xff]  ;;  %v4202_v24 = vld [vmem:[#allocation3 + $0x50] ss:$2 sm:$0xff] }
 0x243   : > { %v4594_v25 = vld [vmem:[#allocation3 + $0x52] ss:$2 sm:$0xff]  ;;  %2591 = vst.msk [vmem:[#allocation2 + $0x198] sm:$0xff] %vm2539_vm1, %v2365_v20  ;;  %v4320_v26 = vpack.c.bf16 %v4273_v23, %v4271_v19  ;;  %v4249_v27 = vpack.c.bf16 %v4202_v24, %v4200_v21 }
 0x244   : > { %v4641_v29 = vpack.c.bf16 %v4594_v25, %v4592_v22  ;;  %v11172_v25 = vld [vmem:[%s11605_s2 + $0x130] sm:$0xff] }
 0x245   : > { %10391 = vmatmul.msk.bf16.gmra.mxu1 %vm2539_vm1, %v4320_v26  ;;  %10405 = vmatmul.msk.bf16.vlgmr.msra.gmra.mxu2 %vm2539_vm1, %v4249_v27 }
 0x246   : > { %10420 = vmatmul.msk.bf16.gmra.mxu3 %vm2539_vm1, %v4641_v29  ;;  %v1880_v31 = vpop.f32.mrf.mxu0 }
 0x247   : > { %v1881_v32 = vadd.f32 %v11930_v6, %v1880_v31 }
 0x249   : > { %v2366_v33 = vmax.f32 %v1881_v32, 0.0  ;;  %10309 = vmatmul.msk.bf16.gmra.mxu0 %vm1401_vm0, %v11168_v30 }
 0x24a   : > { %v2789_v34 = vld [vmem:[#allocation2 + $0x180] ss:$4 sm:$0xff]  ;;  %v2903_v35 = vld [vmem:[#allocation2 + $0x181] ss:$4 sm:$0xff]  ;;  %v3074_v37 = vld [vmem:[#allocation2 + $0x182] ss:$4 sm:$0xff] }
 0x24b   : > { %v3004_v36 = vmax.f32 %v2789_v34, %v2903_v35  ;;  %2592 = vst.msk [vmem:[#allocation2 + $0x1a0] sm:$0xff] %vm2539_vm1, %v2366_v33  ;;  %v3245_v41 = vld [vmem:[#allocation2 + $0x183] ss:$4 sm:$0xff] }
 0x24d   : > { %v3175_v38 = vmax.f32 %v3004_v36, %v3074_v37 }
 0x24e   : > { %v1882_v39 = vpop.f32.mrf.mxu0 }
 0x24f   : > { %v1883_v40 = vadd.f32 %v11930_v6, %v1882_v39  ;;  %v3346_v42 = vmax.f32 %v3175_v38, %v3245_v41 }
 0x251   : > { %v2367_v43 = vmax.f32 %v1883_v40, 0.0 }
 0x252   : > { %v3416_v44 = vld [vmem:[#allocation2 + $0x184] ss:$4 sm:$0xff]  ;;  %v3587_v46 = vld [vmem:[#allocation2 + $0x185] ss:$4 sm:$0xff]  ;;  %v3758_v49 = vld [vmem:[#allocation2 + $0x186] ss:$4 sm:$0xff] }
 0x253   : > { %v3517_v45 = vmax.f32 %v3346_v42, %v3416_v44  ;;  %2593 = vst.msk [vmem:[#allocation2 + $0x1a8] sm:$0xff] %vm2539_vm1, %v2367_v43  ;;  %v3929_v53 = vld [vmem:[#allocation2 + $0x187] ss:$4 sm:$0xff] }
 0x254   : > { %v11173_v44 = vld [vmem:[%s11605_s2 + $0x138] sm:$0xff] }
 0x255   : > { %v3688_v47 = vmax.f32 %v3517_v45, %v3587_v46 }
 0x256   : > { %v1885_v50 = vpop.f32.mrf.mxu0 }
 0x257   : > { %v3859_v51 = vmax.f32 %v3688_v47, %v3758_v49  ;;  %v1886_v52 = vadd.f32 %v11930_v6, %v1885_v50 }
 0x259   : > { %v4030_v54 = vmax.f32 %v3859_v51, %v3929_v53  ;;  %v2368_v55 = vmax.f32 %v1886_v52, 0.0  ;;  %10310 = vmatmul.msk.bf16.gmra.mxu0 %vm1401_vm0, %v11169_v48 }
 0x25b   : > { %4146 = vst.msk [vmem:[#allocation3 + $0x65] sm:$0xff] %vm2539_vm1, %v4030_v54 }
 0x25c   : > { %2594 = vst.msk [vmem:[#allocation2 + $0x1b0] sm:$0xff] %vm2539_vm1, %v2368_v55  ;;  %v12061_v55 = vpop.f32.mrf.mxu1 }
 0x25e   : > { %v1887_v56 = vpop.f32.mrf.mxu0 }
 0x25f   : > { %v1888_v57 = vadd.f32 %v11930_v6, %v1887_v56  ;;  %v11174_v56 = vld [vmem:[%s11605_s2 + $0x140] sm:$0xff] }
 0x261   : > { %v2369_v58 = vmax.f32 %v1888_v57, 0.0  ;;  %v12064_v57 = vpop.f32.mrf.mxu3 }
 0x263   : > { %2595 = vst.msk [vmem:[#allocation2 + $0x1b8] sm:$0xff] %vm2539_vm1, %v2369_v58 }
 0x266   : > { %v1890_v60 = vpop.f32.mrf.mxu0 }
 0x267   : > { %v1891_v61 = vadd.f32 %v11930_v6, %v1890_v60 }
 0x269   : > { %v2370_v62 = vmax.f32 %v1891_v61, 0.0  ;;  %10311 = vmatmul.msk.bf16.gmra.mxu0 %vm1401_vm0, %v11170_v59 }
 0x26a   : > { %v2791_v63 = vld [vmem:[#allocation2 + $0x1a0] ss:$4 sm:$0xff]  ;;  %v2905_v0 = vld [vmem:[#allocation2 + $0x1a1] ss:$4 sm:$0xff]  ;;  %v3076_v2 = vld [vmem:[#allocation2 + $0x1a2] ss:$4 sm:$0xff] }
 0x26b   : > { %v3005_v1 = vmax.f32 %v2791_v63, %v2905_v0  ;;  %2596 = vst.msk [vmem:[#allocation2 + $0x1c0] sm:$0xff] %vm2539_vm1, %v2370_v62  ;;  %v3247_v15 = vld [vmem:[#allocation2 + $0x1a3] ss:$4 sm:$0xff] }
 0x26d   : > { %v3176_v3 = vmax.f32 %v3005_v1, %v3076_v2  ;;  %v12069_v2 = vpop.f32.mrf.mxu1 }
 0x26e   : > { %v1892_v4 = vpop.f32.mrf.mxu0 }
 0x26f   : > { %v1893_v5 = vadd.f32 %v11930_v6, %v1892_v4  ;;  %v3347_v7 = vmax.f32 %v3176_v3, %v3247_v15 }
 0x271   : > { %v2371_v8 = vmax.f32 %v1893_v5, 0.0  ;;  %v12072_v5 = vpop.f32.mrf.mxu3 }
 0x272   : > { %v3418_v9 = vld [vmem:[#allocation2 + $0x1a4] ss:$4 sm:$0xff]  ;;  %v3589_v11 = vld [vmem:[#allocation2 + $0x1a5] ss:$4 sm:$0xff]  ;;  %v3760_v14 = vld [vmem:[#allocation2 + $0x1a6] ss:$4 sm:$0xff] }
 0x273   : > { %v3518_v10 = vmax.f32 %v3347_v7, %v3418_v9  ;;  %2597 = vst.msk [vmem:[#allocation2 + $0x1c8] sm:$0xff] %vm2539_vm1, %v2371_v8  ;;  %v3931_v19 = vld [vmem:[#allocation2 + $0x1a7] ss:$4 sm:$0xff] }
 0x275   : > { %v3689_v12 = vmax.f32 %v3518_v10, %v3589_v11 }
 0x276   : > { %v1895_v16 = vpop.f32.mrf.mxu0 }
 0x277   : > { %v3860_v17 = vmax.f32 %v3689_v12, %v3760_v14  ;;  %v1896_v18 = vadd.f32 %v11930_v6, %v1895_v16  ;;  %v12076_v14 = vpop.f32.mrf.mxu1 }
 0x279   : > { %v4031_v20 = vmax.f32 %v3860_v17, %v3931_v19  ;;  %v2372_v21 = vmax.f32 %v1896_v18, 0.0  ;;  %10312 = vmatmul.msk.bf16.gmra.mxu0 %vm1401_vm0, %v11171_v13  ;;  %v11175_v13 = vld [vmem:[%s11605_s2 + $0x148] sm:$0xff] }
 0x27b   : > { %4147 = vst.msk [vmem:[#allocation3 + $0x6d] sm:$0xff] %vm2539_vm1, %v4031_v20  ;;  %v12079_v20 = vpop.f32.mrf.mxu3 }
 0x27c   : > { %2598 = vst.msk [vmem:[#allocation2 + $0x1d0] sm:$0xff] %vm2539_vm1, %v2372_v21 }
 0x27e   : > { %v1897_v22 = vpop.f32.mrf.mxu0 }
 0x27f   : > { %v1898_v23 = vadd.f32 %v11930_v6, %v1897_v22 }
 0x281   : > { %v2373_v24 = vmax.f32 %v1898_v23, 0.0 }
 0x283   : > { %2599 = vst.msk [vmem:[#allocation2 + $0x1d8] sm:$0xff] %vm2539_vm1, %v2373_v24 }
 0x286   : > { %v1900_v26 = vpop.f32.mrf.mxu0 }
 0x287   : > { %v1901_v27 = vadd.f32 %v11930_v6, %v1900_v26  ;;  %v12085_v26 = vpop.f32.mrf.mxu1 }
 0x289   : > { %v2374_v29 = vmax.f32 %v1901_v27, 0.0  ;;  %10313 = vmatmul.msk.bf16.gmra.mxu0 %vm1401_vm0, %v11172_v25  ;;  %v4275_v27 = vld [vmem:[#allocation3 + $0x61] ss:$2 sm:$0xff] }
 0x28a   : > { %v2793_v30 = vld [vmem:[#allocation2 + $0x1c0] ss:$4 sm:$0xff]  ;;  %v2907_v31 = vld [vmem:[#allocation2 + $0x1c1] ss:$4 sm:$0xff]  ;;  %v3078_v33 = vld [vmem:[#allocation2 + $0x1c2] ss:$4 sm:$0xff] }
 0x28b   : > { %v3006_v32 = vmax.f32 %v2793_v30, %v2907_v31  ;;  %2600 = vst.msk [vmem:[#allocation2 + $0x1e0] sm:$0xff] %vm2539_vm1, %v2374_v29  ;;  %v3249_v37 = vld [vmem:[#allocation2 + $0x1c3] ss:$4 sm:$0xff]  ;;  %v4204_v30 = vld [vmem:[#allocation3 + $0x60] ss:$2 sm:$0xff] }
 0x28c   : > { %v4596_v31 = vld [vmem:[#allocation3 + $0x62] ss:$2 sm:$0xff] }
 0x28d   : > { %v3177_v34 = vmax.f32 %v3006_v32, %v3078_v33  ;;  %v12087_v32 = vpop.f32.mrf.mxu3 }
 0x28e   : > { %v1902_v35 = vpop.f32.mrf.mxu0 }
 0x28f   : > { %v1903_v36 = vadd.f32 %v11930_v6, %v1902_v35  ;;  %v3348_v38 = vmax.f32 %v3177_v34, %v3249_v37 }
 0x291   : > { %v2375_v39 = vmax.f32 %v1903_v36, 0.0 }
 0x292   : > { %v3420_v40 = vld [vmem:[#allocation2 + $0x1c4] ss:$4 sm:$0xff]  ;;  %v3591_v42 = vld [vmem:[#allocation2 + $0x1c5] ss:$4 sm:$0xff]  ;;  %v3762_v45 = vld [vmem:[#allocation2 + $0x1c6] ss:$4 sm:$0xff] }
 0x293   : > { %v3519_v41 = vmax.f32 %v3348_v38, %v3420_v40  ;;  %2601 = vst.msk [vmem:[#allocation2 + $0x1e8] sm:$0xff] %vm2539_vm1, %v2375_v39  ;;  %v3933_v49 = vld [vmem:[#allocation2 + $0x1c7] ss:$4 sm:$0xff] }
 0x294   : > { %v11176_v39 = vld [vmem:[%s11605_s2 + $0x150] sm:$0xff] }
 0x295   : > { %v3690_v43 = vmax.f32 %v3519_v41, %v3591_v42 }
 0x296   : > { %v1905_v46 = vpop.f32.mrf.mxu0 }
 0x297   : > { %v3861_v47 = vmax.f32 %v3690_v43, %v3762_v45  ;;  %v1906_v48 = vadd.f32 %v11930_v6, %v1905_v46 }
 0x299   : > { %v4032_v50 = vmax.f32 %v3861_v47, %v3933_v49  ;;  %v2376_v51 = vmax.f32 %v1906_v48, 0.0  ;;  %10314 = vmatmul.msk.bf16.gmra.mxu0 %vm1401_vm0, %v11173_v44 }
 0x29b   : > { %4148 = vst.msk [vmem:[#allocation3 + $0x75] sm:$0xff] %vm2539_vm1, %v4032_v50 }
 0x29c   : > { %2602 = vst.msk [vmem:[#allocation2 + $0x1f0] sm:$0xff] %vm2539_vm1, %v2376_v51 }
 0x29e   : > { %v1907_v52 = vpop.f32.mrf.mxu0 }
 0x29f   : > { %v1908_v53 = vadd.f32 %v11930_v6, %v1907_v52 }
 0x2a1   : > { %v2377_v54 = vmax.f32 %v1908_v53, 0.0 }
 0x2a3   : > { %2603 = vst.msk [vmem:[#allocation2 + $0x1f8] sm:$0xff] %vm2539_vm1, %v2377_v54 }
 0x2a6   : > { %v1910_v58 = vpop.f32.mrf.mxu0 }
 0x2a7   : > { %v1911_v59 = vadd.f32 %v11930_v6, %v1910_v58 }
 0x2a9   : > { %v2378_v60 = vmax.f32 %v1911_v59, 0.0  ;;  %10315 = vmatmul.msk.bf16.gmra.mxu0 %vm1401_vm0, %v11174_v56 }
 0x2aa   : > { %v2795_v61 = vld [vmem:[#allocation2 + $0x1e0] ss:$4 sm:$0xff]  ;;  %v2909_v62 = vld [vmem:[#allocation2 + $0x1e1] ss:$4 sm:$0xff]  ;;  %v3080_v0 = vld [vmem:[#allocation2 + $0x1e2] ss:$4 sm:$0xff] }
 0x2ab   : > { %v3007_v63 = vmax.f32 %v2795_v61, %v2909_v62  ;;  %2604 = vst.msk [vmem:[#allocation2 + $0x200] sm:$0xff] %vm2539_vm1, %v2378_v60  ;;  %v3251_v15 = vld [vmem:[#allocation2 + $0x1e3] ss:$4 sm:$0xff] }
 0x2ad   : > { %v3178_v1 = vmax.f32 %v3007_v63, %v3080_v0  ;;  %v11177_v0 = vld [vmem:[%s11605_s2 + $0x158] sm:$0xff] }
 0x2ae   : > { %v1912_v3 = vpop.f32.mrf.mxu0 }
 0x2af   : > { %v1913_v4 = vadd.f32 %v11930_v6, %v1912_v3  ;;  %v3349_v7 = vmax.f32 %v3178_v1, %v3251_v15 }
 0x2b1   : > { %v2379_v8 = vmax.f32 %v1913_v4, 0.0 }
 0x2b2   : > { %v3422_v9 = vld [vmem:[#allocation2 + $0x1e4] ss:$4 sm:$0xff]  ;;  %v3593_v11 = vld [vmem:[#allocation2 + $0x1e5] ss:$4 sm:$0xff]  ;;  %v3764_v16 = vld [vmem:[#allocation2 + $0x1e6] ss:$4 sm:$0xff] }
 0x2b3   : > { %v3520_v10 = vmax.f32 %v3349_v7, %v3422_v9  ;;  %2605 = vst.msk [vmem:[#allocation2 + $0x208] sm:$0xff] %vm2539_vm1, %v2379_v8  ;;  %v3935_v21 = vld [vmem:[#allocation2 + $0x1e7] ss:$4 sm:$0xff] }
 0x2b5   : > { %v3691_v12 = vmax.f32 %v3520_v10, %v3593_v11 }
 0x2b6   : > { %v1915_v17 = vpop.f32.mrf.mxu0 }
 0x2b7   : > { %v3862_v18 = vmax.f32 %v3691_v12, %v3764_v16  ;;  %v1916_v19 = vadd.f32 %v11930_v6, %v1915_v17 }
 0x2b9   : > { %v4033_v22 = vmax.f32 %v3862_v18, %v3935_v21  ;;  %v2380_v23 = vmax.f32 %v1916_v19, 0.0  ;;  %10316 = vmatmul.msk.bf16.gmra.mxu0 %vm1401_vm0, %v11175_v13  ;;  %v11178_v13 = vld [vmem:[%s11605_s2 + $0x160] sm:$0xff] }
 0x2bb   : > { %4149 = vst.msk [vmem:[#allocation3 + $0x7d] sm:$0xff] %vm2539_vm1, %v4033_v22 }
 0x2bc   : > { %2606 = vst.msk [vmem:[#allocation2 + $0x210] sm:$0xff] %vm2539_vm1, %v2380_v23 }
 0x2be   : > { %v1917_v24 = vpop.f32.mrf.mxu0 }
 0x2bf   : > { %v1918_v25 = vadd.f32 %v11930_v6, %v1917_v24 }
 0x2c1   : > { %v2381_v29 = vmax.f32 %v1918_v25, 0.0 }
 0x2c2   : > { %v4277_v33 = vld [vmem:[#allocation3 + $0x71] ss:$2 sm:$0xff]  ;;  %v4206_v34 = vld [vmem:[#allocation3 + $0x70] ss:$2 sm:$0xff]  ;;  %v4399_v42 = vpop.f32.mrf.mxu1 }
 0x2c3   : > { %v4598_v35 = vld [vmem:[#allocation3 + $0x72] ss:$2 sm:$0xff]  ;;  %2607 = vst.msk [vmem:[#allocation2 + $0x218] sm:$0xff] %vm2539_vm1, %v2381_v29  ;;  %v4321_v36 = vpack.c.bf16 %v4277_v33, %v4275_v27  ;;  %v4250_v37 = vpack.c.bf16 %v4206_v34, %v4204_v30 }
 0x2c4   : > { %v4642_v38 = vpack.c.bf16 %v4598_v35, %v4596_v31 }
 0x2c5   : > { %10392 = vmatmul.msk.bf16.gmra.mxu1 %vm2539_vm1, %v4321_v36  ;;  %10406 = vmatmul.msk.bf16.gmra.mxu2 %vm2539_vm1, %v4250_v37  ;;  %v11179_v37 = vld [vmem:[%s11605_s2 + $0x168] sm:$0xff] }
 0x2c6   : > { %10421 = vmatmul.msk.bf16.gmra.mxu3 %vm2539_vm1, %v4642_v38  ;;  %v1920_v40 = vpop.f32.mrf.mxu0 }
 0x2c7   : > { %v1921_v41 = vadd.f32 %v11930_v6, %v1920_v40 }
 0x2c8   : > { %v4523_v43 = vpop.f32.mrf.mxu2 }
 0x2c9   : > { %v2382_v44 = vmax.f32 %v1921_v41, 0.0  ;;  %v4524_v45 = vadd.f32 %v4523_v43, %v4399_v42  ;;  %10317 = vmatmul.msk.bf16.gmra.mxu0 %vm1401_vm0, %v11176_v39  ;;  %v4719_v48 = vpop.f32.mrf.mxu3 }
 0x2ca   : > { %v2797_v46 = vld [vmem:[#allocation2 + $0x200] ss:$4 sm:$0xff]  ;;  %v2911_v47 = vld [vmem:[#allocation2 + $0x201] ss:$4 sm:$0xff]  ;;  %v3082_v51 = vld [vmem:[#allocation2 + $0x202] ss:$4 sm:$0xff] }
 0x2cb   : > { %v3008_v49 = vmax.f32 %v2797_v46, %v2911_v47  ;;  %2608 = vst.msk [vmem:[#allocation2 + $0x220] sm:$0xff] %vm2539_vm1, %v2382_v44  ;;  %v12097_v50 = vadd.f32 %v4719_v48, %v4524_v45  ;;  %v3253_v56 = vld [vmem:[#allocation2 + $0x203] ss:$4 sm:$0xff] }
 0x2cc   : > { %v11180_v48 = vld [vmem:[%s11605_s2 + $0x170] sm:$0xff] }
 0x2cd   : > { %v3179_v52 = vmax.f32 %v3008_v49, %v3082_v51 }
 0x2ce   : > { %v1922_v53 = vpop.f32.mrf.mxu0 }
 0x2cf   : > { %v1923_v54 = vadd.f32 %v11930_v6, %v1922_v53  ;;  %v3350_v58 = vmax.f32 %v3179_v52, %v3253_v56 }
 0x2d1   : > { %v2383_v59 = vmax.f32 %v1923_v54, 0.0 }
 0x2d2   : > { %v3424_v60 = vld [vmem:[#allocation2 + $0x204] ss:$4 sm:$0xff]  ;;  %v3595_v62 = vld [vmem:[#allocation2 + $0x205] ss:$4 sm:$0xff]  ;;  %v3766_v1 = vld [vmem:[#allocation2 + $0x206] ss:$4 sm:$0xff] }
 0x2d3   : > { %v3521_v61 = vmax.f32 %v3350_v58, %v3424_v60  ;;  %2609 = vst.msk [vmem:[#allocation2 + $0x228] sm:$0xff] %vm2539_vm1, %v2383_v59  ;;  %v3937_v7 = vld [vmem:[#allocation2 + $0x207] ss:$4 sm:$0xff] }
 0x2d5   : > { %v3692_v63 = vmax.f32 %v3521_v61, %v3595_v62  ;;  %v12128_v61 = vld [vmem:[%s14153_s27] ss:$0 sm:$0xff] }
 0x2d6   : > { %v1925_v3 = vpop.f32.mrf.mxu0 }
 0x2d7   : > { %v3863_v4 = vmax.f32 %v3692_v63, %v3766_v1  ;;  %v1926_v15 = vadd.f32 %v11930_v6, %v1925_v3 }
 0x2d9   : > { %v4034_v8 = vmax.f32 %v3863_v4, %v3937_v7  ;;  %v2384_v9 = vmax.f32 %v1926_v15, 0.0  ;;  %10318 = vmatmul.msk.bf16.gmra.mxu0 %vm1401_vm0, %v11177_v0  ;;  %v11181_v7 = vld [vmem:[%s11605_s2 + $0x178] sm:$0xff] }
 0x2db   : > { %4150 = vst.msk [vmem:[#allocation3 + $0x85] sm:$0xff] %vm2539_vm1, %v4034_v8 }
 0x2dc   : > { %2610 = vst.msk [vmem:[#allocation2 + $0x230] sm:$0xff] %vm2539_vm1, %v2384_v9 }
 0x2de   : > { %v1927_v10 = vpop.f32.mrf.mxu0 }
 0x2df   : > { %v1928_v11 = vadd.f32 %v11930_v6, %v1927_v10 }
 0x2e1   : > { %v2385_v12 = vmax.f32 %v1928_v11, 0.0 }
 0x2e3   : > { %2611 = vst.msk [vmem:[#allocation2 + $0x238] sm:$0xff] %vm2539_vm1, %v2385_v12 }
 0x2e6   : > { %v1930_v16 = vpop.f32.mrf.mxu0 }
 0x2e7   : > { %v1931_v17 = vadd.f32 %v11930_v6, %v1930_v16 }
 0x2e9   : > { %v2386_v18 = vmax.f32 %v1931_v17, 0.0  ;;  %10319 = vmatmul.msk.bf16.gmra.mxu0 %vm1401_vm0, %v11178_v13 }
 0x2ea   : > { %v2799_v19 = vld [vmem:[#allocation2 + $0x220] ss:$4 sm:$0xff]  ;;  %v2913_v21 = vld [vmem:[#allocation2 + $0x221] ss:$4 sm:$0xff]  ;;  %v3084_v23 = vld [vmem:[#allocation2 + $0x222] ss:$4 sm:$0xff] }
 0x2eb   : > { %v3009_v22 = vmax.f32 %v2799_v19, %v2913_v21  ;;  %2612 = vst.msk [vmem:[#allocation2 + $0x240] sm:$0xff] %vm2539_vm1, %v2386_v18  ;;  %v3255_v29 = vld [vmem:[#allocation2 + $0x223] ss:$4 sm:$0xff] }
 0x2ec   : > { %v11182_v21 = vld [vmem:[%s11605_s2 + $0x180] sm:$0xff] }
 0x2ed   : > { %v3180_v24 = vmax.f32 %v3009_v22, %v3084_v23 }
 0x2ee   : > { %v1932_v25 = vpop.f32.mrf.mxu0 }
 0x2ef   : > { %v1933_v27 = vadd.f32 %v11930_v6, %v1932_v25  ;;  %v3351_v30 = vmax.f32 %v3180_v24, %v3255_v29 }
 0x2f1   : > { %v2387_v31 = vmax.f32 %v1933_v27, 0.0 }
 0x2f2   : > { %v3426_v33 = vld [vmem:[#allocation2 + $0x224] ss:$4 sm:$0xff]  ;;  %v3597_v35 = vld [vmem:[#allocation2 + $0x225] ss:$4 sm:$0xff]  ;;  %v3768_v38 = vld [vmem:[#allocation2 + $0x226] ss:$4 sm:$0xff] }
 0x2f3   : > { %v3522_v34 = vmax.f32 %v3351_v30, %v3426_v33  ;;  %2613 = vst.msk [vmem:[#allocation2 + $0x248] sm:$0xff] %vm2539_vm1, %v2387_v31  ;;  %v3939_v42 = vld [vmem:[#allocation2 + $0x227] ss:$4 sm:$0xff] }
 0x2f5   : > { %v3693_v36 = vmax.f32 %v3522_v34, %v3597_v35 }
 0x2f6   : > { %v1935_v39 = vpop.f32.mrf.mxu0 }
 0x2f7   : > { %v3864_v40 = vmax.f32 %v3693_v36, %v3768_v38  ;;  %v1936_v41 = vadd.f32 %v11930_v6, %v1935_v39 }
 0x2f9   : > { %v4035_v43 = vmax.f32 %v3864_v40, %v3939_v42  ;;  %v2388_v44 = vmax.f32 %v1936_v41, 0.0  ;;  %10320 = vmatmul.msk.bf16.gmra.mxu0 %vm1401_vm0, %v11179_v37  ;;  %v11183_v42 = vld [vmem:[%s11605_s2 + $0x188] sm:$0xff] }
 0x2fb   : > { %4151 = vst.msk [vmem:[#allocation3 + $0x8d] sm:$0xff] %vm2539_vm1, %v4035_v43 }
 0x2fc   : > { %2614 = vst.msk [vmem:[#allocation2 + $0x250] sm:$0xff] %vm2539_vm1, %v2388_v44 }
 0x2fe   : > { %v1937_v45 = vpop.f32.mrf.mxu0 }
 0x2ff   : > { %v1938_v46 = vadd.f32 %v11930_v6, %v1937_v45 }
 0x301   : > { %v2389_v47 = vmax.f32 %v1938_v46, 0.0 }
 0x303   : > { %2615 = vst.msk [vmem:[#allocation2 + $0x258] sm:$0xff] %vm2539_vm1, %v2389_v47 }
 0x306   : > { %v1940_v49 = vpop.f32.mrf.mxu0 }
 0x307   : > { %v1941_v51 = vadd.f32 %v11930_v6, %v1940_v49 }
 0x309   : > { %v2390_v52 = vmax.f32 %v1941_v51, 0.0  ;;  %10321 = vmatmul.msk.bf16.gmra.mxu0 %vm1401_vm0, %v11180_v48 }
 0x30a   : > { %v2801_v53 = vld [vmem:[#allocation2 + $0x240] ss:$4 sm:$0xff]  ;;  %v2915_v54 = vld [vmem:[#allocation2 + $0x241] ss:$4 sm:$0xff]  ;;  %v3086_v58 = vld [vmem:[#allocation2 + $0x242] ss:$4 sm:$0xff] }
 0x30b   : > { %v3010_v56 = vmax.f32 %v2801_v53, %v2915_v54  ;;  %2616 = vst.msk [vmem:[#allocation2 + $0x260] sm:$0xff] %vm2539_vm1, %v2390_v52  ;;  %v3257_v6 = vld [vmem:[#allocation2 + $0x243] ss:$4 sm:$0xff]  ;;  %v12151_v53 = vpop.f32.mrf.mxu1  ;;  %v12153_v54 = vpop.f32.mrf.mxu2 }
 0x30d   : > { %v3181_v59 = vmax.f32 %v3010_v56, %v3086_v58  ;;  %v4279_v56 = vld [vmem:[#allocation3 + $0x81] ss:$2 sm:$0xff] }
 0x30e   : > { %v1942_v60 = vpop.f32.mrf.mxu0 }
 0x30f   : > { %v1943_v62 = vadd.f32 %v12128_v61, %v1942_v60  ;;  %v3352_v63 = vmax.f32 %v3181_v59, %v3257_v6  ;;  %v4208_v59 = vld [vmem:[#allocation3 + $0x80] ss:$2 sm:$0xff] }
 0x310   : > { %v4600_v60 = vld [vmem:[#allocation3 + $0x82] ss:$2 sm:$0xff] }
 0x311   : > { %v2391_v0 = vmax.f32 %v1943_v62, 0.0  ;;  %v12155_v62 = vpop.f32.mrf.mxu3 }
 0x312   : > { %v3428_v1 = vld [vmem:[#allocation2 + $0x244] ss:$4 sm:$0xff]  ;;  %v3599_v4 = vld [vmem:[#allocation2 + $0x245] ss:$4 sm:$0xff]  ;;  %v3770_v8 = vld [vmem:[#allocation2 + $0x246] ss:$4 sm:$0xff] }
 0x313   : > { %v3523_v3 = vmax.f32 %v3352_v63, %v3428_v1  ;;  %2617 = vst.msk [vmem:[#allocation2 + $0x268] sm:$0xff] %vm2539_vm1, %v2391_v0  ;;  %v3941_v12 = vld [vmem:[#allocation2 + $0x247] ss:$4 sm:$0xff] }
 0x315   : > { %v3694_v15 = vmax.f32 %v3523_v3, %v3599_v4 }
 0x316   : > { %v1945_v9 = vpop.f32.mrf.mxu0 }
 0x317   : > { %v3865_v10 = vmax.f32 %v3694_v15, %v3770_v8  ;;  %v1946_v11 = vadd.f32 %v12128_v61, %v1945_v9  ;;  %v11184_v15 = vld [vmem:[%s11605_s2 + $0x190] sm:$0xff] }
 0x319   : > { %v4036_v13 = vmax.f32 %v3865_v10, %v3941_v12  ;;  %v2392_v16 = vmax.f32 %v1946_v11, 0.0  ;;  %10322 = vmatmul.msk.bf16.gmra.mxu0 %vm1401_vm0, %v11181_v7 }
 0x31b   : > { %4152 = vst.msk [vmem:[#allocation3 + $0x95] sm:$0xff] %vm2539_vm1, %v4036_v13 }
 0x31c   : > { %2618 = vst.msk [vmem:[#allocation2 + $0x270] sm:$0xff] %vm2539_vm1, %v2392_v16 }
 0x31e   : > { %v1947_v17 = vpop.f32.mrf.mxu0 }
 0x31f   : > { %v1948_v18 = vadd.f32 %v12128_v61, %v1947_v17 }
 0x321   : > { %v2393_v19 = vmax.f32 %v1948_v18, 0.0 }
 0x323   : > { %2619 = vst.msk [vmem:[#allocation2 + $0x278] sm:$0xff] %vm2539_vm1, %v2393_v19 }
 0x326   : > { %v1950_v22 = vpop.f32.mrf.mxu0 }
 0x327   : > { %v1951_v23 = vadd.f32 %v12128_v61, %v1950_v22 }
 0x329   : > { %v2394_v24 = vmax.f32 %v1951_v23, 0.0  ;;  %10323 = vmatmul.msk.bf16.gmra.mxu0 %vm1401_vm0, %v11182_v21 }
 0x32a   : > { %v2803_v25 = vld [vmem:[#allocation2 + $0x260] ss:$4 sm:$0xff]  ;;  %v2917_v27 = vld [vmem:[#allocation2 + $0x261] ss:$4 sm:$0xff]  ;;  %v3088_v30 = vld [vmem:[#allocation2 + $0x262] ss:$4 sm:$0xff] }
 0x32b   : > { %v3011_v29 = vmax.f32 %v2803_v25, %v2917_v27  ;;  %2620 = vst.msk [vmem:[#allocation2 + $0x280] sm:$0xff] %vm2539_vm1, %v2394_v24  ;;  %v3259_v35 = vld [vmem:[#allocation2 + $0x263] ss:$4 sm:$0xff] }
 0x32d   : > { %v3182_v31 = vmax.f32 %v3011_v29, %v3088_v30 }
 0x32e   : > { %v1952_v33 = vpop.f32.mrf.mxu0 }
 0x32f   : > { %v1953_v34 = vadd.f32 %v12128_v61, %v1952_v33  ;;  %v3353_v36 = vmax.f32 %v3182_v31, %v3259_v35  ;;  %v11185_v35 = vld [vmem:[%s11605_s2 + $0x198] sm:$0xff] }
 0x331   : > { %v2395_v37 = vmax.f32 %v1953_v34, 0.0 }
 0x332   : > { %v3430_v38 = vld [vmem:[#allocation2 + $0x264] ss:$4 sm:$0xff]  ;;  %v3601_v40 = vld [vmem:[#allocation2 + $0x265] ss:$4 sm:$0xff]  ;;  %v3772_v43 = vld [vmem:[#allocation2 + $0x266] ss:$4 sm:$0xff] }
 0x333   : > { %v3524_v39 = vmax.f32 %v3353_v36, %v3430_v38  ;;  %2621 = vst.msk [vmem:[#allocation2 + $0x288] sm:$0xff] %vm2539_vm1, %v2395_v37  ;;  %v3943_v47 = vld [vmem:[#allocation2 + $0x267] ss:$4 sm:$0xff] }
 0x335   : > { %v3695_v41 = vmax.f32 %v3524_v39, %v3601_v40 }
 0x336   : > { %v1955_v44 = vpop.f32.mrf.mxu0 }
 0x337   : > { %v3866_v45 = vmax.f32 %v3695_v41, %v3772_v43  ;;  %v1956_v46 = vadd.f32 %v12128_v61, %v1955_v44 }
 0x339   : > { %v4037_v48 = vmax.f32 %v3866_v45, %v3943_v47  ;;  %v2396_v49 = vmax.f32 %v1956_v46, 0.0  ;;  %10324 = vmatmul.msk.bf16.gmra.mxu0 %vm1401_vm0, %v11183_v42  ;;  %v11186_v46 = vld [vmem:[%s11605_s2 + $0x1a0] sm:$0xff] }
 0x33b   : > { %4153 = vst.msk [vmem:[#allocation3 + $0x9d] sm:$0xff] %vm2539_vm1, %v4037_v48 }
 0x33c   : > { %2622 = vst.msk [vmem:[#allocation2 + $0x290] sm:$0xff] %vm2539_vm1, %v2396_v49 }
 0x33e   : > { %v1957_v51 = vpop.f32.mrf.mxu0 }
 0x33f   : > { %v1958_v52 = vadd.f32 %v12128_v61, %v1957_v51 }
 0x341   : > { %v2397_v58 = vmax.f32 %v1958_v52, 0.0 }
 0x342   : > { %v4281_v6 = vld [vmem:[#allocation3 + $0x91] ss:$2 sm:$0xff]  ;;  %v4210_v63 = vld [vmem:[#allocation3 + $0x90] ss:$2 sm:$0xff]  ;;  %v4404_v9 = vpop.f32.mrf.mxu1 }
 0x343   : > { %v4602_v0 = vld [vmem:[#allocation3 + $0x92] ss:$2 sm:$0xff]  ;;  %2623 = vst.msk [vmem:[#allocation2 + $0x298] sm:$0xff] %vm2539_vm1, %v2397_v58  ;;  %v4322_v1 = vpack.c.bf16 %v4281_v6, %v4279_v56  ;;  %v4251_v3 = vpack.c.bf16 %v4210_v63, %v4208_v59 }
 0x344   : > { %v4643_v4 = vpack.c.bf16 %v4602_v0, %v4600_v60 }
 0x345   : > { %10393 = vmatmul.msk.bf16.gmra.mxu1 %vm2539_vm1, %v4322_v1  ;;  %10407 = vmatmul.msk.bf16.gmra.mxu2 %vm2539_vm1, %v4251_v3 }
 0x346   : > { %10422 = vmatmul.msk.bf16.gmra.mxu3 %vm2539_vm1, %v4643_v4  ;;  %v1960_v7 = vpop.f32.mrf.mxu0 }
 0x347   : > { %v1961_v8 = vadd.f32 %v12128_v61, %v1960_v7 }
 0x348   : > { %v4528_v10 = vpop.f32.mrf.mxu2 }
 0x349   : > { %v2398_v11 = vmax.f32 %v1961_v8, 0.0  ;;  %v4529_v12 = vadd.f32 %v4528_v10, %v4404_v9  ;;  %10325 = vmatmul.msk.bf16.gmra.mxu0 %vm1401_vm0, %v11184_v15  ;;  %v4724_v17 = vpop.f32.mrf.mxu3  ;;  %v11187_v8 = vld [vmem:[%s11605_s2 + $0x1a8] sm:$0xff] }
 0x34a   : > { %v2805_v13 = vld [vmem:[#allocation2 + $0x280] ss:$4 sm:$0xff]  ;;  %v2919_v16 = vld [vmem:[#allocation2 + $0x281] ss:$4 sm:$0xff]  ;;  %v3090_v21 = vld [vmem:[#allocation2 + $0x282] ss:$4 sm:$0xff] }
 0x34b   : > { %v3012_v18 = vmax.f32 %v2805_v13, %v2919_v16  ;;  %2624 = vst.msk [vmem:[#allocation2 + $0x2a0] sm:$0xff] %vm2539_vm1, %v2398_v11  ;;  %v12165_v19 = vadd.f32 %v4724_v17, %v4529_v12  ;;  %v3261_v25 = vld [vmem:[#allocation2 + $0x283] ss:$4 sm:$0xff] }
 0x34d   : > { %v3183_v22 = vmax.f32 %v3012_v18, %v3090_v21 }
 0x34e   : > { %v1962_v23 = vpop.f32.mrf.mxu0 }
 0x34f   : > { %v1963_v24 = vadd.f32 %v12128_v61, %v1962_v23  ;;  %v3354_v27 = vmax.f32 %v3183_v22, %v3261_v25  ;;  %v11188_v23 = vld [vmem:[%s11605_s2 + $0x1b0] sm:$0xff] }
 0x351   : > { %v2399_v29 = vmax.f32 %v1963_v24, 0.0 }
 0x352   : > { %v3432_v30 = vld [vmem:[#allocation2 + $0x284] ss:$4 sm:$0xff]  ;;  %v3603_v33 = vld [vmem:[#allocation2 + $0x285] ss:$4 sm:$0xff]  ;;  %v3774_v36 = vld [vmem:[#allocation2 + $0x286] ss:$4 sm:$0xff] }
 0x353   : > { %v3525_v31 = vmax.f32 %v3354_v27, %v3432_v30  ;;  %2625 = vst.msk [vmem:[#allocation2 + $0x2a8] sm:$0xff] %vm2539_vm1, %v2399_v29  ;;  %v3945_v40 = vld [vmem:[#allocation2 + $0x287] ss:$4 sm:$0xff] }
 0x355   : > { %v3696_v34 = vmax.f32 %v3525_v31, %v3603_v33 }
 0x356   : > { %v1965_v37 = vpop.f32.mrf.mxu0 }
 0x357   : > { %v3867_v38 = vmax.f32 %v3696_v34, %v3774_v36  ;;  %v1966_v39 = vadd.f32 %v12128_v61, %v1965_v37 }
 0x359   : > { %v4038_v41 = vmax.f32 %v3867_v38, %v3945_v40  ;;  %v2400_v42 = vmax.f32 %v1966_v39, 0.0  ;;  %10326 = vmatmul.msk.bf16.gmra.mxu0 %vm1401_vm0, %v11185_v35 }
 0x35b   : > { %4154 = vst.msk [vmem:[#allocation3 + $0xa5] sm:$0xff] %vm2539_vm1, %v4038_v41 }
 0x35c   : > { %2626 = vst.msk [vmem:[#allocation2 + $0x2b0] sm:$0xff] %vm2539_vm1, %v2400_v42 }
 0x35e   : > { %v1967_v43 = vpop.f32.mrf.mxu0 }
 0x35f   : > { %v1968_v44 = vadd.f32 %v12128_v61, %v1967_v43 }
 0x361   : > { %v2401_v45 = vmax.f32 %v1968_v44, 0.0  ;;  %v11189_v44 = vld [vmem:[%s11605_s2 + $0x1b8] sm:$0xff] }
 0x363   : > { %2627 = vst.msk [vmem:[#allocation2 + $0x2b8] sm:$0xff] %vm2539_vm1, %v2401_v45 }
 0x366   : > { %v1970_v47 = vpop.f32.mrf.mxu0 }
 0x367   : > { %v1971_v48 = vadd.f32 %v12128_v61, %v1970_v47 }
 0x369   : > { %v2402_v49 = vmax.f32 %v1971_v48, 0.0  ;;  %10327 = vmatmul.msk.bf16.gmra.mxu0 %vm1401_vm0, %v11186_v46 }
 0x36a   : > { %v2807_v51 = vld [vmem:[#allocation2 + $0x2a0] ss:$4 sm:$0xff]  ;;  %v2921_v52 = vld [vmem:[#allocation2 + $0x2a1] ss:$4 sm:$0xff]  ;;  %v3092_v58 = vld [vmem:[#allocation2 + $0x2a2] ss:$4 sm:$0xff] }
 0x36b   : > { %v3013_v56 = vmax.f32 %v2807_v51, %v2921_v52  ;;  %2628 = vst.msk [vmem:[#allocation2 + $0x2c0] sm:$0xff] %vm2539_vm1, %v2402_v49  ;;  %v3263_v63 = vld [vmem:[#allocation2 + $0x2a3] ss:$4 sm:$0xff] }
 0x36d   : > { %v3184_v59 = vmax.f32 %v3013_v56, %v3092_v58 }
 0x36e   : > { %v1972_v60 = vpop.f32.mrf.mxu0 }
 0x36f   : > { %v1973_v6 = vadd.f32 %v12128_v61, %v1972_v60  ;;  %v3355_v0 = vmax.f32 %v3184_v59, %v3263_v63  ;;  %v11190_v60 = vld [vmem:[%s11605_s2 + $0x1c0] sm:$0xff] }
 0x371   : > { %v2403_v1 = vmax.f32 %v1973_v6, 0.0 }
 0x372   : > { %v3434_v3 = vld [vmem:[#allocation2 + $0x2a4] ss:$4 sm:$0xff]  ;;  %v3605_v15 = vld [vmem:[#allocation2 + $0x2a5] ss:$4 sm:$0xff]  ;;  %v3776_v9 = vld [vmem:[#allocation2 + $0x2a6] ss:$4 sm:$0xff] }
 0x373   : > { %v3526_v4 = vmax.f32 %v3355_v0, %v3434_v3  ;;  %2629 = vst.msk [vmem:[#allocation2 + $0x2c8] sm:$0xff] %vm2539_vm1, %v2403_v1  ;;  %v3947_v13 = vld [vmem:[#allocation2 + $0x2a7] ss:$4 sm:$0xff] }
 0x375   : > { %v3697_v7 = vmax.f32 %v3526_v4, %v3605_v15 }
 0x376   : > { %v1975_v10 = vpop.f32.mrf.mxu0 }
 0x377   : > { %v3868_v11 = vmax.f32 %v3697_v7, %v3776_v9  ;;  %v1976_v12 = vadd.f32 %v12128_v61, %v1975_v10 }
 0x379   : > { %v4039_v16 = vmax.f32 %v3868_v11, %v3947_v13  ;;  %v2404_v17 = vmax.f32 %v1976_v12, 0.0  ;;  %10328 = vmatmul.msk.bf16.gmra.mxu0 %vm1401_vm0, %v11187_v8 }
 0x37b   : > { %4155 = vst.msk [vmem:[#allocation3 + $0xad] sm:$0xff] %vm2539_vm1, %v4039_v16 }
 0x37c   : > { %2630 = vst.msk [vmem:[#allocation2 + $0x2d0] sm:$0xff] %vm2539_vm1, %v2404_v17 }
 0x37e   : > { %v1977_v18 = vpop.f32.mrf.mxu0 }
 0x37f   : > { %v1978_v21 = vadd.f32 %v12128_v61, %v1977_v18 }
 0x381   : > { %v2405_v22 = vmax.f32 %v1978_v21, 0.0  ;;  %v11191_v21 = vld [vmem:[%s11605_s2 + $0x1c8] sm:$0xff] }
 0x383   : > { %2631 = vst.msk [vmem:[#allocation2 + $0x2d8] sm:$0xff] %vm2539_vm1, %v2405_v22 }
 0x386   : > { %v1980_v24 = vpop.f32.mrf.mxu0 }
 0x387   : > { %v1981_v25 = vadd.f32 %v12128_v61, %v1980_v24 }
 0x389   : > { %v2406_v27 = vmax.f32 %v1981_v25, 0.0  ;;  %10329 = vmatmul.msk.bf16.gmra.mxu0 %vm1401_vm0, %v11188_v23 }
 0x38a   : > { %v2809_v29 = vld [vmem:[#allocation2 + $0x2c0] ss:$4 sm:$0xff]  ;;  %v2923_v30 = vld [vmem:[#allocation2 + $0x2c1] ss:$4 sm:$0xff]  ;;  %v3094_v33 = vld [vmem:[#allocation2 + $0x2c2] ss:$4 sm:$0xff] }
 0x38b   : > { %v3014_v31 = vmax.f32 %v2809_v29, %v2923_v30  ;;  %2632 = vst.msk [vmem:[#allocation2 + $0x2e0] sm:$0xff] %vm2539_vm1, %v2406_v27  ;;  %v3265_v37 = vld [vmem:[#allocation2 + $0x2c3] ss:$4 sm:$0xff] }
 0x38d   : > { %v3185_v34 = vmax.f32 %v3014_v31, %v3094_v33 }
 0x38e   : > { %v1982_v35 = vpop.f32.mrf.mxu0 }
 0x38f   : > { %v1983_v36 = vadd.f32 %v12128_v61, %v1982_v35  ;;  %v3356_v38 = vmax.f32 %v3185_v34, %v3265_v37  ;;  %v12214_v34 = vpop.f32.mrf.mxu1  ;;  %v12216_v35 = vpop.f32.mrf.mxu2 }
 0x391   : > { %v2407_v39 = vmax.f32 %v1983_v36, 0.0  ;;  %v4283_v36 = vld [vmem:[#allocation3 + $0xa1] ss:$2 sm:$0xff] }
 0x392   : > { %v3436_v40 = vld [vmem:[#allocation2 + $0x2c4] ss:$4 sm:$0xff]  ;;  %v3607_v42 = vld [vmem:[#allocation2 + $0x2c5] ss:$4 sm:$0xff]  ;;  %v3778_v45 = vld [vmem:[#allocation2 + $0x2c6] ss:$4 sm:$0xff] }
 0x393   : > { %v3527_v41 = vmax.f32 %v3356_v38, %v3436_v40  ;;  %2633 = vst.msk [vmem:[#allocation2 + $0x2e8] sm:$0xff] %vm2539_vm1, %v2407_v39  ;;  %v3949_v49 = vld [vmem:[#allocation2 + $0x2c7] ss:$4 sm:$0xff]  ;;  %v4212_v38 = vld [vmem:[#allocation3 + $0xa0] ss:$2 sm:$0xff]  ;;  %v12218_v40 = vpop.f32.mrf.mxu3 }
 0x394   : > { %v4604_v39 = vld [vmem:[#allocation3 + $0xa2] ss:$2 sm:$0xff] }
 0x395   : > { %v3698_v43 = vmax.f32 %v3527_v41, %v3607_v42 }
 0x396   : > { %v1985_v46 = vpop.f32.mrf.mxu0 }
 0x397   : > { %v3869_v47 = vmax.f32 %v3698_v43, %v3778_v45  ;;  %v1986_v48 = vadd.f32 %v12128_v61, %v1985_v46 }
 0x399   : > { %v4040_v51 = vmax.f32 %v3869_v47, %v3949_v49  ;;  %v2408_v52 = vmax.f32 %v1986_v48, 0.0  ;;  %10330 = vmatmul.msk.bf16.gmra.mxu0 %vm1401_vm0, %v11189_v44  ;;  %v11192_v47 = vld [vmem:[%s11605_s2 + $0x1d0] sm:$0xff] }
 0x39b   : > { %4156 = vst.msk [vmem:[#allocation3 + $0xb5] sm:$0xff] %vm2539_vm1, %v4040_v51 }
 0x39c   : > { %2634 = vst.msk [vmem:[#allocation2 + $0x2f0] sm:$0xff] %vm2539_vm1, %v2408_v52 }
 0x39e   : > { %v1987_v56 = vpop.f32.mrf.mxu0 }
 0x39f   : > { %v1988_v58 = vadd.f32 %v12128_v61, %v1987_v56 }
 0x3a1   : > { %v2409_v59 = vmax.f32 %v1988_v58, 0.0 }
 0x3a3   : > { %2635 = vst.msk [vmem:[#allocation2 + $0x2f8] sm:$0xff] %vm2539_vm1, %v2409_v59 }
 0x3a6   : > { %v1990_v6 = vpop.f32.mrf.mxu0 }
 0x3a7   : > { %v1991_v63 = vadd.f32 %v12128_v61, %v1990_v6 }
 0x3a9   : > { %v2410_v0 = vmax.f32 %v1991_v63, 0.0  ;;  %10331 = vmatmul.msk.bf16.gmra.mxu0 %vm1401_vm0, %v11190_v60 }
 0x3aa   : > { %v2811_v1 = vld [vmem:[#allocation2 + $0x2e0] ss:$4 sm:$0xff]  ;;  %v2925_v3 = vld [vmem:[#allocation2 + $0x2e1] ss:$4 sm:$0xff]  ;;  %v3096_v15 = vld [vmem:[#allocation2 + $0x2e2] ss:$4 sm:$0xff] }
 0x3ab   : > { %v3015_v4 = vmax.f32 %v2811_v1, %v2925_v3  ;;  %2636 = vst.msk [vmem:[#allocation2 + $0x300] sm:$0xff] %vm2539_vm1, %v2410_v0  ;;  %v3267_v10 = vld [vmem:[#allocation2 + $0x2e3] ss:$4 sm:$0xff] }
 0x3ad   : > { %v3186_v7 = vmax.f32 %v3015_v4, %v3096_v15 }
 0x3ae   : > { %v1992_v8 = vpop.f32.mrf.mxu0 }
 0x3af   : > { %v1993_v9 = vadd.f32 %v12128_v61, %v1992_v8  ;;  %v3357_v11 = vmax.f32 %v3186_v7, %v3267_v10 }
 0x3b1   : > { %v2411_v12 = vmax.f32 %v1993_v9, 0.0 }
 0x3b2   : > { %v3438_v13 = vld [vmem:[#allocation2 + $0x2e4] ss:$4 sm:$0xff]  ;;  %v3609_v17 = vld [vmem:[#allocation2 + $0x2e5] ss:$4 sm:$0xff]  ;;  %v3780_v22 = vld [vmem:[#allocation2 + $0x2e6] ss:$4 sm:$0xff] }
 0x3b3   : > { %v3528_v16 = vmax.f32 %v3357_v11, %v3438_v13  ;;  %2637 = vst.msk [vmem:[#allocation2 + $0x308] sm:$0xff] %vm2539_vm1, %v2411_v12  ;;  %v3951_v27 = vld [vmem:[#allocation2 + $0x2e7] ss:$4 sm:$0xff] }
 0x3b5   : > { %v3699_v18 = vmax.f32 %v3528_v16, %v3609_v17  ;;  %v11193_v16 = vld [vmem:[%s11605_s2 + $0x1d8] sm:$0xff] }
 0x3b6   : > { %v1995_v23 = vpop.f32.mrf.mxu0 }
 0x3b7   : > { %v3870_v24 = vmax.f32 %v3699_v18, %v3780_v22  ;;  %v1996_v25 = vadd.f32 %v12128_v61, %v1995_v23 }
 0x3b9   : > { %v4041_v29 = vmax.f32 %v3870_v24, %v3951_v27  ;;  %v2412_v30 = vmax.f32 %v1996_v25, 0.0  ;;  %10332 = vmatmul.msk.bf16.gmra.mxu0 %vm1401_vm0, %v11191_v21 }
 0x3bb   : > { %4157 = vst.msk [vmem:[#allocation3 + $0xbd] sm:$0xff] %vm2539_vm1, %v4041_v29 }
 0x3bc   : > { %2638 = vst.msk [vmem:[#allocation2 + $0x310] sm:$0xff] %vm2539_vm1, %v2412_v30 }
 0x3be   : > { %v1997_v31 = vpop.f32.mrf.mxu0 }
 0x3bf   : > { %v1998_v33 = vadd.f32 %v12128_v61, %v1997_v31  ;;  %v11194_v31 = vld [vmem:[%s11605_s2 + $0x1e0] sm:$0xff] }
 0x3c1   : > { %v2413_v37 = vmax.f32 %v1998_v33, 0.0 }
 0x3c2   : > { %v4285_v41 = vld [vmem:[#allocation3 + $0xb1] ss:$2 sm:$0xff]  ;;  %v4214_v42 = vld [vmem:[#allocation3 + $0xb0] ss:$2 sm:$0xff]  ;;  %v4409_v51 = vpop.f32.mrf.mxu1 }
 0x3c3   : > { %v4606_v43 = vld [vmem:[#allocation3 + $0xb2] ss:$2 sm:$0xff]  ;;  %2639 = vst.msk [vmem:[#allocation2 + $0x318] sm:$0xff] %vm2539_vm1, %v2413_v37  ;;  %v4323_v44 = vpack.c.bf16 %v4285_v41, %v4283_v36  ;;  %v4252_v45 = vpack.c.bf16 %v4214_v42, %v4212_v38  ;;  %v4830_v28 = vld [vmem:[#allocation3 + $0xb3] ss:$2 sm:$0xff] }
 0x3c4   : > { %v4644_v46 = vpack.c.bf16 %v4606_v43, %v4604_v39 }
 0x3c5   : > { %10394 = vmatmul.msk.bf16.gmra.mxu1 %vm2539_vm1, %v4323_v44  ;;  %10408 = vmatmul.msk.bf16.gmra.mxu2 %vm2539_vm1, %v4252_v45 }
 0x3c6   : > { %10423 = vmatmul.msk.bf16.gmra.mxu3 %vm2539_vm1, %v4644_v46  ;;  %v2000_v48 = vpop.f32.mrf.mxu0 }
 0x3c7   : > { %v2001_v49 = vadd.f32 %v12128_v61, %v2000_v48 }
 0x3c8   : > { %v4533_v52 = vpop.f32.mrf.mxu2 }
 0x3c9   : > { %v2414_v56 = vmax.f32 %v2001_v49, 0.0  ;;  %v4534_v58 = vadd.f32 %v4533_v52, %v4409_v51  ;;  %10333 = vmatmul.msk.bf16.gmra.mxu0 %vm1401_vm0, %v11192_v47  ;;  %v4729_v6 = vpop.f32.mrf.mxu3 }
 0x3ca   : > { %v2813_v59 = vld [vmem:[#allocation2 + $0x300] ss:$4 sm:$0xff]  ;;  %v2927_v60 = vld [vmem:[#allocation2 + $0x301] ss:$4 sm:$0xff]  ;;  %v3098_v1 = vld [vmem:[#allocation2 + $0x302] ss:$4 sm:$0xff] }
 0x3cb   : > { %v3016_v63 = vmax.f32 %v2813_v59, %v2927_v60  ;;  %2640 = vst.msk [vmem:[#allocation2 + $0x320] sm:$0xff] %vm2539_vm1, %v2414_v56  ;;  %v12228_v0 = vadd.f32 %v4729_v6, %v4534_v58  ;;  %v3269_v7 = vld [vmem:[#allocation2 + $0x303] ss:$4 sm:$0xff] }
 0x3cc   : > { %v11195_v58 = vld [vmem:[%s11605_s2 + $0x1e8] sm:$0xff] }
 0x3cd   : > { %v3187_v3 = vmax.f32 %v3016_v63, %v3098_v1 }
 0x3ce   : > { %v2002_v4 = vpop.f32.mrf.mxu0 }
 0x3cf   : > { %v2003_v15 = vadd.f32 %v12128_v61, %v2002_v4  ;;  %v3358_v8 = vmax.f32 %v3187_v3, %v3269_v7 }
 0x3d1   : > { %v2415_v9 = vmax.f32 %v2003_v15, 0.0 }
 0x3d2   : > { %v3440_v10 = vld [vmem:[#allocation2 + $0x304] ss:$4 sm:$0xff]  ;;  %v3611_v12 = vld [vmem:[#allocation2 + $0x305] ss:$4 sm:$0xff]  ;;  %v3782_v17 = vld [vmem:[#allocation2 + $0x306] ss:$4 sm:$0xff] }
 0x3d3   : > { %v3529_v11 = vmax.f32 %v3358_v8, %v3440_v10  ;;  %2641 = vst.msk [vmem:[#allocation2 + $0x328] sm:$0xff] %vm2539_vm1, %v2415_v9  ;;  %v3953_v23 = vld [vmem:[#allocation2 + $0x307] ss:$4 sm:$0xff] }
 0x3d4   : > { %v11196_v9 = vld [vmem:[%s11605_s2 + $0x1f0] sm:$0xff] }
 0x3d5   : > { %v3700_v13 = vmax.f32 %v3529_v11, %v3611_v12 }
 0x3d6   : > { %v2005_v18 = vpop.f32.mrf.mxu0 }
 0x3d7   : > { %v3871_v21 = vmax.f32 %v3700_v13, %v3782_v17  ;;  %v2006_v22 = vadd.f32 %v12128_v61, %v2005_v18 }
 0x3d9   : > { %v4042_v24 = vmax.f32 %v3871_v21, %v3953_v23  ;;  %v2416_v25 = vmax.f32 %v2006_v22, 0.0  ;;  %10334 = vmatmul.msk.bf16.gmra.mxu0 %vm1401_vm0, %v11193_v16 }
 0x3db   : > { %4158 = vst.msk [vmem:[#allocation3 + $0xc5] sm:$0xff] %vm2539_vm1, %v4042_v24 }
 0x3dc   : > { %2642 = vst.msk [vmem:[#allocation2 + $0x330] sm:$0xff] %vm2539_vm1, %v2416_v25 }
 0x3de   : > { %v2007_v27 = vpop.f32.mrf.mxu0 }
 0x3df   : > { %v2008_v29 = vadd.f32 %v12128_v61, %v2007_v27 }
 0x3e1   : > { %v2417_v30 = vmax.f32 %v2008_v29, 0.0 }
 0x3e3   : > { %2643 = vst.msk [vmem:[#allocation2 + $0x338] sm:$0xff] %vm2539_vm1, %v2417_v30 }
 0x3e6   : > { %v2010_v33 = vpop.f32.mrf.mxu0 }
 0x3e7   : > { %v2011_v36 = vadd.f32 %v12128_v61, %v2010_v33 }
 0x3e9   : > { %v2418_v37 = vmax.f32 %v2011_v36, 0.0  ;;  %10335 = vmatmul.msk.bf16.gmra.mxu0 %vm1401_vm0, %v11194_v31  ;;  %v11197_v36 = vld [vmem:[%s11605_s2 + $0x1f8] sm:$0xff] }
 0x3ea   : > { %v2815_v38 = vld [vmem:[#allocation2 + $0x320] ss:$4 sm:$0xff]  ;;  %v2929_v39 = vld [vmem:[#allocation2 + $0x321] ss:$4 sm:$0xff]  ;;  %v3100_v42 = vld [vmem:[#allocation2 + $0x322] ss:$4 sm:$0xff] }
 0x3eb   : > { %v3017_v41 = vmax.f32 %v2815_v38, %v2929_v39  ;;  %2644 = vst.msk [vmem:[#allocation2 + $0x340] sm:$0xff] %vm2539_vm1, %v2418_v37  ;;  %v3271_v46 = vld [vmem:[#allocation2 + $0x323] ss:$4 sm:$0xff] }
 0x3ed   : > { %v3188_v43 = vmax.f32 %v3017_v41, %v3100_v42 }
 0x3ee   : > { %v2012_v44 = vpop.f32.mrf.mxu0 }
 0x3ef   : > { %v2013_v45 = vadd.f32 %v12128_v61, %v2012_v44  ;;  %v3359_v47 = vmax.f32 %v3188_v43, %v3271_v46 }
 0x3f1   : > { %v2419_v48 = vmax.f32 %v2013_v45, 0.0 }
 0x3f2   : > { %v3442_v49 = vld [vmem:[#allocation2 + $0x324] ss:$4 sm:$0xff]  ;;  %v3613_v52 = vld [vmem:[#allocation2 + $0x325] ss:$4 sm:$0xff]  ;;  %v3784_v59 = vld [vmem:[#allocation2 + $0x326] ss:$4 sm:$0xff] }
 0x3f3   : > { %v3530_v51 = vmax.f32 %v3359_v47, %v3442_v49  ;;  %2645 = vst.msk [vmem:[#allocation2 + $0x348] sm:$0xff] %vm2539_vm1, %v2419_v48  ;;  %v3955_v1 = vld [vmem:[#allocation2 + $0x327] ss:$4 sm:$0xff] }
 0x3f4   : > { %v11198_v48 = vld [vmem:[%s11605_s2 + $0x200] sm:$0xff] }
 0x3f5   : > { %v3701_v56 = vmax.f32 %v3530_v51, %v3613_v52 }
 0x3f6   : > { %v2015_v60 = vpop.f32.mrf.mxu0 }
 0x3f7   : > { %v3872_v6 = vmax.f32 %v3701_v56, %v3784_v59  ;;  %v2016_v63 = vadd.f32 %v12128_v61, %v2015_v60 }
 0x3f9   : > { %v4043_v3 = vmax.f32 %v3872_v6, %v3955_v1  ;;  %v2420_v4 = vmax.f32 %v2016_v63, 0.0  ;;  %10336 = vmatmul.msk.bf16.gmra.mxu0 %vm1401_vm0, %v11195_v58 }
 0x3fb   : > { %4159 = vst.msk [vmem:[#allocation3 + $0xcd] sm:$0xff] %vm2539_vm1, %v4043_v3 }
 0x3fc   : > { %2646 = vst.msk [vmem:[#allocation2 + $0x350] sm:$0xff] %vm2539_vm1, %v2420_v4 }
 0x3fe   : > { %v2017_v15 = vpop.f32.mrf.mxu0 }
 0x3ff   : > { %v2018_v7 = vadd.f32 %v12128_v61, %v2017_v15 }
 0x401   : > { %v2421_v8 = vmax.f32 %v2018_v7, 0.0 }
 0x403   : > { %2647 = vst.msk [vmem:[#allocation2 + $0x358] sm:$0xff] %vm2539_vm1, %v2421_v8 }
 0x406   : > { %v2020_v10 = vpop.f32.mrf.mxu0 }
 0x407   : > { %v2021_v11 = vadd.f32 %v12128_v61, %v2020_v10 }
 0x409   : > { %v2422_v12 = vmax.f32 %v2021_v11, 0.0  ;;  %10337 = vmatmul.msk.bf16.gmra.mxu0 %vm1401_vm0, %v11196_v9  ;;  %v11199_v11 = vld [vmem:[%s11605_s2 + $0x208] sm:$0xff] }
 0x40a   : > { %v2817_v13 = vld [vmem:[#allocation2 + $0x340] ss:$4 sm:$0xff]  ;;  %v2931_v16 = vld [vmem:[#allocation2 + $0x341] ss:$4 sm:$0xff]  ;;  %v3102_v18 = vld [vmem:[#allocation2 + $0x342] ss:$4 sm:$0xff] }
 0x40b   : > { %v3018_v17 = vmax.f32 %v2817_v13, %v2931_v16  ;;  %2648 = vst.msk [vmem:[#allocation2 + $0x360] sm:$0xff] %vm2539_vm1, %v2422_v12  ;;  %v3273_v24 = vld [vmem:[#allocation2 + $0x343] ss:$4 sm:$0xff] }
 0x40d   : > { %v3189_v21 = vmax.f32 %v3018_v17, %v3102_v18 }
 0x40e   : > { %v2022_v22 = vpop.f32.mrf.mxu0 }
 0x40f   : > { %v2023_v23 = vadd.f32 %v12128_v61, %v2022_v22  ;;  %v3360_v25 = vmax.f32 %v3189_v21, %v3273_v24 }
 0x411   : > { %v2423_v27 = vmax.f32 %v2023_v23, 0.0 }
 0x412   : > { %v3444_v29 = vld [vmem:[#allocation2 + $0x344] ss:$4 sm:$0xff]  ;;  %v3615_v31 = vld [vmem:[#allocation2 + $0x345] ss:$4 sm:$0xff]  ;;  %v3786_v37 = vld [vmem:[#allocation2 + $0x346] ss:$4 sm:$0xff] }
 0x413   : > { %v3531_v30 = vmax.f32 %v3360_v25, %v3444_v29  ;;  %2649 = vst.msk [vmem:[#allocation2 + $0x368] sm:$0xff] %vm2539_vm1, %v2423_v27  ;;  %v3957_v42 = vld [vmem:[#allocation2 + $0x347] ss:$4 sm:$0xff]  ;;  %v12277_v25 = vpop.f32.mrf.mxu1  ;;  %v12279_v27 = vpop.f32.mrf.mxu2 }
 0x414   : > { %v4287_v29 = vld [vmem:[#allocation3 + $0xc1] ss:$2 sm:$0xff] }
 0x415   : > { %v3702_v33 = vmax.f32 %v3531_v30, %v3615_v31  ;;  %v4216_v31 = vld [vmem:[#allocation3 + $0xc0] ss:$2 sm:$0xff] }
 0x416   : > { %v2025_v38 = vpop.f32.mrf.mxu0 }
 0x417   : > { %v3873_v39 = vmax.f32 %v3702_v33, %v3786_v37  ;;  %v2026_v41 = vadd.f32 %v12128_v61, %v2025_v38  ;;  %v4608_v33 = vld [vmem:[#allocation3 + $0xc2] ss:$2 sm:$0xff] }
 0x419   : > { %v4044_v43 = vmax.f32 %v3873_v39, %v3957_v42  ;;  %v2424_v44 = vmax.f32 %v2026_v41, 0.0  ;;  %10338 = vmatmul.msk.bf16.gmra.mxu0 %vm1401_vm0, %v11197_v36  ;;  %v12281_v36 = vpop.f32.mrf.mxu3 }
 0x41b   : > { %4160 = vst.msk [vmem:[#allocation3 + $0xd5] sm:$0xff] %vm2539_vm1, %v4044_v43 }
 0x41c   : > { %2650 = vst.msk [vmem:[#allocation2 + $0x370] sm:$0xff] %vm2539_vm1, %v2424_v44  ;;  %v11200_v44 = vld [vmem:[%s11605_s2 + $0x210] sm:$0xff] }
 0x41e   : > { %v2027_v45 = vpop.f32.mrf.mxu0 }
 0x41f   : > { %v2028_v46 = vadd.f32 %v12128_v61, %v2027_v45 }
 0x421   : > { %v2425_v47 = vmax.f32 %v2028_v46, 0.0 }
 0x423   : > { %2651 = vst.msk [vmem:[#allocation2 + $0x378] sm:$0xff] %vm2539_vm1, %v2425_v47 }
 0x426   : > { %v2030_v49 = vpop.f32.mrf.mxu0 }
 0x427   : > { %v2031_v51 = vadd.f32 %v12128_v61, %v2030_v49 }
 0x429   : > { %v2426_v52 = vmax.f32 %v2031_v51, 0.0  ;;  %10339 = vmatmul.msk.bf16.gmra.mxu0 %vm1401_vm0, %v11198_v48 }
 0x42a   : > { %v2819_v56 = vld [vmem:[#allocation2 + $0x360] ss:$4 sm:$0xff]  ;;  %v2933_v58 = vld [vmem:[#allocation2 + $0x361] ss:$4 sm:$0xff]  ;;  %v3104_v60 = vld [vmem:[#allocation2 + $0x362] ss:$4 sm:$0xff] }
 0x42b   : > { %v3019_v59 = vmax.f32 %v2819_v56, %v2933_v58  ;;  %2652 = vst.msk [vmem:[#allocation2 + $0x380] sm:$0xff] %vm2539_vm1, %v2426_v52  ;;  %v3275_v3 = vld [vmem:[#allocation2 + $0x363] ss:$4 sm:$0xff] }
 0x42d   : > { %v3190_v6 = vmax.f32 %v3019_v59, %v3104_v60 }
 0x42e   : > { %v2032_v63 = vpop.f32.mrf.mxu0 }
 0x42f   : > { %v2033_v1 = vadd.f32 %v12128_v61, %v2032_v63  ;;  %v3361_v4 = vmax.f32 %v3190_v6, %v3275_v3 }
 0x431   : > { %v2427_v15 = vmax.f32 %v2033_v1, 0.0 }
 0x432   : > { %v3446_v7 = vld [vmem:[#allocation2 + $0x364] ss:$4 sm:$0xff]  ;;  %v3617_v9 = vld [vmem:[#allocation2 + $0x365] ss:$4 sm:$0xff]  ;;  %v3788_v12 = vld [vmem:[#allocation2 + $0x366] ss:$4 sm:$0xff] }
 0x433   : > { %v3532_v8 = vmax.f32 %v3361_v4, %v3446_v7  ;;  %2653 = vst.msk [vmem:[#allocation2 + $0x388] sm:$0xff] %vm2539_vm1, %v2427_v15  ;;  %v3959_v18 = vld [vmem:[#allocation2 + $0x367] ss:$4 sm:$0xff] }
 0x435   : > { %v3703_v10 = vmax.f32 %v3532_v8, %v3617_v9 }
 0x436   : > { %v2035_v13 = vpop.f32.mrf.mxu0 }
 0x437   : > { %v3874_v16 = vmax.f32 %v3703_v10, %v3788_v12  ;;  %v2036_v17 = vadd.f32 %v12128_v61, %v2035_v13  ;;  %v11201_v12 = vld [vmem:[%s11605_s2 + $0x218] sm:$0xff] }
 0x439   : > { %v4045_v21 = vmax.f32 %v3874_v16, %v3959_v18  ;;  %v2428_v22 = vmax.f32 %v2036_v17, 0.0  ;;  %10340 = vmatmul.msk.bf16.gmra.mxu0 %vm1401_vm0, %v11199_v11 }
 0x43b   : > { %4161 = vst.msk [vmem:[#allocation3 + $0xdd] sm:$0xff] %vm2539_vm1, %v4045_v21 }
 0x43c   : > { %2654 = vst.msk [vmem:[#allocation2 + $0x390] sm:$0xff] %vm2539_vm1, %v2428_v22 }
 0x43e   : > { %v2037_v23 = vpop.f32.mrf.mxu0 }
 0x43f   : > { %v2038_v24 = vadd.f32 %v12128_v61, %v2037_v23 }
 0x441   : > { %v2429_v30 = vmax.f32 %v2038_v24, 0.0 }
 0x442   : > { %v4289_v37 = vld [vmem:[#allocation3 + $0xd1] ss:$2 sm:$0xff]  ;;  %v4218_v38 = vld [vmem:[#allocation3 + $0xd0] ss:$2 sm:$0xff]  ;;  %v4414_v47 = vpop.f32.mrf.mxu1 }
 0x443   : > { %v4610_v39 = vld [vmem:[#allocation3 + $0xd2] ss:$2 sm:$0xff]  ;;  %2655 = vst.msk [vmem:[#allocation2 + $0x398] sm:$0xff] %vm2539_vm1, %v2429_v30  ;;  %v4324_v41 = vpack.c.bf16 %v4289_v37, %v4287_v29  ;;  %v4253_v42 = vpack.c.bf16 %v4218_v38, %v4216_v31 }
 0x444   : > { %v4645_v43 = vpack.c.bf16 %v4610_v39, %v4608_v33  ;;  %v11202_v31 = vld [vmem:[%s11605_s2 + $0x220] sm:$0xff] }
 0x445   : > { %10395 = vmatmul.msk.bf16.gmra.mxu1 %vm2539_vm1, %v4324_v41  ;;  %10409 = vmatmul.msk.bf16.gmra.mxu2 %vm2539_vm1, %v4253_v42 }
 0x446   : > { %10424 = vmatmul.msk.bf16.gmra.mxu3 %vm2539_vm1, %v4645_v43  ;;  %v2040_v45 = vpop.f32.mrf.mxu0 }
 0x447   : > { %v2041_v46 = vadd.f32 %v12128_v61, %v2040_v45 }
 0x448   : > { %v4538_v48 = vpop.f32.mrf.mxu2 }
 0x449   : > { %v2430_v49 = vmax.f32 %v2041_v46, 0.0  ;;  %v4539_v51 = vadd.f32 %v4538_v48, %v4414_v47  ;;  %10341 = vmatmul.msk.bf16.gmra.mxu0 %vm1401_vm0, %v11200_v44  ;;  %v4734_v58 = vpop.f32.mrf.mxu3 }
 0x44a   : > { %v2821_v52 = vld [vmem:[#allocation2 + $0x380] ss:$4 sm:$0xff]  ;;  %v2935_v56 = vld [vmem:[#allocation2 + $0x381] ss:$4 sm:$0xff]  ;;  %v3106_v6 = vld [vmem:[#allocation2 + $0x382] ss:$4 sm:$0xff] }
 0x44b   : > { %v3020_v59 = vmax.f32 %v2821_v52, %v2935_v56  ;;  %2656 = vst.msk [vmem:[#allocation2 + $0x3a0] sm:$0xff] %vm2539_vm1, %v2430_v49  ;;  %v12291_v60 = vadd.f32 %v4734_v58, %v4539_v51  ;;  %v3277_v4 = vld [vmem:[#allocation2 + $0x383] ss:$4 sm:$0xff] }
 0x44d   : > { %v3191_v63 = vmax.f32 %v3020_v59, %v3106_v6  ;;  %v11203_v59 = vld [vmem:[%s11605_s2 + $0x228] sm:$0xff] }
 0x44e   : > { %v2042_v1 = vpop.f32.mrf.mxu0 }
 0x44f   : > { %v2043_v3 = vadd.f32 %v12128_v61, %v2042_v1  ;;  %v3362_v15 = vmax.f32 %v3191_v63, %v3277_v4 }
 0x451   : > { %v2431_v7 = vmax.f32 %v2043_v3, 0.0 }
 0x452   : > { %v3448_v8 = vld [vmem:[#allocation2 + $0x384] ss:$4 sm:$0xff]  ;;  %v3619_v10 = vld [vmem:[#allocation2 + $0x385] ss:$4 sm:$0xff]  ;;  %v3790_v13 = vld [vmem:[#allocation2 + $0x386] ss:$4 sm:$0xff] }
 0x453   : > { %v3533_v9 = vmax.f32 %v3362_v15, %v3448_v8  ;;  %2657 = vst.msk [vmem:[#allocation2 + $0x3a8] sm:$0xff] %vm2539_vm1, %v2431_v7  ;;  %v3961_v21 = vld [vmem:[#allocation2 + $0x387] ss:$4 sm:$0xff] }
 0x455   : > { %v3704_v11 = vmax.f32 %v3533_v9, %v3619_v10 }
 0x456   : > { %v2045_v16 = vpop.f32.mrf.mxu0 }
 0x457   : > { %v3875_v17 = vmax.f32 %v3704_v11, %v3790_v13  ;;  %v2046_v18 = vadd.f32 %v12128_v61, %v2045_v16  ;;  %v11204_v11 = vld [vmem:[%s11605_s2 + $0x230] sm:$0xff] }
 0x459   : > { %v4046_v22 = vmax.f32 %v3875_v17, %v3961_v21  ;;  %v2432_v23 = vmax.f32 %v2046_v18, 0.0  ;;  %10342 = vmatmul.msk.bf16.gmra.mxu0 %vm1401_vm0, %v11201_v12 }
 0x45b   : > { %4162 = vst.msk [vmem:[#allocation3 + $0xe5] sm:$0xff] %vm2539_vm1, %v4046_v22 }
 0x45c   : > { %2658 = vst.msk [vmem:[#allocation2 + $0x3b0] sm:$0xff] %vm2539_vm1, %v2432_v23 }
 0x45e   : > { %v2047_v24 = vpop.f32.mrf.mxu0 }
 0x45f   : > { %v2048_v29 = vadd.f32 %v12128_v61, %v2047_v24 }
 0x461   : > { %v2433_v30 = vmax.f32 %v2048_v29, 0.0 }
 0x463   : > { %2659 = vst.msk [vmem:[#allocation2 + $0x3b8] sm:$0xff] %vm2539_vm1, %v2433_v30 }
 0x466   : > { %v2050_v33 = vpop.f32.mrf.mxu0 }
 0x467   : > { %v2051_v37 = vadd.f32 %v12128_v61, %v2050_v33 }
 0x469   : > { %v2434_v38 = vmax.f32 %v2051_v37, 0.0  ;;  %10343 = vmatmul.msk.bf16.gmra.mxu0 %vm1401_vm0, %v11202_v31 }
 0x46a   : > { %v2823_v39 = vld [vmem:[#allocation2 + $0x3a0] ss:$4 sm:$0xff]  ;;  %v2937_v41 = vld [vmem:[#allocation2 + $0x3a1] ss:$4 sm:$0xff]  ;;  %v3108_v43 = vld [vmem:[#allocation2 + $0x3a2] ss:$4 sm:$0xff] }
 0x46b   : > { %v3021_v42 = vmax.f32 %v2823_v39, %v2937_v41  ;;  %2660 = vst.msk [vmem:[#allocation2 + $0x3c0] sm:$0xff] %vm2539_vm1, %v2434_v38  ;;  %v3279_v47 = vld [vmem:[#allocation2 + $0x3a3] ss:$4 sm:$0xff] }
 0x46d   : > { %v3192_v44 = vmax.f32 %v3021_v42, %v3108_v43  ;;  %v11205_v42 = vld [vmem:[%s11605_s2 + $0x238] sm:$0xff] }
 0x46e   : > { %v2052_v45 = vpop.f32.mrf.mxu0 }
 0x46f   : > { %v2053_v46 = vadd.f32 %v12128_v61, %v2052_v45  ;;  %v3363_v48 = vmax.f32 %v3192_v44, %v3279_v47 }
 0x471   : > { %v2435_v49 = vmax.f32 %v2053_v46, 0.0 }
 0x472   : > { %v3450_v51 = vld [vmem:[#allocation2 + $0x3a4] ss:$4 sm:$0xff]  ;;  %v3621_v56 = vld [vmem:[#allocation2 + $0x3a5] ss:$4 sm:$0xff]  ;;  %v3792_v6 = vld [vmem:[#allocation2 + $0x3a6] ss:$4 sm:$0xff] }
 0x473   : > { %v3534_v52 = vmax.f32 %v3363_v48, %v3450_v51  ;;  %2661 = vst.msk [vmem:[#allocation2 + $0x3c8] sm:$0xff] %vm2539_vm1, %v2435_v49  ;;  %v3963_v4 = vld [vmem:[#allocation2 + $0x3a7] ss:$4 sm:$0xff] }
 0x475   : > { %v3705_v58 = vmax.f32 %v3534_v52, %v3621_v56  ;;  %v12329_v52 = vld [vmem:[%s14153_s27] ss:$0 sm:$0xff] }
 0x476   : > { %v2055_v63 = vpop.f32.mrf.mxu0 }
 0x477   : > { %v3876_v1 = vmax.f32 %v3705_v58, %v3792_v6  ;;  %v2056_v3 = vadd.f32 %v12128_v61, %v2055_v63 }
 0x479   : > { %v4047_v15 = vmax.f32 %v3876_v1, %v3963_v4  ;;  %v2436_v7 = vmax.f32 %v2056_v3, 0.0  ;;  %10344 = vmatmul.msk.bf16.gmra.mxu0 %vm1401_vm0, %v11203_v59 }
 0x47b   : > { %4163 = vst.msk [vmem:[#allocation3 + $0xed] sm:$0xff] %vm2539_vm1, %v4047_v15 }
 0x47c   : > { %2662 = vst.msk [vmem:[#allocation2 + $0x3d0] sm:$0xff] %vm2539_vm1, %v2436_v7 }
 0x47e   : > { %v2057_v8 = vpop.f32.mrf.mxu0 }
 0x47f   : > { %v2058_v9 = vadd.f32 %v12128_v61, %v2057_v8 }
 0x481   : > { %v2437_v10 = vmax.f32 %v2058_v9, 0.0 }
 0x483   : > { %2663 = vst.msk [vmem:[#allocation2 + $0x3d8] sm:$0xff] %vm2539_vm1, %v2437_v10 }
 0x486   : > { %v2060_v12 = vpop.f32.mrf.mxu0 }
 0x487   : > { %v2061_v13 = vadd.f32 %v12128_v61, %v2060_v12 }
 0x489   : > { %v2438_v16 = vmax.f32 %v2061_v13, 0.0  ;;  %10345 = vmatmul.msk.bf16.gmra.mxu0 %vm1401_vm0, %v11204_v11 }
 0x48a   : > { %v2825_v17 = vld [vmem:[#allocation2 + $0x3c0] ss:$4 sm:$0xff]  ;;  %v2939_v18 = vld [vmem:[#allocation2 + $0x3c1] ss:$4 sm:$0xff]  ;;  %v3110_v22 = vld [vmem:[#allocation2 + $0x3c2] ss:$4 sm:$0xff] }
 0x48b   : > { %v3022_v21 = vmax.f32 %v2825_v17, %v2939_v18  ;;  %2664 = vst.msk [vmem:[#allocation2 + $0x3e0] sm:$0xff] %vm2539_vm1, %v2438_v16  ;;  %v3281_v30 = vld [vmem:[#allocation2 + $0x3c3] ss:$4 sm:$0xff] }
 0x48d   : > { %v3193_v23 = vmax.f32 %v3022_v21, %v3110_v22  ;;  %v11207_v21 = vld [vmem:[%s11605_s2 + $0x248] sm:$0xff] }
 0x48e   : > { %v2062_v24 = vpop.f32.mrf.mxu0 }
 0x48f   : > { %v2063_v29 = vadd.f32 %v12128_v61, %v2062_v24  ;;  %v3364_v31 = vmax.f32 %v3193_v23, %v3281_v30 }
 0x491   : > { %v2439_v33 = vmax.f32 %v2063_v29, 0.0 }
 0x492   : > { %v3452_v37 = vld [vmem:[#allocation2 + $0x3c4] ss:$4 sm:$0xff]  ;;  %v3623_v39 = vld [vmem:[#allocation2 + $0x3c5] ss:$4 sm:$0xff]  ;;  %v3794_v43 = vld [vmem:[#allocation2 + $0x3c6] ss:$4 sm:$0xff] }
 0x493   : > { %v3535_v38 = vmax.f32 %v3364_v31, %v3452_v37  ;;  %2665 = vst.msk [vmem:[#allocation2 + $0x3e8] sm:$0xff] %vm2539_vm1, %v2439_v33  ;;  %v3965_v47 = vld [vmem:[#allocation2 + $0x3c7] ss:$4 sm:$0xff] }
 0x495   : > { %v3706_v41 = vmax.f32 %v3535_v38, %v3623_v39  ;;  %v12345_v39 = vpop.f32.mrf.mxu1 }
 0x496   : > { %v2065_v44 = vpop.f32.mrf.mxu0 }
 0x497   : > { %v3877_v45 = vmax.f32 %v3706_v41, %v3794_v43  ;;  %v2066_v46 = vadd.f32 %v12128_v61, %v2065_v44  ;;  %v11206_v61 = vld [vmem:[%s11605_s2 + $0x240] sm:$0xff]  ;;  %v12347_v41 = vpop.f32.mrf.mxu2  ;;  %v4220_v44 = vld [vmem:[#allocation3 + $0xe0] ss:$2 sm:$0xff] }
 0x499   : > { %v4048_v48 = vmax.f32 %v3877_v45, %v3965_v47  ;;  %v2440_v49 = vmax.f32 %v2066_v46, 0.0  ;;  %10346 = vmatmul.msk.bf16.gmra.mxu0 %vm1401_vm0, %v11205_v42  ;;  %v4291_v42 = vld [vmem:[#allocation3 + $0xe1] ss:$2 sm:$0xff]  ;;  %v4612_v45 = vld [vmem:[#allocation3 + $0xe2] ss:$2 sm:$0xff]  ;;  %v12349_v46 = vpop.f32.mrf.mxu3 }
 0x49b   : > { %4164 = vst.msk [vmem:[#allocation3 + $0xf5] sm:$0xff] %vm2539_vm1, %v4048_v48 }
 0x49c   : > { %2666 = vst.msk [vmem:[#allocation2 + $0x3f0] sm:$0xff] %vm2539_vm1, %v2440_v49 }
 0x49e   : > { %v2067_v51 = vpop.f32.mrf.mxu0 }
 0x49f   : > { %v2068_v56 = vadd.f32 %v12329_v52, %v2067_v51 }
 0x4a1   : > { %v2441_v58 = vmax.f32 %v2068_v56, 0.0 }
 0x4a3   : > { %2667 = vst.msk [vmem:[#allocation2 + $0x3f8] sm:$0xff] %vm2539_vm1, %v2441_v58 }
 0x4a6   : > { %v2070_v59 = vpop.f32.mrf.mxu0 }
 0x4a7   : > { %v2071_v6 = vadd.f32 %v12329_v52, %v2070_v59 }
 0x4a9   : > { %v2442_v63 = vmax.f32 %v2071_v6, 0.0  ;;  %10347 = vmatmul.msk.bf16.gmra.mxu0 %vm1401_vm0, %v11206_v61  ;;  %v11208_v61 = vld [vmem:[%s11605_s2 + $0x250] sm:$0xff] }
 0x4aa   : > { %v2827_v1 = vld [vmem:[#allocation2 + $0x3e0] ss:$4 sm:$0xff]  ;;  %v2941_v3 = vld [vmem:[#allocation2 + $0x3e1] ss:$4 sm:$0xff]  ;;  %v3112_v15 = vld [vmem:[#allocation2 + $0x3e2] ss:$4 sm:$0xff] }
 0x4ab   : > { %v3023_v4 = vmax.f32 %v2827_v1, %v2941_v3  ;;  %2668 = vst.msk [vmem:[#allocation2 + $0x400] sm:$0xff] %vm2539_vm1, %v2442_v63  ;;  %v3283_v10 = vld [vmem:[#allocation2 + $0x3e3] ss:$4 sm:$0xff] }
 0x4ad   : > { %v3194_v7 = vmax.f32 %v3023_v4, %v3112_v15 }
 0x4ae   : > { %v2072_v8 = vpop.f32.mrf.mxu0 }
 0x4af   : > { %v2073_v9 = vadd.f32 %v12329_v52, %v2072_v8  ;;  %v3365_v11 = vmax.f32 %v3194_v7, %v3283_v10 }
 0x4b1   : > { %v2443_v12 = vmax.f32 %v2073_v9, 0.0 }
 0x4b2   : > { %v3454_v13 = vld [vmem:[#allocation2 + $0x3e4] ss:$4 sm:$0xff]  ;;  %v3625_v17 = vld [vmem:[#allocation2 + $0x3e5] ss:$4 sm:$0xff]  ;;  %v3796_v22 = vld [vmem:[#allocation2 + $0x3e6] ss:$4 sm:$0xff] }
 0x4b3   : > { %v3536_v16 = vmax.f32 %v3365_v11, %v3454_v13  ;;  %2669 = vst.msk [vmem:[#allocation2 + $0x408] sm:$0xff] %vm2539_vm1, %v2443_v12  ;;  %v3967_v30 = vld [vmem:[#allocation2 + $0x3e7] ss:$4 sm:$0xff] }
 0x4b5   : > { %v3707_v18 = vmax.f32 %v3536_v16, %v3625_v17 }
 0x4b6   : > { %v2075_v23 = vpop.f32.mrf.mxu0 }
 0x4b7   : > { %v3878_v24 = vmax.f32 %v3707_v18, %v3796_v22  ;;  %v2076_v29 = vadd.f32 %v12329_v52, %v2075_v23 }
 0x4b9   : > { %v4049_v31 = vmax.f32 %v3878_v24, %v3967_v30  ;;  %v2444_v33 = vmax.f32 %v2076_v29, 0.0  ;;  %10348 = vmatmul.msk.bf16.gmra.mxu0 %vm1401_vm0, %v11207_v21  ;;  %v11209_v30 = vld [vmem:[%s11605_s2 + $0x258] sm:$0xff] }
 0x4bb   : > { %4165 = vst.msk [vmem:[#allocation3 + $0xfd] sm:$0xff] %vm2539_vm1, %v4049_v31 }
 0x4bc   : > { %2670 = vst.msk [vmem:[#allocation2 + $0x410] sm:$0xff] %vm2539_vm1, %v2444_v33 }
 0x4be   : > { %v2077_v37 = vpop.f32.mrf.mxu0 }
 0x4bf   : > { %v2078_v38 = vadd.f32 %v12329_v52, %v2077_v37 }
 0x4c1   : > { %v2445_v43 = vmax.f32 %v2078_v38, 0.0 }
 0x4c2   : > { %v4293_v47 = vld [vmem:[#allocation3 + $0xf1] ss:$2 sm:$0xff]  ;;  %v4222_v48 = vld [vmem:[#allocation3 + $0xf0] ss:$2 sm:$0xff]  ;;  %v4419_v63 = vpop.f32.mrf.mxu1 }
 0x4c3   : > { %v4614_v49 = vld [vmem:[#allocation3 + $0xf2] ss:$2 sm:$0xff]  ;;  %2671 = vst.msk [vmem:[#allocation2 + $0x418] sm:$0xff] %vm2539_vm1, %v2445_v43  ;;  %v4325_v51 = vpack.c.bf16 %v4293_v47, %v4291_v42  ;;  %v4254_v56 = vpack.c.bf16 %v4222_v48, %v4220_v44 }
 0x4c4   : > { %v4646_v58 = vpack.c.bf16 %v4614_v49, %v4612_v45  ;;  %v11210_v49 = vld [vmem:[%s11605_s2 + $0x260] sm:$0xff] }
 0x4c5   : > { %10396 = vmatmul.msk.bf16.gmra.mxu1 %vm2539_vm1, %v4325_v51  ;;  %10410 = vmatmul.msk.bf16.gmra.mxu2 %vm2539_vm1, %v4254_v56 }
 0x4c6   : > { %10425 = vmatmul.msk.bf16.gmra.mxu3 %vm2539_vm1, %v4646_v58  ;;  %v2080_v59 = vpop.f32.mrf.mxu0 }
 0x4c7   : > { %v2081_v6 = vadd.f32 %v12329_v52, %v2080_v59 }
 0x4c8   : > { %v4543_v1 = vpop.f32.mrf.mxu2 }
 0x4c9   : > { %v2446_v3 = vmax.f32 %v2081_v6, 0.0  ;;  %v4544_v4 = vadd.f32 %v4543_v1, %v4419_v63  ;;  %10349 = vmatmul.msk.bf16.gmra.mxu0 %vm1401_vm0, %v11208_v61  ;;  %v4739_v8 = vpop.f32.mrf.mxu3 }
 0x4ca   : > { %v2829_v15 = vld [vmem:[#allocation2 + $0x400] ss:$4 sm:$0xff]  ;;  %v2943_v7 = vld [vmem:[#allocation2 + $0x401] ss:$4 sm:$0xff]  ;;  %v3114_v11 = vld [vmem:[#allocation2 + $0x402] ss:$4 sm:$0xff] }
 0x4cb   : > { %v3024_v9 = vmax.f32 %v2829_v15, %v2943_v7  ;;  %2672 = vst.msk [vmem:[#allocation2 + $0x420] sm:$0xff] %vm2539_vm1, %v2446_v3  ;;  %v12359_v10 = vadd.f32 %v4739_v8, %v4544_v4  ;;  %v3285_v17 = vld [vmem:[#allocation2 + $0x403] ss:$4 sm:$0xff] }
 0x4cd   : > { %v3195_v12 = vmax.f32 %v3024_v9, %v3114_v11 }
 0x4ce   : > { %v2082_v13 = vpop.f32.mrf.mxu0 }
 0x4cf   : > { %v2083_v16 = vadd.f32 %v12329_v52, %v2082_v13  ;;  %v3366_v18 = vmax.f32 %v3195_v12, %v3285_v17 }
 0x4d1   : > { %v2447_v21 = vmax.f32 %v2083_v16, 0.0  ;;  %v11211_v16 = vld [vmem:[%s11605_s2 + $0x268] sm:$0xff] }
 0x4d2   : > { %v3456_v22 = vld [vmem:[#allocation2 + $0x404] ss:$4 sm:$0xff]  ;;  %v3627_v24 = vld [vmem:[#allocation2 + $0x405] ss:$4 sm:$0xff]  ;;  %v3798_v31 = vld [vmem:[#allocation2 + $0x406] ss:$4 sm:$0xff] }
 0x4d3   : > { %v3537_v23 = vmax.f32 %v3366_v18, %v3456_v22  ;;  %2673 = vst.msk [vmem:[#allocation2 + $0x428] sm:$0xff] %vm2539_vm1, %v2447_v21  ;;  %v3969_v42 = vld [vmem:[#allocation2 + $0x407] ss:$4 sm:$0xff] }
 0x4d5   : > { %v3708_v29 = vmax.f32 %v3537_v23, %v3627_v24 }
 0x4d6   : > { %v2085_v33 = vpop.f32.mrf.mxu0 }
 0x4d7   : > { %v3879_v37 = vmax.f32 %v3708_v29, %v3798_v31  ;;  %v2086_v38 = vadd.f32 %v12329_v52, %v2085_v33 }
 0x4d9   : > { %v4050_v43 = vmax.f32 %v3879_v37, %v3969_v42  ;;  %v2448_v44 = vmax.f32 %v2086_v38, 0.0  ;;  %10350 = vmatmul.msk.bf16.gmra.mxu0 %vm1401_vm0, %v11209_v30  ;;  %v11212_v37 = vld [vmem:[%s11605_s2 + $0x270] sm:$0xff] }
 0x4db   : > { %4166 = vst.msk [vmem:[#allocation3 + $0x105] sm:$0xff] %vm2539_vm1, %v4050_v43 }
 0x4dc   : > { %2674 = vst.msk [vmem:[#allocation2 + $0x430] sm:$0xff] %vm2539_vm1, %v2448_v44 }
 0x4de   : > { %v2087_v45 = vpop.f32.mrf.mxu0 }
 0x4df   : > { %v2088_v47 = vadd.f32 %v12329_v52, %v2087_v45 }
 0x4e1   : > { %v2449_v48 = vmax.f32 %v2088_v47, 0.0 }
 0x4e3   : > { %2675 = vst.msk [vmem:[#allocation2 + $0x438] sm:$0xff] %vm2539_vm1, %v2449_v48 }
 0x4e6   : > { %v2090_v51 = vpop.f32.mrf.mxu0 }
 0x4e7   : > { %v2091_v56 = vadd.f32 %v12329_v52, %v2090_v51 }
 0x4e9   : > { %v2450_v58 = vmax.f32 %v2091_v56, 0.0  ;;  %10351 = vmatmul.msk.bf16.gmra.mxu0 %vm1401_vm0, %v11210_v49 }
 0x4ea   : > { %v2831_v61 = vld [vmem:[#allocation2 + $0x420] ss:$4 sm:$0xff]  ;;  %v2945_v59 = vld [vmem:[#allocation2 + $0x421] ss:$4 sm:$0xff]  ;;  %v3116_v63 = vld [vmem:[#allocation2 + $0x422] ss:$4 sm:$0xff] }
 0x4eb   : > { %v3025_v6 = vmax.f32 %v2831_v61, %v2945_v59  ;;  %2676 = vst.msk [vmem:[#allocation2 + $0x440] sm:$0xff] %vm2539_vm1, %v2450_v58  ;;  %v3287_v15 = vld [vmem:[#allocation2 + $0x423] ss:$4 sm:$0xff] }
 0x4ed   : > { %v3196_v1 = vmax.f32 %v3025_v6, %v3116_v63 }
 0x4ee   : > { %v2092_v3 = vpop.f32.mrf.mxu0 }
 0x4ef   : > { %v2093_v4 = vadd.f32 %v12329_v52, %v2092_v3  ;;  %v3367_v7 = vmax.f32 %v3196_v1, %v3287_v15 }
 0x4f1   : > { %v2451_v8 = vmax.f32 %v2093_v4, 0.0  ;;  %v11213_v4 = vld [vmem:[%s11605_s2 + $0x278] sm:$0xff] }
 0x4f2   : > { %v3458_v9 = vld [vmem:[#allocation2 + $0x424] ss:$4 sm:$0xff]  ;;  %v3629_v12 = vld [vmem:[#allocation2 + $0x425] ss:$4 sm:$0xff]  ;;  %v3800_v17 = vld [vmem:[#allocation2 + $0x426] ss:$4 sm:$0xff] }
 0x4f3   : > { %v3538_v11 = vmax.f32 %v3367_v7, %v3458_v9  ;;  %2677 = vst.msk [vmem:[#allocation2 + $0x448] sm:$0xff] %vm2539_vm1, %v2451_v8  ;;  %v3971_v23 = vld [vmem:[#allocation2 + $0x427] ss:$4 sm:$0xff] }
 0x4f5   : > { %v3709_v13 = vmax.f32 %v3538_v11, %v3629_v12 }
 0x4f6   : > { %v2095_v18 = vpop.f32.mrf.mxu0 }
 0x4f7   : > { %v3880_v21 = vmax.f32 %v3709_v13, %v3800_v17  ;;  %v2096_v22 = vadd.f32 %v12329_v52, %v2095_v18 }
 0x4f9   : > { %v4051_v24 = vmax.f32 %v3880_v21, %v3971_v23  ;;  %v2452_v29 = vmax.f32 %v2096_v22, 0.0  ;;  %10352 = vmatmul.msk.bf16.gmra.mxu0 %vm1401_vm0, %v11211_v16  ;;  %v11214_v21 = vld [vmem:[%s11605_s2 + $0x280] sm:$0xff] }
 0x4fb   : > { %4167 = vst.msk [vmem:[#allocation3 + $0x10d] sm:$0xff] %vm2539_vm1, %v4051_v24 }
 0x4fc   : > { %2678 = vst.msk [vmem:[#allocation2 + $0x450] sm:$0xff] %vm2539_vm1, %v2452_v29 }
 0x4fe   : > { %v2097_v30 = vpop.f32.mrf.mxu0 }
 0x4ff   : > { %v2098_v31 = vadd.f32 %v12329_v52, %v2097_v30 }
 0x501   : > { %v2453_v33 = vmax.f32 %v2098_v31, 0.0 }
 0x503   : > { %2679 = vst.msk [vmem:[#allocation2 + $0x458] sm:$0xff] %vm2539_vm1, %v2453_v33 }
 0x506   : > { %v2100_v38 = vpop.f32.mrf.mxu0 }
 0x507   : > { %v2101_v42 = vadd.f32 %v12329_v52, %v2100_v38 }
 0x509   : > { %v2454_v43 = vmax.f32 %v2101_v42, 0.0  ;;  %10353 = vmatmul.msk.bf16.gmra.mxu0 %vm1401_vm0, %v11212_v37 }
 0x50a   : > { %v2833_v44 = vld [vmem:[#allocation2 + $0x440] ss:$4 sm:$0xff]  ;;  %v2947_v45 = vld [vmem:[#allocation2 + $0x441] ss:$4 sm:$0xff]  ;;  %v3118_v48 = vld [vmem:[#allocation2 + $0x442] ss:$4 sm:$0xff] }
 0x50b   : > { %v3026_v47 = vmax.f32 %v2833_v44, %v2947_v45  ;;  %2680 = vst.msk [vmem:[#allocation2 + $0x460] sm:$0xff] %vm2539_vm1, %v2454_v43  ;;  %v3289_v58 = vld [vmem:[#allocation2 + $0x443] ss:$4 sm:$0xff] }
 0x50d   : > { %v3197_v49 = vmax.f32 %v3026_v47, %v3118_v48 }
 0x50e   : > { %v2102_v51 = vpop.f32.mrf.mxu0 }
 0x50f   : > { %v2103_v56 = vadd.f32 %v12329_v52, %v2102_v51  ;;  %v3368_v61 = vmax.f32 %v3197_v49, %v3289_v58 }
 0x511   : > { %v2455_v59 = vmax.f32 %v2103_v56, 0.0  ;;  %v11215_v56 = vld [vmem:[%s11605_s2 + $0x288] sm:$0xff] }
 0x512   : > { %v3460_v6 = vld [vmem:[#allocation2 + $0x444] ss:$4 sm:$0xff]  ;;  %v3631_v1 = vld [vmem:[#allocation2 + $0x445] ss:$4 sm:$0xff]  ;;  %v3802_v15 = vld [vmem:[#allocation2 + $0x446] ss:$4 sm:$0xff] }
 0x513   : > { %v3539_v63 = vmax.f32 %v3368_v61, %v3460_v6  ;;  %2681 = vst.msk [vmem:[#allocation2 + $0x468] sm:$0xff] %vm2539_vm1, %v2455_v59  ;;  %v3973_v11 = vld [vmem:[#allocation2 + $0x447] ss:$4 sm:$0xff] }
 0x515   : > { %v3710_v3 = vmax.f32 %v3539_v63, %v3631_v1 }
 0x516   : > { %v2105_v7 = vpop.f32.mrf.mxu0 }
 0x517   : > { %v3881_v8 = vmax.f32 %v3710_v3, %v3802_v15  ;;  %v2106_v9 = vadd.f32 %v12329_v52, %v2105_v7  ;;  %v12408_v7 = vpop.f32.mrf.mxu1 }
 0x519   : > { %v4052_v12 = vmax.f32 %v3881_v8, %v3973_v11  ;;  %v2456_v13 = vmax.f32 %v2106_v9, 0.0  ;;  %10354 = vmatmul.msk.bf16.gmra.mxu0 %vm1401_vm0, %v11213_v4  ;;  %v12410_v8 = vpop.f32.mrf.mxu2  ;;  %v4295_v9 = vld [vmem:[#allocation3 + $0x101] ss:$2 sm:$0xff] }
 0x51b   : > { %4168 = vst.msk [vmem:[#allocation3 + $0x115] sm:$0xff] %vm2539_vm1, %v4052_v12  ;;  %v4224_v12 = vld [vmem:[#allocation3 + $0x100] ss:$2 sm:$0xff] }
 0x51c   : > { %2682 = vst.msk [vmem:[#allocation2 + $0x470] sm:$0xff] %vm2539_vm1, %v2456_v13  ;;  %v4616_v13 = vld [vmem:[#allocation3 + $0x102] ss:$2 sm:$0xff] }
 0x51e   : > { %v2107_v16 = vpop.f32.mrf.mxu0 }
 0x51f   : > { %v2108_v17 = vadd.f32 %v12329_v52, %v2107_v16  ;;  %v12412_v16 = vpop.f32.mrf.mxu3 }
 0x521   : > { %v2457_v18 = vmax.f32 %v2108_v17, 0.0 }
 0x523   : > { %2683 = vst.msk [vmem:[#allocation2 + $0x478] sm:$0xff] %vm2539_vm1, %v2457_v18 }
 0x526   : > { %v2110_v22 = vpop.f32.mrf.mxu0 }
 0x527   : > { %v2111_v23 = vadd.f32 %v12329_v52, %v2110_v22 }
 0x529   : > { %v2458_v24 = vmax.f32 %v2111_v23, 0.0  ;;  %10355 = vmatmul.msk.bf16.gmra.mxu0 %vm1401_vm0, %v11214_v21 }
 0x52a   : > { %v2835_v29 = vld [vmem:[#allocation2 + $0x460] ss:$4 sm:$0xff]  ;;  %v2949_v30 = vld [vmem:[#allocation2 + $0x461] ss:$4 sm:$0xff]  ;;  %v3120_v33 = vld [vmem:[#allocation2 + $0x462] ss:$4 sm:$0xff] }
 0x52b   : > { %v3027_v31 = vmax.f32 %v2835_v29, %v2949_v30  ;;  %2684 = vst.msk [vmem:[#allocation2 + $0x480] sm:$0xff] %vm2539_vm1, %v2458_v24  ;;  %v3291_v43 = vld [vmem:[#allocation2 + $0x463] ss:$4 sm:$0xff] }
 0x52c   : > { %v11216_v29 = vld [vmem:[%s11605_s2 + $0x290] sm:$0xff] }
 0x52d   : > { %v3198_v37 = vmax.f32 %v3027_v31, %v3120_v33 }
 0x52e   : > { %v2112_v38 = vpop.f32.mrf.mxu0 }
 0x52f   : > { %v2113_v42 = vadd.f32 %v12329_v52, %v2112_v38  ;;  %v3369_v44 = vmax.f32 %v3198_v37, %v3291_v43 }
 0x531   : > { %v2459_v45 = vmax.f32 %v2113_v42, 0.0 }
 0x532   : > { %v3462_v47 = vld [vmem:[#allocation2 + $0x464] ss:$4 sm:$0xff]  ;;  %v3633_v49 = vld [vmem:[#allocation2 + $0x465] ss:$4 sm:$0xff]  ;;  %v3804_v58 = vld [vmem:[#allocation2 + $0x466] ss:$4 sm:$0xff] }
 0x533   : > { %v3540_v48 = vmax.f32 %v3369_v44, %v3462_v47  ;;  %2685 = vst.msk [vmem:[#allocation2 + $0x488] sm:$0xff] %vm2539_vm1, %v2459_v45  ;;  %v3975_v63 = vld [vmem:[#allocation2 + $0x467] ss:$4 sm:$0xff] }
 0x535   : > { %v3711_v51 = vmax.f32 %v3540_v48, %v3633_v49 }
 0x536   : > { %v2115_v61 = vpop.f32.mrf.mxu0 }
 0x537   : > { %v3882_v59 = vmax.f32 %v3711_v51, %v3804_v58  ;;  %v2116_v6 = vadd.f32 %v12329_v52, %v2115_v61 }
 0x539   : > { %v4053_v1 = vmax.f32 %v3882_v59, %v3975_v63  ;;  %v2460_v3 = vmax.f32 %v2116_v6, 0.0  ;;  %10356 = vmatmul.msk.bf16.gmra.mxu0 %vm1401_vm0, %v11215_v56 }
 0x53b   : > { %4169 = vst.msk [vmem:[#allocation3 + $0x11d] sm:$0xff] %vm2539_vm1, %v4053_v1 }
 0x53c   : > { %2686 = vst.msk [vmem:[#allocation2 + $0x490] sm:$0xff] %vm2539_vm1, %v2460_v3 }
 0x53e   : > { %v2117_v4 = vpop.f32.mrf.mxu0 }
 0x53f   : > { %v2118_v15 = vadd.f32 %v12329_v52, %v2117_v4 }
 0x541   : > { %v2461_v11 = vmax.f32 %v2118_v15, 0.0  ;;  %v11217_v15 = vld [vmem:[%s11605_s2 + $0x298] sm:$0xff] }
 0x542   : > { %v4297_v17 = vld [vmem:[#allocation3 + $0x111] ss:$2 sm:$0xff]  ;;  %v4226_v18 = vld [vmem:[#allocation3 + $0x110] ss:$2 sm:$0xff]  ;;  %v4424_v33 = vpop.f32.mrf.mxu1 }
 0x543   : > { %v4618_v21 = vld [vmem:[#allocation3 + $0x112] ss:$2 sm:$0xff]  ;;  %2687 = vst.msk [vmem:[#allocation2 + $0x498] sm:$0xff] %vm2539_vm1, %v2461_v11  ;;  %v4326_v22 = vpack.c.bf16 %v4297_v17, %v4295_v9  ;;  %v4255_v23 = vpack.c.bf16 %v4226_v18, %v4224_v12 }
 0x544   : > { %v4647_v24 = vpack.c.bf16 %v4618_v21, %v4616_v13 }
 0x545   : > { %10397 = vmatmul.msk.bf16.gmra.mxu1 %vm2539_vm1, %v4326_v22  ;;  %10411 = vmatmul.msk.bf16.gmra.mxu2 %vm2539_vm1, %v4255_v23 }
 0x546   : > { %10426 = vmatmul.msk.bf16.gmra.mxu3 %vm2539_vm1, %v4647_v24  ;;  %v2120_v30 = vpop.f32.mrf.mxu0 }
 0x547   : > { %v2121_v31 = vadd.f32 %v12329_v52, %v2120_v30 }
 0x548   : > { %v4548_v37 = vpop.f32.mrf.mxu2 }
 0x549   : > { %v2462_v38 = vmax.f32 %v2121_v31, 0.0  ;;  %v4549_v42 = vadd.f32 %v4548_v37, %v4424_v33  ;;  %10357 = vmatmul.msk.bf16.gmra.mxu0 %vm1401_vm0, %v11216_v29  ;;  %v4744_v45 = vpop.f32.mrf.mxu3  ;;  %v11218_v29 = vld [vmem:[%s11605_s2 + $0x2a0] sm:$0xff] }
 0x54a   : > { %v2837_v43 = vld [vmem:[#allocation2 + $0x480] ss:$4 sm:$0xff]  ;;  %v2951_v44 = vld [vmem:[#allocation2 + $0x481] ss:$4 sm:$0xff]  ;;  %v3122_v49 = vld [vmem:[#allocation2 + $0x482] ss:$4 sm:$0xff] }
 0x54b   : > { %v3028_v47 = vmax.f32 %v2837_v43, %v2951_v44  ;;  %2688 = vst.msk [vmem:[#allocation2 + $0x4a0] sm:$0xff] %vm2539_vm1, %v2462_v38  ;;  %v12422_v48 = vadd.f32 %v4744_v45, %v4549_v42  ;;  %v3293_v61 = vld [vmem:[#allocation2 + $0x483] ss:$4 sm:$0xff] }
 0x54d   : > { %v3199_v51 = vmax.f32 %v3028_v47, %v3122_v49 }
 0x54e   : > { %v2122_v56 = vpop.f32.mrf.mxu0 }
 0x54f   : > { %v2123_v58 = vadd.f32 %v12329_v52, %v2122_v56  ;;  %v3370_v59 = vmax.f32 %v3199_v51, %v3293_v61 }
 0x551   : > { %v2463_v6 = vmax.f32 %v2123_v58, 0.0 }
 0x552   : > { %v3464_v63 = vld [vmem:[#allocation2 + $0x484] ss:$4 sm:$0xff]  ;;  %v3635_v3 = vld [vmem:[#allocation2 + $0x485] ss:$4 sm:$0xff]  ;;  %v3806_v9 = vld [vmem:[#allocation2 + $0x486] ss:$4 sm:$0xff] }
 0x553   : > { %v3541_v1 = vmax.f32 %v3370_v59, %v3464_v63  ;;  %2689 = vst.msk [vmem:[#allocation2 + $0x4a8] sm:$0xff] %vm2539_vm1, %v2463_v6  ;;  %v3977_v17 = vld [vmem:[#allocation2 + $0x487] ss:$4 sm:$0xff] }
 0x554   : > { %v11219_v63 = vld [vmem:[%s11605_s2 + $0x2a8] sm:$0xff] }
 0x555   : > { %v3712_v4 = vmax.f32 %v3541_v1, %v3635_v3 }
 0x556   : > { %v2125_v11 = vpop.f32.mrf.mxu0 }
 0x557   : > { %v3883_v12 = vmax.f32 %v3712_v4, %v3806_v9  ;;  %v2126_v13 = vadd.f32 %v12329_v52, %v2125_v11 }
 0x559   : > { %v4054_v18 = vmax.f32 %v3883_v12, %v3977_v17  ;;  %v2464_v21 = vmax.f32 %v2126_v13, 0.0  ;;  %10358 = vmatmul.msk.bf16.gmra.mxu0 %vm1401_vm0, %v11217_v15 }
 0x55b   : > { %4170 = vst.msk [vmem:[#allocation3 + $0x125] sm:$0xff] %vm2539_vm1, %v4054_v18 }
 0x55c   : > { %2690 = vst.msk [vmem:[#allocation2 + $0x4b0] sm:$0xff] %vm2539_vm1, %v2464_v21  ;;  %v11220_v21 = vld [vmem:[%s11605_s2 + $0x2b0] sm:$0xff] }
 0x55e   : > { %v2127_v22 = vpop.f32.mrf.mxu0 }
 0x55f   : > { %v2128_v23 = vadd.f32 %v12329_v52, %v2127_v22 }
 0x561   : > { %v2465_v24 = vmax.f32 %v2128_v23, 0.0 }
 0x563   : > { %2691 = vst.msk [vmem:[#allocation2 + $0x4b8] sm:$0xff] %vm2539_vm1, %v2465_v24 }
 0x566   : > { %v2130_v30 = vpop.f32.mrf.mxu0 }
 0x567   : > { %v2131_v31 = vadd.f32 %v12329_v52, %v2130_v30 }
 0x569   : > { %v2466_v33 = vmax.f32 %v2131_v31, 0.0  ;;  %10359 = vmatmul.msk.bf16.gmra.mxu0 %vm1401_vm0, %v11218_v29 }
 0x56a   : > { %v2839_v37 = vld [vmem:[#allocation2 + $0x4a0] ss:$4 sm:$0xff]  ;;  %v2953_v38 = vld [vmem:[#allocation2 + $0x4a1] ss:$4 sm:$0xff]  ;;  %v3124_v43 = vld [vmem:[#allocation2 + $0x4a2] ss:$4 sm:$0xff] }
 0x56b   : > { %v3029_v42 = vmax.f32 %v2839_v37, %v2953_v38  ;;  %2692 = vst.msk [vmem:[#allocation2 + $0x4c0] sm:$0xff] %vm2539_vm1, %v2466_v33  ;;  %v3295_v49 = vld [vmem:[#allocation2 + $0x4a3] ss:$4 sm:$0xff] }
 0x56d   : > { %v3200_v44 = vmax.f32 %v3029_v42, %v3124_v43 }
 0x56e   : > { %v2132_v45 = vpop.f32.mrf.mxu0 }
 0x56f   : > { %v2133_v47 = vadd.f32 %v12329_v52, %v2132_v45  ;;  %v3371_v51 = vmax.f32 %v3200_v44, %v3295_v49 }
 0x571   : > { %v2467_v56 = vmax.f32 %v2133_v47, 0.0 }
 0x572   : > { %v3466_v58 = vld [vmem:[#allocation2 + $0x4a4] ss:$4 sm:$0xff]  ;;  %v3637_v59 = vld [vmem:[#allocation2 + $0x4a5] ss:$4 sm:$0xff]  ;;  %v3808_v1 = vld [vmem:[#allocation2 + $0x4a6] ss:$4 sm:$0xff] }
 0x573   : > { %v3542_v61 = vmax.f32 %v3371_v51, %v3466_v58  ;;  %2693 = vst.msk [vmem:[#allocation2 + $0x4c8] sm:$0xff] %vm2539_vm1, %v2467_v56  ;;  %v3979_v9 = vld [vmem:[#allocation2 + $0x4a7] ss:$4 sm:$0xff] }
 0x574   : > { %v11221_v58 = vld [vmem:[%s11605_s2 + $0x2b8] sm:$0xff] }
 0x575   : > { %v3713_v6 = vmax.f32 %v3542_v61, %v3637_v59 }
 0x576   : > { %v2135_v3 = vpop.f32.mrf.mxu0 }
 0x577   : > { %v3884_v4 = vmax.f32 %v3713_v6, %v3808_v1  ;;  %v2136_v15 = vadd.f32 %v12329_v52, %v2135_v3 }
 0x579   : > { %v4055_v11 = vmax.f32 %v3884_v4, %v3979_v9  ;;  %v2468_v12 = vmax.f32 %v2136_v15, 0.0  ;;  %10360 = vmatmul.msk.bf16.gmra.mxu0 %vm1401_vm0, %v11219_v63 }
 0x57b   : > { %4171 = vst.msk [vmem:[#allocation3 + $0x12d] sm:$0xff] %vm2539_vm1, %v4055_v11 }
 0x57c   : > { %2694 = vst.msk [vmem:[#allocation2 + $0x4d0] sm:$0xff] %vm2539_vm1, %v2468_v12  ;;  %v11222_v12 = vld [vmem:[%s11605_s2 + $0x2c0] sm:$0xff] }
 0x57e   : > { %v2137_v13 = vpop.f32.mrf.mxu0 }
 0x57f   : > { %v2138_v17 = vadd.f32 %v12329_v52, %v2137_v13 }
 0x581   : > { %v2469_v18 = vmax.f32 %v2138_v17, 0.0 }
 0x583   : > { %2695 = vst.msk [vmem:[#allocation2 + $0x4d8] sm:$0xff] %vm2539_vm1, %v2469_v18 }
 0x586   : > { %v2140_v22 = vpop.f32.mrf.mxu0 }
 0x587   : > { %v2141_v23 = vadd.f32 %v12329_v52, %v2140_v22 }
 0x589   : > { %v2470_v24 = vmax.f32 %v2141_v23, 0.0  ;;  %10361 = vmatmul.msk.bf16.gmra.mxu0 %vm1401_vm0, %v11220_v21 }
 0x58a   : > { %v2841_v29 = vld [vmem:[#allocation2 + $0x4c0] ss:$4 sm:$0xff]  ;;  %v2955_v30 = vld [vmem:[#allocation2 + $0x4c1] ss:$4 sm:$0xff]  ;;  %v3126_v33 = vld [vmem:[#allocation2 + $0x4c2] ss:$4 sm:$0xff] }
 0x58b   : > { %v3030_v31 = vmax.f32 %v2841_v29, %v2955_v30  ;;  %2696 = vst.msk [vmem:[#allocation2 + $0x4e0] sm:$0xff] %vm2539_vm1, %v2470_v24  ;;  %v3297_v43 = vld [vmem:[#allocation2 + $0x4c3] ss:$4 sm:$0xff] }
 0x58d   : > { %v3201_v37 = vmax.f32 %v3030_v31, %v3126_v33 }
 0x58e   : > { %v2142_v38 = vpop.f32.mrf.mxu0 }
 0x58f   : > { %v2143_v42 = vadd.f32 %v12329_v52, %v2142_v38  ;;  %v3372_v44 = vmax.f32 %v3201_v37, %v3297_v43 }
 0x591   : > { %v2471_v45 = vmax.f32 %v2143_v42, 0.0 }
 0x592   : > { %v3468_v47 = vld [vmem:[#allocation2 + $0x4c4] ss:$4 sm:$0xff]  ;;  %v3639_v51 = vld [vmem:[#allocation2 + $0x4c5] ss:$4 sm:$0xff]  ;;  %v3810_v61 = vld [vmem:[#allocation2 + $0x4c6] ss:$4 sm:$0xff] }
 0x593   : > { %v3543_v49 = vmax.f32 %v3372_v44, %v3468_v47  ;;  %2697 = vst.msk [vmem:[#allocation2 + $0x4e8] sm:$0xff] %vm2539_vm1, %v2471_v45  ;;  %v3981_v1 = vld [vmem:[#allocation2 + $0x4c7] ss:$4 sm:$0xff] }
 0x594   : > { %v11223_v47 = vld [vmem:[%s11605_s2 + $0x2c8] sm:$0xff] }
 0x595   : > { %v3714_v56 = vmax.f32 %v3543_v49, %v3639_v51 }
 0x596   : > { %v2145_v59 = vpop.f32.mrf.mxu0 }
 0x597   : > { %v3885_v6 = vmax.f32 %v3714_v56, %v3810_v61  ;;  %v2146_v63 = vadd.f32 %v12329_v52, %v2145_v59 }
 0x599   : > { %v4056_v3 = vmax.f32 %v3885_v6, %v3981_v1  ;;  %v2472_v4 = vmax.f32 %v2146_v63, 0.0  ;;  %10362 = vmatmul.msk.bf16.gmra.mxu0 %vm1401_vm0, %v11221_v58 }
 0x59b   : > { %4172 = vst.msk [vmem:[#allocation3 + $0x135] sm:$0xff] %vm2539_vm1, %v4056_v3  ;;  %v12471_v3 = vpop.f32.mrf.mxu1 }
 0x59c   : > { %2698 = vst.msk [vmem:[#allocation2 + $0x4f0] sm:$0xff] %vm2539_vm1, %v2472_v4  ;;  %v12473_v4 = vpop.f32.mrf.mxu2 }
 0x59e   : > { %v2147_v15 = vpop.f32.mrf.mxu0 }
 0x59f   : > { %v2148_v9 = vadd.f32 %v12329_v52, %v2147_v15  ;;  %v4299_v15 = vld [vmem:[#allocation3 + $0x121] ss:$2 sm:$0xff] }
 0x5a1   : > { %v2473_v11 = vmax.f32 %v2148_v9, 0.0 }
 0x5a3   : > { %2699 = vst.msk [vmem:[#allocation2 + $0x4f8] sm:$0xff] %vm2539_vm1, %v2473_v11  ;;  %v4228_v11 = vld [vmem:[#allocation3 + $0x120] ss:$2 sm:$0xff] }
 0x5a6   : > { %v2150_v13 = vpop.f32.mrf.mxu0 }
 0x5a7   : > { %v2151_v17 = vadd.f32 %v12329_v52, %v2150_v13  ;;  %v12475_v13 = vpop.f32.mrf.mxu3 }
 0x5a9   : > { %v2474_v18 = vmax.f32 %v2151_v17, 0.0  ;;  %10363 = vmatmul.msk.bf16.gmra.mxu0 %vm1401_vm0, %v11222_v12  ;;  %v4620_v12 = vld [vmem:[#allocation3 + $0x122] ss:$2 sm:$0xff] }
 0x5aa   : > { %v2843_v21 = vld [vmem:[#allocation2 + $0x4e0] ss:$4 sm:$0xff]  ;;  %v2957_v22 = vld [vmem:[#allocation2 + $0x4e1] ss:$4 sm:$0xff]  ;;  %v3128_v24 = vld [vmem:[#allocation2 + $0x4e2] ss:$4 sm:$0xff] }
 0x5ab   : > { %v3031_v23 = vmax.f32 %v2843_v21, %v2957_v22  ;;  %2700 = vst.msk [vmem:[#allocation2 + $0x500] sm:$0xff] %vm2539_vm1, %v2474_v18  ;;  %v3299_v33 = vld [vmem:[#allocation2 + $0x4e3] ss:$4 sm:$0xff] }
 0x5ad   : > { %v3202_v29 = vmax.f32 %v3031_v23, %v3128_v24 }
 0x5ae   : > { %v2152_v30 = vpop.f32.mrf.mxu0 }
 0x5af   : > { %v2153_v31 = vadd.f32 %v12329_v52, %v2152_v30  ;;  %v3373_v37 = vmax.f32 %v3202_v29, %v3299_v33  ;;  %v11224_v29 = vld [vmem:[%s11605_s2 + $0x2d0] sm:$0xff] }
 0x5b1   : > { %v2475_v38 = vmax.f32 %v2153_v31, 0.0 }
 0x5b2   : > { %v3470_v42 = vld [vmem:[#allocation2 + $0x4e4] ss:$4 sm:$0xff]  ;;  %v3641_v44 = vld [vmem:[#allocation2 + $0x4e5] ss:$4 sm:$0xff]  ;;  %v3812_v49 = vld [vmem:[#allocation2 + $0x4e6] ss:$4 sm:$0xff] }
 0x5b3   : > { %v3544_v43 = vmax.f32 %v3373_v37, %v3470_v42  ;;  %2701 = vst.msk [vmem:[#allocation2 + $0x508] sm:$0xff] %vm2539_vm1, %v2475_v38  ;;  %v3983_v61 = vld [vmem:[#allocation2 + $0x4e7] ss:$4 sm:$0xff] }
 0x5b5   : > { %v3715_v45 = vmax.f32 %v3544_v43, %v3641_v44 }
 0x5b6   : > { %v2155_v51 = vpop.f32.mrf.mxu0 }
 0x5b7   : > { %v3886_v56 = vmax.f32 %v3715_v45, %v3812_v49  ;;  %v2156_v58 = vadd.f32 %v12329_v52, %v2155_v51 }
 0x5b9   : > { %v4057_v59 = vmax.f32 %v3886_v56, %v3983_v61  ;;  %v2476_v6 = vmax.f32 %v2156_v58, 0.0  ;;  %10364 = vmatmul.msk.bf16.gmra.mxu0 %vm1401_vm0, %v11223_v47 }
 0x5bb   : > { %4173 = vst.msk [vmem:[#allocation3 + $0x13d] sm:$0xff] %vm2539_vm1, %v4057_v59 }
 0x5bc   : > { %2702 = vst.msk [vmem:[#allocation2 + $0x510] sm:$0xff] %vm2539_vm1, %v2476_v6 }
 0x5be   : > { %v2157_v63 = vpop.f32.mrf.mxu0 }
 0x5bf   : > { %v2158_v1 = vadd.f32 %v12329_v52, %v2157_v63 }
 0x5c1   : > { %v2477_v9 = vmax.f32 %v2158_v1, 0.0 }
 0x5c2   : > { %v4301_v17 = vld [vmem:[#allocation3 + $0x131] ss:$2 sm:$0xff]  ;;  %v4230_v18 = vld [vmem:[#allocation3 + $0x130] ss:$2 sm:$0xff]  ;;  %v4429_v33 = vpop.f32.mrf.mxu1 }
 0x5c3   : > { %v4622_v21 = vld [vmem:[#allocation3 + $0x132] ss:$2 sm:$0xff]  ;;  %2703 = vst.msk [vmem:[#allocation2 + $0x518] sm:$0xff] %vm2539_vm1, %v2477_v9  ;;  %v4327_v22 = vpack.c.bf16 %v4301_v17, %v4299_v15  ;;  %v4256_v23 = vpack.c.bf16 %v4230_v18, %v4228_v11 }
 0x5c4   : > { %v4648_v24 = vpack.c.bf16 %v4622_v21, %v4620_v12  ;;  %v11225_v12 = vld [vmem:[%s11605_s2 + $0x2d8] sm:$0xff] }
 0x5c5   : > { %10398 = vmatmul.msk.bf16.gmra.mxu1 %vm2539_vm1, %v4327_v22  ;;  %10412 = vmatmul.msk.bf16.gmra.mxu2 %vm2539_vm1, %v4256_v23 }
 0x5c6   : > { %10427 = vmatmul.msk.bf16.gmra.mxu3 %vm2539_vm1, %v4648_v24  ;;  %v2160_v30 = vpop.f32.mrf.mxu0 }
 0x5c7   : > { %v2161_v31 = vadd.f32 %v12329_v52, %v2160_v30 }
 0x5c8   : > { %v4553_v37 = vpop.f32.mrf.mxu2 }
 0x5c9   : > { %v2478_v38 = vmax.f32 %v2161_v31, 0.0  ;;  %v4554_v42 = vadd.f32 %v4553_v37, %v4429_v33  ;;  %10365 = vmatmul.msk.bf16.gmra.mxu0 %vm1401_vm0, %v11224_v29  ;;  %v4749_v45 = vpop.f32.mrf.mxu3  ;;  %v11226_v37 = vld [vmem:[%s11605_s2 + $0x2e0] sm:$0xff] }
 0x5ca   : > { %v2845_v43 = vld [vmem:[#allocation2 + $0x500] ss:$4 sm:$0xff]  ;;  %v2959_v44 = vld [vmem:[#allocation2 + $0x501] ss:$4 sm:$0xff]  ;;  %v3130_v51 = vld [vmem:[#allocation2 + $0x502] ss:$4 sm:$0xff] }
 0x5cb   : > { %v3032_v47 = vmax.f32 %v2845_v43, %v2959_v44  ;;  %2704 = vst.msk [vmem:[#allocation2 + $0x520] sm:$0xff] %vm2539_vm1, %v2478_v38  ;;  %v12485_v49 = vadd.f32 %v4749_v45, %v4554_v42  ;;  %v3301_v59 = vld [vmem:[#allocation2 + $0x503] ss:$4 sm:$0xff] }
 0x5cd   : > { %v3203_v56 = vmax.f32 %v3032_v47, %v3130_v51 }
 0x5ce   : > { %v2162_v58 = vpop.f32.mrf.mxu0 }
 0x5cf   : > { %v2163_v61 = vadd.f32 %v12329_v52, %v2162_v58  ;;  %v3374_v6 = vmax.f32 %v3203_v56, %v3301_v59 }
 0x5d1   : > { %v2479_v63 = vmax.f32 %v2163_v61, 0.0 }
 0x5d2   : > { %v3472_v1 = vld [vmem:[#allocation2 + $0x504] ss:$4 sm:$0xff]  ;;  %v3643_v9 = vld [vmem:[#allocation2 + $0x505] ss:$4 sm:$0xff]  ;;  %v3814_v17 = vld [vmem:[#allocation2 + $0x506] ss:$4 sm:$0xff] }
 0x5d3   : > { %v3545_v15 = vmax.f32 %v3374_v6, %v3472_v1  ;;  %2705 = vst.msk [vmem:[#allocation2 + $0x528] sm:$0xff] %vm2539_vm1, %v2479_v63  ;;  %v3985_v23 = vld [vmem:[#allocation2 + $0x507] ss:$4 sm:$0xff] }
 0x5d5   : > { %v3716_v11 = vmax.f32 %v3545_v15, %v3643_v9 }
 0x5d6   : > { %v2165_v18 = vpop.f32.mrf.mxu0 }
 0x5d7   : > { %v3887_v21 = vmax.f32 %v3716_v11, %v3814_v17  ;;  %v2166_v22 = vadd.f32 %v12329_v52, %v2165_v18 }
 0x5d9   : > { %v4058_v24 = vmax.f32 %v3887_v21, %v3985_v23  ;;  %v2480_v29 = vmax.f32 %v2166_v22, 0.0  ;;  %10366 = vmatmul.msk.bf16.gmra.mxu0 %vm1401_vm0, %v11225_v12  ;;  %v11227_v12 = vld [vmem:[%s11605_s2 + $0x2e8] sm:$0xff] }
 0x5db   : > { %4174 = vst.msk [vmem:[#allocation3 + $0x145] sm:$0xff] %vm2539_vm1, %v4058_v24 }
 0x5dc   : > { %2706 = vst.msk [vmem:[#allocation2 + $0x530] sm:$0xff] %vm2539_vm1, %v2480_v29 }
 0x5de   : > { %v2167_v30 = vpop.f32.mrf.mxu0 }
 0x5df   : > { %v2168_v31 = vadd.f32 %v12329_v52, %v2167_v30 }
 0x5e1   : > { %v2481_v33 = vmax.f32 %v2168_v31, 0.0 }
 0x5e3   : > { %2707 = vst.msk [vmem:[#allocation2 + $0x538] sm:$0xff] %vm2539_vm1, %v2481_v33 }
 0x5e6   : > { %v2170_v38 = vpop.f32.mrf.mxu0 }
 0x5e7   : > { %v2171_v42 = vadd.f32 %v12329_v52, %v2170_v38 }
 0x5e9   : > { %v2482_v43 = vmax.f32 %v2171_v42, 0.0  ;;  %10367 = vmatmul.msk.bf16.gmra.mxu0 %vm1401_vm0, %v11226_v37  ;;  %v11228_v37 = vld [vmem:[%s11605_s2 + $0x2f0] sm:$0xff] }
 0x5ea   : > { %v2847_v44 = vld [vmem:[#allocation2 + $0x520] ss:$4 sm:$0xff]  ;;  %v2961_v45 = vld [vmem:[#allocation2 + $0x521] ss:$4 sm:$0xff]  ;;  %v3132_v51 = vld [vmem:[#allocation2 + $0x522] ss:$4 sm:$0xff] }
 0x5eb   : > { %v3033_v47 = vmax.f32 %v2847_v44, %v2961_v45  ;;  %2708 = vst.msk [vmem:[#allocation2 + $0x540] sm:$0xff] %vm2539_vm1, %v2482_v43  ;;  %v3303_v59 = vld [vmem:[#allocation2 + $0x523] ss:$4 sm:$0xff] }
 0x5ed   : > { %v3204_v56 = vmax.f32 %v3033_v47, %v3132_v51 }
 0x5ee   : > { %v2172_v58 = vpop.f32.mrf.mxu0 }
 0x5ef   : > { %v2173_v61 = vadd.f32 %v12329_v52, %v2172_v58  ;;  %v3375_v6 = vmax.f32 %v3204_v56, %v3303_v59 }
 0x5f1   : > { %v2483_v63 = vmax.f32 %v2173_v61, 0.0  ;;  %v2877_v61 = vld [vmem:[#allocation2 + $0x700] ss:$4 sm:$0x1] }
 0x5f2   : > { %v3474_v1 = vld [vmem:[#allocation2 + $0x524] ss:$4 sm:$0xff]  ;;  %v3645_v9 = vld [vmem:[#allocation2 + $0x525] ss:$4 sm:$0xff]  ;;  %v3816_v17 = vld [vmem:[#allocation2 + $0x526] ss:$4 sm:$0xff] }
 0x5f3   : > { %v3546_v15 = vmax.f32 %v3375_v6, %v3474_v1  ;;  %2709 = vst.msk [vmem:[#allocation2 + $0x548] sm:$0xff] %vm2539_vm1, %v2483_v63  ;;  %v3987_v23 = vld [vmem:[#allocation2 + $0x527] ss:$4 sm:$0xff]  ;;  %v2991_v6 = vld [vmem:[#allocation2 + $0x701] ss:$4 sm:$0x1] }
 0x5f5   : > { %v3717_v11 = vmax.f32 %v3546_v15, %v3645_v9 }
 0x5f6   : > { %v2175_v18 = vpop.f32.mrf.mxu0 }
 0x5f7   : > { %v3888_v21 = vmax.f32 %v3717_v11, %v3816_v17  ;;  %v2176_v22 = vadd.f32 %v12329_v52, %v2175_v18  ;;  %v3048_v11 = vmax.f32 %v2877_v61, %v2991_v6  ;;  %v3162_v17 = vld [vmem:[#allocation2 + $0x702] ss:$4 sm:$0x1] }
 0x5f8   : > { %v11230_v6 = vld [vmem:[%s11605_s2 + $0x300] sm:$0xff] }
 0x5f9   : > { %v4059_v24 = vmax.f32 %v3888_v21, %v3987_v23  ;;  %v2484_v29 = vmax.f32 %v2176_v22, 0.0  ;;  %10368 = vmatmul.msk.bf16.gmra.mxu0 %vm1401_vm0, %v11227_v12  ;;  %v11229_v22 = vld [vmem:[%s11605_s2 + $0x2f8] sm:$0xff] }
 0x5fb   : > { %4175 = vst.msk [vmem:[#allocation3 + $0x14d] sm:$0xff] %vm2539_vm1, %v4059_v24 }
 0x5fc   : > { %2710 = vst.msk [vmem:[#allocation2 + $0x550] sm:$0xff] %vm2539_vm1, %v2484_v29  ;;  %v3219_v29 = vmax.f32 %v3048_v11, %v3162_v17 }
 0x5fe   : > { %v2177_v30 = vpop.f32.mrf.mxu0 }
 0x5ff   : > { %v2178_v31 = vadd.f32 %v12329_v52, %v2177_v30 }
 0x601   : > { %v2485_v33 = vmax.f32 %v2178_v31, 0.0 }
 0x603   : > { %2711 = vst.msk [vmem:[#allocation2 + $0x558] sm:$0xff] %vm2539_vm1, %v2485_v33  ;;  %v3333_v33 = vld [vmem:[#allocation2 + $0x703] ss:$4 sm:$0x1] }
 0x606   : > { %v2180_v38 = vpop.f32.mrf.mxu0 }
 0x607   : > { %v2181_v42 = vadd.f32 %v12329_v52, %v2180_v38 }
 0x609   : > { %v2486_v43 = vmax.f32 %v2181_v42, 0.0  ;;  %10369 = vmatmul.msk.bf16.gmra.mxu0 %vm1401_vm0, %v11228_v37 }
 0x60a   : > { %v2849_v44 = vld [vmem:[#allocation2 + $0x540] ss:$4 sm:$0xff]  ;;  %v2963_v45 = vld [vmem:[#allocation2 + $0x541] ss:$4 sm:$0xff]  ;;  %v3134_v51 = vld [vmem:[#allocation2 + $0x542] ss:$4 sm:$0xff] }
 0x60b   : > { %v3034_v47 = vmax.f32 %v2849_v44, %v2963_v45  ;;  %2712 = vst.msk [vmem:[#allocation2 + $0x560] sm:$0xff] %vm2539_vm1, %v2486_v43  ;;  %v3305_v63 = vld [vmem:[#allocation2 + $0x543] ss:$4 sm:$0xff]  ;;  %v3390_v43 = vmax.f32 %v3219_v29, %v3333_v33  ;;  %v3504_v44 = vld [vmem:[#allocation2 + $0x704] ss:$4 sm:$0x1] }
 0x60d   : > { %v3205_v56 = vmax.f32 %v3034_v47, %v3134_v51  ;;  %v3561_v47 = vmax.f32 %v3390_v43, %v3504_v44  ;;  %v11231_v44 = vld [vmem:[%s11605_s2 + $0x308] sm:$0xff] }
 0x60e   : > { %v2182_v58 = vpop.f32.mrf.mxu0 }
 0x60f   : > { %v2183_v59 = vadd.f32 %v12329_v52, %v2182_v58  ;;  %v3376_v1 = vmax.f32 %v3205_v56, %v3305_v63  ;;  %v3675_v56 = vld [vmem:[#allocation2 + $0x705] ss:$4 sm:$0x1] }
 0x610   : > { %v3732_v61 = vmax.f32 %v3561_v47, %v3675_v56 }
 0x611   : > { %v2487_v15 = vmax.f32 %v2183_v59, 0.0  ;;  %v3846_v59 = vld [vmem:[#allocation2 + $0x706] ss:$4 sm:$0x1] }
 0x612   : > { %v3476_v9 = vld [vmem:[#allocation2 + $0x544] ss:$4 sm:$0xff]  ;;  %v3647_v18 = vld [vmem:[#allocation2 + $0x545] ss:$4 sm:$0xff]  ;;  %v3818_v23 = vld [vmem:[#allocation2 + $0x546] ss:$4 sm:$0xff] }
 0x613   : > { %v3547_v12 = vmax.f32 %v3376_v1, %v3476_v9  ;;  %2713 = vst.msk [vmem:[#allocation2 + $0x568] sm:$0xff] %vm2539_vm1, %v2487_v15  ;;  %v3989_v37 = vld [vmem:[#allocation2 + $0x547] ss:$4 sm:$0xff]  ;;  %v3903_v1 = vmax.f32 %v3732_v61, %v3846_v59 }
 0x614   : > { %v4017_v9 = vld [vmem:[#allocation2 + $0x707] ss:$4 sm:$0x1] }
 0x615   : > { %v3718_v21 = vmax.f32 %v3547_v12, %v3647_v18  ;;  %v4074_v18 = vmax.f32 %v3903_v1, %v4017_v9  ;;  %v12544_v9 = vpop.f32.mrf.mxu1 }
 0x616   : > { %v2185_v24 = vpop.f32.mrf.mxu0 }
 0x617   : > { %v3889_v30 = vmax.f32 %v3718_v21, %v3818_v23  ;;  %v2186_v31 = vadd.f32 %v12329_v52, %v2185_v24  ;;  %4191 = vst.msk [vmem:[#allocation3 + $0x1c5] sm:$0x1] %vm4190_vm3, %v4074_v18  ;;  %v4232_v18 = vld [vmem:[#allocation3 + $0x140] ss:$2 sm:$0xff]  ;;  %vm9748_vm3 = vcmask 131072  }
 0x619   : > { %v4060_v38 = vmax.f32 %v3889_v30, %v3989_v37  ;;  %v2488_v42 = vmax.f32 %v2186_v31, 0.0  ;;  %10370 = vmatmul.msk.bf16.gmra.mxu0 %vm1401_vm0, %v11229_v22 }
 0x61b   : > { %4176 = vst.msk [vmem:[#allocation3 + $0x155] sm:$0xff] %vm2539_vm1, %v4060_v38 }
 0x61c   : > { %2714 = vst.msk [vmem:[#allocation2 + $0x570] sm:$0xff] %vm2539_vm1, %v2488_v42 }
 0x61e   : > { %v2187_v45 = vpop.f32.mrf.mxu0 }
 0x61f   : > { %v2188_v51 = vadd.f32 %v12329_v52, %v2187_v45 }
 0x621   : > { %v2489_v58 = vmax.f32 %v2188_v51, 0.0 }
 0x623   : > { %2715 = vst.msk [vmem:[#allocation2 + $0x578] sm:$0xff] %vm2539_vm1, %v2489_v58 }
 0x626   : > { %v2190_v63 = vpop.f32.mrf.mxu0 }
 0x627   : > { %v2191_v15 = vadd.f32 %v12329_v52, %v2190_v63  ;;  %v12529_v52 = vld [vmem:[%s14153_s27] ss:$0 sm:$0xff] }
 0x629   : > { %v2490_v11 = vmax.f32 %v2191_v15, 0.0  ;;  %10371 = vmatmul.msk.bf16.gmra.mxu0 %vm1401_vm0, %v11230_v6  ;;  %v10462_v6 = vld [vmem:[%s14154_s22 + $0x14] sm:$0xf] }
 0x62a   : > { %v2851_v12 = vld [vmem:[#allocation2 + $0x560] ss:$4 sm:$0xff]  ;;  %v2965_v17 = vld [vmem:[#allocation2 + $0x561] ss:$4 sm:$0xff]  ;;  %v3136_v22 = vld [vmem:[#allocation2 + $0x562] ss:$4 sm:$0xff] }
 0x62b   : > { %v3035_v21 = vmax.f32 %v2851_v12, %v2965_v17  ;;  %2716 = vst.msk [vmem:[#allocation2 + $0x580] sm:$0xff] %vm2539_vm1, %v2490_v11  ;;  %v3307_v30 = vld [vmem:[#allocation2 + $0x563] ss:$4 sm:$0xff]  ;;  %v5370_v63 = vsel %vm4376_vm2, %v10462_v6, 0  ;;  %v12546_v11 = vpop.f32.mrf.mxu2 }
 0x62c   : > { %5379 = vmatpush.bf16.msrb.mxu3 %v5370_v63  ;;  %v4303_v12 = vld [vmem:[#allocation3 + $0x141] ss:$2 sm:$0xff] }
 0x62d   : > { %v3206_v23 = vmax.f32 %v3035_v21, %v3136_v22  ;;  %v4624_v21 = vld [vmem:[#allocation3 + $0x142] ss:$2 sm:$0xff]  ;;  %v12548_v22 = vpop.f32.mrf.mxu3 }
 0x62e   : > { %v2192_v24 = vpop.f32.mrf.mxu0 }
 0x62f   : > { %v2193_v29 = vadd.f32 %v12529_v52, %v2192_v24  ;;  %v3377_v31 = vmax.f32 %v3206_v23, %v3307_v30 }
 0x631   : > { %v2491_v33 = vmax.f32 %v2193_v29, 0.0 }
 0x632   : > { %v3478_v37 = vld [vmem:[#allocation2 + $0x564] ss:$4 sm:$0xff]  ;;  %v3649_v42 = vld [vmem:[#allocation2 + $0x565] ss:$4 sm:$0xff]  ;;  %v3820_v45 = vld [vmem:[#allocation2 + $0x566] ss:$4 sm:$0xff] }
 0x633   : > { %v3548_v38 = vmax.f32 %v3377_v31, %v3478_v37  ;;  %2717 = vst.msk [vmem:[#allocation2 + $0x588] sm:$0xff] %vm2539_vm1, %v2491_v33  ;;  %v3991_v58 = vld [vmem:[#allocation2 + $0x567] ss:$4 sm:$0xff] }
 0x634   : > { %v11232_v37 = vld [vmem:[%s11605_s2 + $0x310] sm:$0xff] }
 0x635   : > { %v3719_v43 = vmax.f32 %v3548_v38, %v3649_v42 }
 0x636   : > { %v2195_v47 = vpop.f32.mrf.mxu0 }
 0x637   : > { %v3890_v51 = vmax.f32 %v3719_v43, %v3820_v45  ;;  %v2196_v56 = vadd.f32 %v12529_v52, %v2195_v47 }
 0x639   : > { %v4061_v61 = vmax.f32 %v3890_v51, %v3991_v58  ;;  %v2492_v59 = vmax.f32 %v2196_v56, 0.0  ;;  %10372 = vmatmul.msk.bf16.gmra.mxu0 %vm1401_vm0, %v11231_v44 }
 0x63b   : > { %4177 = vst.msk [vmem:[#allocation3 + $0x15d] sm:$0xff] %vm2539_vm1, %v4061_v61 }
 0x63c   : > { %2718 = vst.msk [vmem:[#allocation2 + $0x590] sm:$0xff] %vm2539_vm1, %v2492_v59 }
 0x63e   : > { %v2197_v1 = vpop.f32.mrf.mxu0 }
 0x63f   : > { %v2198_v15 = vadd.f32 %v12529_v52, %v2197_v1 }
 0x641   : > { %v2493_v17 = vmax.f32 %v2198_v15, 0.0 }
 0x642   : > { %v4305_v23 = vld [vmem:[#allocation3 + $0x151] ss:$2 sm:$0xff]  ;;  %v4234_v24 = vld [vmem:[#allocation3 + $0x150] ss:$2 sm:$0xff]  ;;  %v4434_v43 = vpop.f32.mrf.mxu1 }
 0x643   : > { %v4626_v29 = vld [vmem:[#allocation3 + $0x152] ss:$2 sm:$0xff]  ;;  %2719 = vst.msk [vmem:[#allocation2 + $0x598] sm:$0xff] %vm2539_vm1, %v2493_v17  ;;  %v4328_v30 = vpack.c.bf16 %v4305_v23, %v4303_v12  ;;  %v4257_v31 = vpack.c.bf16 %v4234_v24, %v4232_v18 }
 0x644   : > { %v4649_v33 = vpack.c.bf16 %v4626_v29, %v4624_v21 }
 0x645   : > { %10399 = vmatmul.msk.bf16.gmra.mxu1 %vm2539_vm1, %v4328_v30  ;;  %10413 = vmatmul.msk.bf16.gmra.mxu2 %vm2539_vm1, %v4257_v31 }
 0x646   : > { %10428 = vmatmul.msk.bf16.gmra.mxu3 %vm2539_vm1, %v4649_v33  ;;  %v2200_v38 = vpop.f32.mrf.mxu0 }
 0x647   : > { %v2201_v42 = vadd.f32 %v12529_v52, %v2200_v38 }
 0x648   : > { %v4558_v44 = vpop.f32.mrf.mxu2 }
 0x649   : > { %v2494_v45 = vmax.f32 %v2201_v42, 0.0  ;;  %v4559_v47 = vadd.f32 %v4558_v44, %v4434_v43  ;;  %10373 = vmatmul.msk.bf16.gmra.mxu0 %vm1401_vm0, %v11232_v37  ;;  %v4754_v58 = vpop.f32.mrf.mxu3  ;;  %v10447_v44 = vld [vmem:[%s14154_s22 + $0x10] sm:$0xf]  ;;  %vm9177_vm0 = vcmask 520192  }
 0x64a   : > { %v2853_v51 = vld [vmem:[#allocation2 + $0x580] ss:$4 sm:$0xff]  ;;  %v2967_v56 = vld [vmem:[#allocation2 + $0x581] ss:$4 sm:$0xff]  ;;  %v3138_v6 = vld [vmem:[#allocation2 + $0x582] ss:$4 sm:$0xff] }
 0x64b   : > { %v3036_v61 = vmax.f32 %v2853_v51, %v2967_v56  ;;  %2720 = vst.msk [vmem:[#allocation2 + $0x5a0] sm:$0xff] %vm2539_vm1, %v2494_v45  ;;  %v12558_v59 = vadd.f32 %v4754_v58, %v4559_v47  ;;  %v3309_v12 = vld [vmem:[#allocation2 + $0x583] ss:$4 sm:$0xff]  ;;  %v5146_v45 = vsel %vm4376_vm2, %v10447_v44, 0 }
 0x64c   : > { %5155 = vmatpush.bf16.msrb.mxu2 %v5146_v45 }
 0x64d   : > { %v3207_v63 = vmax.f32 %v3036_v61, %v3138_v6 }
 0x64e   : > { %v2202_v1 = vpop.f32.mrf.mxu0 }
 0x64f   : > { %v2203_v15 = vadd.f32 %v12529_v52, %v2202_v1  ;;  %v3378_v17 = vmax.f32 %v3207_v63, %v3309_v12 }
 0x651   : > { %v2495_v18 = vmax.f32 %v2203_v15, 0.0 }
 0x652   : > { %v3480_v21 = vld [vmem:[#allocation2 + $0x584] ss:$4 sm:$0xff]  ;;  %v3651_v24 = vld [vmem:[#allocation2 + $0x585] ss:$4 sm:$0xff]  ;;  %v3822_v30 = vld [vmem:[#allocation2 + $0x586] ss:$4 sm:$0xff] }
 0x653   : > { %v3549_v23 = vmax.f32 %v3378_v17, %v3480_v21  ;;  %2721 = vst.msk [vmem:[#allocation2 + $0x5a8] sm:$0xff] %vm2539_vm1, %v2495_v18  ;;  %v3993_v38 = vld [vmem:[#allocation2 + $0x587] ss:$4 sm:$0xff] }
 0x655   : > { %v3720_v29 = vmax.f32 %v3549_v23, %v3651_v24 }
 0x656   : > { %v2205_v31 = vpop.f32.mrf.mxu0 }
 0x657   : > { %v3891_v33 = vmax.f32 %v3720_v29, %v3822_v30  ;;  %v2206_v37 = vadd.f32 %v12529_v52, %v2205_v31 }
 0x659   : > { %v4062_v42 = vmax.f32 %v3891_v33, %v3993_v38  ;;  %v2496_v43 = vmax.f32 %v2206_v37, 0.0 }
 0x65b   : > { %4178 = vst.msk [vmem:[#allocation3 + $0x165] sm:$0xff] %vm2539_vm1, %v4062_v42 }
 0x65c   : > { %2722 = vst.msk [vmem:[#allocation2 + $0x5b0] sm:$0xff] %vm2539_vm1, %v2496_v43 }
 0x65e   : > { %v2207_v47 = vpop.f32.mrf.mxu0 }
 0x65f   : > { %v2208_v51 = vadd.f32 %v12529_v52, %v2207_v47 }
 0x661   : > { %v2497_v56 = vmax.f32 %v2208_v51, 0.0 }
 0x663   : > { %2723 = vst.msk [vmem:[#allocation2 + $0x5b8] sm:$0xff] %vm2539_vm1, %v2497_v56 }
 0x666   : > { %v2210_v58 = vpop.f32.mrf.mxu0 }
 0x667   : > { %v2211_v61 = vadd.f32 %v12529_v52, %v2210_v58 }
 0x669   : > { %v2498_v6 = vmax.f32 %v2211_v61, 0.0 }
 0x66a   : > { %v2855_v63 = vld [vmem:[#allocation2 + $0x5a0] ss:$4 sm:$0xff]  ;;  %v2969_v1 = vld [vmem:[#allocation2 + $0x5a1] ss:$4 sm:$0xff]  ;;  %v3140_v12 = vld [vmem:[#allocation2 + $0x5a2] ss:$4 sm:$0xff] }
 0x66b   : > { %v3037_v15 = vmax.f32 %v2855_v63, %v2969_v1  ;;  %2724 = vst.msk [vmem:[#allocation2 + $0x5c0] sm:$0xff] %vm2539_vm1, %v2498_v6  ;;  %v3311_v23 = vld [vmem:[#allocation2 + $0x5a3] ss:$4 sm:$0xff] }
 0x66d   : > { %v3208_v17 = vmax.f32 %v3037_v15, %v3140_v12 }
 0x66e   : > { %v2212_v18 = vpop.f32.mrf.mxu0 }
 0x66f   : > { %v2213_v21 = vadd.f32 %v12529_v52, %v2212_v18  ;;  %v3379_v24 = vmax.f32 %v3208_v17, %v3311_v23 }
 0x671   : > { %v2499_v29 = vmax.f32 %v2213_v21, 0.0 }
 0x672   : > { %v3482_v30 = vld [vmem:[#allocation2 + $0x5a4] ss:$4 sm:$0xff]  ;;  %v3653_v33 = vld [vmem:[#allocation2 + $0x5a5] ss:$4 sm:$0xff]  ;;  %v3824_v38 = vld [vmem:[#allocation2 + $0x5a6] ss:$4 sm:$0xff] }
 0x673   : > { %v3550_v31 = vmax.f32 %v3379_v24, %v3482_v30  ;;  %2725 = vst.msk [vmem:[#allocation2 + $0x5c8] sm:$0xff] %vm2539_vm1, %v2499_v29  ;;  %v3995_v45 = vld [vmem:[#allocation2 + $0x5a7] ss:$4 sm:$0xff] }
 0x675   : > { %v3721_v37 = vmax.f32 %v3550_v31, %v3653_v33 }
 0x676   : > { %v2215_v42 = vpop.f32.mrf.mxu0 }
 0x677   : > { %v3892_v43 = vmax.f32 %v3721_v37, %v3824_v38  ;;  %v2216_v44 = vadd.f32 %v12529_v52, %v2215_v42 }
 0x679   : > { %v4063_v47 = vmax.f32 %v3892_v43, %v3995_v45  ;;  %v2500_v51 = vmax.f32 %v2216_v44, 0.0 }
 0x67b   : > { %4179 = vst.msk [vmem:[#allocation3 + $0x16d] sm:$0xff] %vm2539_vm1, %v4063_v47 }
 0x67c   : > { %2726 = vst.msk [vmem:[#allocation2 + $0x5d0] sm:$0xff] %vm2539_vm1, %v2500_v51 }
 0x67e   : > { %v2217_v56 = vpop.f32.mrf.mxu0 }
 0x67f   : > { %v2218_v58 = vadd.f32 %v12529_v52, %v2217_v56 }
 0x681   : > { %v2501_v61 = vmax.f32 %v2218_v58, 0.0 }
 0x683   : > { %2727 = vst.msk [vmem:[#allocation2 + $0x5d8] sm:$0xff] %vm2539_vm1, %v2501_v61 }
 0x686   : > { %v2220_v6 = vpop.f32.mrf.mxu0 }
 0x687   : > { %v2221_v63 = vadd.f32 %v12529_v52, %v2220_v6 }
 0x689   : > { %v2502_v1 = vmax.f32 %v2221_v63, 0.0 }
 0x68a   : > { %v2857_v15 = vld [vmem:[#allocation2 + $0x5c0] ss:$4 sm:$0xff]  ;;  %v2971_v12 = vld [vmem:[#allocation2 + $0x5c1] ss:$4 sm:$0xff]  ;;  %v3142_v18 = vld [vmem:[#allocation2 + $0x5c2] ss:$4 sm:$0xff] }
 0x68b   : > { %v3038_v17 = vmax.f32 %v2857_v15, %v2971_v12  ;;  %2728 = vst.msk [vmem:[#allocation2 + $0x5e0] sm:$0xff] %vm2539_vm1, %v2502_v1  ;;  %v3313_v29 = vld [vmem:[#allocation2 + $0x5c3] ss:$4 sm:$0xff] }
 0x68d   : > { %v3209_v21 = vmax.f32 %v3038_v17, %v3142_v18 }
 0x68e   : > { %v2222_v23 = vpop.f32.mrf.mxu0 }
 0x68f   : > { %v2223_v24 = vadd.f32 %v12529_v52, %v2222_v23  ;;  %v3380_v30 = vmax.f32 %v3209_v21, %v3313_v29 }
 0x691   : > { %v2503_v31 = vmax.f32 %v2223_v24, 0.0 }
 0x692   : > { %v3484_v33 = vld [vmem:[#allocation2 + $0x5c4] ss:$4 sm:$0xff]  ;;  %v3655_v38 = vld [vmem:[#allocation2 + $0x5c5] ss:$4 sm:$0xff]  ;;  %v3826_v43 = vld [vmem:[#allocation2 + $0x5c6] ss:$4 sm:$0xff] }
 0x693   : > { %v3551_v37 = vmax.f32 %v3380_v30, %v3484_v33  ;;  %2729 = vst.msk [vmem:[#allocation2 + $0x5e8] sm:$0xff] %vm2539_vm1, %v2503_v31  ;;  %v3997_v51 = vld [vmem:[#allocation2 + $0x5c7] ss:$4 sm:$0xff] }
 0x695   : > { %v3722_v42 = vmax.f32 %v3551_v37, %v3655_v38 }
 0x696   : > { %v2225_v44 = vpop.f32.mrf.mxu0 }
 0x697   : > { %v3893_v45 = vmax.f32 %v3722_v42, %v3826_v43  ;;  %v2226_v47 = vadd.f32 %v12529_v52, %v2225_v44 }
 0x699   : > { %v4064_v56 = vmax.f32 %v3893_v45, %v3997_v51  ;;  %v2504_v58 = vmax.f32 %v2226_v47, 0.0 }
 0x69b   : > { %4180 = vst.msk [vmem:[#allocation3 + $0x175] sm:$0xff] %vm2539_vm1, %v4064_v56 }
 0x69c   : > { %2730 = vst.msk [vmem:[#allocation2 + $0x5f0] sm:$0xff] %vm2539_vm1, %v2504_v58 }
 0x69e   : > { %v2227_v61 = vpop.f32.mrf.mxu0 }
 0x69f   : > { %v2228_v6 = vadd.f32 %v12529_v52, %v2227_v61 }
 0x6a1   : > { %v2505_v63 = vmax.f32 %v2228_v6, 0.0 }
 0x6a3   : > { %2731 = vst.msk [vmem:[#allocation2 + $0x5f8] sm:$0xff] %vm2539_vm1, %v2505_v63 }
 0x6a6   : > { %v2230_v1 = vpop.f32.mrf.mxu0 }
 0x6a7   : > { %v2231_v15 = vadd.f32 %v12529_v52, %v2230_v1 }
 0x6a9   : > { %v2506_v12 = vmax.f32 %v2231_v15, 0.0  ;;  %v12597_v15 = vpop.f32.mrf.mxu1 }
 0x6aa   : > { %v2859_v17 = vld [vmem:[#allocation2 + $0x5e0] ss:$4 sm:$0xff]  ;;  %v2973_v18 = vld [vmem:[#allocation2 + $0x5e1] ss:$4 sm:$0xff]  ;;  %v3144_v23 = vld [vmem:[#allocation2 + $0x5e2] ss:$4 sm:$0xff] }
 0x6ab   : > { %v3039_v21 = vmax.f32 %v2859_v17, %v2973_v18  ;;  %2732 = vst.msk [vmem:[#allocation2 + $0x600] sm:$0xff] %vm2539_vm1, %v2506_v12  ;;  %v3315_v31 = vld [vmem:[#allocation2 + $0x5e3] ss:$4 sm:$0xff]  ;;  %v12599_v12 = vpop.f32.mrf.mxu2 }
 0x6ac   : > { %14155 = vst [vmem:[#allocation21_spill] sm:$0xff] %v12597_v15  ;;  %v4307_v17 = vld [vmem:[#allocation3 + $0x161] ss:$2 sm:$0xff] }
 0x6ad   : > { %v3210_v24 = vmax.f32 %v3039_v21, %v3144_v23  ;;  %14156 = vst [vmem:[#allocation22_spill] sm:$0xff] %v12599_v12  ;;  %v4236_v21 = vld [vmem:[#allocation3 + $0x160] ss:$2 sm:$0xff] }
 0x6ae   : > { %v2232_v29 = vpop.f32.mrf.mxu0  ;;  %v4628_v23 = vld [vmem:[#allocation3 + $0x162] ss:$2 sm:$0xff] }
 0x6af   : > { %v2233_v30 = vadd.f32 %v12529_v52, %v2232_v29  ;;  %v3381_v33 = vmax.f32 %v3210_v24, %v3315_v31  ;;  %v12601_v24 = vpop.f32.mrf.mxu3 }
 0x6b0   : > { %14157 = vst [vmem:[#allocation23_spill] sm:$0xff] %v12601_v24 }
 0x6b1   : > { %v2507_v37 = vmax.f32 %v2233_v30, 0.0 }
 0x6b2   : > { %v3486_v38 = vld [vmem:[#allocation2 + $0x5e4] ss:$4 sm:$0xff]  ;;  %v3657_v43 = vld [vmem:[#allocation2 + $0x5e5] ss:$4 sm:$0xff]  ;;  %v3828_v45 = vld [vmem:[#allocation2 + $0x5e6] ss:$4 sm:$0xff] }
 0x6b3   : > { %v3552_v42 = vmax.f32 %v3381_v33, %v3486_v38  ;;  %2733 = vst.msk [vmem:[#allocation2 + $0x608] sm:$0xff] %vm2539_vm1, %v2507_v37  ;;  %v3999_v58 = vld [vmem:[#allocation2 + $0x5e7] ss:$4 sm:$0xff] }
 0x6b5   : > { %v3723_v44 = vmax.f32 %v3552_v42, %v3657_v43 }
 0x6b6   : > { %v2235_v47 = vpop.f32.mrf.mxu0 }
 0x6b7   : > { %v3894_v51 = vmax.f32 %v3723_v44, %v3828_v45  ;;  %v2236_v56 = vadd.f32 %v12529_v52, %v2235_v47 }
 0x6b9   : > { %v4065_v61 = vmax.f32 %v3894_v51, %v3999_v58  ;;  %v2508_v6 = vmax.f32 %v2236_v56, 0.0 }
 0x6bb   : > { %4181 = vst.msk [vmem:[#allocation3 + $0x17d] sm:$0xff] %vm2539_vm1, %v4065_v61 }
 0x6bc   : > { %2734 = vst.msk [vmem:[#allocation2 + $0x610] sm:$0xff] %vm2539_vm1, %v2508_v6 }
 0x6be   : > { %v2237_v63 = vpop.f32.mrf.mxu0 }
 0x6bf   : > { %v2238_v1 = vadd.f32 %v12529_v52, %v2237_v63 }
 0x6c1   : > { %v2509_v18 = vmax.f32 %v2238_v1, 0.0 }
 0x6c2   : > { %v4309_v29 = vld [vmem:[#allocation3 + $0x171] ss:$2 sm:$0xff]  ;;  %v4238_v30 = vld [vmem:[#allocation3 + $0x170] ss:$2 sm:$0xff]  ;;  %v4439_v44 = vpop.f32.mrf.mxu1 }
 0x6c3   : > { %v4630_v31 = vld [vmem:[#allocation3 + $0x172] ss:$2 sm:$0xff]  ;;  %2735 = vst.msk [vmem:[#allocation2 + $0x618] sm:$0xff] %vm2539_vm1, %v2509_v18  ;;  %v4329_v33 = vpack.c.bf16 %v4309_v29, %v4307_v17  ;;  %v4258_v37 = vpack.c.bf16 %v4238_v30, %v4236_v21 }
 0x6c4   : > { %v4650_v38 = vpack.c.bf16 %v4630_v31, %v4628_v23 }
 0x6c5   : > { %10400 = vmatmul.msk.bf16.gmra.mxu1 %vm2539_vm1, %v4329_v33  ;;  %10414 = vmatmul.msk.bf16.gmra.mxu2 %vm2539_vm1, %v4258_v37 }
 0x6c6   : > { %10429 = vmatmul.msk.bf16.gmra.mxu3 %vm2539_vm1, %v4650_v38  ;;  %v2240_v42 = vpop.f32.mrf.mxu0 }
 0x6c7   : > { %v2241_v43 = vadd.f32 %v12529_v52, %v2240_v42 }
 0x6c8   : > { %v4563_v45 = vpop.f32.mrf.mxu2 }
 0x6c9   : > { %v2510_v47 = vmax.f32 %v2241_v43, 0.0  ;;  %v4564_v51 = vadd.f32 %v4563_v45, %v4439_v44  ;;  %v4759_v61 = vpop.f32.mrf.mxu3 }
 0x6ca   : > { %v2861_v56 = vld [vmem:[#allocation2 + $0x600] ss:$4 sm:$0xff]  ;;  %v2975_v58 = vld [vmem:[#allocation2 + $0x601] ss:$4 sm:$0xff]  ;;  %v3146_v1 = vld [vmem:[#allocation2 + $0x602] ss:$4 sm:$0xff] }
 0x6cb   : > { %v3040_v6 = vmax.f32 %v2861_v56, %v2975_v58  ;;  %2736 = vst.msk [vmem:[#allocation2 + $0x620] sm:$0xff] %vm2539_vm1, %v2510_v47  ;;  %v12609_v63 = vadd.f32 %v4759_v61, %v4564_v51  ;;  %v3317_v23 = vld [vmem:[#allocation2 + $0x603] ss:$4 sm:$0xff] }
 0x6cd   : > { %14158 = vst [vmem:[#allocation24_spill] sm:$0xff] %v12609_v63  ;;  %v3211_v17 = vmax.f32 %v3040_v6, %v3146_v1  ;;  %v5298_v63 = vld [vmem:[#allocation3 + $0x155] ss:$2 sm:$0xff] }
 0x6ce   : > { %v2242_v18 = vpop.f32.mrf.mxu0 }
 0x6cf   : > { %v2243_v21 = vadd.f32 %v12529_v52, %v2242_v18  ;;  %v3382_v29 = vmax.f32 %v3211_v17, %v3317_v23 }
 0x6d1   : > { %v2511_v30 = vmax.f32 %v2243_v21, 0.0 }
 0x6d2   : > { %v3488_v31 = vld [vmem:[#allocation2 + $0x604] ss:$4 sm:$0xff]  ;;  %v3659_v37 = vld [vmem:[#allocation2 + $0x605] ss:$4 sm:$0xff]  ;;  %v3830_v42 = vld [vmem:[#allocation2 + $0x606] ss:$4 sm:$0xff] }
 0x6d3   : > { %v3553_v33 = vmax.f32 %v3382_v29, %v3488_v31  ;;  %2737 = vst.msk [vmem:[#allocation2 + $0x628] sm:$0xff] %vm2539_vm1, %v2511_v30  ;;  %v4001_v44 = vld [vmem:[#allocation2 + $0x607] ss:$4 sm:$0xff] }
 0x6d5   : > { %v3724_v38 = vmax.f32 %v3553_v33, %v3659_v37 }
 0x6d7   : > { %v3895_v43 = vmax.f32 %v3724_v38, %v3830_v42 }
 0x6d9   : > { %v4066_v45 = vmax.f32 %v3895_v43, %v4001_v44 }
 0x6da   : > { %v2863_v47 = vld [vmem:[#allocation2 + $0x620] ss:$4 sm:$0xff]  ;;  %v2977_v51 = vld [vmem:[#allocation2 + $0x621] ss:$4 sm:$0xff]  ;;  %v3148_v58 = vld [vmem:[#allocation2 + $0x622] ss:$4 sm:$0xff] }
 0x6db   : > { %4182 = vst.msk [vmem:[#allocation3 + $0x185] sm:$0xff] %vm2539_vm1, %v4066_v45  ;;  %v3041_v56 = vmax.f32 %v2863_v47, %v2977_v51  ;;  %v3319_v61 = vld [vmem:[#allocation2 + $0x623] ss:$4 sm:$0xff]  ;;  %v3490_v1 = vld [vmem:[#allocation2 + $0x624] ss:$4 sm:$0xff] }
 0x6dc   : > { %v3661_v18 = vld [vmem:[#allocation2 + $0x625] ss:$4 sm:$0xff]  ;;  %v3832_v23 = vld [vmem:[#allocation2 + $0x626] ss:$4 sm:$0xff]  ;;  %v4003_v30 = vld [vmem:[#allocation2 + $0x627] ss:$4 sm:$0xff] }
 0x6dd   : > { %v3212_v52 = vmax.f32 %v3041_v56, %v3148_v58  ;;  %v10432_v56 = vld [vmem:[%s14154_s22 + $0xc] sm:$0xf] }
 0x6de   : > { %v4922_v58 = vsel %vm4376_vm2, %v10432_v56, 0 }
 0x6df   : > { %v3383_v6 = vmax.f32 %v3212_v52, %v3319_v61  ;;  %4931 = vmatpush.bf16.msrb.mxu1 %v4922_v58  ;;  %v4315_v52 = vld [vmem:[#allocation3 + $0x1a1] ss:$2 sm:$0xff]  ;;  %v4317_v61 = vld [vmem:[#allocation3 + $0x1b1] ss:$2 sm:$0xff] }
 0x6e1   : > { %v3554_v17 = vmax.f32 %v3383_v6, %v3490_v1  ;;  %v4244_v6 = vld [vmem:[#allocation3 + $0x1a0] ss:$2 sm:$0xff]  ;;  %v4246_v1 = vld [vmem:[#allocation3 + $0x1b0] ss:$2 sm:$0xff] }
 0x6e3   : > { %v3725_v21 = vmax.f32 %v3554_v17, %v3661_v18  ;;  %v4636_v17 = vld [vmem:[#allocation3 + $0x1a2] ss:$2 sm:$0xff]  ;;  %v4638_v18 = vld [vmem:[#allocation3 + $0x1b2] ss:$2 sm:$0xff] }
 0x6e5   : > { %v3896_v29 = vmax.f32 %v3725_v21, %v3832_v23  ;;  %v4331_v21 = vpack.c.bf16 %v4317_v61, %v4315_v52  ;;  %v4260_v23 = vpack.c.bf16 %v4246_v1, %v4244_v6  ;;  %v10477_v52 = vld [vmem:[%s14154_s22 + $0x18] sm:$0xf]  ;;  %v5038_v1 = vld [vmem:[#allocation3 + $0x34] ss:$2 sm:$0xff] }
 0x6e6   : > { %v5594_v61 = vsel %vm4376_vm2, %v10477_v52, 0  ;;  %v4198_v6 = vld [vmem:[#allocation3 + $0x30] ss:$2 sm:$0xff]  ;;  %v5270_v52 = vld [vmem:[#allocation3 + $0x75] ss:$2 sm:$0xff] }
 0x6e7   : > { %v4067_v31 = vmax.f32 %v3896_v29, %v4003_v30  ;;  %v4652_v29 = vpack.c.bf16 %v4638_v18, %v4636_v17  ;;  %v10492_v30 = vld [vmem:[%s14154_s22 + $0x1c] sm:$0xf]  ;;  %v4196_v18 = vld [vmem:[#allocation3 + $0x20] ss:$2 sm:$0xff] }
 0x6e8   : > { %v5262_v17 = vld [vmem:[#allocation3 + $0x35] ss:$2 sm:$0xff] }
 0x6e9   : > { %4183 = vst.msk [vmem:[#allocation3 + $0x18d] sm:$0xff] %vm2539_vm1, %v4067_v31  ;;  %v10507_v31 = vld [vmem:[%s14154_s22 + $0x20] sm:$0xf] }
 0x6f0   : > { %v4311_v33 = vld [vmem:[#allocation3 + $0x181] ss:$2 sm:$0xff]  ;;  %v4313_v37 = vld [vmem:[#allocation3 + $0x191] ss:$2 sm:$0xff]  ;;  %v4240_v38 = vld [vmem:[#allocation3 + $0x180] ss:$2 sm:$0xff] }
 0x6f1   : > { %v4330_v42 = vpack.c.bf16 %v4313_v37, %v4311_v33  ;;  %v4242_v43 = vld [vmem:[#allocation3 + $0x190] ss:$2 sm:$0xff]  ;;  %v5818_v33 = vsel %vm4376_vm2, %v10492_v30, 0  ;;  %v6042_v37 = vsel %vm4376_vm2, %v10507_v31, 0 }
 0x6f2   : > { %v4632_v44 = vld [vmem:[#allocation3 + $0x182] ss:$2 sm:$0xff]  ;;  %v4634_v45 = vld [vmem:[#allocation3 + $0x192] ss:$2 sm:$0xff]  ;;  %v4259_v47 = vpack.c.bf16 %v4242_v43, %v4240_v38  ;;  %5827 = vmatpush.bf16.msra.mxu2 %v5818_v33  ;;  %6051 = vmatpush.bf16.msra.mxu3 %v6042_v37  ;;  %v5258_v43 = vld [vmem:[#allocation3 + $0x15] ss:$2 sm:$0xff] }
 0x6f3   : > { %v4651_v51 = vpack.c.bf16 %v4634_v45, %v4632_v44  ;;  %10401 = vmatmul.msk.bf16.gmra.mxu1 %vm2539_vm1, %v4330_v42  ;;  %v4194_v38 = vld [vmem:[#allocation3 + $0x10] ss:$2 sm:$0xff]  ;;  %v4192_v44 = vld [vmem:[#allocation3] ss:$2 sm:$0xff]  ;;  %v4810_v33 = vld [vmem:[#allocation3 + $0x13] ss:$2 sm:$0xff] }
 0x6f4   : > { %10415 = vmatmul.msk.bf16.gmra.mxu2 %vm2539_vm1, %v4259_v47  ;;  %v5034_v42 = vld [vmem:[#allocation3 + $0x14] ss:$2 sm:$0xff]  ;;  %v4247_v45 = vpack.c.bf16 %v4194_v38, %v4192_v44  ;;  %v5032_v47 = vld [vmem:[#allocation3 + $0x4] ss:$2 sm:$0xff]  ;;  %v5266_v38 = vld [vmem:[#allocation3 + $0x55] ss:$2 sm:$0xff] }
 0x6f5   : > { %10430 = vmatmul.msk.bf16.gmra.mxu3 %vm2539_vm1, %v4651_v51  ;;  %v5256_v51 = vld [vmem:[#allocation3 + $0x5] ss:$2 sm:$0xff]  ;;  %v5087_v56 = vpack.c.bf16 %v5034_v42, %v5032_v47  ;;  %v5042_v37 = vld [vmem:[#allocation3 + $0x54] ss:$2 sm:$0xff]  ;;  %v5040_v44 = vld [vmem:[#allocation3 + $0x44] ss:$2 sm:$0xff] }
 0x6f6   : > { %v5311_v58 = vpack.c.bf16 %v5258_v43, %v5256_v51  ;;  %v4808_v42 = vld [vmem:[#allocation3 + $0x3] ss:$2 sm:$0xff]  ;;  %v5089_v47 = vpack.c.bf16 %v5042_v37, %v5040_v44  ;;  %v5050_v44 = vld [vmem:[#allocation3 + $0x94] ss:$2 sm:$0xff] }
 0x6f7   : > { %v4863_v43 = vpack.c.bf16 %v4810_v33, %v4808_v42 }
 0x703   : > { %10402 = vmatmul.msk.bf16.gmra.mxu1 %vm2539_vm1, %v4331_v21  ;;  %v4248_v21 = vpack.c.bf16 %v4198_v6, %v4196_v18  ;;  %v12648_v6 = vpop.f32.mrf.mxu2  ;;  %v5044_v18 = vld [vmem:[#allocation3 + $0x64] ss:$2 sm:$0xff] }
 0x704   : > { %10416 = vmatmul.msk.bf16.gmra.mxu2 %vm2539_vm1, %v4260_v23  ;;  %v5036_v23 = vld [vmem:[#allocation3 + $0x24] ss:$2 sm:$0xff]  ;;  %14160 = vst [vmem:[#allocation26_spill] sm:$0xff] %v12648_v6 }
 0x705   : > { %10431 = vmatmul.msk.bf16.gmra.mxu3 %vm2539_vm1, %v4652_v29  ;;  %v5260_v29 = vld [vmem:[#allocation3 + $0x25] ss:$2 sm:$0xff]  ;;  %v5088_v30 = vpack.c.bf16 %v5038_v1, %v5036_v23  ;;  %v12650_v23 = vpop.f32.mrf.mxu3 }
 0x706   : > { %v5312_v31 = vpack.c.bf16 %v5262_v17, %v5260_v29  ;;  %v4812_v1 = vld [vmem:[#allocation3 + $0x23] ss:$2 sm:$0xff]  ;;  %14161 = vst [vmem:[#allocation27_spill] sm:$0xff] %v12650_v23 }
 0x707   : > { %v4836_v23 = vld [vmem:[#allocation3 + $0xe3] ss:$2 sm:$0xff] }
 0x713   : > { %10403 = vmatmul.msk.bf16.vlgmr.msra.gmra.mxu1 %vm2539_vm1, %v4247_v45  ;;  %v5264_v45 = vld [vmem:[#allocation3 + $0x45] ss:$2 sm:$0xff] }
 0x714   : > { %10448 = vmatmul.msk.bf16.vlgmr.msrb.gmra.mxu2 %vm2539_vm1, %v5087_v56  ;;  %5603 = vmatpush.bf16.msra.mxu1 %v5594_v61  ;;  %v5313_v51 = vpack.c.bf16 %v5266_v38, %v5264_v45  ;;  %v4814_v56 = vld [vmem:[#allocation3 + $0x33] ss:$2 sm:$0xff]  ;;  %v12646_v61 = vpop.f32.mrf.mxu1 }
 0x715   : > { %10463 = vmatmul.msk.bf16.vlgmr.msrb.gmra.mxu3 %vm2539_vm1, %v5311_v58  ;;  %v5046_v58 = vld [vmem:[#allocation3 + $0x74] ss:$2 sm:$0xff]  ;;  %14159 = vst [vmem:[#allocation25_spill] sm:$0xff] %v12646_v61  ;;  %v4864_v17 = vpack.c.bf16 %v4814_v56, %v4812_v1  ;;  %v5274_v45 = vld [vmem:[#allocation3 + $0x95] ss:$2 sm:$0xff] }
 0x716   : > { %v5090_v29 = vpack.c.bf16 %v5046_v58, %v5044_v18  ;;  %v5048_v56 = vld [vmem:[#allocation3 + $0x84] ss:$2 sm:$0xff]  ;;  %v5272_v58 = vld [vmem:[#allocation3 + $0x85] ss:$2 sm:$0xff]  ;;  %v5054_v18 = vld [vmem:[#allocation3 + $0xb4] ss:$2 sm:$0xff] }
 0x717   : > { %v5315_v1 = vpack.c.bf16 %v5274_v45, %v5272_v58 }
 0x723   : > { %10404 = vmatmul.msk.bf16.gmra.mxu1 %vm2539_vm1, %v4248_v21  ;;  %v5268_v21 = vld [vmem:[#allocation3 + $0x65] ss:$2 sm:$0xff] }
 0x724   : > { %10449 = vmatmul.msk.bf16.gmra.mxu2 %vm2539_vm1, %v5088_v30  ;;  %v5314_v30 = vpack.c.bf16 %v5270_v52, %v5268_v21  ;;  %v5091_v52 = vpack.c.bf16 %v5050_v44, %v5048_v56  ;;  %v5278_v21 = vld [vmem:[#allocation3 + $0xb5] ss:$2 sm:$0xff] }
 0x725   : > { %10464 = vmatmul.msk.bf16.gmra.mxu3 %vm2539_vm1, %v5312_v31  ;;  %v4826_v44 = vld [vmem:[#allocation3 + $0x93] ss:$2 sm:$0xff] }
 0x726   : > { %v5282_v56 = vld [vmem:[#allocation3 + $0xd5] ss:$2 sm:$0xff] }
 0x733   : > { %10433 = vmatmul.msk.bf16.vlgmr.msrb.gmra.mxu1 %vm2539_vm1, %v4863_v43  ;;  %v4818_v43 = vld [vmem:[#allocation3 + $0x53] ss:$2 sm:$0xff] }
 0x734   : > { %10450 = vmatmul.msk.bf16.gmra.mxu2 %vm2539_vm1, %v5089_v47  ;;  %v4816_v47 = vld [vmem:[#allocation3 + $0x43] ss:$2 sm:$0xff] }
 0x735   : > { %10465 = vmatmul.msk.bf16.gmra.mxu3 %vm2539_vm1, %v5313_v51  ;;  %v4865_v51 = vpack.c.bf16 %v4818_v43, %v4816_v47 }
 0x742   : > { %v4444_v31 = vpop.f32.mrf.mxu1 }
 0x743   : > { %10434 = vmatmul.msk.bf16.gmra.mxu1 %vm2539_vm1, %v4864_v17  ;;  %v4822_v17 = vld [vmem:[#allocation3 + $0x73] ss:$2 sm:$0xff] }
 0x744   : > { %10451 = vmatmul.msk.bf16.gmra.mxu2 %vm2539_vm1, %v5090_v29  ;;  %v4820_v29 = vld [vmem:[#allocation3 + $0x63] ss:$2 sm:$0xff] }
 0x745   : > { %10466 = vmatmul.msk.bf16.gmra.mxu3 %vm2539_vm1, %v5314_v30  ;;  %v4866_v30 = vpack.c.bf16 %v4822_v17, %v4820_v29  ;;  %v5056_v17 = vld [vmem:[#allocation3 + $0xc4] ss:$2 sm:$0xff] }
 0x748   : > { %v4568_v33 = vpop.f32.mrf.mxu2 }
 0x749   : > { %v4569_v37 = vadd.f32 %v4568_v33, %v4444_v31  ;;  %v4764_v38 = vpop.f32.mrf.mxu3  ;;  %v5052_v31 = vld [vmem:[#allocation3 + $0xa4] ss:$2 sm:$0xff]  ;;  %v5276_v33 = vld [vmem:[#allocation3 + $0xa5] ss:$2 sm:$0xff] }
 0x74a   : > { %v12663_v43 = vpop.f32.mrf.mxu1 }
 0x74b   : > { %v12655_v42 = vadd.f32 %v4764_v38, %v4569_v37  ;;  %v5092_v37 = vpack.c.bf16 %v5054_v18, %v5052_v31  ;;  %v5316_v38 = vpack.c.bf16 %v5278_v21, %v5276_v33  ;;  %14163 = vst [vmem:[#allocation29_spill] sm:$0xff] %v12663_v43  ;;  %v5280_v18 = vld [vmem:[#allocation3 + $0xc5] ss:$2 sm:$0xff] }
 0x74c   : > { %v5317_v29 = vpack.c.bf16 %v5282_v56, %v5280_v18  ;;  %v4828_v56 = vld [vmem:[#allocation3 + $0xa3] ss:$2 sm:$0xff] }
 0x74d   : > { %14162 = vst [vmem:[#allocation28_spill] sm:$0xff] %v12655_v42  ;;  %v5284_v18 = vld [vmem:[#allocation3 + $0xe5] ss:$2 sm:$0xff] }
 0x750   : > { %v12665_v45 = vpop.f32.mrf.mxu2 }
 0x751   : > { %14164 = vst [vmem:[#allocation30_spill] sm:$0xff] %v12665_v45  ;;  %v12667_v47 = vpop.f32.mrf.mxu3 }
 0x752   : > { %14165 = vst [vmem:[#allocation31_spill] sm:$0xff] %v12667_v47 }
 0x753   : > { %10435 = vmatmul.msk.bf16.gmra.mxu1 %vm2539_vm1, %v4865_v51  ;;  %v5058_v51 = vld [vmem:[#allocation3 + $0xd4] ss:$2 sm:$0xff] }
 0x754   : > { %10452 = vmatmul.msk.bf16.gmra.mxu2 %vm2539_vm1, %v5091_v52  ;;  %v4824_v52 = vld [vmem:[#allocation3 + $0x83] ss:$2 sm:$0xff]  ;;  %v5093_v21 = vpack.c.bf16 %v5058_v51, %v5056_v17  ;;  %v4868_v17 = vpack.c.bf16 %v4830_v28, %v4828_v56 }
 0x755   : > { %10467 = vmatmul.msk.bf16.gmra.mxu3 %vm2539_vm1, %v5315_v1  ;;  %v4867_v1 = vpack.c.bf16 %v4826_v44, %v4824_v52  ;;  %v5062_v44 = vld [vmem:[#allocation3 + $0xf4] ss:$2 sm:$0xff]  ;;  %v5286_v52 = vld [vmem:[#allocation3 + $0xf5] ss:$2 sm:$0xff] }
 0x756   : > { %v5318_v42 = vpack.c.bf16 %v5286_v52, %v5284_v18  ;;  %v4832_v52 = vld [vmem:[#allocation3 + $0xc3] ss:$2 sm:$0xff] }
 0x757   : > { %v5288_v18 = vld [vmem:[#allocation3 + $0x105] ss:$2 sm:$0xff] }
 0x763   : > { %10436 = vmatmul.msk.bf16.gmra.mxu1 %vm2539_vm1, %v4866_v30 }
 0x764   : > { %10453 = vmatmul.msk.bf16.gmra.mxu2 %vm2539_vm1, %v5092_v37 }
 0x765   : > { %10468 = vmatmul.msk.bf16.gmra.mxu3 %vm2539_vm1, %v5316_v38 }
 0x770   : > { %v4449_v58 = vpop.f32.mrf.mxu1 }
 0x773   : > { %10437 = vmatmul.msk.bf16.gmra.mxu1 %vm2539_vm1, %v4867_v1  ;;  %v5060_v1 = vld [vmem:[#allocation3 + $0xe4] ss:$2 sm:$0xff] }
 0x774   : > { %10454 = vmatmul.msk.bf16.gmra.mxu2 %vm2539_vm1, %v5093_v21 }
 0x775   : > { %10469 = vmatmul.msk.bf16.gmra.mxu3 %vm2539_vm1, %v5317_v29  ;;  %v5094_v29 = vpack.c.bf16 %v5062_v44, %v5060_v1 }
 0x777   : > { %v4573_v30 = vpop.f32.mrf.mxu2 }
 0x778   : > { %v4769_v31 = vpop.f32.mrf.mxu3  ;;  %v4574_v33 = vadd.f32 %v4573_v30, %v4449_v58  ;;  %v4451_v37 = vpop.f32.mrf.mxu1 }
 0x77a   : > { %v12672_v38 = vadd.f32 %v4769_v31, %v4574_v33 }
 0x77c   : > { %14166 = vst [vmem:[#allocation32_spill] sm:$0xff] %v12672_v38  ;;  %v5066_v38 = vld [vmem:[#allocation3 + $0x114] ss:$2 sm:$0xff] }
 0x77f   : > { %v4575_v47 = vpop.f32.mrf.mxu2 }
 0x780   : > { %v4771_v45 = vpop.f32.mrf.mxu3  ;;  %v4576_v43 = vadd.f32 %v4575_v47, %v4451_v37  ;;  %v4454_v51 = vpop.f32.mrf.mxu1  ;;  %v4834_v37 = vld [vmem:[#allocation3 + $0xd3] ss:$2 sm:$0xff] }
 0x781   : > { %v4869_v1 = vpack.c.bf16 %v4834_v37, %v4832_v52  ;;  %v5294_v37 = vld [vmem:[#allocation3 + $0x135] ss:$2 sm:$0xff] }
 0x782   : > { %v12674_v21 = vadd.f32 %v4771_v45, %v4576_v43  ;;  %v5290_v43 = vld [vmem:[#allocation3 + $0x115] ss:$2 sm:$0xff] }
 0x783   : > { %10438 = vmatmul.msk.bf16.gmra.mxu1 %vm2539_vm1, %v4868_v17  ;;  %v5064_v17 = vld [vmem:[#allocation3 + $0x104] ss:$2 sm:$0xff] }
 0x784   : > { %14167 = vst [vmem:[#allocation33_spill] sm:$0xff] %v12674_v21  ;;  %10455 = vmatmul.msk.bf16.gmra.mxu2 %vm2539_vm1, %v5094_v29  ;;  %v5319_v21 = vpack.c.bf16 %v5290_v43, %v5288_v18 }
 0x785   : > { %10470 = vmatmul.msk.bf16.gmra.mxu3 %vm2539_vm1, %v5318_v42  ;;  %v5095_v42 = vpack.c.bf16 %v5066_v38, %v5064_v17  ;;  %v5292_v38 = vld [vmem:[#allocation3 + $0x125] ss:$2 sm:$0xff] }
 0x786   : > { %v5320_v17 = vpack.c.bf16 %v5294_v37, %v5292_v38  ;;  %v4840_v37 = vld [vmem:[#allocation3 + $0x103] ss:$2 sm:$0xff]  ;;  %v5072_v38 = vld [vmem:[#allocation3 + $0x144] ss:$2 sm:$0xff] }
 0x787   : > { %v4578_v58 = vpop.f32.mrf.mxu2 }
 0x788   : > { %v4774_v30 = vpop.f32.mrf.mxu3  ;;  %v4579_v31 = vadd.f32 %v4578_v58, %v4454_v51  ;;  %v4456_v33 = vpop.f32.mrf.mxu1 }
 0x78a   : > { %v12679_v47 = vadd.f32 %v4774_v30, %v4579_v31  ;;  %v4838_v31 = vld [vmem:[#allocation3 + $0xf3] ss:$2 sm:$0xff] }
 0x78c   : > { %14168 = vst [vmem:[#allocation34_spill] sm:$0xff] %v12679_v47  ;;  %v5070_v47 = vld [vmem:[#allocation3 + $0x134] ss:$2 sm:$0xff] }
 0x78f   : > { %v4580_v28 = vpop.f32.mrf.mxu2 }
 0x790   : > { %v4776_v56 = vpop.f32.mrf.mxu3  ;;  %v4581_v45 = vadd.f32 %v4580_v28, %v4456_v33  ;;  %v4513_v44 = vpop.f32.mrf.mxu1 }
 0x792   : > { %v12681_v29 = vadd.f32 %v4776_v56, %v4581_v45  ;;  %v4870_v56 = vpack.c.bf16 %v4838_v31, %v4836_v23  ;;  %v5068_v45 = vld [vmem:[#allocation3 + $0x124] ss:$2 sm:$0xff]  ;;  %v5074_v31 = vld [vmem:[#allocation3 + $0x154] ss:$2 sm:$0xff] }
 0x793   : > { %10439 = vmatmul.msk.bf16.gmra.mxu1 %vm2539_vm1, %v4869_v1  ;;  %v5096_v43 = vpack.c.bf16 %v5070_v47, %v5068_v45  ;;  %v5097_v24 = vpack.c.bf16 %v5074_v31, %v5072_v38 }
 0x794   : > { %14169 = vst [vmem:[#allocation35_spill] sm:$0xff] %v12681_v29  ;;  %10456 = vmatmul.msk.bf16.gmra.mxu2 %vm2539_vm1, %v5095_v42  ;;  %v4514_v42 = vadd.f32 %v4513_v44, %v12061_v55  ;;  %v4842_v29 = vld [vmem:[#allocation3 + $0x113] ss:$2 sm:$0xff] }
 0x795   : > { %10471 = vmatmul.msk.bf16.gmra.mxu3 %vm2539_vm1, %v5319_v21 }
 0x796   : > { %v4779_v23 = vadd.f32 %v12064_v57, %v4514_v42 }
 0x797   : > { %v5157_v51 = vpop.f32.mrf.mxu2 }
 0x798   : > { %v5381_v58 = vpop.f32.mrf.mxu3  ;;  %v4515_v30 = vpop.f32.mrf.mxu1 }
 0x799   : > { %v4516_v12 = vadd.f32 %v4515_v30, %v12069_v2  ;;  %v4846_v2 = vld [vmem:[#allocation3 + $0x133] ss:$2 sm:$0xff] }
 0x79b   : > { %v4780_v42 = vadd.f32 %v12072_v5, %v4516_v12  ;;  %v5300_v5 = vld [vmem:[#allocation3 + $0x165] ss:$2 sm:$0xff] }
 0x79f   : > { %v5159_v33 = vpop.f32.mrf.mxu2 }
 0x7a0   : > { %v5383_v28 = vpop.f32.mrf.mxu3  ;;  %v4518_v52 = vpop.f32.mrf.mxu1 }
 0x7a1   : > { %v4519_v31 = vadd.f32 %v4518_v52, %v12076_v14 }
 0x7a3   : > { %10440 = vmatmul.msk.bf16.gmra.mxu1 %vm2539_vm1, %v4870_v56  ;;  %v4871_v56 = vpack.c.bf16 %v4842_v29, %v4840_v37  ;;  %v5078_v37 = vld [vmem:[#allocation3 + $0x174] ss:$2 sm:$0xff] }
 0x7a4   : > { %10457 = vmatmul.msk.bf16.gmra.mxu2 %vm2539_vm1, %v5096_v43  ;;  %v5296_v43 = vld [vmem:[#allocation3 + $0x145] ss:$2 sm:$0xff] }
 0x7a5   : > { %10472 = vmatmul.msk.bf16.gmra.mxu3 %vm2539_vm1, %v5320_v17  ;;  %v5321_v17 = vpack.c.bf16 %v5298_v63, %v5296_v43  ;;  %v5076_v43 = vld [vmem:[#allocation3 + $0x164] ss:$2 sm:$0xff] }
 0x7a6   : > { %v5098_v12 = vpack.c.bf16 %v5078_v37, %v5076_v43  ;;  %v5304_v37 = vld [vmem:[#allocation3 + $0x185] ss:$2 sm:$0xff] }
 0x7a7   : > { %v5162_v21 = vpop.f32.mrf.mxu2 }
 0x7a8   : > { %v5386_v1 = vpop.f32.mrf.mxu3  ;;  %v4520_v18 = vpop.f32.mrf.mxu1 }
 0x7a9   : > { %v4521_v14 = vadd.f32 %v4520_v18, %v12085_v26  ;;  %v5080_v18 = vld [vmem:[#allocation3 + $0x184] ss:$2 sm:$0xff] }
 0x7af   : > { %v5164_v6 = vpop.f32.mrf.mxu2 }
 0x7b0   : > { %v5388_v61 = vpop.f32.mrf.mxu3  ;;  %v4933_v47 = vpop.f32.mrf.mxu1 }
 0x7b1   : > { %v5003_v45 = vadd.f32 %v4933_v47, %v4779_v23 }
 0x7b3   : > { %v5227_v15 = vadd.f32 %v5157_v51, %v5003_v45  ;;  %10441 = vmatmul.msk.bf16.gmra.mxu1 %vm2539_vm1, %v4871_v56  ;;  %v5302_v45 = vld [vmem:[#allocation3 + $0x175] ss:$2 sm:$0xff] }
 0x7b4   : > { %10458 = vmatmul.msk.bf16.gmra.mxu2 %vm2539_vm1, %v5097_v24  ;;  %v4781_v24 = vadd.f32 %v12079_v20, %v4519_v31 }
 0x7b5   : > { %10473 = vmatmul.msk.bf16.gmra.mxu3 %vm2539_vm1, %v5321_v17  ;;  %v12695_v55 = vadd.f32 %v5381_v58, %v5227_v15  ;;  %v4844_v58 = vld [vmem:[#allocation3 + $0x123] ss:$2 sm:$0xff]  ;;  %v5322_v17 = vpack.c.bf16 %v5302_v45, %v5300_v5 }
 0x7b6   : > { %v4872_v38 = vpack.c.bf16 %v4846_v2, %v4844_v58  ;;  %v4850_v2 = vld [vmem:[#allocation3 + $0x153] ss:$2 sm:$0xff] }
 0x7b7   : > { %v5167_v57 = vpop.f32.mrf.mxu2 }
 0x7b8   : > { %v5391_v44 = vpop.f32.mrf.mxu3  ;;  %v4935_v29 = vpop.f32.mrf.mxu1 }
 0x7b9   : > { %v5004_v23 = vadd.f32 %v4935_v29, %v4780_v42  ;;  %v4782_v42 = vadd.f32 %v12087_v32, %v4521_v14  ;;  %v4526_v32 = vadd.f32 %v12153_v54, %v12151_v53  ;;  %v5084_v53 = vld [vmem:[#allocation3 + $0x1a4] ss:$2 sm:$0xff] }
 0x7bb   : > { %v5228_v63 = vadd.f32 %v5159_v33, %v5004_v23  ;;  %v4784_v5 = vadd.f32 %v12155_v62, %v4526_v32 }
 0x7bd   : > { %v12699_v47 = vadd.f32 %v5383_v28, %v5228_v63 }
 0x7bf   : > { %v5169_v51 = vpop.f32.mrf.mxu2 }
 0x7c0   : > { %v5393_v30 = vpop.f32.mrf.mxu3  ;;  %v4938_v15 = vpop.f32.mrf.mxu1 }
 0x7c1   : > { %v5005_v56 = vadd.f32 %v4938_v15, %v4781_v24  ;;  %v5082_v24 = vld [vmem:[#allocation3 + $0x194] ss:$2 sm:$0xff]  ;;  %v4848_v15 = vld [vmem:[#allocation3 + $0x143] ss:$2 sm:$0xff] }
 0x7c2   : > { %v4873_v58 = vpack.c.bf16 %v4850_v2, %v4848_v15  ;;  %v5310_v2 = vld [vmem:[#allocation3 + $0x1b5] ss:$2 sm:$0xff]  ;;  %v4531_v15 = vadd.f32 %v12216_v35, %v12214_v34 }
 0x7c3   : > { %v5229_v33 = vadd.f32 %v5162_v21, %v5005_v56  ;;  %10442 = vmatmul.msk.bf16.gmra.mxu1 %vm2539_vm1, %v4872_v38  ;;  %v5306_v56 = vld [vmem:[#allocation3 + $0x195] ss:$2 sm:$0xff]  ;;  %v5099_v38 = vpack.c.bf16 %v5082_v24, %v5080_v18 }
 0x7c4   : > { %10459 = vmatmul.msk.bf16.gmra.mxu2 %vm2539_vm1, %v5098_v12  ;;  %v5323_v43 = vpack.c.bf16 %v5306_v56, %v5304_v37  ;;  %v4852_v24 = vld [vmem:[#allocation3 + $0x163] ss:$2 sm:$0xff]  ;;  %v4858_v34 = vld [vmem:[#allocation3 + $0x193] ss:$2 sm:$0xff] }
 0x7c5   : > { %10474 = vmatmul.msk.bf16.gmra.mxu3 %vm2539_vm1, %v5322_v17  ;;  %v12706_v20 = vadd.f32 %v5386_v1, %v5229_v33 }
 0x7c7   : > { %v5172_v28 = vpop.f32.mrf.mxu2 }
 0x7c8   : > { %v5396_v52 = vpop.f32.mrf.mxu3  ;;  %v4940_v29 = vpop.f32.mrf.mxu1 }
 0x7c9   : > { %v5006_v23 = vadd.f32 %v4940_v29, %v4782_v42  ;;  %v4854_v29 = vld [vmem:[#allocation3 + $0x173] ss:$2 sm:$0xff] }
 0x7ca   : > { %v4874_v37 = vpack.c.bf16 %v4854_v29, %v4852_v24  ;;  %v10522_v24 = vld [vmem:[%s14154_s22 + $0x24] sm:$0xf] }
 0x7cb   : > { %v5230_v31 = vadd.f32 %v5164_v6, %v5006_v23  ;;  %v5086_v23 = vld [vmem:[#allocation3 + $0x1b4] ss:$2 sm:$0xff] }
 0x7cc   : > { %v5100_v62 = vpack.c.bf16 %v5086_v23, %v5084_v53  ;;  %v5704_v53 = vld [vmem:[#allocation3 + $0x7] ss:$2 sm:$0xff] }
 0x7cd   : > { %v12709_v63 = vadd.f32 %v5388_v61, %v5230_v31  ;;  %v5308_v31 = vld [vmem:[#allocation3 + $0x1a5] ss:$2 sm:$0xff] }
 0x7cf   : > { %v5174_v26 = vpop.f32.mrf.mxu2 }
 0x7d0   : > { %v5398_v21 = vpop.f32.mrf.mxu3  ;;  %v4943_v45 = vpop.f32.mrf.mxu1 }
 0x7d1   : > { %v5007_v1 = vadd.f32 %v4943_v45, %v12097_v50  ;;  %v5324_v45 = vpack.c.bf16 %v5310_v2, %v5308_v31  ;;  %v4536_v31 = vadd.f32 %v12279_v27, %v12277_v25  ;;  %v6266_v25 = vsel %vm4376_vm2, %v10522_v24, 0  ;;  %v5480_v24 = vld [vmem:[#allocation3 + $0x6] ss:$2 sm:$0xff] }
 0x7d2   : > { %6275 = vmatpush.bf16.msrb.mxu1 %v6266_v25 }
 0x7d3   : > { %v5231_v6 = vadd.f32 %v5167_v57, %v5007_v1  ;;  %10443 = vmatmul.msk.bf16.gmra.mxu1 %vm2539_vm1, %v4873_v58  ;;  %v4786_v1 = vadd.f32 %v12218_v40, %v4531_v15 }
 0x7d4   : > { %10460 = vmatmul.msk.bf16.gmra.mxu2 %vm2539_vm1, %v5099_v38 }
 0x7d5   : > { %10475 = vmatmul.msk.bf16.gmra.mxu3 %vm2539_vm1, %v5323_v43  ;;  %v12717_v61 = vadd.f32 %v5391_v44, %v5231_v6  ;;  %v4856_v6 = vld [vmem:[#allocation3 + $0x183] ss:$2 sm:$0xff] }
 0x7d6   : > { %v4875_v29 = vpack.c.bf16 %v4858_v34, %v4856_v6  ;;  %v5710_v6 = vld [vmem:[#allocation3 + $0x37] ss:$2 sm:$0xff]  ;;  %v5934_v34 = vld [vmem:[#allocation3 + $0x38] ss:$2 sm:$0xff] }
 0x7d7   : > { %v5177_v12 = vpop.f32.mrf.mxu2 }
 0x7d8   : > { %v5401_v50 = vpop.f32.mrf.mxu3  ;;  %v4945_v17 = vpop.f32.mrf.mxu1 }
 0x7d9   : > { %v5008_v14 = vadd.f32 %v4945_v17, %v4784_v5  ;;  %v5706_v5 = vld [vmem:[#allocation3 + $0x17] ss:$2 sm:$0xff]  ;;  %v5930_v17 = vld [vmem:[#allocation3 + $0x18] ss:$2 sm:$0xff] }
 0x7db   : > { %v5232_v33 = vadd.f32 %v5169_v51, %v5008_v14 }
 0x7dd   : > { %v12720_v42 = vadd.f32 %v5393_v30, %v5232_v33 }
 0x7df   : > { %v5179_v54 = vpop.f32.mrf.mxu2 }
 0x7e0   : > { %v5403_v57 = vpop.f32.mrf.mxu3  ;;  %v4948_v18 = vpop.f32.mrf.mxu1 }
 0x7e1   : > { %v5009_v44 = vadd.f32 %v4948_v18, %v12165_v19  ;;  %v10552_v18 = vld [vmem:[%s14154_s22 + $0x2c] sm:$0xf] }
 0x7e3   : > { %v5233_v51 = vadd.f32 %v5172_v28, %v5009_v44  ;;  %10444 = vmatmul.msk.bf16.gmra.mxu1 %vm2539_vm1, %v4874_v37 }
 0x7e4   : > { %10461 = vmatmul.msk.bf16.gmra.mxu2 %vm2539_vm1, %v5100_v62 }
 0x7e5   : > { %10476 = vmatmul.msk.bf16.gmra.mxu3 %vm2539_vm1, %v5324_v45  ;;  %v12728_v30 = vadd.f32 %v5396_v52, %v5233_v51  ;;  %v10537_v52 = vld [vmem:[%s14154_s22 + $0x28] sm:$0xf] }
 0x7e6   : > { %v6490_v40 = vsel %vm4376_vm2, %v10537_v52, 0  ;;  %v5708_v52 = vld [vmem:[#allocation3 + $0x27] ss:$2 sm:$0xff] }
 0x7e7   : > { %v5182_v58 = vpop.f32.mrf.mxu2  ;;  %6499 = vmatpush.bf16.msrb.mxu2 %v6490_v40 }
 0x7e8   : > { %v5406_v56 = vpop.f32.mrf.mxu3  ;;  %v4950_v19 = vpop.f32.mrf.mxu1 }
 0x7e9   : > { %v5010_v38 = vadd.f32 %v4950_v19, %v4786_v1  ;;  %v4860_v1 = vld [vmem:[#allocation3 + $0x1a3] ss:$2 sm:$0xff]  ;;  %v4862_v19 = vld [vmem:[#allocation3 + $0x1b3] ss:$2 sm:$0xff] }
 0x7eb   : > { %v5234_v43 = vadd.f32 %v5174_v26, %v5010_v38  ;;  %v5928_v26 = vld [vmem:[#allocation3 + $0x8] ss:$2 sm:$0xff] }
 0x7ec   : > { %v5983_v23 = vpack.c.bf16 %v5930_v17, %v5928_v26  ;;  %v4876_v17 = vpack.c.bf16 %v4862_v19, %v4860_v1 }
 0x7ed   : > { %v12731_v32 = vadd.f32 %v5398_v21, %v5234_v43  ;;  %v5759_v21 = vpack.c.bf16 %v5706_v5, %v5704_v53 }
 0x7ef   : > { %v5184_v35 = vpop.f32.mrf.mxu2 }
 0x7f0   : > { %v5408_v28 = vpop.f32.mrf.mxu3  ;;  %v4953_v14 = vpop.f32.mrf.mxu1 }
 0x7f1   : > { %v5011_v33 = vadd.f32 %v4953_v14, %v12228_v0  ;;  %v6714_v0 = vsel %vm4376_vm2, %v10552_v18, 0  ;;  %v5932_v14 = vld [vmem:[#allocation3 + $0x28] ss:$2 sm:$0xff]  ;;  %v5938_v18 = vld [vmem:[#allocation3 + $0x58] ss:$2 sm:$0xff] }
 0x7f2   : > { %6723 = vmatpush.bf16.msrb.mxu3 %v6714_v0  ;;  %v5984_v40 = vpack.c.bf16 %v5934_v34, %v5932_v14 }
 0x7f3   : > { %v5235_v2 = vadd.f32 %v5177_v12, %v5011_v33  ;;  %10445 = vmatmul.msk.bf16.gmra.mxu1 %vm2539_vm1, %v4875_v29  ;;  %v4788_v12 = vadd.f32 %v12281_v36, %v4536_v31  ;;  %v5760_v36 = vpack.c.bf16 %v5710_v6, %v5708_v52  ;;  %v4541_v33 = vadd.f32 %v12347_v41, %v12345_v39  ;;  %v5942_v52 = vld [vmem:[#allocation3 + $0x78] ss:$2 sm:$0xff] }
 0x7f4   : > { %10493 = vmatmul.msk.bf16.vlgmr.msra.gmra.mxu2 %vm2539_vm1, %v5759_v21 }
 0x7f5   : > { %10508 = vmatmul.msk.bf16.vlgmr.msra.gmra.mxu3 %vm2539_vm1, %v5983_v23  ;;  %v12751_v27 = vadd.f32 %v5401_v50, %v5235_v2  ;;  %v4790_v29 = vadd.f32 %v12349_v46, %v4541_v33  ;;  %v5482_v2 = vld [vmem:[#allocation3 + $0x16] ss:$2 sm:$0xff]  ;;  %v5716_v33 = vld [vmem:[#allocation3 + $0x67] ss:$2 sm:$0xff] }
 0x7f7   : > { %v5187_v44 = vpop.f32.mrf.mxu2 }
 0x7f8   : > { %v5411_v37 = vpop.f32.mrf.mxu3  ;;  %v4955_v62 = vpop.f32.mrf.mxu1 }
 0x7f9   : > { %v5012_v45 = vadd.f32 %v4955_v62, %v4788_v12  ;;  %v5712_v12 = vld [vmem:[#allocation3 + $0x47] ss:$2 sm:$0xff]  ;;  %v5936_v62 = vld [vmem:[#allocation3 + $0x48] ss:$2 sm:$0xff] }
 0x7fb   : > { %v5236_v15 = vadd.f32 %v5179_v54, %v5012_v45  ;;  %v5985_v45 = vpack.c.bf16 %v5938_v18, %v5936_v62 }
 0x7fd   : > { %v12754_v51 = vadd.f32 %v5403_v57, %v5236_v15  ;;  %v4546_v15 = vadd.f32 %v12410_v8, %v12408_v7 }
 0x7ff   : > { %v5189_v38 = vpop.f32.mrf.mxu2  ;;  %v4792_v1 = vadd.f32 %v12412_v16, %v4546_v15 }
 0x800   : > { %v5413_v43 = vpop.f32.mrf.mxu3  ;;  %v4958_v5 = vpop.f32.mrf.mxu1 }
 0x801   : > { %v5013_v50 = vadd.f32 %v4958_v5, %v12291_v60 }
 0x803   : > { %v5237_v54 = vadd.f32 %v5182_v58, %v5013_v50  ;;  %10446 = vmatmul.msk.bf16.gmra.mxu1 %vm2539_vm1, %v4876_v17  ;;  %v5714_v58 = vld [vmem:[#allocation3 + $0x57] ss:$2 sm:$0xff]  ;;  %v5486_v17 = vld [vmem:[#allocation3 + $0x36] ss:$2 sm:$0xff] }
 0x804   : > { %10494 = vmatmul.msk.bf16.gmra.mxu2 %vm2539_vm1, %v5760_v36  ;;  %v5761_v46 = vpack.c.bf16 %v5714_v58, %v5712_v12  ;;  %v5484_v36 = vld [vmem:[#allocation3 + $0x26] ss:$2 sm:$0xff] }
 0x805   : > { %10509 = vmatmul.msk.bf16.gmra.mxu3 %vm2539_vm1, %v5984_v40  ;;  %v12762_v57 = vadd.f32 %v5406_v56, %v5237_v54  ;;  %v5535_v56 = vpack.c.bf16 %v5482_v2, %v5480_v24  ;;  %v5940_v54 = vld [vmem:[#allocation3 + $0x68] ss:$2 sm:$0xff] }
 0x806   : > { %v5490_v24 = vld [vmem:[#allocation3 + $0x56] ss:$2 sm:$0xff]  ;;  %v5488_v12 = vld [vmem:[#allocation3 + $0x46] ss:$2 sm:$0xff] }
 0x807   : > { %v5192_v60 = vpop.f32.mrf.mxu2 }
 0x808   : > { %v5416_v53 = vpop.f32.mrf.mxu3  ;;  %v4960_v26 = vpop.f32.mrf.mxu1 }
 0x809   : > { %v5014_v21 = vadd.f32 %v4960_v26, %v4790_v29  ;;  %v5986_v29 = vpack.c.bf16 %v5942_v52, %v5940_v54  ;;  %v4551_v26 = vadd.f32 %v12473_v4, %v12471_v3  ;;  %v5494_v52 = vld [vmem:[#allocation3 + $0x76] ss:$2 sm:$0xff] }
 0x80a   : > { %v5948_v54 = vld [vmem:[#allocation3 + $0xa8] ss:$2 sm:$0xff] }
 0x80b   : > { %v5238_v23 = vadd.f32 %v5184_v35, %v5014_v21  ;;  %v4794_v21 = vadd.f32 %v12475_v13, %v4551_v26  ;;  %v14171_v26 = vld [vmem:[#allocation22_spill] sm:$0xff] }
 0x80d   : > { %v12765_v31 = vadd.f32 %v5408_v28, %v5238_v23 }
 0x80f   : > { %v5194_v39 = vpop.f32.mrf.mxu2 }
 0x810   : > { %v5418_v41 = vpop.f32.mrf.mxu3  ;;  %v4963_v0 = vpop.f32.mrf.mxu1 }
 0x811   : > { %v5015_v25 = vadd.f32 %v4963_v0, %v12359_v10 }
 0x813   : > { %v5239_v35 = vadd.f32 %v5187_v44, %v5015_v25  ;;  %10478 = vmatmul.msk.bf16.vlgmr.msra.gmra.mxu1 %vm2539_vm1, %v5535_v56  ;;  %v5718_v44 = vld [vmem:[#allocation3 + $0x77] ss:$2 sm:$0xff]  ;;  %v5946_v25 = vld [vmem:[#allocation3 + $0x98] ss:$2 sm:$0xff] }
 0x814   : > { %10495 = vmatmul.msk.bf16.gmra.mxu2 %vm2539_vm1, %v5761_v46  ;;  %v5762_v16 = vpack.c.bf16 %v5718_v44, %v5716_v33  ;;  %v5720_v46 = vld [vmem:[#allocation3 + $0x87] ss:$2 sm:$0xff] }
 0x815   : > { %10510 = vmatmul.msk.bf16.gmra.mxu3 %vm2539_vm1, %v5985_v45  ;;  %v12773_v28 = vadd.f32 %v5411_v37, %v5239_v35  ;;  %v5536_v37 = vpack.c.bf16 %v5486_v17, %v5484_v36  ;;  %v5944_v45 = vld [vmem:[#allocation3 + $0x88] ss:$2 sm:$0xff]  ;;  %v4556_v35 = vadd.f32 %v12546_v11, %v12544_v9  ;;  %v5724_v33 = vld [vmem:[#allocation3 + $0xa7] ss:$2 sm:$0xff] }
 0x816   : > { %v5987_v15 = vpack.c.bf16 %v5946_v25, %v5944_v45  ;;  %v5496_v45 = vld [vmem:[#allocation3 + $0x86] ss:$2 sm:$0xff] }
 0x817   : > { %v5197_v10 = vpop.f32.mrf.mxu2 }
 0x818   : > { %v5421_v19 = vpop.f32.mrf.mxu3  ;;  %v4965_v6 = vpop.f32.mrf.mxu1 }
 0x819   : > { %v5016_v34 = vadd.f32 %v4965_v6, %v4792_v1  ;;  %v4796_v1 = vadd.f32 %v12548_v22, %v4556_v35  ;;  %v5728_v35 = vld [vmem:[#allocation3 + $0xc7] ss:$2 sm:$0xff] }
 0x81b   : > { %v5240_v5 = vadd.f32 %v5189_v38, %v5016_v34 }
 0x81d   : > { %v12776_v50 = vadd.f32 %v5413_v43, %v5240_v5 }
 0x81f   : > { %v5199_v7 = vpop.f32.mrf.mxu2 }
 0x820   : > { %v5423_v8 = vpop.f32.mrf.mxu3  ;;  %v4968_v14 = vpop.f32.mrf.mxu1 }
 0x821   : > { %v5017_v40 = vadd.f32 %v4968_v14, %v12422_v48  ;;  %v5950_v14 = vld [vmem:[#allocation3 + $0xb8] ss:$2 sm:$0xff] }
 0x823   : > { %v5241_v38 = vadd.f32 %v5192_v60, %v5017_v40  ;;  %10479 = vmatmul.msk.bf16.gmra.mxu1 %vm2539_vm1, %v5536_v37  ;;  %v5722_v60 = vld [vmem:[#allocation3 + $0x97] ss:$2 sm:$0xff]  ;;  %v5492_v40 = vld [vmem:[#allocation3 + $0x66] ss:$2 sm:$0xff] }
 0x824   : > { %10496 = vmatmul.msk.bf16.gmra.mxu2 %vm2539_vm1, %v5762_v16  ;;  %v5763_v13 = vpack.c.bf16 %v5722_v60, %v5720_v46  ;;  %v5988_v16 = vpack.c.bf16 %v5950_v14, %v5948_v54 }
 0x825   : > { %10511 = vmatmul.msk.bf16.gmra.mxu3 %vm2539_vm1, %v5986_v29  ;;  %v12784_v43 = vadd.f32 %v5416_v53, %v5241_v38  ;;  %v5537_v53 = vpack.c.bf16 %v5490_v24, %v5488_v12  ;;  %v14170_v29 = vld [vmem:[#allocation21_spill] sm:$0xff] }
 0x826   : > { %v4561_v38 = vadd.f32 %v14171_v26, %v14170_v29  ;;  %v5734_v29 = vld [vmem:[#allocation3 + $0xf7] ss:$2 sm:$0xff]  ;;  %v5958_v26 = vld [vmem:[#allocation3 + $0xf8] ss:$2 sm:$0xff] }
 0x827   : > { %v5202_v48 = vpop.f32.mrf.mxu2 }
 0x828   : > { %v5426_v23 = vpop.f32.mrf.mxu3  ;;  %v4970_v2 = vpop.f32.mrf.mxu1 }
 0x829   : > { %v5018_v58 = vadd.f32 %v4970_v2, %v4794_v21  ;;  %v14172_v21 = vld [vmem:[#allocation23_spill] sm:$0xff] }
 0x82a   : > { %v4798_v2 = vadd.f32 %v14172_v21, %v4561_v38  ;;  %v14177_v21 = vld [vmem:[#allocation28_spill] sm:$0xff] }
 0x82b   : > { %v5242_v18 = vadd.f32 %v5194_v39, %v5018_v58 }
 0x82d   : > { %v12787_v0 = vadd.f32 %v5418_v41, %v5242_v18 }
 0x82f   : > { %v5204_v3 = vpop.f32.mrf.mxu2 }
 0x830   : > { %v5428_v4 = vpop.f32.mrf.mxu3  ;;  %v4973_v56 = vpop.f32.mrf.mxu1 }
 0x831   : > { %v5019_v62 = vadd.f32 %v4973_v56, %v12485_v49  ;;  %v5498_v56 = vld [vmem:[#allocation3 + $0x96] ss:$2 sm:$0xff] }
 0x833   : > { %v5243_v39 = vadd.f32 %v5197_v10, %v5019_v62  ;;  %10480 = vmatmul.msk.bf16.gmra.mxu1 %vm2539_vm1, %v5537_v53  ;;  %v5726_v10 = vld [vmem:[#allocation3 + $0xb7] ss:$2 sm:$0xff]  ;;  %v5954_v53 = vld [vmem:[#allocation3 + $0xd8] ss:$2 sm:$0xff] }
 0x834   : > { %10497 = vmatmul.msk.bf16.gmra.mxu2 %vm2539_vm1, %v5763_v13  ;;  %v5764_v22 = vpack.c.bf16 %v5726_v10, %v5724_v33  ;;  %v5730_v62 = vld [vmem:[#allocation3 + $0xd7] ss:$2 sm:$0xff] }
 0x835   : > { %10512 = vmatmul.msk.bf16.gmra.mxu3 %vm2539_vm1, %v5987_v15  ;;  %v12795_v41 = vadd.f32 %v5421_v19, %v5243_v39  ;;  %v5538_v19 = vpack.c.bf16 %v5494_v52, %v5492_v40  ;;  %v14173_v13 = vld [vmem:[#allocation24_spill] sm:$0xff]  ;;  %v5952_v39 = vld [vmem:[#allocation3 + $0xc8] ss:$2 sm:$0xff] }
 0x836   : > { %v14176_v10 = vld [vmem:[#allocation27_spill] sm:$0xff] }
 0x837   : > { %v5207_v49 = vpop.f32.mrf.mxu2 }
 0x838   : > { %v5431_v6 = vpop.f32.mrf.mxu3  ;;  %v4975_v34 = vpop.f32.mrf.mxu1 }
 0x839   : > { %v5020_v5 = vadd.f32 %v4975_v34, %v4796_v1  ;;  %v5765_v1 = vpack.c.bf16 %v5730_v62, %v5728_v35  ;;  %v5989_v34 = vpack.c.bf16 %v5954_v53, %v5952_v39  ;;  %v14178_v62 = vld [vmem:[#allocation29_spill] sm:$0xff]  ;;  %v14179_v53 = vld [vmem:[#allocation30_spill] sm:$0xff] }
 0x83b   : > { %v5244_v17 = vadd.f32 %v5199_v7, %v5020_v5  ;;  %v14174_v5 = vld [vmem:[#allocation25_spill] sm:$0xff] }
 0x83d   : > { %v12798_v44 = vadd.f32 %v5423_v8, %v5244_v17  ;;  %v14175_v17 = vld [vmem:[#allocation26_spill] sm:$0xff] }
 0x83e   : > { %v4566_v52 = vadd.f32 %v14175_v17, %v14174_v5  ;;  %v5506_v5 = vld [vmem:[#allocation3 + $0xd6] ss:$2 sm:$0xff] }
 0x83f   : > { %v5209_v9 = vpop.f32.mrf.mxu2 }
 0x840   : > { %v5433_v11 = vpop.f32.mrf.mxu3  ;;  %v4978_v36 = vpop.f32.mrf.mxu1  ;;  %v4800_v14 = vadd.f32 %v14176_v10, %v4566_v52  ;;  %v5738_v52 = vld [vmem:[#allocation3 + $0x117] ss:$2 sm:$0xff] }
 0x841   : > { %v5021_v37 = vadd.f32 %v4978_v36, %v12558_v59 }
 0x843   : > { %v5245_v7 = vadd.f32 %v5202_v48, %v5021_v37  ;;  %10481 = vmatmul.msk.bf16.gmra.mxu1 %vm2539_vm1, %v5538_v19 }
 0x844   : > { %10498 = vmatmul.msk.bf16.gmra.mxu2 %vm2539_vm1, %v5764_v22  ;;  %v5502_v22 = vld [vmem:[#allocation3 + $0xb6] ss:$2 sm:$0xff] }
 0x845   : > { %10513 = vmatmul.msk.bf16.gmra.mxu3 %vm2539_vm1, %v5988_v16  ;;  %v12806_v8 = vadd.f32 %v5426_v23, %v5245_v7  ;;  %v5539_v23 = vpack.c.bf16 %v5498_v56, %v5496_v45  ;;  %v5500_v7 = vld [vmem:[#allocation3 + $0xa6] ss:$2 sm:$0xff] }
 0x846   : > { %v14180_v45 = vld [vmem:[#allocation31_spill] sm:$0xff] }
 0x847   : > { %v5212_v59 = vpop.f32.mrf.mxu2 }
 0x848   : > { %v5436_v58 = vpop.f32.mrf.mxu3  ;;  %v4980_v18 = vpop.f32.mrf.mxu1 }
 0x849   : > { %v5022_v24 = vadd.f32 %v4980_v18, %v4798_v2  ;;  %v5732_v18 = vld [vmem:[#allocation3 + $0xe7] ss:$2 sm:$0xff] }
 0x84b   : > { %v5246_v60 = vadd.f32 %v5204_v3, %v5022_v24  ;;  %v5956_v24 = vld [vmem:[#allocation3 + $0xe8] ss:$2 sm:$0xff] }
 0x84c   : > { %v5990_v56 = vpack.c.bf16 %v5958_v26, %v5956_v24 }
 0x84d   : > { %v12809_v25 = vadd.f32 %v5428_v4, %v5246_v60  ;;  %v5766_v60 = vpack.c.bf16 %v5734_v29, %v5732_v18 }
 0x84f   : > { %v5214_v12 = vpop.f32.mrf.mxu2 }
 0x850   : > { %v5438_v48 = vpop.f32.mrf.mxu3  ;;  %v4983_v46 = vpop.f32.mrf.mxu1 }
 0x851   : > { %v5023_v15 = vadd.f32 %v4983_v46, %v14173_v13  ;;  %v4571_v46 = vadd.f32 %v14179_v53, %v14178_v62  ;;  %v5966_v53 = vld [vmem:[#allocation3 + $0x138] ss:$2 sm:$0xff] }
 0x853   : > { %v5247_v3 = vadd.f32 %v5207_v49, %v5023_v15  ;;  %10482 = vmatmul.msk.bf16.gmra.mxu1 %vm2539_vm1, %v5539_v23  ;;  %v4802_v13 = vadd.f32 %v14180_v45, %v4571_v46  ;;  %v14183_v45 = vld [vmem:[#allocation34_spill] sm:$0xff] }
 0x854   : > { %10499 = vmatmul.msk.bf16.gmra.mxu2 %vm2539_vm1, %v5765_v1 }
 0x855   : > { %10514 = vmatmul.msk.bf16.gmra.mxu3 %vm2539_vm1, %v5989_v34  ;;  %v12817_v4 = vadd.f32 %v5431_v6, %v5247_v3  ;;  %v5540_v6 = vpack.c.bf16 %v5502_v22, %v5500_v7  ;;  %v5962_v3 = vld [vmem:[#allocation3 + $0x118] ss:$2 sm:$0xff]  ;;  %v5960_v22 = vld [vmem:[#allocation3 + $0x108] ss:$2 sm:$0xff] }
 0x856   : > { %v5991_v26 = vpack.c.bf16 %v5962_v3, %v5960_v22 }
 0x857   : > { %v5217_v36 = vpop.f32.mrf.mxu2 }
 0x858   : > { %v5441_v40 = vpop.f32.mrf.mxu3  ;;  %v4985_v37 = vpop.f32.mrf.mxu1 }
 0x859   : > { %v5024_v19 = vadd.f32 %v4985_v37, %v4800_v14  ;;  %v5504_v14 = vld [vmem:[#allocation3 + $0xc6] ss:$2 sm:$0xff]  ;;  %v14181_v37 = vld [vmem:[#allocation32_spill] sm:$0xff] }
 0x85b   : > { %v5248_v33 = vadd.f32 %v5209_v9, %v5024_v19 }
 0x85d   : > { %v12820_v54 = vadd.f32 %v5433_v11, %v5248_v33  ;;  %v5736_v33 = vld [vmem:[#allocation3 + $0x107] ss:$2 sm:$0xff] }
 0x85e   : > { %v5767_v29 = vpack.c.bf16 %v5738_v52, %v5736_v33  ;;  %v5514_v33 = vld [vmem:[#allocation3 + $0x116] ss:$2 sm:$0xff] }
 0x85f   : > { %v5219_v16 = vpop.f32.mrf.mxu2 }
 0x860   : > { %v5443_v49 = vpop.f32.mrf.mxu3  ;;  %v4988_v38 = vpop.f32.mrf.mxu1 }
 0x861   : > { %v5025_v2 = vadd.f32 %v4988_v38, %v14177_v21 }
 0x863   : > { %v5249_v9 = vadd.f32 %v5212_v59, %v5025_v2  ;;  %10483 = vmatmul.msk.bf16.gmra.mxu1 %vm2539_vm1, %v5540_v6  ;;  %v14182_v2 = vld [vmem:[#allocation33_spill] sm:$0xff] }
 0x864   : > { %10500 = vmatmul.msk.bf16.gmra.mxu2 %vm2539_vm1, %v5766_v60  ;;  %v5510_v60 = vld [vmem:[#allocation3 + $0xf6] ss:$2 sm:$0xff] }
 0x865   : > { %10515 = vmatmul.msk.bf16.gmra.mxu3 %vm2539_vm1, %v5990_v56  ;;  %v12828_v11 = vadd.f32 %v5436_v58, %v5249_v9  ;;  %v5541_v58 = vpack.c.bf16 %v5506_v5, %v5504_v14  ;;  %v5508_v9 = vld [vmem:[#allocation3 + $0xe6] ss:$2 sm:$0xff] }
 0x866   : > { %v14184_v14 = vld [vmem:[#allocation35_spill] sm:$0xff] }
 0x867   : > { %v5222_v15 = vpop.f32.mrf.mxu2 }
 0x868   : > { %v5446_v23 = vpop.f32.mrf.mxu3  ;;  %v4990_v35 = vpop.f32.mrf.mxu1 }
 0x869   : > { %v5026_v39 = vadd.f32 %v4990_v35, %v4802_v13  ;;  %v5542_v35 = vpack.c.bf16 %v5510_v60, %v5508_v9 }
 0x86b   : > { %v5250_v1 = vadd.f32 %v5214_v12, %v5026_v39  ;;  %v5964_v39 = vld [vmem:[#allocation3 + $0x128] ss:$2 sm:$0xff] }
 0x86c   : > { %v5992_v5 = vpack.c.bf16 %v5966_v53, %v5964_v39 }
 0x86d   : > { %v12831_v34 = vadd.f32 %v5438_v48, %v5250_v1 }
 0x86f   : > { %v5224_v17 = vpop.f32.mrf.mxu2 }
 0x870   : > { %v5448_v59 = vpop.f32.mrf.mxu3  ;;  %v4993_v10 = vpop.f32.mrf.mxu1 }
 0x871   : > { %v5027_v19 = vadd.f32 %v4993_v10, %v14181_v37 }
 0x873   : > { %v5251_v38 = vadd.f32 %v5217_v36, %v5027_v19  ;;  %10484 = vmatmul.msk.bf16.gmra.mxu1 %vm2539_vm1, %v5541_v58  ;;  %v5742_v36 = vld [vmem:[#allocation3 + $0x137] ss:$2 sm:$0xff] }
 0x874   : > { %10501 = vmatmul.msk.bf16.gmra.mxu2 %vm2539_vm1, %v5767_v29 }
 0x875   : > { %10516 = vmatmul.msk.bf16.gmra.mxu3 %vm2539_vm1, %v5991_v26  ;;  %v12837_v12 = vadd.f32 %v5441_v40, %v5251_v38  ;;  %v5740_v40 = vld [vmem:[#allocation3 + $0x127] ss:$2 sm:$0xff]  ;;  %v5970_v26 = vld [vmem:[#allocation3 + $0x158] ss:$2 sm:$0xff] }
 0x876   : > { %v5768_v1 = vpack.c.bf16 %v5742_v36, %v5740_v40 }
 0x877   : > { %v5829_v48 = vpop.f32.mrf.mxu2 }
 0x878   : > { %v6053_v7 = vpop.f32.mrf.mxu3  ;;  %v4995_v21 = vpop.f32.mrf.mxu1 }
 0x879   : > { %v5028_v6 = vadd.f32 %v4995_v21, %v14182_v2  ;;  %v5512_v21 = vld [vmem:[#allocation3 + $0x106] ss:$2 sm:$0xff] }
 0x87b   : > { %v5252_v18 = vadd.f32 %v5219_v16, %v5028_v6  ;;  %v5543_v6 = vpack.c.bf16 %v5514_v33, %v5512_v21 }
 0x87d   : > { %v12840_v24 = vadd.f32 %v5443_v49, %v5252_v18  ;;  %v5968_v18 = vld [vmem:[#allocation3 + $0x148] ss:$2 sm:$0xff] }
 0x87e   : > { %v5993_v36 = vpack.c.bf16 %v5970_v26, %v5968_v18  ;;  %v5976_v18 = vld [vmem:[#allocation3 + $0x188] ss:$2 sm:$0xff] }
 0x87f   : > { %v5831_v56 = vpop.f32.mrf.mxu2 }
 0x880   : > { %v6055_v62 = vpop.f32.mrf.mxu3  ;;  %v4998_v46 = vpop.f32.mrf.mxu1 }
 0x881   : > { %v5029_v13 = vadd.f32 %v4998_v46, %v14183_v45 }
 0x883   : > { %v5253_v52 = vadd.f32 %v5222_v15, %v5029_v13  ;;  %10485 = vmatmul.msk.bf16.gmra.mxu1 %vm2539_vm1, %v5542_v35  ;;  %v5746_v15 = vld [vmem:[#allocation3 + $0x157] ss:$2 sm:$0xff]  ;;  %v5518_v35 = vld [vmem:[#allocation3 + $0x136] ss:$2 sm:$0xff] }
 0x884   : > { %10502 = vmatmul.msk.bf16.gmra.mxu2 %vm2539_vm1, %v5768_v1  ;;  %v5974_v1 = vld [vmem:[#allocation3 + $0x178] ss:$2 sm:$0xff] }
 0x885   : > { %10517 = vmatmul.msk.bf16.gmra.mxu3 %vm2539_vm1, %v5992_v5  ;;  %v12846_v16 = vadd.f32 %v5446_v23, %v5253_v52  ;;  %v5744_v23 = vld [vmem:[#allocation3 + $0x147] ss:$2 sm:$0xff]  ;;  %v5516_v52 = vld [vmem:[#allocation3 + $0x126] ss:$2 sm:$0xff] }
 0x886   : > { %v5769_v60 = vpack.c.bf16 %v5746_v15, %v5744_v23 }
 0x887   : > { %v5834_v49 = vpop.f32.mrf.mxu2 }
 0x888   : > { %v6058_v3 = vpop.f32.mrf.mxu3  ;;  %v5000_v10 = vpop.f32.mrf.mxu1 }
 0x889   : > { %v5030_v37 = vadd.f32 %v5000_v10, %v14184_v14  ;;  %v5544_v14 = vpack.c.bf16 %v5518_v35, %v5516_v52 }
 0x88b   : > { %v5254_v19 = vadd.f32 %v5224_v17, %v5030_v37  ;;  %v5972_v37 = vld [vmem:[#allocation3 + $0x168] ss:$2 sm:$0xff] }
 0x88c   : > { %v5994_v33 = vpack.c.bf16 %v5974_v1, %v5972_v37  ;;  %v5758_v37 = vld [vmem:[#allocation3 + $0x1b7] ss:$2 sm:$0xff] }
 0x88d   : > { %v12849_v58 = vadd.f32 %v5448_v59, %v5254_v19 }
 0x88f   : > { %v5836_v22 = vpop.f32.mrf.mxu2 }
 0x890   : > { %v6060_v29 = vpop.f32.mrf.mxu3  ;;  %v5605_v38 = vpop.f32.mrf.mxu1 }
 0x891   : > { %v5675_v2 = vadd.f32 %v5605_v38, %v12695_v55 }
 0x893   : > { %v5899_v53 = vadd.f32 %v5829_v48, %v5675_v2  ;;  %10486 = vmatmul.msk.bf16.gmra.mxu1 %vm2539_vm1, %v5543_v6  ;;  %v5750_v48 = vld [vmem:[#allocation3 + $0x177] ss:$2 sm:$0xff]  ;;  %v5522_v2 = vld [vmem:[#allocation3 + $0x156] ss:$2 sm:$0xff] }
 0x894   : > { %10503 = vmatmul.msk.bf16.gmra.mxu2 %vm2539_vm1, %v5769_v60 }
 0x895   : > { %10518 = vmatmul.msk.bf16.gmra.mxu3 %vm2539_vm1, %v5993_v36  ;;  %v12855_v17 = vadd.f32 %v6053_v7, %v5899_v53  ;;  %v5748_v7 = vld [vmem:[#allocation3 + $0x167] ss:$2 sm:$0xff]  ;;  %v5520_v36 = vld [vmem:[#allocation3 + $0x146] ss:$2 sm:$0xff] }
 0x896   : > { %v5770_v19 = vpack.c.bf16 %v5750_v48, %v5748_v7 }
 0x897   : > { %v5839_v59 = vpop.f32.mrf.mxu2 }
 0x898   : > { %v6063_v46 = vpop.f32.mrf.mxu3  ;;  %v5607_v9 = vpop.f32.mrf.mxu1 }
 0x899   : > { %v5676_v45 = vadd.f32 %v5607_v9, %v12699_v47  ;;  %v5545_v9 = vpack.c.bf16 %v5522_v2, %v5520_v36 }
 0x89b   : > { %v5900_v55 = vadd.f32 %v5831_v56, %v5676_v45  ;;  %v5978_v45 = vld [vmem:[#allocation3 + $0x198] ss:$2 sm:$0xff] }
 0x89c   : > { %v5995_v35 = vpack.c.bf16 %v5978_v45, %v5976_v18  ;;  %v6602_v45 = vld [vmem:[#allocation3 + $0x1b] ss:$2 sm:$0xff] }
 0x89d   : > { %v12858_v13 = vadd.f32 %v6055_v62, %v5900_v55 }
 0x89f   : > { %v5841_v40 = vpop.f32.mrf.mxu2 }
 0x8a0   : > { %v6065_v39 = vpop.f32.mrf.mxu3  ;;  %v5610_v5 = vpop.f32.mrf.mxu1 }
 0x8a1   : > { %v5677_v10 = vadd.f32 %v5610_v5, %v12706_v20 }
 0x8a3   : > { %v5901_v15 = vadd.f32 %v5834_v49, %v5677_v10  ;;  %10487 = vmatmul.msk.bf16.gmra.mxu1 %vm2539_vm1, %v5544_v14  ;;  %v5752_v49 = vld [vmem:[#allocation3 + $0x187] ss:$2 sm:$0xff]  ;;  %v5526_v10 = vld [vmem:[#allocation3 + $0x176] ss:$2 sm:$0xff] }
 0x8a4   : > { %10504 = vmatmul.msk.bf16.gmra.mxu2 %vm2539_vm1, %v5770_v19  ;;  %v5756_v14 = vld [vmem:[#allocation3 + $0x1a7] ss:$2 sm:$0xff]  ;;  %v5980_v19 = vld [vmem:[#allocation3 + $0x1a8] ss:$2 sm:$0xff] }
 0x8a5   : > { %10519 = vmatmul.msk.bf16.gmra.mxu3 %vm2539_vm1, %v5994_v33  ;;  %v12864_v47 = vadd.f32 %v6058_v3, %v5901_v15  ;;  %v5754_v3 = vld [vmem:[#allocation3 + $0x197] ss:$2 sm:$0xff]  ;;  %v5982_v33 = vld [vmem:[#allocation3 + $0x1b8] ss:$2 sm:$0xff] }
 0x8a6   : > { %v5771_v55 = vpack.c.bf16 %v5754_v3, %v5752_v49  ;;  %v5996_v2 = vpack.c.bf16 %v5982_v33, %v5980_v19 }
 0x8a7   : > { %v5844_v56 = vpop.f32.mrf.mxu2 }
 0x8a8   : > { %v6068_v62 = vpop.f32.mrf.mxu3  ;;  %v5612_v26 = vpop.f32.mrf.mxu1 }
 0x8a9   : > { %v5678_v38 = vadd.f32 %v5612_v26, %v12709_v63  ;;  %v5524_v26 = vld [vmem:[#allocation3 + $0x166] ss:$2 sm:$0xff] }
 0x8ab   : > { %v5902_v20 = vadd.f32 %v5836_v22, %v5678_v38  ;;  %v5546_v38 = vpack.c.bf16 %v5526_v10, %v5524_v26  ;;  %v5534_v26 = vld [vmem:[#allocation3 + $0x1b6] ss:$2 sm:$0xff] }
 0x8ad   : > { %v12867_v21 = vadd.f32 %v6060_v29, %v5902_v20  ;;  %v5772_v20 = vpack.c.bf16 %v5758_v37, %v5756_v14 }
 0x8af   : > { %v5846_v6 = vpop.f32.mrf.mxu2 }
 0x8b0   : > { %v6070_v23 = vpop.f32.mrf.mxu3  ;;  %v5615_v60 = vpop.f32.mrf.mxu1 }
 0x8b1   : > { %v5679_v53 = vadd.f32 %v5615_v60, %v12717_v61 }
 0x8b3   : > { %v5903_v48 = vadd.f32 %v5839_v59, %v5679_v53  ;;  %10488 = vmatmul.msk.bf16.gmra.mxu1 %vm2539_vm1, %v5545_v9 }
 0x8b4   : > { %10505 = vmatmul.msk.bf16.gmra.mxu2 %vm2539_vm1, %v5771_v55 }
 0x8b5   : > { %10520 = vmatmul.msk.bf16.gmra.mxu3 %vm2539_vm1, %v5995_v35  ;;  %v12873_v63 = vadd.f32 %v6063_v46, %v5903_v48  ;;  %v5530_v35 = vld [vmem:[#allocation3 + $0x196] ss:$2 sm:$0xff] }
 0x8b7   : > { %v5849_v22 = vpop.f32.mrf.mxu2 }
 0x8b8   : > { %v6073_v29 = vpop.f32.mrf.mxu3  ;;  %v5617_v1 = vpop.f32.mrf.mxu1 }
 0x8b9   : > { %v5680_v5 = vadd.f32 %v5617_v1, %v12720_v42 }
 0x8bb   : > { %v5904_v61 = vadd.f32 %v5841_v40, %v5680_v5  ;;  %v6600_v5 = vld [vmem:[#allocation3 + $0xb] ss:$2 sm:$0xff] }
 0x8bc   : > { %v6655_v10 = vpack.c.bf16 %v6602_v45, %v6600_v5  ;;  %v6610_v5 = vld [vmem:[#allocation3 + $0x5b] ss:$2 sm:$0xff] }
 0x8bd   : > { %v12876_v52 = vadd.f32 %v6065_v39, %v5904_v61 }
 0x8bf   : > { %v5851_v7 = vpop.f32.mrf.mxu2 }
 0x8c0   : > { %v6075_v59 = vpop.f32.mrf.mxu3  ;;  %v5620_v15 = vpop.f32.mrf.mxu1 }
 0x8c1   : > { %v5681_v46 = vadd.f32 %v5620_v15, %v12728_v30  ;;  %v5528_v30 = vld [vmem:[#allocation3 + $0x186] ss:$2 sm:$0xff] }
 0x8c2   : > { %v5547_v1 = vpack.c.bf16 %v5530_v35, %v5528_v30  ;;  %v5532_v15 = vld [vmem:[#allocation3 + $0x1a6] ss:$2 sm:$0xff] }
 0x8c3   : > { %v5905_v49 = vadd.f32 %v5844_v56, %v5681_v46  ;;  %10489 = vmatmul.msk.bf16.gmra.mxu1 %vm2539_vm1, %v5546_v38  ;;  %v6378_v56 = vld [vmem:[#allocation3 + $0x1a] ss:$2 sm:$0xff] }
 0x8c4   : > { %10506 = vmatmul.msk.bf16.gmra.mxu2 %vm2539_vm1, %v5772_v20  ;;  %v6382_v38 = vld [vmem:[#allocation3 + $0x3a] ss:$2 sm:$0xff]  ;;  %v6606_v20 = vld [vmem:[#allocation3 + $0x3b] ss:$2 sm:$0xff] }
 0x8c5   : > { %10521 = vmatmul.msk.bf16.gmra.mxu3 %vm2539_vm1, %v5996_v2  ;;  %v12882_v42 = vadd.f32 %v6068_v62, %v5905_v49  ;;  %v6376_v62 = vld [vmem:[#allocation3 + $0xa] ss:$2 sm:$0xff] }
 0x8c6   : > { %v6431_v61 = vpack.c.bf16 %v6378_v56, %v6376_v62 }
 0x8c7   : > { %v5854_v40 = vpop.f32.mrf.mxu2 }
 0x8c8   : > { %v6078_v39 = vpop.f32.mrf.mxu3  ;;  %v5622_v18 = vpop.f32.mrf.mxu1 }
 0x8c9   : > { %v5682_v60 = vadd.f32 %v5622_v18, %v12731_v32  ;;  %v5548_v18 = vpack.c.bf16 %v5534_v26, %v5532_v15 }
 0x8cb   : > { %v5906_v36 = vadd.f32 %v5846_v6, %v5682_v60  ;;  %v6604_v60 = vld [vmem:[#allocation3 + $0x2b] ss:$2 sm:$0xff] }
 0x8cc   : > { %v6656_v30 = vpack.c.bf16 %v6606_v20, %v6604_v60  ;;  %v6614_v60 = vld [vmem:[#allocation3 + $0x7b] ss:$2 sm:$0xff] }
 0x8cd   : > { %v12885_v53 = vadd.f32 %v6070_v23, %v5906_v36 }
 0x8cf   : > { %v5856_v9 = vpop.f32.mrf.mxu2 }
 0x8d0   : > { %v6080_v3 = vpop.f32.mrf.mxu3  ;;  %v5625_v55 = vpop.f32.mrf.mxu1 }
 0x8d1   : > { %v5683_v48 = vadd.f32 %v5625_v55, %v12751_v27 }
 0x8d3   : > { %v5907_v14 = vadd.f32 %v5849_v22, %v5683_v48  ;;  %10490 = vmatmul.msk.bf16.gmra.mxu1 %vm2539_vm1, %v5547_v1  ;;  %v6154_v48 = vld [vmem:[#allocation3 + $0x19] ss:$2 sm:$0xff] }
 0x8d4   : > { %10538 = vmatmul.msk.bf16.vlgmr.msrb.gmra.mxu2 %vm2539_vm1, %v6431_v61 }
 0x8d5   : > { %10553 = vmatmul.msk.bf16.vlgmr.msrb.gmra.mxu3 %vm2539_vm1, %v6655_v10  ;;  %v12891_v32 = vadd.f32 %v6073_v29, %v5907_v14  ;;  %v6380_v29 = vld [vmem:[#allocation3 + $0x2a] ss:$2 sm:$0xff]  ;;  %v6152_v10 = vld [vmem:[#allocation3 + $0x9] ss:$2 sm:$0xff] }
 0x8d6   : > { %v6432_v36 = vpack.c.bf16 %v6382_v38, %v6380_v29 }
 0x8d7   : > { %v5859_v6 = vpop.f32.mrf.mxu2 }
 0x8d8   : > { %v6083_v23 = vpop.f32.mrf.mxu3  ;;  %v5627_v37 = vpop.f32.mrf.mxu1 }
 0x8d9   : > { %v5684_v19 = vadd.f32 %v5627_v37, %v12754_v51  ;;  %v6207_v37 = vpack.c.bf16 %v6154_v48, %v6152_v10  ;;  %v10571_v10 = vld [vmem:[%s14185_s5 + $0x8] sm:$0xf] }
 0x8db   : > { %v5908_v27 = vadd.f32 %v5851_v7, %v5684_v19  ;;  %v6608_v19 = vld [vmem:[#allocation3 + $0x4b] ss:$2 sm:$0xff] }
 0x8dc   : > { %v6657_v15 = vpack.c.bf16 %v6610_v5, %v6608_v19 }
 0x8dd   : > { %v12894_v33 = vadd.f32 %v6075_v59, %v5908_v27 }
 0x8df   : > { %v5861_v46 = vpop.f32.mrf.mxu2 }
 0x8e0   : > { %v6085_v22 = vpop.f32.mrf.mxu3  ;;  %v5630_v2 = vpop.f32.mrf.mxu1 }
 0x8e1   : > { %v5685_v49 = vadd.f32 %v5630_v2, %v12762_v57 }
 0x8e3   : > { %v5909_v56 = vadd.f32 %v5854_v40, %v5685_v49  ;;  %10491 = vmatmul.msk.bf16.gmra.mxu1 %vm2539_vm1, %v5548_v18  ;;  %v6386_v40 = vld [vmem:[#allocation3 + $0x5a] ss:$2 sm:$0xff]  ;;  %v6158_v49 = vld [vmem:[#allocation3 + $0x39] ss:$2 sm:$0xff] }
 0x8e4   : > { %10539 = vmatmul.msk.bf16.gmra.mxu2 %vm2539_vm1, %v6432_v36 }
 0x8e5   : > { %10554 = vmatmul.msk.bf16.gmra.mxu3 %vm2539_vm1, %v6656_v30  ;;  %v12900_v51 = vadd.f32 %v6078_v39, %v5909_v56  ;;  %v6384_v39 = vld [vmem:[#allocation3 + $0x4a] ss:$2 sm:$0xff]  ;;  %v6156_v30 = vld [vmem:[#allocation3 + $0x29] ss:$2 sm:$0xff] }
 0x8e6   : > { %v6433_v27 = vpack.c.bf16 %v6386_v40, %v6384_v39 }
 0x8e7   : > { %v5864_v7 = vpop.f32.mrf.mxu2 }
 0x8e8   : > { %v6088_v59 = vpop.f32.mrf.mxu3  ;;  %v5632_v45 = vpop.f32.mrf.mxu1 }
 0x8e9   : > { %v5686_v55 = vadd.f32 %v5632_v45, %v12765_v31  ;;  %v6208_v45 = vpack.c.bf16 %v6158_v49, %v6156_v30  ;;  %v6616_v49 = vld [vmem:[#allocation3 + $0x8b] ss:$2 sm:$0xff] }
 0x8eb   : > { %v5910_v57 = vadd.f32 %v5856_v9, %v5686_v55  ;;  %v6612_v55 = vld [vmem:[#allocation3 + $0x6b] ss:$2 sm:$0xff] }
 0x8ec   : > { %v6658_v48 = vpack.c.bf16 %v6614_v60, %v6612_v55 }
 0x8ed   : > { %v12903_v35 = vadd.f32 %v6080_v3, %v5910_v57 }
 0x8ef   : > { %v5866_v1 = vpop.f32.mrf.mxu2 }
 0x8f0   : > { %v6090_v62 = vpop.f32.mrf.mxu3  ;;  %v5635_v61 = vpop.f32.mrf.mxu1 }
 0x8f1   : > { %v5687_v14 = vadd.f32 %v5635_v61, %v12773_v28 }
 0x8f3   : > { %v5911_v26 = vadd.f32 %v5859_v6, %v5687_v14  ;;  %10523 = vmatmul.msk.bf16.vlgmr.msrb.gmra.mxu1 %vm2539_vm1, %v6207_v37  ;;  %v6390_v6 = vld [vmem:[#allocation3 + $0x7a] ss:$2 sm:$0xff] }
 0x8f4   : > { %10540 = vmatmul.msk.bf16.gmra.mxu2 %vm2539_vm1, %v6433_v27 }
 0x8f5   : > { %10555 = vmatmul.msk.bf16.gmra.mxu3 %vm2539_vm1, %v6657_v15  ;;  %v12909_v31 = vadd.f32 %v6083_v23, %v5911_v26  ;;  %v6388_v23 = vld [vmem:[#allocation3 + $0x6a] ss:$2 sm:$0xff]  ;;  %v6394_v15 = vld [vmem:[#allocation3 + $0x9a] ss:$2 sm:$0xff]  ;;  %v6160_v26 = vld [vmem:[#allocation3 + $0x49] ss:$2 sm:$0xff] }
 0x8f6   : > { %v6434_v57 = vpack.c.bf16 %v6390_v6, %v6388_v23 }
 0x8f7   : > { %v5869_v9 = vpop.f32.mrf.mxu2 }
 0x8f8   : > { %v6093_v3 = vpop.f32.mrf.mxu3  ;;  %v5637_v38 = vpop.f32.mrf.mxu1 }
 0x8f9   : > { %v5688_v20 = vadd.f32 %v5637_v38, %v12776_v50 }
 0x8fb   : > { %v5912_v28 = vadd.f32 %v5861_v46, %v5688_v20 }
 0x8fd   : > { %v12912_v2 = vadd.f32 %v6085_v22, %v5912_v28  ;;  %v6392_v28 = vld [vmem:[#allocation3 + $0x8a] ss:$2 sm:$0xff] }
 0x8fe   : > { %v6435_v6 = vpack.c.bf16 %v6394_v15, %v6392_v28 }
 0x8ff   : > { %v5871_v18 = vpop.f32.mrf.mxu2 }
 0x900   : > { %v6095_v29 = vpop.f32.mrf.mxu3  ;;  %v5640_v36 = vpop.f32.mrf.mxu1 }
 0x901   : > { %v5689_v56 = vadd.f32 %v5640_v36, %v12784_v43 }
 0x903   : > { %v5913_v40 = vadd.f32 %v5864_v7, %v5689_v56  ;;  %10524 = vmatmul.msk.bf16.gmra.mxu1 %vm2539_vm1, %v6208_v45  ;;  %v11248_v7 = vld [vmem:[%s14185_s5 + $0x8] sm:$0x30] }
 0x904   : > { %10541 = vmatmul.msk.bf16.gmra.mxu2 %vm2539_vm1, %v6434_v57  ;;  %v10572_v14 = vor.u32 %v11248_v7, %v10571_v10  ;;  %v6166_v57 = vld [vmem:[#allocation3 + $0x79] ss:$2 sm:$0xff] }
 0x905   : > { %10556 = vmatmul.msk.bf16.gmra.mxu3 %vm2539_vm1, %v6658_v48  ;;  %v12918_v50 = vadd.f32 %v6088_v59, %v5913_v40  ;;  %v6162_v59 = vld [vmem:[#allocation3 + $0x59] ss:$2 sm:$0xff] }
 0x906   : > { %v7170_v39 = vsel %vm7168_vm5, %v10572_v14, 0  ;;  %v6209_v20 = vpack.c.bf16 %v6162_v59, %v6160_v26  ;;  %v6620_v14 = vld [vmem:[#allocation3 + $0xab] ss:$2 sm:$0xff] }
 0x907   : > { %v5874_v46 = vpop.f32.mrf.mxu2  ;;  %7179 = vmatpush.bf16.msra.mxu2 %v7170_v39 }
 0x908   : > { %v6098_v22 = vpop.f32.mrf.mxu3  ;;  %v5642_v5 = vpop.f32.mrf.mxu1 }
 0x909   : > { %v5690_v61 = vadd.f32 %v5642_v5, %v12787_v0  ;;  %v6618_v0 = vld [vmem:[#allocation3 + $0x9b] ss:$2 sm:$0xff] }
 0x90a   : > { %v6659_v60 = vpack.c.bf16 %v6618_v0, %v6616_v49  ;;  %v6622_v5 = vld [vmem:[#allocation3 + $0xbb] ss:$2 sm:$0xff] }
 0x90b   : > { %v5914_v43 = vadd.f32 %v5866_v1, %v5690_v61  ;;  %v6660_v39 = vpack.c.bf16 %v6622_v5, %v6620_v14  ;;  %v6626_v49 = vld [vmem:[#allocation3 + $0xdb] ss:$2 sm:$0xff] }
 0x90c   : > { %v6630_v14 = vld [vmem:[#allocation3 + $0xfb] ss:$2 sm:$0xff] }
 0x90d   : > { %v12927_v37 = vadd.f32 %v6090_v62, %v5914_v43  ;;  %v6164_v43 = vld [vmem:[#allocation3 + $0x69] ss:$2 sm:$0xff] }
 0x90e   : > { %v6210_v7 = vpack.c.bf16 %v6166_v57, %v6164_v43 }
 0x90f   : > { %v5876_v19 = vpop.f32.mrf.mxu2 }
 0x910   : > { %v6100_v27 = vpop.f32.mrf.mxu3  ;;  %v5645_v1 = vpop.f32.mrf.mxu1 }
 0x911   : > { %v5691_v38 = vadd.f32 %v5645_v1, %v12795_v41 }
 0x913   : > { %v5915_v36 = vadd.f32 %v5869_v9, %v5691_v38  ;;  %10525 = vmatmul.msk.bf16.gmra.mxu1 %vm2539_vm1, %v6209_v20  ;;  %v6398_v9 = vld [vmem:[#allocation3 + $0xba] ss:$2 sm:$0xff]  ;;  %v6170_v38 = vld [vmem:[#allocation3 + $0x99] ss:$2 sm:$0xff] }
 0x914   : > { %10542 = vmatmul.msk.bf16.gmra.mxu2 %vm2539_vm1, %v6435_v6 }
 0x915   : > { %10557 = vmatmul.msk.bf16.gmra.mxu3 %vm2539_vm1, %v6659_v60  ;;  %v12934_v62 = vadd.f32 %v6093_v3, %v5915_v36  ;;  %v6396_v3 = vld [vmem:[#allocation3 + $0xaa] ss:$2 sm:$0xff]  ;;  %v6168_v60 = vld [vmem:[#allocation3 + $0x89] ss:$2 sm:$0xff] }
 0x916   : > { %v6436_v59 = vpack.c.bf16 %v6398_v9, %v6396_v3 }
 0x917   : > { %v5879_v30 = vpop.f32.mrf.mxu2 }
 0x918   : > { %v6103_v56 = vpop.f32.mrf.mxu3  ;;  %v5647_v45 = vpop.f32.mrf.mxu1 }
 0x919   : > { %v5692_v23 = vadd.f32 %v5647_v45, %v12798_v44  ;;  %v6211_v45 = vpack.c.bf16 %v6170_v38, %v6168_v60 }
 0x91b   : > { %v5916_v41 = vadd.f32 %v5871_v18, %v5692_v23  ;;  %v6624_v23 = vld [vmem:[#allocation3 + $0xcb] ss:$2 sm:$0xff] }
 0x91c   : > { %v6661_v57 = vpack.c.bf16 %v6626_v49, %v6624_v23  ;;  %v6634_v23 = vld [vmem:[#allocation3 + $0x11b] ss:$2 sm:$0xff] }
 0x91d   : > { %v12937_v55 = vadd.f32 %v6095_v29, %v5916_v41 }
 0x91f   : > { %v5881_v48 = vpop.f32.mrf.mxu2 }
 0x920   : > { %v6105_v40 = vpop.f32.mrf.mxu3  ;;  %v5650_v61 = vpop.f32.mrf.mxu1 }
 0x921   : > { %v5693_v10 = vadd.f32 %v5650_v61, %v12806_v8 }
 0x923   : > { %v5917_v15 = vadd.f32 %v5874_v46, %v5693_v10  ;;  %10526 = vmatmul.msk.bf16.gmra.mxu1 %vm2539_vm1, %v6210_v7  ;;  %v6402_v46 = vld [vmem:[#allocation3 + $0xda] ss:$2 sm:$0xff]  ;;  %v6174_v10 = vld [vmem:[#allocation3 + $0xb9] ss:$2 sm:$0xff] }
 0x924   : > { %10543 = vmatmul.msk.bf16.gmra.mxu2 %vm2539_vm1, %v6436_v59 }
 0x925   : > { %10558 = vmatmul.msk.bf16.gmra.mxu3 %vm2539_vm1, %v6660_v39  ;;  %v12943_v44 = vadd.f32 %v6098_v22, %v5917_v15  ;;  %v6400_v22 = vld [vmem:[#allocation3 + $0xca] ss:$2 sm:$0xff]  ;;  %v6172_v39 = vld [vmem:[#allocation3 + $0xa9] ss:$2 sm:$0xff] }
 0x926   : > { %v6437_v41 = vpack.c.bf16 %v6402_v46, %v6400_v22 }
 0x927   : > { %v5884_v18 = vpop.f32.mrf.mxu2 }
 0x928   : > { %v6108_v29 = vpop.f32.mrf.mxu3  ;;  %v5652_v0 = vpop.f32.mrf.mxu1 }
 0x929   : > { %v5694_v1 = vadd.f32 %v5652_v0, %v12809_v25  ;;  %v6212_v0 = vpack.c.bf16 %v6174_v10, %v6172_v39 }
 0x92b   : > { %v5918_v8 = vadd.f32 %v5876_v19, %v5694_v1  ;;  %v6628_v1 = vld [vmem:[#allocation3 + $0xeb] ss:$2 sm:$0xff] }
 0x92c   : > { %v6662_v38 = vpack.c.bf16 %v6630_v14, %v6628_v1  ;;  %v6180_v1 = vld [vmem:[#allocation3 + $0xe9] ss:$2 sm:$0xff] }
 0x92d   : > { %v12946_v26 = vadd.f32 %v6100_v27, %v5918_v8 }
 0x92f   : > { %v5886_v20 = vpop.f32.mrf.mxu2 }
 0x930   : > { %v6110_v28 = vpop.f32.mrf.mxu3  ;;  %v5655_v6 = vpop.f32.mrf.mxu1 }
 0x931   : > { %v5695_v36 = vadd.f32 %v5655_v6, %v12817_v4 }
 0x933   : > { %v5919_v9 = vadd.f32 %v5879_v30, %v5695_v36  ;;  %10527 = vmatmul.msk.bf16.gmra.mxu1 %vm2539_vm1, %v6211_v45  ;;  %v6406_v30 = vld [vmem:[#allocation3 + $0xfa] ss:$2 sm:$0xff]  ;;  %v6178_v36 = vld [vmem:[#allocation3 + $0xd9] ss:$2 sm:$0xff] }
 0x934   : > { %10544 = vmatmul.msk.bf16.gmra.mxu2 %vm2539_vm1, %v6437_v41 }
 0x935   : > { %10559 = vmatmul.msk.bf16.gmra.mxu3 %vm2539_vm1, %v6661_v57  ;;  %v12952_v25 = vadd.f32 %v6103_v56, %v5919_v9  ;;  %v6404_v56 = vld [vmem:[#allocation3 + $0xea] ss:$2 sm:$0xff]  ;;  %v6176_v57 = vld [vmem:[#allocation3 + $0xc9] ss:$2 sm:$0xff] }
 0x936   : > { %v6438_v8 = vpack.c.bf16 %v6406_v30, %v6404_v56  ;;  %v6638_v56 = vld [vmem:[#allocation3 + $0x13b] ss:$2 sm:$0xff] }
 0x937   : > { %v5889_v19 = vpop.f32.mrf.mxu2 }
 0x938   : > { %v6113_v27 = vpop.f32.mrf.mxu3  ;;  %v5657_v5 = vpop.f32.mrf.mxu1 }
 0x939   : > { %v5696_v61 = vadd.f32 %v5657_v5, %v12820_v54  ;;  %v6213_v5 = vpack.c.bf16 %v6178_v36, %v6176_v57 }
 0x93b   : > { %v5920_v4 = vadd.f32 %v5881_v48, %v5696_v61  ;;  %v6632_v61 = vld [vmem:[#allocation3 + $0x10b] ss:$2 sm:$0xff] }
 0x93c   : > { %v6663_v10 = vpack.c.bf16 %v6634_v23, %v6632_v61  ;;  %v6418_v61 = vld [vmem:[#allocation3 + $0x15a] ss:$2 sm:$0xff] }
 0x93d   : > { %v12955_v43 = vadd.f32 %v6105_v40, %v5920_v4 }
 0x93f   : > { %v5891_v7 = vpop.f32.mrf.mxu2 }
 0x940   : > { %v6115_v3 = vpop.f32.mrf.mxu3  ;;  %v5660_v59 = vpop.f32.mrf.mxu1 }
 0x941   : > { %v5697_v15 = vadd.f32 %v5660_v59, %v12828_v11 }
 0x943   : > { %v5921_v46 = vadd.f32 %v5884_v18, %v5697_v15  ;;  %10528 = vmatmul.msk.bf16.gmra.mxu1 %vm2539_vm1, %v6212_v0  ;;  %v6410_v18 = vld [vmem:[#allocation3 + $0x11a] ss:$2 sm:$0xff] }
 0x944   : > { %10545 = vmatmul.msk.bf16.gmra.mxu2 %vm2539_vm1, %v6438_v8  ;;  %v6414_v0 = vld [vmem:[#allocation3 + $0x13a] ss:$2 sm:$0xff] }
 0x945   : > { %10560 = vmatmul.msk.bf16.gmra.mxu3 %vm2539_vm1, %v6662_v38  ;;  %v12961_v54 = vadd.f32 %v6108_v29, %v5921_v46  ;;  %v6408_v29 = vld [vmem:[#allocation3 + $0x10a] ss:$2 sm:$0xff]  ;;  %v6636_v46 = vld [vmem:[#allocation3 + $0x12b] ss:$2 sm:$0xff] }
 0x946   : > { %v6439_v4 = vpack.c.bf16 %v6410_v18, %v6408_v29  ;;  %v6412_v38 = vld [vmem:[#allocation3 + $0x12a] ss:$2 sm:$0xff] }
 0x947   : > { %v5894_v48 = vpop.f32.mrf.mxu2 }
 0x948   : > { %v6118_v40 = vpop.f32.mrf.mxu3  ;;  %v5662_v49 = vpop.f32.mrf.mxu1 }
 0x949   : > { %v5698_v6 = vadd.f32 %v5662_v49, %v12831_v34  ;;  %v6440_v49 = vpack.c.bf16 %v6414_v0, %v6412_v38 }
 0x94b   : > { %v5922_v11 = vadd.f32 %v5886_v20, %v5698_v6  ;;  %v6664_v6 = vpack.c.bf16 %v6638_v56, %v6636_v46  ;;  %v6190_v46 = vld [vmem:[#allocation3 + $0x139] ss:$2 sm:$0xff] }
 0x94d   : > { %v12964_v60 = vadd.f32 %v6110_v28, %v5922_v11 }
 0x94f   : > { %v5896_v45 = vpop.f32.mrf.mxu2 }
 0x950   : > { %v6120_v22 = vpop.f32.mrf.mxu3  ;;  %v5665_v41 = vpop.f32.mrf.mxu1 }
 0x951   : > { %v5699_v9 = vadd.f32 %v5665_v41, %v12837_v12  ;;  %v14186_v12 = vmov 0.0  }
 0x952   : > { %7065 = vst.msk [vmem:[#allocation5] sm:$0xff] %vm6883_vm6, %v14186_v12 }
 0x953   : > { %v5923_v30 = vadd.f32 %v5889_v19, %v5699_v9  ;;  %10529 = vmatmul.msk.bf16.gmra.mxu1 %vm2539_vm1, %v6213_v5  ;;  %7066 = vst.msk [vmem:[#allocation5 + $0x8] sm:$0xff] %vm6883_vm6, %v14186_v12  ;;  %v6186_v9 = vld [vmem:[#allocation3 + $0x119] ss:$2 sm:$0xff] }
 0x954   : > { %10546 = vmatmul.msk.bf16.gmra.mxu2 %vm2539_vm1, %v6439_v4  ;;  %7067 = vst.msk [vmem:[#allocation5 + $0x10] sm:$0xff] %vm6883_vm6, %v14186_v12 }
 0x955   : > { %10561 = vmatmul.msk.bf16.gmra.mxu3 %vm2539_vm1, %v6663_v10  ;;  %v12970_v34 = vadd.f32 %v6113_v27, %v5923_v30  ;;  %7068 = vst.msk [vmem:[#allocation5 + $0x18] sm:$0xff] %vm6883_vm6, %v14186_v12  ;;  %v6182_v27 = vld [vmem:[#allocation3 + $0xf9] ss:$2 sm:$0xff]  ;;  %v6184_v10 = vld [vmem:[#allocation3 + $0x109] ss:$2 sm:$0xff] }
 0x956   : > { %7069 = vst.msk [vmem:[#allocation5 + $0x20] sm:$0xff] %vm6883_vm6, %v14186_v12 }
 0x957   : > { %v6501_v20 = vpop.f32.mrf.mxu2  ;;  %7070 = vst.msk [vmem:[#allocation5 + $0x28] sm:$0xff] %vm6883_vm6, %v14186_v12 }
 0x958   : > { %v6725_v28 = vpop.f32.mrf.mxu3  ;;  %v5667_v14 = vpop.f32.mrf.mxu1  ;;  %7071 = vst.msk [vmem:[#allocation5 + $0x30] sm:$0xff] %vm6883_vm6, %v14186_v12 }
 0x959   : > { %v5700_v59 = vadd.f32 %v5667_v14, %v12840_v24  ;;  %7072 = vst.msk [vmem:[#allocation5 + $0x38] sm:$0xff] %vm6883_vm6, %v14186_v12  ;;  %v6215_v14 = vpack.c.bf16 %v6186_v9, %v6184_v10 }
 0x95a   : > { %7073 = vst.msk [vmem:[#allocation5 + $0x40] sm:$0xff] %vm6883_vm6, %v14186_v12 }
 0x95b   : > { %v5924_v39 = vadd.f32 %v5891_v7, %v5700_v59  ;;  %7074 = vst.msk [vmem:[#allocation5 + $0x48] sm:$0xff] %vm6883_vm6, %v14186_v12  ;;  %v6416_v59 = vld [vmem:[#allocation3 + $0x14a] ss:$2 sm:$0xff] }
 0x95c   : > { %7075 = vst.msk [vmem:[#allocation5 + $0x50] sm:$0xff] %vm6883_vm6, %v14186_v12 }
 0x95d   : > { %v12981_v19 = vadd.f32 %v6115_v3, %v5924_v39  ;;  %v6214_v3 = vpack.c.bf16 %v6182_v27, %v6180_v1  ;;  %7076 = vst.msk [vmem:[#allocation5 + $0x58] sm:$0xff] %vm6883_vm6, %v14186_v12  ;;  %v6640_v39 = vld [vmem:[#allocation3 + $0x14b] ss:$2 sm:$0xff]  ;;  %v6441_v27 = vpack.c.bf16 %v6418_v61, %v6416_v59 }
 0x95e   : > { %7077 = vst.msk [vmem:[#allocation5 + $0x60] sm:$0xff] %vm6883_vm6, %v14186_v12 }
 0x95f   : > { %v6503_v24 = vpop.f32.mrf.mxu2  ;;  %7078 = vst.msk [vmem:[#allocation5 + $0x68] sm:$0xff] %vm6883_vm6, %v14186_v12 }
 0x960   : > { %v6727_v15 = vpop.f32.mrf.mxu3  ;;  %v5670_v7 = vpop.f32.mrf.mxu1  ;;  %7080 = vst.msk [vmem:[#allocation5 + $0x70] sm:$0x7f] %vm7079_vm7, %v14186_v12 }
 0x961   : > { %v5701_v8 = vadd.f32 %v5670_v7, %v12846_v16  ;;  %8211 = vst.msk [vmem:[#allocation7] sm:$0xff] %vm8098_vm8, %v14186_v12 }
 0x962   : > { %8212 = vst.msk [vmem:[#allocation7 + $0x8] sm:$0xff] %vm8098_vm8, %v14186_v12 }
 0x963   : > { %v5925_v11 = vadd.f32 %v5894_v48, %v5701_v8  ;;  %10530 = vmatmul.msk.bf16.gmra.mxu1 %vm2539_vm1, %v6214_v3  ;;  %8213 = vst.msk [vmem:[#allocation7 + $0x10] sm:$0xff] %vm8098_vm8, %v14186_v12 }
 0x964   : > { %10547 = vmatmul.msk.bf16.gmra.mxu2 %vm2539_vm1, %v6440_v49  ;;  %8214 = vst.msk [vmem:[#allocation7 + $0x18] sm:$0xff] %vm8098_vm8, %v14186_v12 }
 0x965   : > { %10562 = vmatmul.msk.bf16.gmra.mxu3 %vm2539_vm1, %v6664_v6  ;;  %v13003_v16 = vadd.f32 %v6118_v40, %v5925_v11  ;;  %v6642_v40 = vld [vmem:[#allocation3 + $0x15b] ss:$2 sm:$0xff]  ;;  %v6422_v11 = vld [vmem:[#allocation3 + $0x17a] ss:$2 sm:$0xff]  ;;  %8215 = vst.msk [vmem:[#allocation7 + $0x20] sm:$0xff] %vm8098_vm8, %v14186_v12 }
 0x966   : > { %v6665_v0 = vpack.c.bf16 %v6642_v40, %v6640_v39  ;;  %8216 = vst.msk [vmem:[#allocation7 + $0x28] sm:$0xff] %vm8098_vm8, %v14186_v12 }
 0x967   : > { %v6506_v48 = vpop.f32.mrf.mxu2  ;;  %8217 = vst.msk [vmem:[#allocation7 + $0x30] sm:$0xff] %vm8098_vm8, %v14186_v12 }
 0x968   : > { %v6730_v36 = vpop.f32.mrf.mxu3  ;;  %v5672_v18 = vpop.f32.mrf.mxu1 }
 0x969   : > { %v5702_v23 = vadd.f32 %v5672_v18, %v12849_v58  ;;  %v13016_v58 = vld [vmem:[%s14187_s4] ss:$0 sm:$0xff]  ;;  %v6646_v18 = vld [vmem:[#allocation3 + $0x17b] ss:$2 sm:$0xff]  ;;  %s9763_s4 = sshll.u32 %s9759_s23, 4  ;;  %s9764_s4 = int_to_ptr.hbm [resolvable:$true] %s9763_s4 }
 0x96b   : > { %v5926_v41 = vadd.f32 %v5896_v45, %v5702_v23 }
 0x96d   : > { %v13010_v57 = vadd.f32 %v6120_v22, %v5926_v41  ;;  %v6188_v41 = vld [vmem:[#allocation3 + $0x129] ss:$2 sm:$0xff] }
 0x96e   : > { %v6216_v40 = vpack.c.bf16 %v6190_v46, %v6188_v41  ;;  %v6424_v46 = vld [vmem:[#allocation3 + $0x18a] ss:$2 sm:$0xff] }
 0x96f   : > { %v6508_v5 = vpop.f32.mrf.mxu2 }
 0x970   : > { %v6732_v29 = vpop.f32.mrf.mxu3  ;;  %v6277_v4 = vpop.f32.mrf.mxu1 }
 0x971   : > { %v6347_v30 = vadd.f32 %v6277_v4, %v12855_v17  ;;  %v6644_v4 = vld [vmem:[#allocation3 + $0x16b] ss:$2 sm:$0xff] }
 0x973   : > { %v6571_v56 = vadd.f32 %v6501_v20, %v6347_v30  ;;  %10531 = vmatmul.msk.bf16.gmra.mxu1 %vm2539_vm1, %v6215_v14 }
 0x974   : > { %10548 = vmatmul.msk.bf16.gmra.mxu2 %vm2539_vm1, %v6441_v27 }
 0x975   : > { %10563 = vmatmul.msk.bf16.gmra.mxu3 %vm2539_vm1, %v6665_v0  ;;  %v6795_v45 = vadd.f32 %v6725_v28, %v6571_v56  ;;  %v10595_v56 = vld [vmem:[%s14185_s5 + $0x10] sm:$0xf] }
 0x977   : > { %v6827_v17 = vadd.f32 %v13016_v58, %v6795_v45  ;;  %v13022_v22 = vpop.f32.mrf.mxu2 }
 0x978   : > { %v13024_v7 = vpop.f32.mrf.mxu3  ;;  %v6279_v1 = vpop.f32.mrf.mxu1 }
 0x979   : > { %v6855_v20 = vmax.f32 %v6827_v17, 0.0  ;;  %v6348_v8 = vadd.f32 %v6279_v1, %v12858_v13  ;;  %v6420_v13 = vld [vmem:[#allocation3 + $0x16a] ss:$2 sm:$0xff]  ;;  %v6194_v1 = vld [vmem:[#allocation3 + $0x159] ss:$2 sm:$0xff] }
 0x97a   : > { %v6442_v10 = vpack.c.bf16 %v6422_v11, %v6420_v13 }
 0x97b   : > { %6884 = vst.msk [vmem:[#allocation4] sm:$0xff] %vm6883_vm6, %v6855_v20  ;;  %v6572_v3 = vadd.f32 %v6503_v24, %v6348_v8  ;;  %v6666_v24 = vpack.c.bf16 %v6646_v18, %v6644_v4  ;;  %v6192_v18 = vld [vmem:[#allocation3 + $0x149] ss:$2 sm:$0xff] }
 0x97d   : > { %v6796_v38 = vadd.f32 %v6727_v15, %v6572_v3 }
 0x97f   : > { %v6828_v49 = vadd.f32 %v13016_v58, %v6796_v38  ;;  %v13029_v6 = vpop.f32.mrf.mxu2 }
 0x980   : > { %v13031_v28 = vpop.f32.mrf.mxu3  ;;  %v6282_v23 = vpop.f32.mrf.mxu1 }
 0x981   : > { %v6856_v9 = vmax.f32 %v6828_v49, 0.0  ;;  %v6349_v61 = vadd.f32 %v6282_v23, %v12864_v47  ;;  %v6648_v49 = vld [vmem:[#allocation3 + $0x18b] ss:$2 sm:$0xff] }
 0x983   : > { %6885 = vst.msk [vmem:[#allocation4 + $0x8] sm:$0xff] %vm6883_vm6, %v6856_v9  ;;  %v6573_v15 = vadd.f32 %v6506_v48, %v6349_v61  ;;  %10532 = vmatmul.msk.bf16.gmra.mxu1 %vm2539_vm1, %v6216_v40  ;;  %v6217_v9 = vpack.c.bf16 %v6194_v1, %v6192_v18  ;;  %v6426_v61 = vld [vmem:[#allocation3 + $0x19a] ss:$2 sm:$0xff]  ;;  %v6650_v40 = vld [vmem:[#allocation3 + $0x19b] ss:$2 sm:$0xff] }
 0x984   : > { %10549 = vmatmul.msk.bf16.gmra.mxu2 %vm2539_vm1, %v6442_v10  ;;  %v6443_v4 = vpack.c.bf16 %v6426_v61, %v6424_v46  ;;  %v6667_v10 = vpack.c.bf16 %v6650_v40, %v6648_v49  ;;  %v6430_v46 = vld [vmem:[#allocation3 + $0x1ba] ss:$2 sm:$0xff]  ;;  %v6652_v49 = vld [vmem:[#allocation3 + $0x1ab] ss:$2 sm:$0xff] }
 0x985   : > { %10564 = vmatmul.msk.bf16.gmra.mxu3 %vm2539_vm1, %v6666_v24  ;;  %v6797_v30 = vadd.f32 %v6730_v36, %v6573_v15  ;;  %v11249_v36 = vld [vmem:[%s14185_s5 + $0x10] sm:$0x30] }
 0x986   : > { %v10596_v45 = vor.u32 %v11249_v36, %v10595_v56  ;;  %v6196_v18 = vld [vmem:[#allocation3 + $0x169] ss:$2 sm:$0xff] }
 0x987   : > { %v6829_v14 = vadd.f32 %v13016_v58, %v6797_v30  ;;  %v13039_v59 = vpop.f32.mrf.mxu2 }
 0x988   : > { %v13041_v47 = vpop.f32.mrf.mxu3  ;;  %v6284_v39 = vpop.f32.mrf.mxu1  ;;  %v7340_v3 = vsel %vm7168_vm5, %v10596_v45, 0 }
 0x989   : > { %v6857_v27 = vmax.f32 %v6829_v14, 0.0  ;;  %v6350_v0 = vadd.f32 %v6284_v39, %v12867_v21  ;;  %7349 = vmatpush.bf16.msra.mxu3 %v7340_v3 }
 0x98a   : > { %v6912_v20 = vld [vmem:[#allocation4] ss:$2 sm:$0xff]  ;;  %v6940_v8 = vld [vmem:[#allocation4 + $0x1] ss:$2 sm:$0xff] }
 0x98b   : > { %6886 = vst.msk [vmem:[#allocation4 + $0x10] sm:$0xff] %vm6883_vm6, %v6857_v27  ;;  %v6574_v48 = vadd.f32 %v6508_v5, %v6350_v0  ;;  %v6967_v23 = vmax.f32 %v6912_v20, %v6940_v8  ;;  %v6198_v20 = vld [vmem:[#allocation3 + $0x179] ss:$2 sm:$0xff] }
 0x98d   : > { %v6798_v17 = vadd.f32 %v6732_v29, %v6574_v48 }
 0x98f   : > { %v6830_v21 = vadd.f32 %v13016_v58, %v6798_v17  ;;  %v13053_v38 = vpop.f32.mrf.mxu2  ;;  %v6428_v17 = vld [vmem:[#allocation3 + $0x1aa] ss:$2 sm:$0xff] }
 0x990   : > { %v13055_v5 = vpop.f32.mrf.mxu3  ;;  %v6287_v11 = vpop.f32.mrf.mxu1 }
 0x991   : > { %v6858_v41 = vmax.f32 %v6830_v21, 0.0  ;;  %v6351_v29 = vadd.f32 %v6287_v11, %v12873_v63  ;;  %v6654_v11 = vld [vmem:[#allocation3 + $0x1bb] ss:$2 sm:$0xff] }
 0x992   : > { %v6982_v13 = vld [vmem:[#allocation4 + $0x2] ss:$2 sm:$0xff]  ;;  %v7024_v30 = vld [vmem:[#allocation4 + $0x3] ss:$2 sm:$0xff]  ;;  %v6668_v61 = vpack.c.bf16 %v6654_v11, %v6652_v49 }
 0x993   : > { %v7009_v24 = vmax.f32 %v6967_v23, %v6982_v13  ;;  %6887 = vst.msk [vmem:[#allocation4 + $0x18] sm:$0xff] %vm6883_vm6, %v6858_v41  ;;  %v6575_v15 = vadd.f32 %v13022_v22, %v6351_v29  ;;  %10533 = vmatmul.msk.bf16.gmra.mxu1 %vm2539_vm1, %v6217_v9  ;;  %v6444_v9 = vpack.c.bf16 %v6430_v46, %v6428_v17 }
 0x994   : > { %10550 = vmatmul.msk.bf16.gmra.mxu2 %vm2539_vm1, %v6443_v4 }
 0x995   : > { %10565 = vmatmul.msk.bf16.gmra.mxu3 %vm2539_vm1, %v6667_v10  ;;  %v7051_v14 = vmax.f32 %v7009_v24, %v7024_v30  ;;  %v6799_v63 = vadd.f32 %v13024_v7, %v6575_v15 }
 0x997   : > { %7081 = vst.msk [vmem:[#allocation5 + $0x4] sm:$0xff] %vm6883_vm6, %v7051_v14  ;;  %v6831_v39 = vadd.f32 %v13016_v58, %v6799_v63  ;;  %v13066_v27 = vpop.f32.mrf.mxu2 }
 0x998   : > { %v13068_v0 = vpop.f32.mrf.mxu3  ;;  %v6289_v48 = vpop.f32.mrf.mxu1 }
 0x999   : > { %v6859_v22 = vmax.f32 %v6831_v39, 0.0  ;;  %v6352_v56 = vadd.f32 %v6289_v48, %v12876_v52 }
 0x99a   : > { %v6914_v7 = vld [vmem:[#allocation4 + $0x10] ss:$2 sm:$0xff]  ;;  %v6942_v1 = vld [vmem:[#allocation4 + $0x11] ss:$2 sm:$0xff] }
 0x99b   : > { %6888 = vst.msk [vmem:[#allocation4 + $0x20] sm:$0xff] %vm6883_vm6, %v6859_v22  ;;  %v6576_v36 = vadd.f32 %v13029_v6, %v6352_v56  ;;  %v6968_v23 = vmax.f32 %v6914_v7, %v6942_v1  ;;  %v6200_v56 = vld [vmem:[#allocation3 + $0x189] ss:$2 sm:$0xff] }
 0x99d   : > { %v6800_v45 = vadd.f32 %v13031_v28, %v6576_v36  ;;  %v6218_v28 = vpack.c.bf16 %v6198_v20, %v6196_v18 }
 0x99e   : > { %v7118_v11 = vld [vmem:[#allocation5 + $0x1] sm:$0xff] }
 0x99f   : > { %v6832_v8 = vadd.f32 %v13016_v58, %v6800_v45  ;;  %v13075_v3 = vpop.f32.mrf.mxu2 }
 0x9a0   : > { %v13077_v21 = vpop.f32.mrf.mxu3  ;;  %v6292_v52 = vpop.f32.mrf.mxu1 }
 0x9a1   : > { %v6860_v41 = vmax.f32 %v6832_v8, 0.0  ;;  %v6353_v6 = vadd.f32 %v6292_v52, %v12882_v42  ;;  %v6202_v8 = vld [vmem:[#allocation3 + $0x199] ss:$2 sm:$0xff] }
 0x9a2   : > { %v6984_v29 = vld [vmem:[#allocation4 + $0x12] ss:$2 sm:$0xff]  ;;  %v7026_v4 = vld [vmem:[#allocation4 + $0x13] ss:$2 sm:$0xff] }
 0x9a3   : > { %v7010_v40 = vmax.f32 %v6968_v23, %v6984_v29  ;;  %6889 = vst.msk [vmem:[#allocation4 + $0x28] sm:$0xff] %vm6883_vm6, %v6860_v41  ;;  %v6577_v13 = vadd.f32 %v13039_v59, %v6353_v6  ;;  %10534 = vmatmul.msk.bf16.gmra.mxu1 %vm2539_vm1, %v6218_v28 }
 0x9a4   : > { %10551 = vmatmul.msk.bf16.gmra.mxu2 %vm2539_vm1, %v6444_v9 }
 0x9a5   : > { %10566 = vmatmul.msk.bf16.gmra.mxu3 %vm2539_vm1, %v6668_v61  ;;  %v7052_v10 = vmax.f32 %v7010_v40, %v7026_v4  ;;  %v6801_v24 = vadd.f32 %v13041_v47, %v6577_v13 }
 0x9a7   : > { %7082 = vst.msk [vmem:[#allocation5 + $0xc] sm:$0xff] %vm6883_vm6, %v7052_v10  ;;  %v6833_v42 = vadd.f32 %v13016_v58, %v6801_v24  ;;  %v13088_v15 = vpop.f32.mrf.mxu2 }
 0x9a8   : > { %v13090_v30 = vpop.f32.mrf.mxu3  ;;  %v6294_v14 = vpop.f32.mrf.mxu1 }
 0x9a9   : > { %v6861_v59 = vmax.f32 %v6833_v42, 0.0  ;;  %v6354_v63 = vadd.f32 %v6294_v14, %v12885_v53  ;;  %v6204_v42 = vld [vmem:[#allocation3 + $0x1a9] ss:$2 sm:$0xff] }
 0x9aa   : > { %v6916_v22 = vld [vmem:[#allocation4 + $0x20] ss:$2 sm:$0xff]  ;;  %v6944_v47 = vld [vmem:[#allocation4 + $0x21] ss:$2 sm:$0xff] }
 0x9ab   : > { %6890 = vst.msk [vmem:[#allocation4 + $0x30] sm:$0xff] %vm6883_vm6, %v6861_v59  ;;  %v6578_v39 = vadd.f32 %v13053_v38, %v6354_v63  ;;  %v6969_v53 = vmax.f32 %v6916_v22, %v6944_v47  ;;  %v6219_v38 = vpack.c.bf16 %v6202_v8, %v6200_v56  ;;  %v6206_v59 = vld [vmem:[#allocation3 + $0x1b9] ss:$2 sm:$0xff] }
 0x9ad   : > { %v6802_v48 = vadd.f32 %v13055_v5, %v6578_v39  ;;  %v7289_v5 = vld [vmem:[#allocation5 + $0x2] sm:$0xff] }
 0x9ae   : > { %v7119_v7 = vld [vmem:[#allocation5 + $0x9] sm:$0xff] }
 0x9af   : > { %v6834_v36 = vadd.f32 %v13016_v58, %v6802_v48  ;;  %v13097_v45 = vpop.f32.mrf.mxu2  ;;  %v7290_v1 = vld [vmem:[#allocation5 + $0xa] sm:$0xff]  ;;  %v7132_v18 = vpack.c.bf16 %v7119_v7, %v7118_v11  ;;  %v6220_v7 = vpack.c.bf16 %v6206_v59, %v6204_v42  ;;  %v11250_v11 = vld [vmem:[%s14185_s5 + $0x18] sm:$0x30] }
 0x9b0   : > { %v13099_v17 = vpop.f32.mrf.mxu3  ;;  %v6297_v20 = vpop.f32.mrf.mxu1  ;;  %v7303_v23 = vpack.c.bf16 %v7290_v1, %v7289_v5  ;;  %v13121_v48 = vld [vmem:[#allocation5 + $0x8] sm:$0xff] }
 0x9b1   : > { %v6862_v46 = vmax.f32 %v6834_v36, 0.0  ;;  %v6355_v49 = vadd.f32 %v6297_v20, %v12891_v32 }
 0x9b2   : > { %v6986_v52 = vld [vmem:[#allocation4 + $0x22] ss:$2 sm:$0xff]  ;;  %v7028_v28 = vld [vmem:[#allocation4 + $0x23] ss:$2 sm:$0xff] }
 0x9b3   : > { %v7011_v41 = vmax.f32 %v6969_v53, %v6986_v52  ;;  %6891 = vst.msk [vmem:[#allocation4 + $0x38] sm:$0xff] %vm6883_vm6, %v6862_v46  ;;  %v6579_v6 = vadd.f32 %v13066_v27, %v6355_v49  ;;  %10535 = vmatmul.msk.bf16.gmra.mxu1 %vm2539_vm1, %v6219_v38 }
 0x9b4   : > { %10573 = vmatmul.msk.bf16.vlgmr.msra.gmra.mxu2 %vm6883_vm6, %v7132_v18 }
 0x9b5   : > { %10597 = vmatmul.msk.bf16.vlgmr.msra.gmra.mxu3 %vm6883_vm6, %v7303_v23  ;;  %v7053_v29 = vmax.f32 %v7011_v41, %v7028_v28  ;;  %v6803_v32 = vadd.f32 %v13068_v0, %v6579_v6  ;;  %v7401_v28 = vld [vmem:[#allocation5 + $0xb] sm:$0xff] }
 0x9b7   : > { %7083 = vst.msk [vmem:[#allocation5 + $0x14] sm:$0xff] %vm6883_vm6, %v7053_v29  ;;  %v6835_v9 = vadd.f32 %v13016_v58, %v6803_v32  ;;  %v13110_v61 = vpop.f32.mrf.mxu2 }
 0x9b8   : > { %v13112_v40 = vpop.f32.mrf.mxu3  ;;  %v6299_v13 = vpop.f32.mrf.mxu1 }
 0x9b9   : > { %v6863_v27 = vmax.f32 %v6835_v9, 0.0  ;;  %v6356_v4 = vadd.f32 %v6299_v13, %v12894_v33 }
 0x9ba   : > { %v6918_v0 = vld [vmem:[#allocation4 + $0x30] ss:$2 sm:$0xff]  ;;  %v6946_v14 = vld [vmem:[#allocation4 + $0x31] ss:$2 sm:$0xff] }
 0x9bb   : > { %6892 = vst.msk [vmem:[#allocation4 + $0x40] sm:$0xff] %vm6883_vm6, %v6863_v27  ;;  %v6580_v10 = vadd.f32 %v13075_v3, %v6356_v4  ;;  %v6970_v56 = vmax.f32 %v6918_v0, %v6946_v14  ;;  %v7400_v14 = vld [vmem:[#allocation5 + $0x3] sm:$0xff] }
 0x9bd   : > { %v6804_v24 = vadd.f32 %v13077_v21, %v6580_v10 }
 0x9be   : > { %v13123_v22 = vld [vmem:[#allocation5 + $0x10] sm:$0xff] }
 0x9bf   : > { %v6836_v63 = vadd.f32 %v13016_v58, %v6804_v24  ;;  %v13119_v39 = vpop.f32.mrf.mxu2  ;;  %v7969_v3 = vpack.c.bf16 %v13123_v22, %v13121_v48  ;;  %v7120_v9 = vld [vmem:[#allocation5 + $0x11] sm:$0xff] }
 0x9c0   : > { %v13125_v47 = vpop.f32.mrf.mxu3  ;;  %v6302_v33 = vpop.f32.mrf.mxu1  ;;  %v7291_v13 = vld [vmem:[#allocation5 + $0x12] sm:$0xff] }
 0x9c1   : > { %v6864_v21 = vmax.f32 %v6836_v63, 0.0  ;;  %v6357_v36 = vadd.f32 %v6302_v33, %v12900_v51  ;;  %v10608_v51 = vld [vmem:[%s14185_s5 + $0x18] sm:$0xf] }
 0x9c2   : > { %v6988_v1 = vld [vmem:[#allocation4 + $0x32] ss:$2 sm:$0xff]  ;;  %v7030_v53 = vld [vmem:[#allocation4 + $0x33] ss:$2 sm:$0xff]  ;;  %v10609_v52 = vor.u32 %v11250_v11, %v10608_v51 }
 0x9c3   : > { %v7012_v20 = vmax.f32 %v6970_v56, %v6988_v1  ;;  %6893 = vst.msk [vmem:[#allocation4 + $0x48] sm:$0xff] %vm6883_vm6, %v6864_v21  ;;  %v6581_v8 = vadd.f32 %v13088_v15, %v6357_v36  ;;  %10536 = vmatmul.msk.bf16.gmra.mxu1 %vm2539_vm1, %v6220_v7  ;;  %vm9514_vm1 = vcmask 586752  }
 0x9c4   : > { %v7451_v41 = vsel %vm7168_vm5, %v10609_v52, 0 }
 0x9c5   : > { %v7054_v46 = vmax.f32 %v7012_v20, %v7030_v53  ;;  %v6805_v49 = vadd.f32 %v13090_v30, %v6581_v8  ;;  %7460 = vmatpush.bf16.msra.mxu1 %v7451_v41 }
 0x9c7   : > { %7084 = vst.msk [vmem:[#allocation5 + $0x1c] sm:$0xff] %vm6883_vm6, %v7054_v46  ;;  %v6837_v38 = vadd.f32 %v13016_v58, %v6805_v49  ;;  %v13142_v5 = vpop.f32.mrf.mxu2 }
 0x9c8   : > { %v6304_v15 = vpop.f32.mrf.mxu1  ;;  %v13145_v30 = vpop.f32.mrf.mxu3 }
 0x9c9   : > { %v6865_v18 = vmax.f32 %v6837_v38, 0.0  ;;  %v6358_v23 = vadd.f32 %v6304_v15, %v12903_v35 }
 0x9ca   : > { %v6920_v29 = vld [vmem:[#allocation4 + $0x40] ss:$2 sm:$0xff]  ;;  %v6948_v27 = vld [vmem:[#allocation4 + $0x41] ss:$2 sm:$0xff] }
 0x9cb   : > { %6894 = vst.msk [vmem:[#allocation4 + $0x50] sm:$0xff] %vm6883_vm6, %v6865_v18  ;;  %v6582_v6 = vadd.f32 %v13097_v45, %v6358_v23  ;;  %v6971_v59 = vmax.f32 %v6920_v29, %v6948_v27 }
 0x9cd   : > { %v6806_v32 = vadd.f32 %v13099_v17, %v6582_v6  ;;  %v7414_v17 = vpack.c.bf16 %v7401_v28, %v7400_v14  ;;  %v7402_v28 = vld [vmem:[#allocation5 + $0x13] sm:$0xff] }
 0x9ce   : > { %v7121_v4 = vld [vmem:[#allocation5 + $0x19] sm:$0xff] }
 0x9cf   : > { %v7292_v10 = vld [vmem:[#allocation5 + $0x1a] sm:$0xff]  ;;  %v6838_v35 = vadd.f32 %v13016_v58, %v6806_v32  ;;  %v7133_v24 = vpack.c.bf16 %v7121_v4, %v7120_v9  ;;  %v6538_v56 = vpop.f32.mrf.mxu2 }
 0x9d0   : > { %v7304_v42 = vpack.c.bf16 %v7292_v10, %v7291_v13  ;;  %v6307_v0 = vpop.f32.mrf.mxu1  ;;  %v6762_v1 = vpop.f32.mrf.mxu3  ;;  %v7403_v18 = vld [vmem:[#allocation5 + $0x1b] sm:$0xff] }
 0x9d1   : > { %v6866_v63 = vmax.f32 %v6838_v35, 0.0  ;;  %v6359_v45 = vadd.f32 %v6307_v0, %v12909_v31  ;;  %10574 = vmatmul.msk.bf16.gmra.mxu2 %vm6883_vm6, %v7133_v24  ;;  %v13166_v23 = vld [vmem:[#allocation5 + $0x18] sm:$0xff] }
 0x9d2   : > { %10598 = vmatmul.msk.bf16.gmra.mxu3 %vm6883_vm6, %v7304_v42  ;;  %v6990_v33 = vld [vmem:[#allocation4 + $0x42] ss:$2 sm:$0xff]  ;;  %v7032_v7 = vld [vmem:[#allocation4 + $0x43] ss:$2 sm:$0xff] }
 0x9d3   : > { %v7013_v21 = vmax.f32 %v6971_v59, %v6990_v33  ;;  %6895 = vst.msk [vmem:[#allocation4 + $0x58] sm:$0xff] %vm6883_vm6, %v6866_v63  ;;  %v6583_v36 = vadd.f32 %v13110_v61, %v6359_v45  ;;  %10610 = vmatmul.msk.bf16.vlgmr.msra.gmra.mxu1 %vm6883_vm6, %v7414_v17 }
 0x9d5   : > { %v7055_v20 = vmax.f32 %v7013_v21, %v7032_v7  ;;  %v6807_v8 = vadd.f32 %v13112_v40, %v6583_v36 }
 0x9d7   : > { %7085 = vst.msk [vmem:[#allocation5 + $0x24] sm:$0xff] %vm6883_vm6, %v7055_v20  ;;  %v6839_v31 = vadd.f32 %v13016_v58, %v6807_v8  ;;  %v6541_v61 = vpop.f32.mrf.mxu2 }
 0x9d8   : > { %v6309_v53 = vpop.f32.mrf.mxu1  ;;  %v6765_v52 = vpop.f32.mrf.mxu3 }
 0x9d9   : > { %v6867_v46 = vmax.f32 %v6839_v31, 0.0  ;;  %v6360_v49 = vadd.f32 %v6309_v53, %v12912_v2 }
 0x9da   : > { %v6922_v11 = vld [vmem:[#allocation4 + $0x50] ss:$2 sm:$0xff]  ;;  %v6950_v15 = vld [vmem:[#allocation4 + $0x51] ss:$2 sm:$0xff] }
 0x9db   : > { %6896 = vst.msk [vmem:[#allocation4 + $0x60] sm:$0xff] %vm6883_vm6, %v6867_v46  ;;  %v6584_v38 = vadd.f32 %v13119_v39, %v6360_v49  ;;  %v6972_v29 = vmax.f32 %v6922_v11, %v6950_v15 }
 0x9dd   : > { %v6808_v51 = vadd.f32 %v13125_v47, %v6584_v38  ;;  %v7415_v47 = vpack.c.bf16 %v7403_v18, %v7402_v28 }
 0x9de   : > { %v13168_v41 = vld [vmem:[#allocation5 + $0x20] sm:$0xff] }
 0x9df   : > { %v6840_v40 = vadd.f32 %v13016_v58, %v6808_v51  ;;  %v7970_v2 = vpack.c.bf16 %v13168_v41, %v13166_v23  ;;  %v6543_v24 = vpop.f32.mrf.mxu2  ;;  %v7293_v21 = vld [vmem:[#allocation5 + $0x22] sm:$0xff] }
 0x9e0   : > { %v6312_v6 = vpop.f32.mrf.mxu1  ;;  %v6767_v0 = vpop.f32.mrf.mxu3  ;;  %v7404_v49 = vld [vmem:[#allocation5 + $0x23] sm:$0xff] }
 0x9e1   : > { %v6868_v39 = vmax.f32 %v6840_v40, 0.0  ;;  %v6361_v32 = vadd.f32 %v6312_v6, %v12918_v50 }
 0x9e2   : > { %v6992_v9 = vld [vmem:[#allocation4 + $0x52] ss:$2 sm:$0xff]  ;;  %v7034_v4 = vld [vmem:[#allocation4 + $0x53] ss:$2 sm:$0xff] }
 0x9e3   : > { %v7014_v13 = vmax.f32 %v6972_v29, %v6992_v9  ;;  %6897 = vst.msk [vmem:[#allocation4 + $0x68] sm:$0xff] %vm6883_vm6, %v6868_v39  ;;  %v6585_v27 = vadd.f32 %v13142_v5, %v6361_v32  ;;  %10611 = vmatmul.msk.bf16.gmra.mxu1 %vm6883_vm6, %v7415_v47  ;;  %v7122_v5 = vld [vmem:[#allocation5 + $0x21] sm:$0xff] }
 0x9e5   : > { %v7056_v10 = vmax.f32 %v7014_v13, %v7034_v4  ;;  %v6809_v35 = vadd.f32 %v13145_v30, %v6585_v27 }
 0x9e7   : > { %7086 = vst.msk [vmem:[#allocation5 + $0x2c] sm:$0xff] %vm6883_vm6, %v7056_v10  ;;  %v6841_v42 = vadd.f32 %v13016_v58, %v6809_v35  ;;  %v6546_v53 = vpop.f32.mrf.mxu2 }
 0x9e8   : > { %v6314_v50 = vpop.f32.mrf.mxu1  ;;  %v6770_v11 = vpop.f32.mrf.mxu3 }
 0x9e9   : > { %v6869_v14 = vmax.f32 %v6841_v42, 0.0  ;;  %v6362_v59 = vadd.f32 %v6314_v50, %v12927_v37 }
 0x9ea   : > { %v6924_v45 = vld [vmem:[#allocation4 + $0x60] ss:$2 sm:$0xff]  ;;  %v6952_v17 = vld [vmem:[#allocation4 + $0x61] ss:$2 sm:$0xff] }
 0x9eb   : > { %6898 = vst.msk [vmem:[#allocation4 + $0x70] sm:$0xff] %vm6883_vm6, %v6869_v14  ;;  %v6586_v63 = vadd.f32 %v6538_v56, %v6362_v59  ;;  %v6973_v38 = vmax.f32 %v6924_v45, %v6952_v17 }
 0x9ed   : > { %v6810_v33 = vadd.f32 %v6762_v1, %v6586_v63 }
 0x9ee   : > { %v7123_v36 = vld [vmem:[#allocation5 + $0x29] sm:$0xff] }
 0x9ef   : > { %v7294_v30 = vld [vmem:[#allocation5 + $0x2a] sm:$0xff]  ;;  %v6842_v20 = vadd.f32 %v13016_v58, %v6810_v33  ;;  %v7134_v8 = vpack.c.bf16 %v7123_v36, %v7122_v5  ;;  %v6548_v47 = vpop.f32.mrf.mxu2 }
 0x9f0   : > { %v7405_v7 = vld [vmem:[#allocation5 + $0x2b] sm:$0xff]  ;;  %v7305_v31 = vpack.c.bf16 %v7294_v30, %v7293_v21  ;;  %v6317_v46 = vpop.f32.mrf.mxu1  ;;  %v6772_v13 = vpop.f32.mrf.mxu3 }
 0x9f1   : > { %v6870_v37 = vmax.f32 %v6842_v20, 0.0  ;;  %v6363_v51 = vadd.f32 %v6317_v46, %v12934_v62  ;;  %10575 = vmatmul.msk.bf16.gmra.mxu2 %vm6883_vm6, %v7134_v8  ;;  %v7416_v56 = vpack.c.bf16 %v7405_v7, %v7404_v49  ;;  %v13199_v50 = vld [vmem:[#allocation5 + $0x28] sm:$0xff] }
 0x9f2   : > { %10599 = vmatmul.msk.bf16.gmra.mxu3 %vm6883_vm6, %v7305_v31  ;;  %v6994_v1 = vld [vmem:[#allocation4 + $0x62] ss:$2 sm:$0xff]  ;;  %v7036_v40 = vld [vmem:[#allocation4 + $0x63] ss:$2 sm:$0xff] }
 0x9f3   : > { %v7015_v15 = vmax.f32 %v6973_v38, %v6994_v1  ;;  %6899 = vst.msk [vmem:[#allocation4 + $0x78] sm:$0xff] %vm6883_vm6, %v6870_v37  ;;  %v6587_v18 = vadd.f32 %v6541_v61, %v6363_v51  ;;  %10612 = vmatmul.msk.bf16.gmra.mxu1 %vm6883_vm6, %v7416_v56  ;;  %v10582_v61 = vld [vmem:[%s14185_s5] sm:$0xf] }
 0x9f5   : > { %v7057_v6 = vmax.f32 %v7015_v15, %v7036_v40  ;;  %v6811_v28 = vadd.f32 %v6765_v52, %v6587_v18  ;;  %v11247_v52 = vld [vmem:[%s14185_s5] sm:$0x30] }
 0x9f6   : > { %v10583_v27 = vor.u32 %v11247_v52, %v10582_v61 }
 0x9f7   : > { %7087 = vst.msk [vmem:[#allocation5 + $0x34] sm:$0xff] %vm6883_vm6, %v7057_v6  ;;  %v6843_v62 = vadd.f32 %v13016_v58, %v6811_v28  ;;  %v6551_v36 = vpop.f32.mrf.mxu2 }
 0x9f8   : > { %v6319_v29 = vpop.f32.mrf.mxu1  ;;  %v7243_v42 = vsel %vm7168_vm5, %v10583_v27, 0  ;;  %v6775_v20 = vpop.f32.mrf.mxu3 }
 0x9f9   : > { %v6871_v39 = vmax.f32 %v6843_v62, 0.0  ;;  %v6364_v32 = vadd.f32 %v6319_v29, %v12937_v55  ;;  %7252 = vmatpush.bf16.msrb.mxu2 %v7243_v42 }
 0x9fa   : > { %v6926_v10 = vld [vmem:[#allocation4 + $0x70] ss:$2 sm:$0xff]  ;;  %v6954_v35 = vld [vmem:[#allocation4 + $0x71] ss:$2 sm:$0xff] }
 0x9fb   : > { %6900 = vst.msk [vmem:[#allocation4 + $0x80] sm:$0xff] %vm6883_vm6, %v6871_v39  ;;  %v6588_v9 = vadd.f32 %v6543_v24, %v6364_v32  ;;  %v6974_v63 = vmax.f32 %v6926_v10, %v6954_v35 }
 0x9fd   : > { %v6812_v4 = vadd.f32 %v6767_v0, %v6588_v9 }
 0x9fe   : > { %v13201_v24 = vld [vmem:[#allocation5 + $0x30] sm:$0xff] }
 0x9ff   : > { %v6844_v55 = vadd.f32 %v13016_v58, %v6812_v4  ;;  %v7971_v59 = vpack.c.bf16 %v13201_v24, %v13199_v50  ;;  %v7124_v38 = vld [vmem:[#allocation5 + $0x31] sm:$0xff]  ;;  %v6553_v15 = vpop.f32.mrf.mxu2 }
 0xa00   : > { %v6322_v14 = vpop.f32.mrf.mxu1  ;;  %v7295_v37 = vld [vmem:[#allocation5 + $0x32] sm:$0xff]  ;;  %v6777_v39 = vpop.f32.mrf.mxu3 }
 0xa01   : > { %v6872_v5 = vmax.f32 %v6844_v55, 0.0  ;;  %v6365_v45 = vadd.f32 %v6322_v14, %v12943_v44  ;;  %v7406_v1 = vld [vmem:[#allocation5 + $0x33] sm:$0xff] }
 0xa02   : > { %v6996_v0 = vld [vmem:[#allocation4 + $0x72] ss:$2 sm:$0xff]  ;;  %v7038_v21 = vld [vmem:[#allocation4 + $0x73] ss:$2 sm:$0xff] }
 0xa03   : > { %v7016_v17 = vmax.f32 %v6974_v63, %v6996_v0  ;;  %6901 = vst.msk [vmem:[#allocation4 + $0x88] sm:$0xff] %vm6883_vm6, %v6872_v5  ;;  %v6589_v33 = vadd.f32 %v6546_v53, %v6365_v45 }
 0xa05   : > { %v7058_v30 = vmax.f32 %v7016_v17, %v7038_v21  ;;  %v6813_v7 = vadd.f32 %v6770_v11, %v6589_v33 }
 0xa07   : > { %7088 = vst.msk [vmem:[#allocation5 + $0x3c] sm:$0xff] %vm6883_vm6, %v7058_v30  ;;  %v6845_v8 = vadd.f32 %v13016_v58, %v6813_v7  ;;  %v6556_v42 = vpop.f32.mrf.mxu2 }
 0xa08   : > { %v6324_v31 = vpop.f32.mrf.mxu1  ;;  %v6780_v63 = vpop.f32.mrf.mxu3 }
 0xa09   : > { %v6873_v46 = vmax.f32 %v6845_v8, 0.0  ;;  %v6366_v49 = vadd.f32 %v6324_v31, %v12946_v26 }
 0xa0a   : > { %v6928_v51 = vld [vmem:[#allocation4 + $0x80] ss:$2 sm:$0xff]  ;;  %v6956_v53 = vld [vmem:[#allocation4 + $0x81] ss:$2 sm:$0xff] }
 0xa0b   : > { %6902 = vst.msk [vmem:[#allocation4 + $0x90] sm:$0xff] %vm6883_vm6, %v6873_v46  ;;  %v6590_v44 = vadd.f32 %v6548_v47, %v6366_v49  ;;  %v6975_v32 = vmax.f32 %v6928_v51, %v6956_v53 }
 0xa0d   : > { %v6814_v56 = vadd.f32 %v6772_v13, %v6590_v44 }
 0xa0e   : > { %v7125_v11 = vld [vmem:[#allocation5 + $0x39] sm:$0xff] }
 0xa0f   : > { %v7296_v18 = vld [vmem:[#allocation5 + $0x3a] sm:$0xff]  ;;  %v6846_v6 = vadd.f32 %v13016_v58, %v6814_v56  ;;  %v7135_v28 = vpack.c.bf16 %v7125_v11, %v7124_v38  ;;  %v6558_v31 = vpop.f32.mrf.mxu2 }
 0xa10   : > { %v7407_v40 = vld [vmem:[#allocation5 + $0x3b] sm:$0xff]  ;;  %v7306_v62 = vpack.c.bf16 %v7296_v18, %v7295_v37  ;;  %v6327_v26 = vpop.f32.mrf.mxu1  ;;  %v6782_v38 = vpop.f32.mrf.mxu3 }
 0xa11   : > { %v7417_v29 = vpack.c.bf16 %v7407_v40, %v7406_v1  ;;  %v6874_v9 = vmax.f32 %v6846_v6, 0.0  ;;  %v6367_v47 = vadd.f32 %v6327_v26, %v12952_v25  ;;  %10576 = vmatmul.msk.bf16.gmra.mxu2 %vm6883_vm6, %v7135_v28  ;;  %v13222_v21 = vld [vmem:[#allocation5 + $0x38] sm:$0xff] }
 0xa12   : > { %10600 = vmatmul.msk.bf16.gmra.mxu3 %vm6883_vm6, %v7306_v62  ;;  %v6998_v61 = vld [vmem:[#allocation4 + $0x82] ss:$2 sm:$0xff]  ;;  %v7040_v27 = vld [vmem:[#allocation4 + $0x83] ss:$2 sm:$0xff] }
 0xa13   : > { %10613 = vmatmul.msk.bf16.gmra.mxu1 %vm6883_vm6, %v7417_v29  ;;  %v7017_v52 = vmax.f32 %v6975_v32, %v6998_v61  ;;  %6903 = vst.msk [vmem:[#allocation4 + $0x98] sm:$0xff] %vm6883_vm6, %v6874_v9  ;;  %v6591_v13 = vadd.f32 %v6551_v36, %v6367_v47 }
 0xa15   : > { %v7059_v4 = vmax.f32 %v7017_v52, %v7040_v27  ;;  %v6815_v10 = vadd.f32 %v6775_v20, %v6591_v13 }
 0xa17   : > { %7089 = vst.msk [vmem:[#allocation5 + $0x44] sm:$0xff] %vm6883_vm6, %v7059_v4  ;;  %v6847_v35 = vadd.f32 %v13016_v58, %v6815_v10  ;;  %v6561_v18 = vpop.f32.mrf.mxu2 }
 0xa18   : > { %v6329_v25 = vpop.f32.mrf.mxu1  ;;  %v6785_v26 = vpop.f32.mrf.mxu3 }
 0xa19   : > { %v6875_v55 = vmax.f32 %v6847_v35, 0.0  ;;  %v6368_v14 = vadd.f32 %v6329_v25, %v12955_v43 }
 0xa1a   : > { %v6930_v0 = vld [vmem:[#allocation4 + $0x90] ss:$2 sm:$0xff]  ;;  %v6958_v17 = vld [vmem:[#allocation4 + $0x91] ss:$2 sm:$0xff] }
 0xa1b   : > { %6904 = vst.msk [vmem:[#allocation4 + $0xa0] sm:$0xff] %vm6883_vm6, %v6875_v55  ;;  %v6592_v5 = vadd.f32 %v6553_v15, %v6368_v14  ;;  %v6976_v20 = vmax.f32 %v6930_v0, %v6958_v17 }
 0xa1d   : > { %v6816_v45 = vadd.f32 %v6777_v39, %v6592_v5 }
 0xa1e   : > { %v13224_v36 = vld [vmem:[#allocation5 + $0x40] sm:$0xff] }
 0xa1f   : > { %v6848_v33 = vadd.f32 %v13016_v58, %v6816_v45  ;;  %v7972_v7 = vpack.c.bf16 %v13224_v36, %v13222_v21  ;;  %v7126_v40 = vld [vmem:[#allocation5 + $0x41] sm:$0xff]  ;;  %v6563_v45 = vpop.f32.mrf.mxu2 }
 0xa20   : > { %v6332_v30 = vpop.f32.mrf.mxu1  ;;  %v7297_v6 = vld [vmem:[#allocation5 + $0x42] sm:$0xff] }
 0xa21   : > { %v6876_v8 = vmax.f32 %v6848_v33, 0.0  ;;  %v6369_v43 = vadd.f32 %v6332_v30, %v12961_v54  ;;  %v7408_v39 = vld [vmem:[#allocation5 + $0x43] sm:$0xff] }
 0xa22   : > { %v7000_v46 = vld [vmem:[#allocation4 + $0x92] ss:$2 sm:$0xff]  ;;  %v7042_v37 = vld [vmem:[#allocation4 + $0x93] ss:$2 sm:$0xff] }
 0xa23   : > { %v7018_v49 = vmax.f32 %v6976_v20, %v7000_v46  ;;  %6905 = vst.msk [vmem:[#allocation4 + $0xa8] sm:$0xff] %vm6883_vm6, %v6876_v8  ;;  %v6593_v44 = vadd.f32 %v6556_v42, %v6369_v43 }
 0xa25   : > { %v7060_v51 = vmax.f32 %v7018_v49, %v7042_v37  ;;  %v6817_v53 = vadd.f32 %v6780_v63, %v6593_v44 }
 0xa27   : > { %7090 = vst.msk [vmem:[#allocation5 + $0x4c] sm:$0xff] %vm6883_vm6, %v7060_v51  ;;  %v6849_v56 = vadd.f32 %v13016_v58, %v6817_v53 }
 0xa28   : > { %v6334_v1 = vpop.f32.mrf.mxu1 }
 0xa29   : > { %v6877_v15 = vmax.f32 %v6849_v56, 0.0  ;;  %v6370_v11 = vadd.f32 %v6334_v1, %v12964_v60 }
 0xa2a   : > { %v6932_v28 = vld [vmem:[#allocation4 + $0xa0] ss:$2 sm:$0xff]  ;;  %v6960_v62 = vld [vmem:[#allocation4 + $0xa1] ss:$2 sm:$0xff] }
 0xa2b   : > { %6906 = vst.msk [vmem:[#allocation4 + $0xb0] sm:$0xff] %vm6883_vm6, %v6877_v15  ;;  %v6594_v54 = vadd.f32 %v6558_v31, %v6370_v11  ;;  %v6977_v4 = vmax.f32 %v6932_v28, %v6960_v62 }
 0xa2d   : > { %v6818_v29 = vadd.f32 %v6782_v38, %v6594_v54  ;;  %v6566_v38 = vpop.f32.mrf.mxu2 }
 0xa2e   : > { %v7127_v32 = vld [vmem:[#allocation5 + $0x49] sm:$0xff] }
 0xa2f   : > { %v7298_v9 = vld [vmem:[#allocation5 + $0x4a] sm:$0xff]  ;;  %v6850_v61 = vadd.f32 %v13016_v58, %v6818_v29  ;;  %v7136_v52 = vpack.c.bf16 %v7127_v32, %v7126_v40 }
 0xa30   : > { %v7409_v47 = vld [vmem:[#allocation5 + $0x4b] sm:$0xff]  ;;  %v7307_v13 = vpack.c.bf16 %v7298_v9, %v7297_v6  ;;  %v6337_v60 = vpop.f32.mrf.mxu1 }
 0xa31   : > { %v7418_v27 = vpack.c.bf16 %v7409_v47, %v7408_v39  ;;  %v6878_v10 = vmax.f32 %v6850_v61, 0.0  ;;  %v6371_v35 = vadd.f32 %v6337_v60, %v12970_v34  ;;  %10577 = vmatmul.msk.bf16.gmra.mxu2 %vm6883_vm6, %v7136_v52  ;;  %v6787_v34 = vpop.f32.mrf.mxu3  ;;  %v13245_v49 = vld [vmem:[#allocation5 + $0x48] sm:$0xff] }
 0xa32   : > { %10601 = vmatmul.msk.bf16.gmra.mxu3 %vm6883_vm6, %v7307_v13  ;;  %v7002_v42 = vld [vmem:[#allocation4 + $0xa2] ss:$2 sm:$0xff]  ;;  %v7044_v14 = vld [vmem:[#allocation4 + $0xa3] ss:$2 sm:$0xff] }
 0xa33   : > { %10614 = vmatmul.msk.bf16.gmra.mxu1 %vm6883_vm6, %v7418_v27  ;;  %v7019_v25 = vmax.f32 %v6977_v4, %v7002_v42  ;;  %6907 = vst.msk [vmem:[#allocation4 + $0xb8] sm:$0xff] %vm6883_vm6, %v6878_v10  ;;  %v6595_v55 = vadd.f32 %v6561_v18, %v6371_v35 }
 0xa35   : > { %v7061_v63 = vmax.f32 %v7019_v25, %v7044_v14  ;;  %v6819_v5 = vadd.f32 %v6785_v26, %v6595_v55 }
 0xa37   : > { %7091 = vst.msk [vmem:[#allocation5 + $0x54] sm:$0xff] %vm6883_vm6, %v7061_v63  ;;  %v6851_v0 = vadd.f32 %v13016_v58, %v6819_v5 }
 0xa38   : > { %v6339_v17 = vpop.f32.mrf.mxu1 }
 0xa39   : > { %v6879_v33 = vmax.f32 %v6851_v0, 0.0  ;;  %v6372_v30 = vadd.f32 %v6339_v17, %v12981_v19  ;;  %v6790_v1 = vpop.f32.mrf.mxu3  ;;  %v10647_v17 = vld [vmem:[%s14185_s5 + $0x30] sm:$0xf] }
 0xa3a   : > { %v6934_v43 = vld [vmem:[#allocation4 + $0xb0] ss:$2 sm:$0xff]  ;;  %v6962_v31 = vld [vmem:[#allocation4 + $0xb1] ss:$2 sm:$0xff] }
 0xa3b   : > { %6908 = vst.msk [vmem:[#allocation4 + $0xc0] sm:$0xff] %vm6883_vm6, %v6879_v33  ;;  %v6596_v20 = vadd.f32 %v6563_v45, %v6372_v30  ;;  %v6978_v53 = vmax.f32 %v6934_v43, %v6962_v31  ;;  %v11253_v30 = vld [vmem:[%s14185_s5 + $0x30] sm:$0x30] }
 0xa3c   : > { %v10648_v43 = vor.u32 %v11253_v30, %v10647_v17  ;;  %v7738_v17 = vld [vmem:[#allocation5 + $0x2e] sm:$0xff]  ;;  %v7111_v30 = vpack.c.bf16 %v13199_v50, %v13168_v41 }
 0xa3d   : > { %v6820_v8 = vadd.f32 %v6787_v34, %v6596_v20  ;;  %v11252_v34 = vld [vmem:[%s14185_s5 + $0x28] sm:$0x30] }
 0xa3e   : > { %v13247_v44 = vld [vmem:[#allocation5 + $0x50] sm:$0xff] }
 0xa3f   : > { %v6852_v46 = vadd.f32 %v13016_v58, %v6820_v8  ;;  %v7973_v51 = vpack.c.bf16 %v13247_v44, %v13245_v49  ;;  %v7128_v9 = vld [vmem:[#allocation5 + $0x51] sm:$0xff] }
 0xa40   : > { %v6342_v37 = vpop.f32.mrf.mxu1  ;;  %v7299_v47 = vld [vmem:[#allocation5 + $0x52] sm:$0xff] }
 0xa41   : > { %v6880_v56 = vmax.f32 %v6852_v46, 0.0  ;;  %v6373_v19 = vadd.f32 %v6342_v37, %v13003_v16  ;;  %v6568_v16 = vpop.f32.mrf.mxu2  ;;  %v6792_v32 = vpop.f32.mrf.mxu3  ;;  %v7410_v27 = vld [vmem:[#allocation5 + $0x53] sm:$0xff]  ;;  %v7784_v37 = vsel %vm7168_vm5, %v10648_v43, 0 }
 0xa42   : > { %v7004_v15 = vld [vmem:[#allocation4 + $0xb2] ss:$2 sm:$0xff]  ;;  %v7046_v18 = vld [vmem:[#allocation4 + $0xb3] ss:$2 sm:$0xff]  ;;  %7793 = vmatpush.bf16.msrb.mxu1 %v7784_v37 }
 0xa43   : > { %v7020_v11 = vmax.f32 %v6978_v53, %v7004_v15  ;;  %6909 = vst.msk [vmem:[#allocation4 + $0xc8] sm:$0xff] %vm6883_vm6, %v6880_v56  ;;  %v6597_v54 = vadd.f32 %v6566_v38, %v6373_v19  ;;  %v10621_v53 = vld [vmem:[%s14185_s5 + $0x20] sm:$0xf]  ;;  %v11251_v56 = vld [vmem:[%s14185_s5 + $0x20] sm:$0x30]  ;;  %v7740_v37 = vld [vmem:[#allocation5 + $0x3e] sm:$0xff] }
 0xa45   : > { %v7062_v40 = vmax.f32 %v7020_v11, %v7046_v18  ;;  %v6821_v6 = vadd.f32 %v6790_v1, %v6597_v54  ;;  %v10622_v1 = vor.u32 %v11251_v56, %v10621_v53  ;;  %v7628_v53 = vld [vmem:[#allocation5 + $0x35] sm:$0xff]  ;;  %v7112_v56 = vpack.c.bf16 %v13222_v21, %v13201_v24 }
 0xa47   : > { %7092 = vst.msk [vmem:[#allocation5 + $0x5c] sm:$0xff] %vm6883_vm6, %v7062_v40  ;;  %v6853_v28 = vadd.f32 %v13016_v58, %v6821_v6  ;;  %v7562_v54 = vsel %vm7168_vm5, %v10622_v1, 0  ;;  %v7739_v1 = vld [vmem:[#allocation5 + $0x36] sm:$0xff] }
 0xa48   : > { %v6344_v62 = vpop.f32.mrf.mxu1  ;;  %7571 = vmatpush.bf16.msra.mxu2 %v7562_v54 }
 0xa49   : > { %v6881_v29 = vmax.f32 %v6853_v28, 0.0  ;;  %v6374_v39 = vadd.f32 %v6344_v62, %v13010_v57 }
 0xa4a   : > { %v6936_v61 = vld [vmem:[#allocation4 + $0xc0] ss:$2 sm:$0xff]  ;;  %v6964_v52 = vld [vmem:[#allocation4 + $0xc1] ss:$2 sm:$0xff] }
 0xa4b   : > { %6910 = vst.msk [vmem:[#allocation4 + $0xd0] sm:$0xff] %vm6883_vm6, %v6881_v29  ;;  %v6598_v26 = vadd.f32 %v6568_v16, %v6374_v39  ;;  %v6979_v55 = vmax.f32 %v6936_v61, %v6964_v52  ;;  %v7623_v61 = vld [vmem:[#allocation5 + $0xd] sm:$0xff] }
 0xa4c   : > { %v7734_v52 = vld [vmem:[#allocation5 + $0xe] sm:$0xff] }
 0xa4d   : > { %v6822_v13 = vadd.f32 %v6792_v32, %v6598_v26 }
 0xa4e   : > { %v7129_v60 = vld [vmem:[#allocation5 + $0x59] sm:$0xff] }
 0xa4f   : > { %v7300_v4 = vld [vmem:[#allocation5 + $0x5a] sm:$0xff]  ;;  %v6854_v35 = vadd.f32 %v13016_v58, %v6822_v13  ;;  %v7137_v57 = vpack.c.bf16 %v7129_v60, %v7128_v9  ;;  %v10634_v58 = vld [vmem:[%s14185_s5 + $0x28] sm:$0xf] }
 0xa50   : > { %v7411_v10 = vld [vmem:[#allocation5 + $0x5b] sm:$0xff]  ;;  %v7308_v42 = vpack.c.bf16 %v7300_v4, %v7299_v47  ;;  %v10635_v33 = vor.u32 %v11252_v34, %v10634_v58  ;;  %v7627_v34 = vld [vmem:[#allocation5 + $0x2d] sm:$0xff] }
 0xa51   : > { %v7419_v25 = vpack.c.bf16 %v7411_v10, %v7410_v27  ;;  %v6882_v14 = vmax.f32 %v6854_v35, 0.0  ;;  %10578 = vmatmul.msk.bf16.gmra.mxu2 %vm6883_vm6, %v7137_v57  ;;  %v13286_v18 = vld [vmem:[#allocation5 + $0x58] sm:$0xff]  ;;  %v7095_v13 = vld [vmem:[#allocation5] sm:$0xff]  ;;  %v13300_v57 = vpop.f32.mrf.mxu2 }
 0xa52   : > { %10602 = vmatmul.msk.bf16.gmra.mxu3 %vm6883_vm6, %v7308_v42  ;;  %v7006_v63 = vld [vmem:[#allocation4 + $0xc2] ss:$2 sm:$0xff]  ;;  %v7048_v45 = vld [vmem:[#allocation4 + $0xc3] ss:$2 sm:$0xff]  ;;  %v7673_v38 = vsel %vm7168_vm5, %v10635_v33, 0  ;;  %v7109_v60 = vpack.c.bf16 %v13121_v48, %v7095_v13 }
 0xa53   : > { %10615 = vmatmul.msk.bf16.gmra.mxu1 %vm6883_vm6, %v7419_v25  ;;  %v7021_v5 = vmax.f32 %v6979_v55, %v7006_v63  ;;  %6911 = vst.msk [vmem:[#allocation4 + $0xd8] sm:$0xff] %vm6883_vm6, %v6882_v14  ;;  %7682 = vmatpush.bf16.msrb.mxu3 %v7673_v38  ;;  %v7622_v27 = vld [vmem:[#allocation5 + $0x5] sm:$0xff]  ;;  %v7625_v42 = vld [vmem:[#allocation5 + $0x1d] sm:$0xff]  ;;  %v7624_v55 = vld [vmem:[#allocation5 + $0x15] sm:$0xff]  ;;  %v7110_v14 = vpack.c.bf16 %v13166_v23, %v13123_v22 }
 0xa54   : > { %v7636_v4 = vpack.c.bf16 %v7623_v61, %v7622_v27  ;;  %v7733_v10 = vld [vmem:[#allocation5 + $0x6] sm:$0xff]  ;;  %v7736_v25 = vld [vmem:[#allocation5 + $0x1e] sm:$0xff]  ;;  %v7637_v63 = vpack.c.bf16 %v7625_v42, %v7624_v55  ;;  %v13338_v61 = vpop.f32.mrf.mxu1  ;;  %v7114_v42 = vpack.c.bf16 %v13286_v18, %v13247_v44  ;;  %v7743_v55 = vld [vmem:[#allocation5 + $0x56] sm:$0xff] }
 0xa55   : > { %v7063_v0 = vmax.f32 %v7021_v5, %v7048_v45  ;;  %v7747_v35 = vpack.c.bf16 %v7734_v52, %v7733_v10  ;;  %v7735_v5 = vld [vmem:[#allocation5 + $0x16] sm:$0xff]  ;;  %v7626_v33 = vld [vmem:[#allocation5 + $0x25] sm:$0xff] }
 0xa56   : > { %v7748_v45 = vpack.c.bf16 %v7736_v25, %v7735_v5  ;;  %v7629_v38 = vld [vmem:[#allocation5 + $0x3d] sm:$0xff]  ;;  %v7632_v10 = vld [vmem:[#allocation5 + $0x55] sm:$0xff] }
 0xa57   : > { %7093 = vst.msk [vmem:[#allocation5 + $0x64] sm:$0xff] %vm6883_vm6, %v7063_v0 }
 0xa59   : > { %v13306_v0 = vpop.f32.mrf.mxu2 }
 0xa5a   : > { %v6938_v20 = vld [vmem:[#allocation4 + $0xd0] ss:$2 sm:$0x7f]  ;;  %v6966_v8 = vld [vmem:[#allocation4 + $0xd1] ss:$2 sm:$0x7f] }
 0xa5b   : > { %v6980_v31 = vmax.f32 %v6938_v20, %v6966_v8  ;;  %v7008_v46 = vld [vmem:[#allocation4 + $0xd2] ss:$2 sm:$0x7f]  ;;  %v7050_v15 = vld [vmem:[#allocation4 + $0xd3] ss:$2 sm:$0x7f]  ;;  %v7638_v20 = vpack.c.bf16 %v7627_v34, %v7626_v33 }
 0xa5c   : > { %v7737_v8 = vld [vmem:[#allocation5 + $0x26] sm:$0xff]  ;;  %v11254_v33 = vld [vmem:[%s14185_s5 + $0x38] sm:$0x30] }
 0xa5d   : > { %v7022_v19 = vmax.f32 %v6980_v31, %v7008_v46  ;;  %v7749_v43 = vpack.c.bf16 %v7738_v17, %v7737_v8  ;;  %v10660_v17 = vld [vmem:[%s14185_s5 + $0x38] sm:$0xf] }
 0xa5e   : > { %v13288_v40 = vld [vmem:[#allocation5 + $0x60] sm:$0xff] }
 0xa5f   : > { %v7064_v11 = vmax.f32 %v7022_v19, %v7050_v15  ;;  %v7974_v6 = vpack.c.bf16 %v13288_v40, %v13286_v18  ;;  %v7130_v28 = vld [vmem:[#allocation5 + $0x61] sm:$0xff]  ;;  %v7639_v19 = vpack.c.bf16 %v7629_v38, %v7628_v53  ;;  %v7750_v15 = vpack.c.bf16 %v7740_v37, %v7739_v1 }
 0xa60   : > { %v7301_v62 = vld [vmem:[#allocation5 + $0x62] sm:$0xff] }
 0xa61   : > { %7094 = vst.msk [vmem:[#allocation5 + $0x6c] sm:$0x7f] %vm7079_vm7, %v7064_v11  ;;  %v7412_v29 = vld [vmem:[#allocation5 + $0x63] sm:$0xff]  ;;  %v13309_v58 = vpop.f32.mrf.mxu2  ;;  %v13325_v11 = vpop.f32.mrf.mxu3 }
 0xa62   : > { %v7633_v27 = vld [vmem:[#allocation5 + $0x5d] sm:$0xff] }
 0xa63   : > { %v7641_v25 = vpack.c.bf16 %v7633_v27, %v7632_v10  ;;  %v7511_v10 = vld [vmem:[#allocation5 + $0x4] sm:$0xff] }
 0xa68   : > { %v7131_v39 = vld [vmem:[#allocation5 + $0x69] sm:$0x7f] }
 0xa69   : > { %v7302_v16 = vld [vmem:[#allocation5 + $0x6a] sm:$0x7f]  ;;  %v7138_v32 = vpack.c.bf16 %v7131_v39, %v7130_v28  ;;  %v13316_v31 = vpop.f32.mrf.mxu2 }
 0xa6a   : > { %v7413_v26 = vld [vmem:[#allocation5 + $0x6b] sm:$0x7f]  ;;  %v7309_v9 = vpack.c.bf16 %v7302_v16, %v7301_v62  ;;  %v13329_v62 = vpop.f32.mrf.mxu3 }
 0xa6b   : > { %v7420_v47 = vpack.c.bf16 %v7413_v26, %v7412_v29  ;;  %10579 = vmatmul.msk.bf16.gmra.mxu2 %vm6883_vm6, %v7138_v32  ;;  %v7631_v28 = vld [vmem:[#allocation5 + $0x4d] sm:$0xff]  ;;  %v7630_v16 = vld [vmem:[#allocation5 + $0x45] sm:$0xff]  ;;  %v7113_v26 = vpack.c.bf16 %v13245_v49, %v13224_v36 }
 0xa6c   : > { %10603 = vmatmul.msk.bf16.gmra.mxu3 %vm6883_vm6, %v7309_v9  ;;  %v7742_v29 = vld [vmem:[#allocation5 + $0x4e] sm:$0xff]  ;;  %v7640_v32 = vpack.c.bf16 %v7631_v28, %v7630_v16  ;;  %v7741_v9 = vld [vmem:[#allocation5 + $0x46] sm:$0xff] }
 0xa6d   : > { %10616 = vmatmul.msk.bf16.gmra.mxu1 %vm6883_vm6, %v7420_v47  ;;  %v7751_v47 = vpack.c.bf16 %v7742_v29, %v7741_v9  ;;  %v7108_v53 = vld [vmem:[#allocation5 + $0x68] sm:$0x7f] }
 0xa6e   : > { %v7745_v1 = vld [vmem:[#allocation5 + $0x66] sm:$0xff]  ;;  %v7115_v28 = vpack.c.bf16 %v7108_v53, %v13288_v40 }
 0xa72   : > { %v13340_v52 = vpop.f32.mrf.mxu3 }
 0xa74   : > { %v13318_v46 = vpop.f32.mrf.mxu2 }
 0xa7b   : > { %10584 = vmatmul.msk.bf16.vlgmr.msrb.gmra.mxu2 %vm6883_vm6, %v7109_v60  ;;  %v7744_v60 = vld [vmem:[#allocation5 + $0x5e] sm:$0xff] }
 0xa7c   : > { %10636 = vmatmul.msk.bf16.vlgmr.msrb.gmra.mxu3 %vm6883_vm6, %v7636_v4  ;;  %v13327_v54 = vpop.f32.mrf.mxu2  ;;  %v13344_v4 = vpop.f32.mrf.mxu1 }
 0xa7d   : > { %10649 = vmatmul.msk.bf16.vlgmr.msrb.gmra.mxu1 %vm6883_vm6, %v7747_v35  ;;  %v13346_v35 = vpop.f32.mrf.mxu3 }
 0xa84   : > { %v13371_v38 = vpop.f32.mrf.mxu1 }
 0xa8b   : > { %10585 = vmatmul.msk.bf16.gmra.mxu2 %vm6883_vm6, %v7110_v14  ;;  %v10673_v14 = vld [vmem:[%s14185_s5 + $0x40] sm:$0xf] }
 0xa8c   : > { %10637 = vmatmul.msk.bf16.gmra.mxu3 %vm6883_vm6, %v7637_v63  ;;  %v11255_v63 = vld [vmem:[%s14185_s5 + $0x40] sm:$0x30]  ;;  %s593_s5 = sand.u32 1, %s11438_s30  }
 0xa8d   : > { %10650 = vmatmul.msk.bf16.gmra.mxu1 %vm6883_vm6, %v7748_v45  ;;  %v7752_v45 = vpack.c.bf16 %v7744_v60, %v7743_v55  ;;  %v10674_v34 = vor.u32 %v11255_v63, %v10673_v14  ;;  %v7512_v60 = vld [vmem:[#allocation5 + $0xc] sm:$0xff]  ;;  %s594_s20 = scalar_lea.vmem [#allocation15], %s593_s5  ;;  %s9751_s28 = scalar_lea.sflag [#allocation16], %s593_s5 }
 0xa8e   : > { %s9761_s25 = sshll.u32 %s594_s20, 4  ;;  %s9762_s25 = int_to_ptr.vmem [resolvable:$true] %s9761_s25 }
 0xa94   : > { %v13331_v39 = vpop.f32.mrf.mxu2 }
 0xa9b   : > { %10586 = vmatmul.msk.bf16.gmra.mxu2 %vm6883_vm6, %v7111_v30  ;;  %v8006_v30 = vsel %vm7168_vm5, %v10674_v34, 0  ;;  %v7513_v34 = vld [vmem:[#allocation5 + $0x14] sm:$0xff] }
 0xa9c   : > { %10638 = vmatmul.msk.bf16.gmra.mxu3 %vm6883_vm6, %v7638_v20  ;;  %v13342_v13 = vpop.f32.mrf.mxu2  ;;  %v10661_v20 = vor.u32 %v11254_v33, %v10660_v17  ;;  %v7516_v33 = vld [vmem:[#allocation5 + $0x2c] sm:$0xff] }
 0xa9d   : > { %10651 = vmatmul.msk.bf16.gmra.mxu1 %vm6883_vm6, %v7749_v43  ;;  %8015 = vmatpush.bf16.msra.mxu3 %v8006_v30  ;;  %v13369_v43 = vpop.f32.mrf.mxu3 }
 0xa9e   : > { %v7895_v8 = vsel %vm7168_vm5, %v10661_v20, 0  ;;  %v7515_v20 = vld [vmem:[#allocation5 + $0x24] sm:$0xff] }
 0xa9f   : > { %7904 = vmatpush.bf16.msrb.mxu2 %v7895_v8  ;;  %v7527_v8 = vpack.c.bf16 %v7516_v33, %v7515_v20  ;;  %v7523_v33 = vld [vmem:[#allocation5 + $0x64] sm:$0xff] }
 0xaab   : > { %10587 = vmatmul.msk.bf16.gmra.mxu2 %vm6883_vm6, %v7112_v56  ;;  %v7634_v56 = vld [vmem:[#allocation5 + $0x65] sm:$0xff] }
 0xaac   : > { %10639 = vmatmul.msk.bf16.gmra.mxu3 %vm6883_vm6, %v7639_v19  ;;  %v7635_v19 = vld [vmem:[#allocation5 + $0x6d] sm:$0x7f] }
 0xaad   : > { %10652 = vmatmul.msk.bf16.gmra.mxu1 %vm6883_vm6, %v7750_v15  ;;  %v7746_v15 = vld [vmem:[#allocation5 + $0x6e] sm:$0x7f]  ;;  %v7642_v29 = vpack.c.bf16 %v7635_v19, %v7634_v56 }
 0xaae   : > { %v7753_v16 = vpack.c.bf16 %v7746_v15, %v7745_v1  ;;  %v7517_v56 = vld [vmem:[#allocation5 + $0x34] sm:$0xff]  ;;  %v7520_v15 = vld [vmem:[#allocation5 + $0x4c] sm:$0xff] }
 0xab4   : > { %v13356_v5 = vpop.f32.mrf.mxu2 }
 0xabb   : > { %10588 = vmatmul.msk.bf16.gmra.mxu2 %vm6883_vm6, %v7113_v26  ;;  %v13376_v26 = vpop.f32.mrf.mxu3 }
 0xabc   : > { %10640 = vmatmul.msk.bf16.gmra.mxu3 %vm6883_vm6, %v7640_v32  ;;  %v13373_v37 = vpop.f32.mrf.mxu2  ;;  %v13380_v32 = vpop.f32.mrf.mxu1 }
 0xabd   : > { %10653 = vmatmul.msk.bf16.gmra.mxu1 %vm6883_vm6, %v7751_v47 }
 0xac3   : > { %v13385_v47 = vpop.f32.mrf.mxu3 }
 0xacb   : > { %10589 = vmatmul.msk.bf16.gmra.mxu2 %vm6883_vm6, %v7114_v42  ;;  %v7525_v42 = vpack.c.bf16 %v7512_v60, %v7511_v10  ;;  %v7521_v10 = vld [vmem:[#allocation5 + $0x54] sm:$0xff] }
 0xacc   : > { %10641 = vmatmul.msk.bf16.gmra.mxu3 %vm6883_vm6, %v7641_v25  ;;  %v13394_v25 = vpop.f32.mrf.mxu3 }
 0xacd   : > { %10654 = vmatmul.msk.bf16.gmra.mxu1 %vm6883_vm6, %v7752_v45  ;;  %v7514_v45 = vld [vmem:[#allocation5 + $0x1c] sm:$0xff] }
 0xace   : > { %v7526_v17 = vpack.c.bf16 %v7514_v45, %v7513_v34  ;;  %v7524_v45 = vld [vmem:[#allocation5 + $0x6c] sm:$0x7f] }
 0xacf   : > { %v7967_v34 = vld [vmem:[#allocation5 + $0x68] sm:$0xff]  ;;  %v7531_v20 = vpack.c.bf16 %v7524_v45, %v7523_v33  ;;  %v7846_v45 = vld [vmem:[#allocation5 + $0x17] sm:$0xff] }
 0xad4   : > { %v13382_v9 = vpop.f32.mrf.mxu2  ;;  %v13398_v14 = vpop.f32.mrf.mxu3 }
 0xadb   : > { %10590 = vmatmul.msk.bf16.gmra.mxu2 %vm6883_vm6, %v7115_v28  ;;  %v7519_v28 = vld [vmem:[#allocation5 + $0x44] sm:$0xff] }
 0xadc   : > { %10642 = vmatmul.msk.bf16.gmra.mxu3 %vm6883_vm6, %v7642_v29  ;;  %v13387_v27 = vpop.f32.mrf.mxu2  ;;  %v13407_v22 = vpop.f32.mrf.mxu3  ;;  %v7529_v29 = vpack.c.bf16 %v7520_v15, %v7519_v28 }
 0xadd   : > { %10655 = vmatmul.msk.bf16.gmra.mxu1 %vm6883_vm6, %v7753_v16 }
 0xae4   : > { %v13409_v30 = vpop.f32.mrf.mxu3 }
 0xaeb   : > { %10623 = vmatmul.msk.bf16.vlgmr.msra.gmra.mxu2 %vm6883_vm6, %v7525_v42 }
 0xaec   : > { %10675 = vmatmul.msk.bf16.vlgmr.msra.gmra.mxu3 %vm6883_vm6, %v7969_v3  ;;  %v13416_v23 = vpop.f32.mrf.mxu3 }
 0xaee   : > { %v13396_v55 = vpop.f32.mrf.mxu2 }
 0xaf4   : > { %v13420_v19 = vpop.f32.mrf.mxu3 }
 0xaf6   : > { %v13400_v63 = vpop.f32.mrf.mxu2 }
 0xafb   : > { %10624 = vmatmul.msk.bf16.gmra.mxu2 %vm6883_vm6, %v7526_v17  ;;  %v7968_v17 = vld [vmem:[#allocation5 + $0x70] sm:$0x7f] }
 0xafc   : > { %10676 = vmatmul.msk.bf16.gmra.mxu3 %vm6883_vm6, %v7970_v2  ;;  %v7518_v2 = vld [vmem:[#allocation5 + $0x3c] sm:$0xff]  ;;  %v13429_v24 = vpop.f32.mrf.mxu3 }
 0xafd   : > { %v7528_v1 = vpack.c.bf16 %v7518_v2, %v7517_v56  ;;  %v7844_v56 = vld [vmem:[#allocation5 + $0x7] sm:$0xff] }
 0xafe   : > { %v7254_v48 = vpop.f32.mrf.mxu2 }
 0xb04   : > { %v13438_v16 = vpop.f32.mrf.mxu3 }
 0xb06   : > { %v7256_v3 = vpop.f32.mrf.mxu2 }
 0xb0b   : > { %10625 = vmatmul.msk.bf16.gmra.mxu2 %vm6883_vm6, %v7527_v8  ;;  %v7975_v8 = vpack.c.bf16 %v7968_v17, %v7967_v34 }
 0xb0c   : > { %10677 = vmatmul.msk.bf16.gmra.mxu3 %vm6883_vm6, %v7971_v59  ;;  %v13444_v60 = vpop.f32.mrf.mxu3 }
 0xb0e   : > { %v7259_v53 = vpop.f32.mrf.mxu2 }
 0xb14   : > { %v13453_v44 = vpop.f32.mrf.mxu3 }
 0xb16   : > { %v13418_v41 = vpop.f32.mrf.mxu2 }
 0xb1b   : > { %10626 = vmatmul.msk.bf16.gmra.mxu2 %vm6883_vm6, %v7528_v1 }
 0xb1c   : > { %10678 = vmatmul.msk.bf16.gmra.mxu3 %vm6883_vm6, %v7972_v7  ;;  %v7522_v7 = vld [vmem:[#allocation5 + $0x5c] sm:$0xff]  ;;  %v13457_v2 = vpop.f32.mrf.mxu3 }
 0xb1d   : > { %v7530_v42 = vpack.c.bf16 %v7522_v7, %v7521_v10  ;;  %v7472_v7 = vpop.f32.mrf.mxu1 }
 0xb1e   : > { %v13427_v50 = vpop.f32.mrf.mxu2 }
 0xb24   : > { %v13468_v28 = vpop.f32.mrf.mxu3 }
 0xb26   : > { %v13431_v59 = vpop.f32.mrf.mxu2 }
 0xb2b   : > { %10627 = vmatmul.msk.bf16.gmra.mxu2 %vm6883_vm6, %v7529_v29  ;;  %v7255_v29 = vadd.f32 %v7254_v48, %v13300_v57  ;;  %v13481_v57 = vpop.f32.mrf.mxu1 }
 0xb2c   : > { %10679 = vmatmul.msk.bf16.gmra.mxu3 %vm6883_vm6, %v7973_v51  ;;  %v13475_v33 = vpop.f32.mrf.mxu3 }
 0xb2d   : > { %v7386_v34 = vadd.f32 %v13325_v11, %v7255_v29 }
 0xb2e   : > { %v13440_v21 = vpop.f32.mrf.mxu2 }
 0xb34   : > { %v13486_v29 = vpop.f32.mrf.mxu3 }
 0xb36   : > { %v13442_v36 = vpop.f32.mrf.mxu2 }
 0xb3b   : > { %10628 = vmatmul.msk.bf16.gmra.mxu2 %vm6883_vm6, %v7530_v42  ;;  %v7847_v42 = vld [vmem:[#allocation5 + $0x1f] sm:$0xff] }
 0xb3c   : > { %10680 = vmatmul.msk.bf16.gmra.mxu3 %vm6883_vm6, %v7974_v6  ;;  %v7845_v6 = vld [vmem:[#allocation5 + $0xf] sm:$0xff]  ;;  %v7859_v17 = vpack.c.bf16 %v7847_v42, %v7846_v45 }
 0xb3d   : > { %v7858_v1 = vpack.c.bf16 %v7845_v6, %v7844_v56  ;;  %v7849_v45 = vld [vmem:[#allocation5 + $0x2f] sm:$0xff] }
 0xb3e   : > { %v13451_v49 = vpop.f32.mrf.mxu2 }
 0xb46   : > { %v13455_v51 = vpop.f32.mrf.mxu2 }
 0xb4b   : > { %10629 = vmatmul.msk.bf16.gmra.mxu2 %vm6883_vm6, %v7531_v20  ;;  %v7257_v20 = vadd.f32 %v7256_v3, %v13306_v0  ;;  %v7477_v0 = vpop.f32.mrf.mxu1  ;;  %v7848_v3 = vld [vmem:[#allocation5 + $0x27] sm:$0xff] }
 0xb4c   : > { %10681 = vmatmul.msk.bf16.gmra.mxu3 %vm6883_vm6, %v7975_v8  ;;  %v7497_v8 = vadd.f32 %v13338_v61, %v7386_v34  ;;  %v7860_v34 = vpack.c.bf16 %v7849_v45, %v7848_v3 }
 0xb4d   : > { %v7387_v48 = vadd.f32 %v13329_v62, %v7257_v20  ;;  %v7262_v62 = vadd.f32 %v13418_v41, %v13316_v31  ;;  %v13497_v20 = vpop.f32.mrf.mxu3  ;;  %v7850_v31 = vld [vmem:[#allocation5 + $0x37] sm:$0xff] }
 0xb4e   : > { %v13461_v18 = vpop.f32.mrf.mxu2 }
 0xb4f   : > { %v7498_v11 = vadd.f32 %v13344_v4, %v7387_v48 }
 0xb55   : > { %v13508_v3 = vpop.f32.mrf.mxu3 }
 0xb56   : > { %v13463_v40 = vpop.f32.mrf.mxu2 }
 0xb5b   : > { %10662 = vmatmul.msk.bf16.vlgmr.msrb.gmra.mxu2 %vm6883_vm6, %v7858_v1  ;;  %v7260_v1 = vadd.f32 %v7259_v53, %v13309_v58 }
 0xb5d   : > { %v7388_v61 = vadd.f32 %v13340_v52, %v7260_v1  ;;  %v7265_v52 = vadd.f32 %v13427_v50, %v13318_v46  ;;  %v7270_v50 = vadd.f32 %v13440_v21, %v13331_v39 }
 0xb5e   : > { %v13466_v15 = vpop.f32.mrf.mxu2 }
 0xb5f   : > { %v7499_v58 = vadd.f32 %v13371_v38, %v7388_v61  ;;  %v7390_v38 = vadd.f32 %v13369_v43, %v7265_v52  ;;  %v7853_v43 = vld [vmem:[#allocation5 + $0x4f] sm:$0xff] }
 0xb66   : > { %v13471_v10 = vpop.f32.mrf.mxu2 }
 0xb6b   : > { %10663 = vmatmul.msk.bf16.gmra.mxu2 %vm6883_vm6, %v7859_v17 }
 0xb6e   : > { %v7573_v6 = vpop.f32.mrf.mxu2 }
 0xb6f   : > { %v13479_v56 = vadd.f32 %v7573_v6, %v7497_v8  ;;  %v7389_v8 = vadd.f32 %v13346_v35, %v7262_v62  ;;  %v13500_v6 = vpop.f32.mrf.mxu1  ;;  %v7501_v35 = vadd.f32 %v7472_v7, %v7390_v38  ;;  %v7855_v38 = vld [vmem:[#allocation5 + $0x5f] sm:$0xff] }
 0xb71   : > { %v7500_v48 = vadd.f32 %v13380_v32, %v7389_v8  ;;  %v13515_v32 = vpop.f32.mrf.mxu3 }
 0xb76   : > { %v7575_v42 = vpop.f32.mrf.mxu2 }
 0xb77   : > { %v13488_v17 = vadd.f32 %v7575_v42, %v7498_v11  ;;  %v7851_v11 = vld [vmem:[#allocation5 + $0x3f] sm:$0xff]  ;;  %v7482_v45 = vpop.f32.mrf.mxu1 }
 0xb78   : > { %v7861_v41 = vpack.c.bf16 %v7851_v11, %v7850_v31  ;;  %v7275_v31 = vadd.f32 %v13451_v49, %v13356_v5  ;;  %v11259_v5 = vld [vmem:[%s14188_s7 + $0x18] sm:$0xff] }
 0xb79   : > { %8289 = vmatpush.bf16.msrb.mxu3 %v11259_v5 }
 0xb7b   : > { %10664 = vmatmul.msk.bf16.gmra.mxu2 %vm6883_vm6, %v7860_v34 }
 0xb7e   : > { %v7578_v53 = vpop.f32.mrf.mxu2 }
 0xb7f   : > { %v13495_v4 = vadd.f32 %v7578_v53, %v7499_v58  ;;  %v13513_v46 = vpop.f32.mrf.mxu1  ;;  %v7852_v58 = vld [vmem:[#allocation5 + $0x47] sm:$0xff]  ;;  %v7392_v53 = vadd.f32 %v13385_v47, %v7270_v50  ;;  %v7854_v47 = vld [vmem:[#allocation5 + $0x57] sm:$0xff] }
 0xb80   : > { %v7862_v8 = vpack.c.bf16 %v7853_v43, %v7852_v58 }
 0xb81   : > { %v7503_v52 = vadd.f32 %v7477_v0, %v7392_v53  ;;  %v7280_v53 = vadd.f32 %v13461_v18, %v13382_v9  ;;  %v7285_v9 = vadd.f32 %v13466_v15, %v13396_v55 }
 0xb86   : > { %v7580_v1 = vpop.f32.mrf.mxu2 }
 0xb87   : > { %v13505_v42 = vadd.f32 %v7580_v1, %v7500_v48  ;;  %v7487_v7 = vpop.f32.mrf.mxu1  ;;  %v13523_v48 = vpop.f32.mrf.mxu3 }
 0xb8b   : > { %10665 = vmatmul.msk.bf16.gmra.mxu2 %vm6883_vm6, %v7861_v41 }
 0xb8e   : > { %v7583_v61 = vpop.f32.mrf.mxu2 }
 0xb8f   : > { %v13511_v34 = vadd.f32 %v7583_v61, %v7501_v35  ;;  %v13529_v39 = vpop.f32.mrf.mxu1  ;;  %v13533_v41 = vpop.f32.mrf.mxu3  ;;  %v7394_v35 = vadd.f32 %v13398_v14, %v7275_v31  ;;  %v7863_v61 = vpack.c.bf16 %v7855_v38, %v7854_v47  ;;  %v7856_v14 = vld [vmem:[#allocation5 + $0x67] sm:$0xff] }
 0xb91   : > { %v7505_v0 = vadd.f32 %v7482_v45, %v7394_v35  ;;  %v7396_v45 = vadd.f32 %v13409_v30, %v7280_v53  ;;  %v7398_v30 = vadd.f32 %v13420_v19, %v7285_v9  ;;  %v13584_v9 = vld [vmem:[%s14193_s6] ss:$0 sm:$0xff] }
 0xb93   : > { %v7507_v47 = vadd.f32 %v7487_v7, %v7396_v45 }
 0xb96   : > { %v13519_v62 = vpop.f32.mrf.mxu2 }
 0xb97   : > { %v7492_v50 = vpop.f32.mrf.mxu1  ;;  %v13542_v49 = vpop.f32.mrf.mxu3 }
 0xb98   : > { %14189 = vst [vmem:[#allocation21_spill] sm:$0xff] %v13542_v49  ;;  %v7509_v15 = vadd.f32 %v7492_v50, %v7398_v30  ;;  %v7720_v30 = vadd.f32 %v13444_v60, %v13488_v17 }
 0xb9b   : > { %10666 = vmatmul.msk.bf16.gmra.mxu2 %vm6883_vm6, %v7862_v8 }
 0xb9e   : > { %v7588_v1 = vpop.f32.mrf.mxu2 }
 0xb9f   : > { %v13525_v11 = vadd.f32 %v7588_v1, %v7503_v52  ;;  %v7857_v52 = vld [vmem:[#allocation5 + $0x6f] sm:$0x7f]  ;;  %v13548_v1 = vpop.f32.mrf.mxu1  ;;  %v13552_v38 = vpop.f32.mrf.mxu3 }
 0xba0   : > { %14190 = vst [vmem:[#allocation22_spill] sm:$0xff] %v13548_v1  ;;  %v7864_v31 = vpack.c.bf16 %v7857_v52, %v7856_v14  ;;  %v7719_v52 = vadd.f32 %v13438_v16, %v13479_v56 }
 0xba1   : > { %14191 = vst [vmem:[#allocation23_spill] sm:$0xff] %v13552_v38 }
 0xba6   : > { %v13531_v21 = vpop.f32.mrf.mxu2 }
 0xba7   : > { %v8017_v18 = vpop.f32.mrf.mxu3 }
 0xbab   : > { %10667 = vmatmul.msk.bf16.gmra.mxu2 %vm6883_vm6, %v7863_v61 }
 0xbae   : > { %v7593_v43 = vpop.f32.mrf.mxu2 }
 0xbaf   : > { %v13537_v58 = vadd.f32 %v7593_v43, %v7505_v0  ;;  %v7795_v0 = vpop.f32.mrf.mxu1  ;;  %v8019_v53 = vpop.f32.mrf.mxu3 }
 0xbb6   : > { %v13546_v8 = vpop.f32.mrf.mxu2 }
 0xbb7   : > { %v7797_v55 = vpop.f32.mrf.mxu1  ;;  %v8022_v45 = vpop.f32.mrf.mxu3 }
 0xbbb   : > { %10668 = vmatmul.msk.bf16.gmra.mxu2 %vm6883_vm6, %v7864_v31  ;;  %v7830_v31 = vadd.f32 %v7795_v0, %v7719_v52  ;;  %v7721_v0 = vadd.f32 %v13453_v44, %v13495_v4 }
 0xbbe   : > { %v7598_v35 = vpop.f32.mrf.mxu2 }
 0xbbf   : > { %v13554_v61 = vadd.f32 %v7598_v35, %v7507_v47  ;;  %v7800_v14 = vpop.f32.mrf.mxu1  ;;  %v8024_v12 = vpop.f32.mrf.mxu3 }
 0xbc0   : > { %v7832_v49 = vadd.f32 %v7800_v14, %v7721_v0 }
 0xbc6   : > { %v13558_v43 = vpop.f32.mrf.mxu2 }
 0xbc7   : > { %v7802_v50 = vpop.f32.mrf.mxu1  ;;  %v8027_v60 = vpop.f32.mrf.mxu3 }
 0xbce   : > { %v7603_v7 = vpop.f32.mrf.mxu2 }
 0xbcf   : > { %v13575_v5 = vadd.f32 %v7603_v7, %v7509_v15 }
 0xbd6   : > { %v13577_v19 = vpop.f32.mrf.mxu2 }
 0xbd7   : > { %14192 = vst [vmem:[#allocation24_spill] sm:$0xff] %v13577_v19  ;;  %v7831_v19 = vadd.f32 %v7797_v55, %v7720_v30  ;;  %v7722_v55 = vadd.f32 %v13457_v2, %v13505_v42  ;;  %v11257_v2 = vld [vmem:[%s14188_s7 + $0x8] sm:$0xff] }
 0xbd8   : > { %8341 = vmatpush.bf16.msra.mxu2 %v11257_v2 }
 0xbde   : > { %v7906_v47 = vpop.f32.mrf.mxu2 }
 0xbdf   : > { %v7941_v35 = vadd.f32 %v7906_v47, %v7830_v31  ;;  %v7805_v31 = vpop.f32.mrf.mxu1 }
 0xbe1   : > { %v8052_v15 = vadd.f32 %v8017_v18, %v7941_v35 }
 0xbe3   : > { %v8070_v7 = vadd.f32 %v13584_v9, %v8052_v15 }
 0xbe5   : > { %v8084_v38 = vmax.f32 %v8070_v7, 0.0 }
 0xbe6   : > { %v7908_v16 = vpop.f32.mrf.mxu2 }
 0xbe7   : > { %8099 = vst.msk [vmem:[#allocation6] sm:$0xff] %vm8098_vm8, %v8084_v38  ;;  %v7942_v56 = vadd.f32 %v7908_v16, %v7831_v19  ;;  %v7267_v38 = vadd.f32 %v13431_v59, %v13327_v54  ;;  %v7807_v4 = vpop.f32.mrf.mxu1  ;;  %v7833_v19 = vadd.f32 %v7802_v50, %v7722_v55  ;;  %v8029_v54 = vpop.f32.mrf.mxu3  ;;  %v7723_v59 = vadd.f32 %v13468_v28, %v13511_v34 }
 0xbe9   : > { %v8053_v52 = vadd.f32 %v8019_v53, %v7942_v56  ;;  %v7391_v14 = vadd.f32 %v13376_v26, %v7267_v38  ;;  %v7834_v0 = vadd.f32 %v7805_v31, %v7723_v59 }
 0xbeb   : > { %v8071_v47 = vadd.f32 %v13584_v9, %v8053_v52 }
 0xbed   : > { %v8085_v1 = vmax.f32 %v8071_v47, 0.0 }
 0xbee   : > { %v7911_v17 = vpop.f32.mrf.mxu2 }
 0xbef   : > { %8100 = vst.msk [vmem:[#allocation6 + $0x8] sm:$0xff] %vm8098_vm8, %v8085_v1  ;;  %v7943_v18 = vadd.f32 %v7911_v17, %v7832_v49  ;;  %v11258_v49 = vld [vmem:[%s14188_s7 + $0x10] sm:$0xff]  ;;  %v7810_v52 = vpop.f32.mrf.mxu1 }
 0xbf0   : > { %8290 = vmatpush.bf16.msrb.mxu3 %v11258_v49 }
 0xbf1   : > { %v8054_v35 = vadd.f32 %v8022_v45, %v7943_v18  ;;  %v7502_v45 = vadd.f32 %v13481_v57, %v7391_v14  ;;  %v8032_v57 = vpop.f32.mrf.mxu3 }
 0xbf3   : > { %v8072_v44 = vadd.f32 %v13584_v9, %v8054_v35  ;;  %v7613_v7 = vadd.f32 %v13519_v62, %v7502_v45  ;;  %v7272_v62 = vadd.f32 %v13442_v36, %v13342_v13  ;;  %v11256_v13 = vld [vmem:[%s14188_s7] sm:$0xff] }
 0xbf4   : > { %8342 = vmatpush.bf16.msra.mxu2 %v11256_v13 }
 0xbf5   : > { %v8086_v53 = vmax.f32 %v8072_v44, 0.0  ;;  %v7724_v34 = vadd.f32 %v13475_v33, %v7613_v7  ;;  %v7393_v14 = vadd.f32 %v13394_v25, %v7272_v62  ;;  %v11262_v25 = vld [vmem:[%s14188_s7 + $0x30] sm:$0xff] }
 0xbf6   : > { %v7913_v30 = vpop.f32.mrf.mxu2  ;;  %v8114_v1 = vld [vmem:[#allocation6] ss:$2 sm:$0xff]  ;;  %v8128_v26 = vld [vmem:[#allocation6 + $0x1] ss:$2 sm:$0xff] }
 0xbf7   : > { %8101 = vst.msk [vmem:[#allocation6 + $0x10] sm:$0xff] %vm8098_vm8, %v8086_v53  ;;  %v7944_v15 = vadd.f32 %v7913_v30, %v7833_v19  ;;  %v8141_v16 = vmax.f32 %v8114_v1, %v8128_v26  ;;  %v7835_v19 = vadd.f32 %v7807_v4, %v7724_v34  ;;  %v7812_v36 = vpop.f32.mrf.mxu1  ;;  %v7504_v59 = vadd.f32 %v13500_v6, %v7393_v14 }
 0xbf9   : > { %v8055_v42 = vadd.f32 %v8024_v12, %v7944_v15  ;;  %v7725_v15 = vadd.f32 %v13486_v29, %v13525_v11  ;;  %v8034_v1 = vpop.f32.mrf.mxu3  ;;  %v7615_v26 = vadd.f32 %v13531_v21, %v7504_v59 }
 0xbfb   : > { %v8073_v50 = vadd.f32 %v13584_v9, %v8055_v42  ;;  %v7836_v7 = vadd.f32 %v7810_v52, %v7725_v15 }
 0xbfd   : > { %v8087_v56 = vmax.f32 %v8073_v50, 0.0 }
 0xbfe   : > { %v8149_v47 = vld [vmem:[#allocation6 + $0x2] ss:$2 sm:$0xff]  ;;  %v7916_v17 = vpop.f32.mrf.mxu2  ;;  %v8170_v28 = vld [vmem:[#allocation6 + $0x3] ss:$2 sm:$0xff] }
 0xbff   : > { %v8162_v18 = vmax.f32 %v8141_v16, %v8149_v47  ;;  %8102 = vst.msk [vmem:[#allocation6 + $0x18] sm:$0xff] %vm8098_vm8, %v8087_v56  ;;  %v7945_v12 = vadd.f32 %v7916_v17, %v7834_v0  ;;  %v8191_v38 = vld [vmem:[#allocation6 + $0x4] ss:$2 sm:$0xff]  ;;  %v7726_v0 = vadd.f32 %v13497_v20, %v7615_v26  ;;  %v7815_v17 = vpop.f32.mrf.mxu1 }
 0xc01   : > { %v8183_v55 = vmax.f32 %v8162_v18, %v8170_v28  ;;  %v8056_v35 = vadd.f32 %v8027_v60, %v7945_v12  ;;  %v11263_v60 = vld [vmem:[%s14188_s7 + $0x38] sm:$0xff]  ;;  %v7277_v18 = vadd.f32 %v13455_v51, %v13373_v37  ;;  %v7837_v34 = vadd.f32 %v7812_v36, %v7726_v0 }
 0xc02   : > { %8484 = vmatpush.bf16.msra.mxu1 %v11263_v60 }
 0xc03   : > { %v8204_v44 = vmax.f32 %v8183_v55, %v8191_v38  ;;  %v8074_v31 = vadd.f32 %v13584_v9, %v8056_v35  ;;  %v7395_v55 = vadd.f32 %v13407_v22, %v7277_v18  ;;  %v8037_v35 = vpop.f32.mrf.mxu3 }
 0xc05   : > { %8220 = vst.msk [vmem:[#allocation7 + $0x3] sm:$0xff] %vm8098_vm8, %v8204_v44  ;;  %v8088_v53 = vmax.f32 %v8074_v31, 0.0  ;;  %v7506_v44 = vadd.f32 %v13513_v46, %v7395_v55 }
 0xc06   : > { %v7918_v30 = vpop.f32.mrf.mxu2  ;;  %v8116_v4 = vld [vmem:[#allocation6 + $0x10] ss:$2 sm:$0xff]  ;;  %v8130_v2 = vld [vmem:[#allocation6 + $0x11] ss:$2 sm:$0xff]  ;;  %8485 = vmatpush.bf16.msra.mxu1 %v11262_v25 }
 0xc07   : > { %8103 = vst.msk [vmem:[#allocation6 + $0x20] sm:$0xff] %vm8098_vm8, %v8088_v53  ;;  %v7946_v33 = vadd.f32 %v7918_v30, %v7835_v19  ;;  %v8142_v45 = vmax.f32 %v8116_v4, %v8130_v2  ;;  %v7817_v14 = vpop.f32.mrf.mxu1  ;;  %v7617_v22 = vadd.f32 %v13546_v8, %v7506_v44 }
 0xc09   : > { %v8057_v49 = vadd.f32 %v8029_v54, %v7946_v33 }
 0xc0b   : > { %v8075_v42 = vadd.f32 %v13584_v9, %v8057_v49  ;;  %v8039_v8 = vpop.f32.mrf.mxu3 }
 0xc0c   : > { %v8243_v53 = vld [vmem:[#allocation7 + $0x1] sm:$0xff] }
 0xc0d   : > { %v8089_v50 = vmax.f32 %v8075_v42, 0.0  ;;  %v8228_v19 = vld [vmem:[#allocation7] sm:$0xff] }
 0xc0e   : > { %v8151_v29 = vld [vmem:[#allocation6 + $0x12] ss:$2 sm:$0xff]  ;;  %v7921_v11 = vpop.f32.mrf.mxu2  ;;  %v8172_v56 = vld [vmem:[#allocation6 + $0x13] ss:$2 sm:$0xff] }
 0xc0f   : > { %v8163_v54 = vmax.f32 %v8142_v45, %v8151_v29  ;;  %8104 = vst.msk [vmem:[#allocation6 + $0x28] sm:$0xff] %vm8098_vm8, %v8089_v50  ;;  %v7947_v16 = vadd.f32 %v7921_v11, %v7836_v7  ;;  %v8193_v21 = vld [vmem:[#allocation6 + $0x14] ss:$2 sm:$0xff]  ;;  %v7282_v7 = vadd.f32 %v13463_v40, %v13387_v27 }
 0xc10   : > { %v8438_v30 = vld [vmem:[#allocation7 + $0x3] sm:$0xff] }
 0xc11   : > { %v8184_v47 = vmax.f32 %v8163_v54, %v8172_v56  ;;  %v8058_v6 = vadd.f32 %v8032_v57, %v7947_v16  ;;  %v7727_v57 = vadd.f32 %v13508_v3, %v13537_v58  ;;  %v7820_v56 = vpop.f32.mrf.mxu1 }
 0xc13   : > { %v8205_v12 = vmax.f32 %v8184_v47, %v8193_v21  ;;  %v8076_v52 = vadd.f32 %v13584_v9, %v8058_v6  ;;  %v7838_v60 = vadd.f32 %v7815_v17, %v7727_v57  ;;  %v7397_v47 = vadd.f32 %v13416_v23, %v7282_v7  ;;  %v8042_v18 = vpop.f32.mrf.mxu3 }
 0xc14   : > { %v7729_v6 = vadd.f32 %v13523_v48, %v13554_v61 }
 0xc15   : > { %8221 = vst.msk [vmem:[#allocation7 + $0xb] sm:$0xff] %vm8098_vm8, %v8205_v12  ;;  %v8090_v28 = vmax.f32 %v8076_v52, 0.0  ;;  %v7508_v21 = vadd.f32 %v13529_v39, %v7397_v47  ;;  %v7287_v39 = vadd.f32 %v13471_v10, %v13400_v63  ;;  %v14194_v63 = vld [vmem:[#allocation21_spill] sm:$0xff]  ;;  %v14197_v47 = vld [vmem:[#allocation23_spill] sm:$0xff] }
 0xc16   : > { %v7923_v38 = vpop.f32.mrf.mxu2  ;;  %v8118_v62 = vld [vmem:[#allocation6 + $0x20] ss:$2 sm:$0xff]  ;;  %v8132_v37 = vld [vmem:[#allocation6 + $0x21] ss:$2 sm:$0xff]  ;;  %v7840_v55 = vadd.f32 %v7820_v56, %v7729_v6  ;;  %v7731_v10 = vadd.f32 %v14194_v63, %v13575_v5  ;;  %v11260_v56 = vld [vmem:[%s14188_s7 + $0x20] sm:$0xff] }
 0xc17   : > { %8105 = vst.msk [vmem:[#allocation6 + $0x30] sm:$0xff] %vm8098_vm8, %v8090_v28  ;;  %v7948_v20 = vadd.f32 %v7923_v38, %v7837_v34  ;;  %v8143_v33 = vmax.f32 %v8118_v62, %v8132_v37  ;;  %v7619_v52 = vadd.f32 %v13558_v43, %v7508_v21 }
 0xc19   : > { %v8059_v51 = vadd.f32 %v8034_v1, %v7948_v20  ;;  %v7728_v1 = vadd.f32 %v13515_v32, %v7617_v22  ;;  %v7822_v48 = vpop.f32.mrf.mxu1  ;;  %v7730_v57 = vadd.f32 %v13533_v41, %v7619_v52  ;;  %v7399_v41 = vadd.f32 %v13429_v24, %v7287_v39  ;;  %v14196_v24 = vld [vmem:[#allocation24_spill] sm:$0xff] }
 0xc1b   : > { %v8077_v31 = vadd.f32 %v13584_v9, %v8059_v51  ;;  %v7839_v16 = vadd.f32 %v7817_v14, %v7728_v1 }
 0xc1c   : > { %v8244_v13 = vld [vmem:[#allocation7 + $0x9] sm:$0xff] }
 0xc1d   : > { %v8229_v36 = vld [vmem:[#allocation7 + $0x8] sm:$0xff]  ;;  %v8091_v49 = vmax.f32 %v8077_v31, 0.0  ;;  %v8250_v3 = vpack.c.bf16 %v8244_v13, %v8243_v53  ;;  %v8044_v31 = vpop.f32.mrf.mxu3 }
 0xc1e   : > { %v8439_v15 = vld [vmem:[#allocation7 + $0xb] sm:$0xff]  ;;  %v8235_v58 = vpack.c.bf16 %v8229_v36, %v8228_v19  ;;  %v7926_v2 = vpop.f32.mrf.mxu2  ;;  %v8174_v42 = vld [vmem:[#allocation6 + $0x23] ss:$2 sm:$0xff]  ;;  %v8195_v50 = vld [vmem:[#allocation6 + $0x24] ss:$2 sm:$0xff]  ;;  %v7841_v19 = vadd.f32 %v7822_v48, %v7730_v57 }
 0xc1f   : > { %v8445_v25 = vpack.c.bf16 %v8439_v15, %v8438_v30  ;;  %v8153_v4 = vld [vmem:[#allocation6 + $0x22] ss:$2 sm:$0xff]  ;;  %8106 = vst.msk [vmem:[#allocation6 + $0x38] sm:$0xff] %vm8098_vm8, %v8091_v49  ;;  %v7949_v59 = vadd.f32 %v7926_v2, %v7838_v60  ;;  %10694 = vmatmul.msk.bf16.vlgmr.msrb.gmra.mxu3 %vm8098_vm8, %v8250_v3  ;;  %v11261_v30 = vld [vmem:[%s14188_s7 + $0x28] sm:$0xff] }
 0xc20   : > { %v8164_v46 = vmax.f32 %v8143_v33, %v8153_v4  ;;  %10706 = vmatmul.msk.bf16.vlgmr.msra.gmra.mxu2 %vm8098_vm8, %v8235_v58  ;;  %8409 = vmatpush.bf16.msra.mxu3 %v11261_v30  ;;  %v14195_v15 = vld [vmem:[#allocation22_spill] sm:$0xff] }
 0xc21   : > { %10738 = vmatmul.msk.bf16.vlgmr.msra.gmra.mxu1 %vm8098_vm8, %v8445_v25  ;;  %v8060_v45 = vadd.f32 %v8037_v35, %v7949_v59  ;;  %v7825_v36 = vpop.f32.mrf.mxu1  ;;  %v7510_v49 = vadd.f32 %v14195_v15, %v7399_v41 }
 0xc22   : > { %v8185_v26 = vmax.f32 %v8164_v46, %v8174_v42  ;;  %v7842_v59 = vadd.f32 %v7825_v36, %v7731_v10 }
 0xc23   : > { %v8078_v11 = vadd.f32 %v13584_v9, %v8060_v45  ;;  %v7621_v2 = vadd.f32 %v14196_v24, %v7510_v49 }
 0xc24   : > { %v8206_v29 = vmax.f32 %v8185_v26, %v8195_v50  ;;  %8410 = vmatpush.bf16.msra.mxu3 %v11260_v56  ;;  %v8663_v56 = vld [vmem:[#allocation7 + $0x6] sm:$0xff] }
 0xc25   : > { %v8092_v54 = vmax.f32 %v8078_v11, 0.0  ;;  %v8047_v7 = vpop.f32.mrf.mxu3 }
 0xc26   : > { %8222 = vst.msk [vmem:[#allocation7 + $0x13] sm:$0xff] %vm8098_vm8, %v8206_v29  ;;  %v7928_v0 = vpop.f32.mrf.mxu2  ;;  %v8120_v27 = vld [vmem:[#allocation6 + $0x30] ss:$2 sm:$0xff]  ;;  %v8134_v40 = vld [vmem:[#allocation6 + $0x31] ss:$2 sm:$0xff] }
 0xc27   : > { %8107 = vst.msk [vmem:[#allocation6 + $0x40] sm:$0xff] %vm8098_vm8, %v8092_v54  ;;  %v7950_v32 = vadd.f32 %v7928_v0, %v7839_v16  ;;  %v8144_v28 = vmax.f32 %v8120_v27, %v8134_v40 }
 0xc29   : > { %v8061_v17 = vadd.f32 %v8039_v8, %v7950_v32  ;;  %v7732_v32 = vadd.f32 %v14197_v47, %v7621_v2  ;;  %v11266_v47 = vld [vmem:[%s14188_s7 + $0x50] sm:$0xff] }
 0xc2b   : > { %v8079_v12 = vadd.f32 %v13584_v9, %v8061_v17 }
 0xc2d   : > { %v8093_v34 = vmax.f32 %v8079_v12, 0.0  ;;  %v8245_v58 = vld [vmem:[#allocation7 + $0x11] sm:$0xff]  ;;  %v7827_v12 = vpop.f32.mrf.mxu1 }
 0xc2e   : > { %v8155_v23 = vld [vmem:[#allocation6 + $0x32] ss:$2 sm:$0xff]  ;;  %v7931_v35 = vpop.f32.mrf.mxu2  ;;  %v8176_v61 = vld [vmem:[#allocation6 + $0x33] ss:$2 sm:$0xff]  ;;  %v8440_v4 = vld [vmem:[#allocation7 + $0x13] sm:$0xff] }
 0xc2f   : > { %v8165_v38 = vmax.f32 %v8144_v28, %v8155_v23  ;;  %8108 = vst.msk [vmem:[#allocation6 + $0x48] sm:$0xff] %vm8098_vm8, %v8093_v34  ;;  %v7951_v20 = vadd.f32 %v7931_v35, %v7840_v55  ;;  %v8197_v51 = vld [vmem:[#allocation6 + $0x34] ss:$2 sm:$0xff]  ;;  %v7843_v28 = vadd.f32 %v7827_v12, %v7732_v32  ;;  %v8049_v23 = vpop.f32.mrf.mxu3 }
 0xc30   : > { %v8230_v25 = vld [vmem:[#allocation7 + $0x10] sm:$0xff] }
 0xc31   : > { %v8186_v62 = vmax.f32 %v8165_v38, %v8176_v61  ;;  %v8062_v37 = vadd.f32 %v8042_v18, %v7951_v20  ;;  %v14198_v18 = vmov 0.0  }
 0xc32   : > { %8219 = vst.msk [vmem:[#allocation7 + $0x38] sm:$0xf] %vm8218_vm9, %v14198_v18 }
 0xc33   : > { %v8207_v43 = vmax.f32 %v8186_v62, %v8197_v51  ;;  %v8080_v44 = vadd.f32 %v13584_v9, %v8062_v37  ;;  %v11265_v51 = vld [vmem:[%s14188_s7 + $0x48] sm:$0xff]  ;;  %8808 = vst.msk [vmem:[#allocation9] sm:$0xff] %vm8756_vm12, %v14198_v18 }
 0xc34   : > { %8559 = vmatpush.bf16.msrb.mxu2 %v11265_v51  ;;  %8809 = vst.msk [vmem:[#allocation9 + $0x8] sm:$0xff] %vm8756_vm12, %v14198_v18 }
 0xc35   : > { %8223 = vst.msk [vmem:[#allocation7 + $0x1b] sm:$0xff] %vm8098_vm8, %v8207_v43  ;;  %v8094_v53 = vmax.f32 %v8080_v44, 0.0  ;;  %v11269_v43 = vld [vmem:[%s14188_s7 + $0x68] sm:$0xff] }
 0xc36   : > { %v7933_v14 = vpop.f32.mrf.mxu2  ;;  %v8122_v33 = vld [vmem:[#allocation6 + $0x40] ss:$2 sm:$0xff]  ;;  %v8136_v60 = vld [vmem:[#allocation6 + $0x41] ss:$2 sm:$0xff]  ;;  %8709 = vmatpush.bf16.msrb.mxu1 %v11269_v43  ;;  %8810 = vst.msk [vmem:[#allocation9 + $0x10] sm:$0xff] %vm8756_vm12, %v14198_v18 }
 0xc37   : > { %8109 = vst.msk [vmem:[#allocation6 + $0x50] sm:$0xff] %vm8098_vm8, %v8094_v53  ;;  %v7952_v22 = vadd.f32 %v7933_v14, %v7841_v19  ;;  %v8145_v46 = vmax.f32 %v8122_v33, %v8136_v60  ;;  %v11268_v53 = vld [vmem:[%s14188_s7 + $0x60] sm:$0xff] }
 0xc38   : > { %9173 = vst.msk [vmem:[#allocation11] sm:$0xff] %vm8756_vm12, %v14198_v18 }
 0xc39   : > { %v8063_v13 = vadd.f32 %v8044_v31, %v7952_v22  ;;  %9353 = vst.msk [vmem:[#allocation13] sm:$0xff] %vm8756_vm12, %v14198_v18 }
 0xc3a   : > { %8710 = vmatpush.bf16.msrb.mxu1 %v11268_v53  ;;  %8811 = vst.msk [vmem:[#allocation9 + $0x18] sm:$0x3f] %vm8763_vm13, %v14198_v18 }
 0xc3b   : > { %v8081_v3 = vadd.f32 %v13584_v9, %v8063_v13  ;;  %9175 = vst.msk [vmem:[#allocation11 + $0x8] sm:$0x7f] %vm9174_vm15, %v14198_v18  ;;  %v11292_v18 = vld [vmem:[%s14120_s11 + $0x10] sm:$0xff] }
 0xc3c   : > { %v8246_v8 = vld [vmem:[#allocation7 + $0x19] sm:$0xff] }
 0xc3d   : > { %v8231_v42 = vld [vmem:[#allocation7 + $0x18] sm:$0xff]  ;;  %v8095_v26 = vmax.f32 %v8081_v3, 0.0  ;;  %v8251_v5 = vpack.c.bf16 %v8246_v8, %v8245_v58 }
 0xc3e   : > { %v8441_v1 = vld [vmem:[#allocation7 + $0x1b] sm:$0xff]  ;;  %v8236_v45 = vpack.c.bf16 %v8231_v42, %v8230_v25  ;;  %v7936_v11 = vpop.f32.mrf.mxu2 }
 0xc3f   : > { %v8446_v50 = vpack.c.bf16 %v8441_v1, %v8440_v4  ;;  %v8157_v29 = vld [vmem:[#allocation6 + $0x42] ss:$2 sm:$0xff]  ;;  %8110 = vst.msk [vmem:[#allocation6 + $0x58] sm:$0xff] %vm8098_vm8, %v8095_v26  ;;  %v7953_v16 = vadd.f32 %v7936_v11, %v7842_v59  ;;  %10695 = vmatmul.msk.bf16.gmra.mxu3 %vm8098_vm8, %v8251_v5  ;;  %v8178_v0 = vld [vmem:[#allocation6 + $0x43] ss:$2 sm:$0xff]  ;;  %v8513_v11 = vld [vmem:[#allocation7 + $0x4] sm:$0xff] }
 0xc40   : > { %v8166_v54 = vmax.f32 %v8145_v46, %v8157_v29  ;;  %10707 = vmatmul.msk.bf16.gmra.mxu2 %vm8098_vm8, %v8236_v45  ;;  %v8199_v27 = vld [vmem:[#allocation6 + $0x44] ss:$2 sm:$0xff]  ;;  %v8364_v45 = vld [vmem:[#allocation7 + $0xa] sm:$0xff] }
 0xc41   : > { %10739 = vmatmul.msk.bf16.gmra.mxu1 %vm8098_vm8, %v8446_v50  ;;  %v8064_v17 = vadd.f32 %v8047_v7, %v7953_v16  ;;  %v11267_v46 = vld [vmem:[%s14188_s7 + $0x58] sm:$0xff]  ;;  %v8514_v50 = vld [vmem:[#allocation7 + $0xc] sm:$0xff]  ;;  %v8363_v29 = vld [vmem:[#allocation7 + $0x2] sm:$0xff] }
 0xc42   : > { %v8187_v6 = vmax.f32 %v8166_v54, %v8178_v0  ;;  %8634 = vmatpush.bf16.msrb.mxu3 %v11267_v46  ;;  %v8664_v7 = vld [vmem:[#allocation7 + $0xe] sm:$0xff]  ;;  %v8370_v54 = vpack.c.bf16 %v8364_v45, %v8363_v29  ;;  %v8520_v16 = vpack.c.bf16 %v8514_v50, %v8513_v11  ;;  %v8366_v32 = vld [vmem:[#allocation7 + $0x1a] sm:$0xff] }
 0xc43   : > { %v8082_v21 = vadd.f32 %v13584_v9, %v8064_v17  ;;  %v8670_v0 = vpack.c.bf16 %v8664_v7, %v8663_v56 }
 0xc44   : > { %v8208_v40 = vmax.f32 %v8187_v6, %v8199_v27  ;;  %v8365_v27 = vld [vmem:[#allocation7 + $0x12] sm:$0xff] }
 0xc45   : > { %v8096_v52 = vmax.f32 %v8082_v21, 0.0  ;;  %v8371_v21 = vpack.c.bf16 %v8366_v32, %v8365_v27 }
 0xc46   : > { %8224 = vst.msk [vmem:[#allocation7 + $0x23] sm:$0xff] %vm8098_vm8, %v8208_v40  ;;  %v7938_v34 = vpop.f32.mrf.mxu2  ;;  %v8124_v38 = vld [vmem:[#allocation6 + $0x50] ss:$2 sm:$0xff]  ;;  %v8138_v20 = vld [vmem:[#allocation6 + $0x51] ss:$2 sm:$0xff]  ;;  %8635 = vmatpush.bf16.msrb.mxu3 %v11266_v47  ;;  %v8515_v40 = vld [vmem:[#allocation7 + $0x14] sm:$0xff] }
 0xc47   : > { %8111 = vst.msk [vmem:[#allocation6 + $0x60] sm:$0xff] %vm8098_vm8, %v8096_v52  ;;  %v7954_v55 = vadd.f32 %v7938_v34, %v7843_v28  ;;  %v8146_v61 = vmax.f32 %v8124_v38, %v8138_v20  ;;  %v8665_v52 = vld [vmem:[#allocation7 + $0x16] sm:$0xff] }
 0xc49   : > { %v8065_v35 = vadd.f32 %v8049_v23, %v7954_v55 }
 0xc4b   : > { %v8083_v48 = vadd.f32 %v13584_v9, %v8065_v35  ;;  %v11264_v9 = vld [vmem:[%s14188_s7 + $0x40] sm:$0xff]  ;;  %s11398_s7 = sshra.s32 %s9764_s4, 4  ;;  %s11399_s7 = int_to_ptr.hbm [resolvable:$true] %s11398_s7 }
 0xc4c   : > { %8560 = vmatpush.bf16.msrb.mxu2 %v11264_v9  ;;  %p11405_p0 = scmp.lt.s32.totalorder %s11399_s7, %s14128_s19 }
 0xc4d   : > { %v8097_v57 = vmax.f32 %v8083_v48, 0.0  ;;  %v8247_v33 = vld [vmem:[#allocation7 + $0x21] sm:$0xff] }
 0xc4e   : > { %v8159_v62 = vld [vmem:[#allocation6 + $0x52] ss:$2 sm:$0xff]  ;;  %v8180_v39 = vld [vmem:[#allocation6 + $0x53] ss:$2 sm:$0xff] }
 0xc4f   : > { %v8167_v37 = vmax.f32 %v8146_v61, %v8159_v62  ;;  %8113 = vst.msk [vmem:[#allocation6 + $0x68] sm:$0x7f] %vm8112_vm10, %v8097_v57  ;;  %v8201_v31 = vld [vmem:[#allocation6 + $0x54] ss:$2 sm:$0xff]  ;;  %v8516_v6 = vld [vmem:[#allocation7 + $0x1c] sm:$0xff] }
 0xc50   : > { %v8232_v36 = vld [vmem:[#allocation7 + $0x20] sm:$0xff]  ;;  %v8521_v12 = vpack.c.bf16 %v8516_v6, %v8515_v40 }
 0xc51   : > { %v8188_v44 = vmax.f32 %v8167_v37, %v8180_v39  ;;  %v8442_v15 = vld [vmem:[#allocation7 + $0x23] sm:$0xff] }
 0xc52   : > { %v8666_v17 = vld [vmem:[#allocation7 + $0x1e] sm:$0xff] }
 0xc53   : > { %v8209_v19 = vmax.f32 %v8188_v44, %v8201_v31  ;;  %v8671_v28 = vpack.c.bf16 %v8666_v17, %v8665_v52  ;;  %v8367_v35 = vld [vmem:[#allocation7 + $0x22] sm:$0xff] }
 0xc55   : > { %8225 = vst.msk [vmem:[#allocation7 + $0x2b] sm:$0xff] %vm8098_vm8, %v8209_v19 }
 0xc56   : > { %v8126_v30 = vld [vmem:[#allocation6 + $0x60] ss:$2 sm:$0x3f]  ;;  %v8140_v41 = vld [vmem:[#allocation6 + $0x61] ss:$2 sm:$0x3f] }
 0xc57   : > { %v8147_v14 = vmax.f32 %v8126_v30, %v8140_v41  ;;  %v8161_v22 = vld [vmem:[#allocation6 + $0x62] ss:$2 sm:$0x3f]  ;;  %v8182_v10 = vld [vmem:[#allocation6 + $0x63] ss:$2 sm:$0x3f] }
 0xc58   : > { %v8203_v13 = vld [vmem:[#allocation6 + $0x64] ss:$2 sm:$0x3f] }
 0xc59   : > { %v8168_v63 = vmax.f32 %v8147_v14, %v8161_v22  ;;  %v8589_v14 = vld [vmem:[#allocation7 + $0xd] sm:$0xff]  ;;  %v8588_v22 = vld [vmem:[#allocation7 + $0x5] sm:$0xff] }
 0xc5b   : > { %v8189_v60 = vmax.f32 %v8168_v63, %v8182_v10  ;;  %v8595_v63 = vpack.c.bf16 %v8589_v14, %v8588_v22 }
 0xc5c   : > { %v8248_v49 = vld [vmem:[#allocation7 + $0x29] sm:$0xff] }
 0xc5d   : > { %v8233_v3 = vld [vmem:[#allocation7 + $0x28] sm:$0xff]  ;;  %v8210_v25 = vmax.f32 %v8189_v60, %v8203_v13  ;;  %v8252_v4 = vpack.c.bf16 %v8248_v49, %v8247_v33  ;;  %v8590_v49 = vld [vmem:[#allocation7 + $0x15] sm:$0xff] }
 0xc5e   : > { %v8443_v58 = vld [vmem:[#allocation7 + $0x2b] sm:$0xff]  ;;  %v8237_v24 = vpack.c.bf16 %v8233_v3, %v8232_v36  ;;  %v8591_v36 = vld [vmem:[#allocation7 + $0x1d] sm:$0xff] }
 0xc5f   : > { %v8447_v2 = vpack.c.bf16 %v8443_v58, %v8442_v15  ;;  %10696 = vmatmul.msk.bf16.gmra.mxu3 %vm8098_vm8, %v8252_v4  ;;  %8227 = vst.msk [vmem:[#allocation7 + $0x33] sm:$0x3f] %vm8226_vm11, %v8210_v25  ;;  %v8368_v34 = vld [vmem:[#allocation7 + $0x2a] sm:$0xff]  ;;  %v8596_v3 = vpack.c.bf16 %v8591_v36, %v8590_v49 }
 0xc60   : > { %10708 = vmatmul.msk.bf16.gmra.mxu2 %vm8098_vm8, %v8237_v24  ;;  %v8517_v38 = vld [vmem:[#allocation7 + $0x24] sm:$0xff]  ;;  %v8372_v20 = vpack.c.bf16 %v8368_v34, %v8367_v35 }
 0xc61   : > { %10740 = vmatmul.msk.bf16.gmra.mxu1 %vm8098_vm8, %v8447_v2  ;;  %v8667_v61 = vld [vmem:[#allocation7 + $0x26] sm:$0xff] }
 0xc62   : > { %v8592_v2 = vld [vmem:[#allocation7 + $0x25] sm:$0xff] }
 0xc66   : > { %v8249_v59 = vld [vmem:[#allocation7 + $0x31] sm:$0x3f] }
 0xc67   : > { %v8234_v8 = vld [vmem:[#allocation7 + $0x30] sm:$0x3f]  ;;  %v8253_v1 = vpack.c.bf16 %v8249_v59, %v8249_v59  ;;  %v8669_v44 = vld [vmem:[#allocation7 + $0x36] sm:$0x3f] }
 0xc68   : > { %v8444_v42 = vld [vmem:[#allocation7 + $0x33] sm:$0x3f]  ;;  %v8238_v26 = vpack.c.bf16 %v8234_v8, %v8234_v8  ;;  %v8673_v53 = vpack.c.bf16 %v8669_v44, %v8669_v44 }
 0xc69   : > { %v8448_v5 = vpack.c.bf16 %v8444_v42, %v8444_v42  ;;  %v8518_v55 = vld [vmem:[#allocation7 + $0x2c] sm:$0xff]  ;;  %v8519_v43 = vld [vmem:[#allocation7 + $0x34] sm:$0x3f] }
 0xc6a   : > { %v8668_v23 = vld [vmem:[#allocation7 + $0x2e] sm:$0xff]  ;;  %v8522_v48 = vpack.c.bf16 %v8518_v55, %v8517_v38  ;;  %v8523_v9 = vpack.c.bf16 %v8519_v43, %v8519_v43  ;;  %v11273_v43 = vld [vmem:[%s14118_s9 + $0x18] sm:$0xff] }
 0xc6b   : > { %v8672_v57 = vpack.c.bf16 %v8668_v23, %v8667_v61  ;;  %v8369_v51 = vld [vmem:[#allocation7 + $0x32] sm:$0x3f] }
 0xc6c   : > { %v8373_v31 = vpack.c.bf16 %v8369_v51, %v8369_v51  ;;  %v8593_v24 = vld [vmem:[#allocation7 + $0x2d] sm:$0xff]  ;;  %v8594_v50 = vld [vmem:[#allocation7 + $0x35] sm:$0x3f] }
 0xc6d   : > { %v8597_v59 = vpack.c.bf16 %v8593_v24, %v8592_v2  ;;  %v8598_v29 = vpack.c.bf16 %v8594_v50, %v8594_v50  ;;  %v11277_v51 = vld [vmem:[%s14118_s9 + $0x38] sm:$0xff] }
 0xc6e   : > { %8880 = vmatpush.bf16.msra.mxu2 %v11277_v51 }
 0xc6f   : > { %10697 = vmatmul.msk.bf16.gmra.mxu3 %vm8098_vm8, %v8253_v1 }
 0xc70   : > { %10709 = vmatmul.msk.bf16.gmra.mxu2 %vm8098_vm8, %v8238_v26 }
 0xc71   : > { %10741 = vmatmul.msk.bf16.gmra.mxu1 %vm8098_vm8, %v8448_v5 }
 0xc7f   : > { %10722 = vmatmul.msk.bf16.vlgmr.msra.gmra.mxu3 %vm8098_vm8, %v8370_v54 }
 0xc80   : > { %10754 = vmatmul.msk.bf16.vlgmr.msrb.gmra.mxu2 %vm8098_vm8, %v8520_v16  ;;  %8929 = vmatpush.bf16.msra.mxu3 %v11273_v43 }
 0xc81   : > { %10786 = vmatmul.msk.bf16.vlgmr.msrb.gmra.mxu1 %vm8098_vm8, %v8670_v0 }
 0xc8f   : > { %10723 = vmatmul.msk.bf16.gmra.mxu3 %vm8098_vm8, %v8371_v21 }
 0xc90   : > { %10755 = vmatmul.msk.bf16.gmra.mxu2 %vm8098_vm8, %v8521_v12 }
 0xc91   : > { %10787 = vmatmul.msk.bf16.gmra.mxu1 %vm8098_vm8, %v8671_v28 }
 0xc9e   : > { %v13731_v19 = vpop.f32.mrf.mxu1 }
 0xc9f   : > { %10724 = vmatmul.msk.bf16.gmra.mxu3 %vm8098_vm8, %v8372_v20 }
 0xca0   : > { %10756 = vmatmul.msk.bf16.gmra.mxu2 %vm8098_vm8, %v8522_v48 }
 0xca1   : > { %10788 = vmatmul.msk.bf16.gmra.mxu1 %vm8098_vm8, %v8672_v57 }
 0xca2   : > { %v8292_v62 = vpop.f32.mrf.mxu3 }
 0xca3   : > { %v8344_v37 = vpop.f32.mrf.mxu2 }
 0xca4   : > { %v13726_v39 = vadd.f32 %v8344_v37, %v8292_v62 }
 0xca6   : > { %v13738_v60 = vpop.f32.mrf.mxu1 }
 0xcaa   : > { %v13733_v30 = vpop.f32.mrf.mxu3 }
 0xcab   : > { %v13735_v41 = vpop.f32.mrf.mxu2 }
 0xcac   : > { %v8347_v49 = vadd.f32 %v13735_v41, %v13733_v30 }
 0xcaf   : > { %10725 = vmatmul.msk.bf16.gmra.mxu3 %vm8098_vm8, %v8373_v31 }
 0xcb0   : > { %10757 = vmatmul.msk.bf16.gmra.mxu2 %vm8098_vm8, %v8523_v9 }
 0xcb1   : > { %10789 = vmatmul.msk.bf16.gmra.mxu1 %vm8098_vm8, %v8673_v53 }
 0xcbe   : > { %v13742_v15 = vpop.f32.mrf.mxu1 }
 0xcbf   : > { %10770 = vmatmul.msk.bf16.vlgmr.msrb.gmra.mxu3 %vm8098_vm8, %v8595_v63 }
 0xcc2   : > { %v8297_v10 = vpop.f32.mrf.mxu3 }
 0xcc3   : > { %v8349_v33 = vpop.f32.mrf.mxu2 }
 0xcc4   : > { %v13740_v13 = vadd.f32 %v8349_v33, %v8297_v10 }
 0xcc6   : > { %v13745_v58 = vpop.f32.mrf.mxu1 }
 0xcca   : > { %v13747_v25 = vpop.f32.mrf.mxu3 }
 0xccb   : > { %v13749_v4 = vpop.f32.mrf.mxu2 }
 0xccf   : > { %10771 = vmatmul.msk.bf16.gmra.mxu3 %vm8098_vm8, %v8596_v3 }
 0xcde   : > { %v8497_v46 = vpop.f32.mrf.mxu1 }
 0xcdf   : > { %10772 = vmatmul.msk.bf16.gmra.mxu3 %vm8098_vm8, %v8597_v59  ;;  %v13806_v59 = vld [vmem:[%s14199_s8] ss:$0 sm:$0xff]  ;;  %s11400_s8 = scalar_lea.hbm %s11399_s7, 1 }
 0xce0   : > { %p11401_p11 = scmp.ne.s32.totalorder %s11399_s7, %s11400_s8  ;;  %p11406_p1 = scmp.lt.s32.totalorder %s11404_s29, %s11400_s8 }
 0xce2   : > { %v8302_v8 = vpop.f32.mrf.mxu3  ;;  %p11402_p12 = pnand %p11401_p11, %p11587_p5  ;;  %p11407_p2 = por %p11406_p1, %p11405_p0 }
 0xce3   : > { %v8354_v42 = vpop.f32.mrf.mxu2 }
 0xce4   : > { %v8355_v1 = vadd.f32 %v8354_v42, %v8302_v8  ;;  %p11403_p13 = pneg %p11402_p12 }
 0xce6   : > { %v13752_v26 = vpop.f32.mrf.mxu1  ;;  %p11408_p3 = pnand %p11407_p2, %p11403_p13 }
 0xcea   : > { %v13754_v5 = vpop.f32.mrf.mxu3 }
 0xceb   : > { %v13756_v45 = vpop.f32.mrf.mxu2 }
 0xcee   : > { %v8502_v7 = vpop.f32.mrf.mxu1 }
 0xcef   : > { %10773 = vmatmul.msk.bf16.gmra.mxu3 %vm8098_vm8, %v8598_v29 }
 0xcf2   : > { %v8307_v11 = vpop.f32.mrf.mxu3 }
 0xcf3   : > { %v8359_v54 = vpop.f32.mrf.mxu2 }
 0xcf4   : > { %v8360_v16 = vadd.f32 %v8359_v54, %v8307_v11  ;;  %v11275_v11 = vld [vmem:[%s14118_s9 + $0x28] sm:$0xff] }
 0xcf6   : > { %v8504_v56 = vpop.f32.mrf.mxu1 }
 0xcfa   : > { %v8309_v0 = vpop.f32.mrf.mxu3 }
 0xcfb   : > { %v8361_v47 = vpop.f32.mrf.mxu2 }
 0xcfe   : > { %v8712_v32 = vpop.f32.mrf.mxu1 }
 0xd02   : > { %v8412_v6 = vpop.f32.mrf.mxu3 }
 0xd03   : > { %v8562_v17 = vpop.f32.mrf.mxu2  ;;  %v8431_v63 = vadd.f32 %v8412_v6, %v13726_v39  ;;  %v11276_v39 = vld [vmem:[%s14118_s9 + $0x30] sm:$0xff] }
 0xd04   : > { %8881 = vmatpush.bf16.msra.mxu2 %v11276_v39 }
 0xd05   : > { %v8506_v36 = vadd.f32 %v13731_v19, %v8431_v63  ;;  %v11272_v19 = vld [vmem:[%s14118_s9 + $0x10] sm:$0xff] }
 0xd06   : > { %v8714_v27 = vpop.f32.mrf.mxu1  ;;  %8930 = vmatpush.bf16.msra.mxu3 %v11272_v19  ;;  %v11284_v19 = vld [vmem:[%s14118_s9 + $0x70] sm:$0xff] }
 0xd07   : > { %v8581_v3 = vadd.f32 %v8562_v17, %v8506_v36 }
 0xd08   : > { %8882 = vmatpush.bf16.msra.mxu2 %v11275_v11 }
 0xd0a   : > { %v8414_v40 = vpop.f32.mrf.mxu3 }
 0xd0b   : > { %v8564_v21 = vpop.f32.mrf.mxu2  ;;  %v8432_v24 = vadd.f32 %v8414_v40, %v8347_v49  ;;  %v11289_v40 = vld [vmem:[%s14118_s9 + $0x98] sm:$0xff]  ;;  %v11270_v49 = vld [vmem:[%s14118_s9] sm:$0xff] }
 0xd0c   : > { %9129 = vmatpush.bf16.msra.mxu1 %v11289_v40 }
 0xd0d   : > { %v8507_v8 = vadd.f32 %v13738_v60, %v8432_v24  ;;  %v11271_v60 = vld [vmem:[%s14118_s9 + $0x8] sm:$0xff]  ;;  %v11285_v24 = vld [vmem:[%s14118_s9 + $0x78] sm:$0xff] }
 0xd0e   : > { %v13759_v12 = vpop.f32.mrf.mxu1  ;;  %8931 = vmatpush.bf16.msra.mxu3 %v11271_v60 }
 0xd0f   : > { %v8582_v42 = vadd.f32 %v8564_v21, %v8507_v8 }
 0xd12   : > { %v8417_v52 = vpop.f32.mrf.mxu3  ;;  %8932 = vmatpush.bf16.msra.mxu3 %v11270_v49 }
 0xd13   : > { %v8567_v28 = vpop.f32.mrf.mxu2 }
 0xd16   : > { %v13761_v34 = vpop.f32.mrf.mxu1  ;;  %9061 = vmatpush.bf16.msrb.mxu3 %v11285_v24 }
 0xd1a   : > { %v8419_v55 = vpop.f32.mrf.mxu3  ;;  %9062 = vmatpush.bf16.msrb.mxu3 %v11284_v19 }
 0xd1b   : > { %v13763_v23 = vpop.f32.mrf.mxu2 }
 0xd1e   : > { %v13765_v35 = vpop.f32.mrf.mxu1 }
 0xd22   : > { %v8422_v38 = vpop.f32.mrf.mxu3 }
 0xd23   : > { %v13767_v20 = vpop.f32.mrf.mxu2  ;;  %v8435_v48 = vadd.f32 %v8422_v38, %v8355_v1  ;;  %v8433_v1 = vadd.f32 %v8417_v52, %v13740_v13  ;;  %v8352_v13 = vadd.f32 %v13749_v4, %v13747_v25 }
 0xd25   : > { %v13769_v61 = vadd.f32 %v8497_v46, %v8435_v48  ;;  %v8508_v54 = vadd.f32 %v13742_v15, %v8433_v1  ;;  %v8434_v47 = vadd.f32 %v8419_v55, %v8352_v13 }
 0xd26   : > { %v13771_v57 = vpop.f32.mrf.mxu1 }
 0xd27   : > { %v8583_v0 = vadd.f32 %v8567_v28, %v8508_v54  ;;  %v8509_v15 = vadd.f32 %v13745_v58, %v8434_v47  ;;  %v11279_v54 = vld [vmem:[%s14118_s9 + $0x48] sm:$0xff] }
 0xd29   : > { %v8584_v4 = vadd.f32 %v13763_v23, %v8509_v15  ;;  %v8585_v23 = vadd.f32 %v13767_v20, %v13769_v61 }
 0xd2a   : > { %v13773_v62 = vpop.f32.mrf.mxu3 }
 0xd2b   : > { %v13775_v37 = vpop.f32.mrf.mxu2 }
 0xd2e   : > { %v13789_v44 = vpop.f32.mrf.mxu1 }
 0xd32   : > { %v8427_v31 = vpop.f32.mrf.mxu3 }
 0xd33   : > { %v13795_v9 = vpop.f32.mrf.mxu2  ;;  %v8437_v53 = vadd.f32 %v8427_v31, %v8360_v16 }
 0xd35   : > { %v13797_v14 = vadd.f32 %v8502_v7, %v8437_v53 }
 0xd36   : > { %v8729_v22 = vpop.f32.mrf.mxu1 }
 0xd37   : > { %v8587_v1 = vadd.f32 %v13795_v9, %v13797_v14 }
 0xd3a   : > { %v8429_v10 = vpop.f32.mrf.mxu3 }
 0xd3b   : > { %v8579_v33 = vpop.f32.mrf.mxu2 }
 0xd42   : > { %v8637_v2 = vpop.f32.mrf.mxu3 }
 0xd43   : > { %v8656_v46 = vadd.f32 %v8637_v2, %v8581_v3  ;;  %v11281_v3 = vld [vmem:[%s14118_s9 + $0x58] sm:$0xff]  ;;  %v11287_v2 = vld [vmem:[%s14118_s9 + $0x88] sm:$0xff] }
 0xd45   : > { %v8731_v30 = vadd.f32 %v8712_v32, %v8656_v46  ;;  %v11280_v46 = vld [vmem:[%s14118_s9 + $0x50] sm:$0xff] }
 0xd47   : > { %v8742_v41 = vadd.f32 %v13806_v59, %v8731_v30 }
 0xd49   : > { %v8749_v50 = vmax.f32 %v8742_v41, 0.0 }
 0xd4a   : > { %v8639_v7 = vpop.f32.mrf.mxu3 }
 0xd4b   : > { %8757 = vst.msk [vmem:[#allocation8] sm:$0xff] %vm8756_vm12, %v8749_v50  ;;  %v8657_v29 = vadd.f32 %v8639_v7, %v8582_v42  ;;  %v11286_v42 = vld [vmem:[%s14118_s9 + $0x80] sm:$0xff] }
 0xd4d   : > { %v8732_v16 = vadd.f32 %v8714_v27, %v8657_v29 }
 0xd4f   : > { %v8743_v56 = vadd.f32 %v13806_v59, %v8732_v16  ;;  %v11283_v16 = vld [vmem:[%s14118_s9 + $0x68] sm:$0xff] }
 0xd50   : > { %9063 = vmatpush.bf16.msrb.mxu3 %v11283_v16 }
 0xd51   : > { %v8750_v32 = vmax.f32 %v8743_v56, 0.0  ;;  %v11278_v56 = vld [vmem:[%s14118_s9 + $0x40] sm:$0xff] }
 0xd52   : > { %v8642_v6 = vpop.f32.mrf.mxu3 }
 0xd53   : > { %8758 = vst.msk [vmem:[#allocation8 + $0x8] sm:$0xff] %vm8756_vm12, %v8750_v32  ;;  %v8658_v17 = vadd.f32 %v8642_v6, %v8583_v0  ;;  %v11282_v0 = vld [vmem:[%s14118_s9 + $0x60] sm:$0xff] }
 0xd54   : > { %9064 = vmatpush.bf16.msrb.mxu3 %v11282_v0  ;;  %v11377_v0 = vld [vmem:[%s14119_s10] ss:$0 sm:$0xff] }
 0xd55   : > { %v8733_v27 = vadd.f32 %v13759_v12, %v8658_v17  ;;  %v8357_v12 = vadd.f32 %v13756_v45, %v13754_v5 }
 0xd57   : > { %v8744_v25 = vadd.f32 %v13806_v59, %v8733_v27  ;;  %v8436_v51 = vadd.f32 %v13773_v62, %v8357_v12  ;;  %v11274_v62 = vld [vmem:[%s14118_s9 + $0x20] sm:$0xff] }
 0xd58   : > { %8883 = vmatpush.bf16.msra.mxu2 %v11274_v62  ;;  %v9083_v62 = vld [vmem:[#allocation9 + $0x1c] sm:$0x3] }
 0xd59   : > { %v8751_v21 = vmax.f32 %v8744_v25, 0.0  ;;  %v8511_v33 = vadd.f32 %v13752_v26, %v8436_v51  ;;  %v11288_v26 = vld [vmem:[%s14118_s9 + $0x90] sm:$0xff] }
 0xd5a   : > { %v8644_v52 = vpop.f32.mrf.mxu3  ;;  %v8765_v38 = vld [vmem:[#allocation8] ss:$2 sm:$0xff]  ;;  %v8773_v58 = vld [vmem:[#allocation8 + $0x1] ss:$2 sm:$0xff]  ;;  %9130 = vmatpush.bf16.msra.mxu1 %v11288_v26 }
 0xd5b   : > { %8759 = vst.msk [vmem:[#allocation8 + $0x10] sm:$0xff] %vm8756_vm12, %v8751_v21  ;;  %v8659_v28 = vadd.f32 %v8644_v52, %v8584_v4  ;;  %v8780_v43 = vmax.f32 %v8765_v38, %v8773_v58  ;;  %v8586_v20 = vadd.f32 %v13775_v37, %v8511_v33 }
 0xd5c   : > { %8993 = vmatpush.bf16.msrb.mxu2 %v11281_v3 }
 0xd5d   : > { %v8734_v55 = vadd.f32 %v13761_v34, %v8659_v28 }
 0xd5e   : > { %9131 = vmatpush.bf16.msra.mxu1 %v11287_v2 }
 0xd5f   : > { %v8745_v48 = vadd.f32 %v13806_v59, %v8734_v55 }
 0xd60   : > { %8994 = vmatpush.bf16.msrb.mxu2 %v11280_v46 }
 0xd61   : > { %v8752_v31 = vmax.f32 %v8745_v48, 0.0 }
 0xd62   : > { %v8785_v53 = vld [vmem:[#allocation8 + $0x2] ss:$2 sm:$0xff]  ;;  %v8647_v22 = vpop.f32.mrf.mxu3  ;;  %v8797_v10 = vld [vmem:[#allocation8 + $0x3] ss:$2 sm:$0xff]  ;;  %9132 = vmatpush.bf16.msra.mxu1 %v11286_v42 }
 0xd63   : > { %v8792_v63 = vmax.f32 %v8780_v43, %v8785_v53  ;;  %8760 = vst.msk [vmem:[#allocation8 + $0x18] sm:$0xff] %vm8756_vm12, %v8752_v31  ;;  %v8660_v34 = vadd.f32 %v8647_v22, %v8585_v23 }
 0xd64   : > { %8995 = vmatpush.bf16.msrb.mxu2 %v11279_v54 }
 0xd65   : > { %v8735_v5 = vadd.f32 %v13765_v35, %v8660_v34  ;;  %v8804_v45 = vmax.f32 %v8792_v63, %v8797_v10 }
 0xd67   : > { %v8746_v36 = vadd.f32 %v13806_v59, %v8735_v5  ;;  %8812 = vst.msk [vmem:[#allocation9 + $0x2] sm:$0xff] %vm8756_vm12, %v8804_v45 }
 0xd68   : > { %8996 = vmatpush.bf16.msrb.mxu2 %v11278_v56 }
 0xd69   : > { %v8753_v61 = vmax.f32 %v8746_v36, 0.0 }
 0xd6a   : > { %v8649_v35 = vpop.f32.mrf.mxu3  ;;  %v8767_v8 = vld [vmem:[#allocation8 + $0x10] ss:$2 sm:$0xff]  ;;  %v8775_v30 = vld [vmem:[#allocation8 + $0x11] ss:$2 sm:$0xff] }
 0xd6b   : > { %8761 = vst.msk [vmem:[#allocation8 + $0x20] sm:$0xff] %vm8756_vm12, %v8753_v61  ;;  %v8661_v37 = vadd.f32 %v8649_v35, %v8586_v20 }
 0xd6d   : > { %v8736_v39 = vadd.f32 %v13771_v57, %v8661_v37  ;;  %v8781_v57 = vmax.f32 %v8767_v8, %v8775_v30 }
 0xd6e   : > { %v8817_v40 = vld [vmem:[#allocation9] sm:$0xff] }
 0xd6f   : > { %v8747_v41 = vadd.f32 %v13806_v59, %v8736_v39  ;;  %v8944_v37 = vld [vmem:[#allocation9 + $0x2] sm:$0xff] }
 0xd71   : > { %v8754_v50 = vmax.f32 %v8747_v41, 0.0 }
 0xd72   : > { %v8652_v7 = vpop.f32.mrf.mxu3  ;;  %v8787_v29 = vld [vmem:[#allocation8 + $0x12] ss:$2 sm:$0xff]  ;;  %v8799_v13 = vld [vmem:[#allocation8 + $0x13] ss:$2 sm:$0xff] }
 0xd73   : > { %8762 = vst.msk [vmem:[#allocation8 + $0x28] sm:$0xff] %vm8756_vm12, %v8754_v50  ;;  %v8662_v11 = vadd.f32 %v8652_v7, %v8587_v1  ;;  %v8793_v60 = vmax.f32 %v8781_v57, %v8787_v29 }
 0xd75   : > { %v8737_v9 = vadd.f32 %v13789_v44, %v8662_v11  ;;  %v8805_v14 = vmax.f32 %v8793_v60, %v8799_v13  ;;  %v8831_v44 = vld [vmem:[#allocation9 + $0x1] sm:$0xff] }
 0xd76   : > { %v11297_v60 = vld [vmem:[%s14120_s11 + $0x38] sm:$0xff] }
 0xd77   : > { %v8748_v47 = vadd.f32 %v13806_v59, %v8737_v9  ;;  %8813 = vst.msk [vmem:[#allocation9 + $0xa] sm:$0xff] %vm8756_vm12, %v8805_v14 }
 0xd79   : > { %v8755_v32 = vmax.f32 %v8748_v47, 0.0 }
 0xd7a   : > { %v8654_v6 = vpop.f32.mrf.mxu3  ;;  %v8769_v27 = vld [vmem:[#allocation8 + $0x20] ss:$2 sm:$0xff]  ;;  %v8777_v25 = vld [vmem:[#allocation8 + $0x21] ss:$2 sm:$0xff] }
 0xd7b   : > { %8764 = vst.msk [vmem:[#allocation8 + $0x30] sm:$0x3f] %vm8763_vm13, %v8755_v32  ;;  %v8782_v28 = vmax.f32 %v8769_v27, %v8777_v25 }
 0xd7e   : > { %v8832_v17 = vld [vmem:[#allocation9 + $0x9] sm:$0xff] }
 0xd7f   : > { %v8818_v15 = vld [vmem:[#allocation9 + $0x8] sm:$0xff]  ;;  %v8835_v4 = vpack.c.bf16 %v8832_v17, %v8831_v44 }
 0xd80   : > { %v8821_v21 = vpack.c.bf16 %v8818_v15, %v8817_v40  ;;  %v9080_v53 = vld [vmem:[#allocation9 + $0x4] sm:$0xff] }
 0xd81   : > { %10814 = vmatmul.msk.bf16.vlgmr.msra.gmra.mxu2 %vm8756_vm12, %v8835_v4  ;;  %v8945_v49 = vld [vmem:[#allocation9 + $0xa] sm:$0xff] }
 0xd82   : > { %10832 = vmatmul.msk.bf16.vlgmr.msra.gmra.mxu3 %vm8756_vm12, %v8821_v21  ;;  %v8771_v59 = vld [vmem:[#allocation8 + $0x30] ss:$2 sm:$0x3]  ;;  %v8779_v52 = vld [vmem:[#allocation8 + $0x31] ss:$2 sm:$0x3]  ;;  %v8948_v24 = vpack.c.bf16 %v8945_v49, %v8944_v37  ;;  %9233 = vmatpush.bf16.msra.mxu2 %v11297_v60 }
 0xd83   : > { %v8783_v55 = vmax.f32 %v8771_v59, %v8779_v52  ;;  %v8789_v38 = vld [vmem:[#allocation8 + $0x22] ss:$2 sm:$0xff]  ;;  %v8791_v58 = vld [vmem:[#allocation8 + $0x32] ss:$2 sm:$0x3]  ;;  %v11293_v59 = vld [vmem:[%s14120_s11 + $0x18] sm:$0xff] }
 0xd84   : > { %v8794_v12 = vmax.f32 %v8782_v28, %v8789_v38  ;;  %v8801_v23 = vld [vmem:[#allocation8 + $0x23] ss:$2 sm:$0xff]  ;;  %v8803_v51 = vld [vmem:[#allocation8 + $0x33] ss:$2 sm:$0x3]  ;;  %v9012_v26 = vld [vmem:[#allocation9 + $0x3] sm:$0xff]  ;;  %9274 = vmatpush.bf16.msra.mxu3 %v11293_v59 }
 0xd85   : > { %v8795_v48 = vmax.f32 %v8783_v55, %v8791_v58  ;;  %v11296_v21 = vld [vmem:[%s14120_s11 + $0x30] sm:$0xff]  ;;  %v11295_v55 = vld [vmem:[%s14120_s11 + $0x28] sm:$0xff] }
 0xd86   : > { %v8806_v43 = vmax.f32 %v8794_v12, %v8801_v23  ;;  %9234 = vmatpush.bf16.msra.mxu2 %v11296_v21  ;;  %v11299_v37 = vld [vmem:[%s14120_s11 + $0x48] sm:$0xff]  ;;  %v11302_v21 = vld [vmem:[%s14122_s13] sm:$0xff] }
 0xd87   : > { %v8807_v31 = vmax.f32 %v8795_v48, %v8803_v51 }
 0xd88   : > { %8814 = vst.msk [vmem:[#allocation9 + $0x12] sm:$0xff] %vm8756_vm12, %v8806_v43  ;;  %9275 = vmatpush.bf16.msra.mxu3 %v11292_v18  ;;  %v11294_v43 = vld [vmem:[%s14120_s11 + $0x20] sm:$0xff] }
 0xd89   : > { %8816 = vst.msk [vmem:[#allocation9 + $0x1a] sm:$0x3] %vm8815_vm14, %v8807_v31  ;;  %v11291_v31 = vld [vmem:[%s14120_s11 + $0x8] sm:$0xff] }
 0xd8a   : > { %9235 = vmatpush.bf16.msra.mxu2 %v11295_v55 }
 0xd8c   : > { %9276 = vmatpush.bf16.msra.mxu3 %v11291_v31 }
 0xd8e   : > { %9236 = vmatpush.bf16.msra.mxu2 %v11294_v43 }
 0xd8f   : > { %v8819_v22 = vld [vmem:[#allocation9 + $0x10] sm:$0xff]  ;;  %v8820_v63 = vld [vmem:[#allocation9 + $0x18] sm:$0x3] }
 0xd90   : > { %v9081_v34 = vld [vmem:[#allocation9 + $0xc] sm:$0xff]  ;;  %v8822_v10 = vpack.c.bf16 %v8820_v63, %v8819_v22  ;;  %v8834_v45 = vld [vmem:[#allocation9 + $0x19] sm:$0x3]  ;;  %v9015_v46 = vld [vmem:[#allocation9 + $0x1b] sm:$0x3] }
 0xd91   : > { %v9084_v33 = vpack.c.bf16 %v9081_v34, %v9080_v53  ;;  %v8833_v5 = vld [vmem:[#allocation9 + $0x11] sm:$0xff]  ;;  %v8947_v39 = vld [vmem:[#allocation9 + $0x1a] sm:$0x3]  ;;  %v11290_v34 = vld [vmem:[%s14120_s11] sm:$0xff] }
 0xd92   : > { %v8836_v36 = vpack.c.bf16 %v8834_v45, %v8833_v5  ;;  %10833 = vmatmul.msk.bf16.gmra.mxu3 %vm8756_vm12, %v8822_v10  ;;  %v9013_v20 = vld [vmem:[#allocation9 + $0xb] sm:$0xff]  ;;  %v9082_v61 = vld [vmem:[#allocation9 + $0x14] sm:$0xff]  ;;  %v11301_v10 = vld [vmem:[%s14120_s11 + $0x58] sm:$0xff] }
 0xd93   : > { %10910 = vmatmul.msk.bf16.vlgmr.msra.gmra.mxu1 %vm8756_vm12, %v9084_v33  ;;  %v9016_v35 = vpack.c.bf16 %v9013_v20, %v9012_v26  ;;  %v9085_v3 = vpack.c.bf16 %v9083_v62, %v9082_v61  ;;  %v9014_v2 = vld [vmem:[#allocation9 + $0x13] sm:$0xff]  ;;  %9277 = vmatpush.bf16.msra.mxu3 %v11290_v34 }
 0xd94   : > { %10815 = vmatmul.msk.bf16.gmra.mxu2 %vm8756_vm12, %v8836_v36  ;;  %v9017_v19 = vpack.c.bf16 %v9015_v46, %v9014_v2  ;;  %v8946_v8 = vld [vmem:[#allocation9 + $0x12] sm:$0xff]  ;;  %v11298_v46 = vld [vmem:[%s14120_s11 + $0x40] sm:$0xff] }
 0xd95   : > { %v8949_v30 = vpack.c.bf16 %v8947_v39, %v8946_v8  ;;  %v11300_v36 = vld [vmem:[%s14120_s11 + $0x50] sm:$0xff] }
 0xda2   : > { %10884 = vmatmul.msk.bf16.vlgmr.msrb.gmra.mxu3 %vm8756_vm12, %v9016_v35 }
 0xda3   : > { %10911 = vmatmul.msk.bf16.gmra.mxu1 %vm8756_vm12, %v9085_v3 }
 0xda4   : > { %10858 = vmatmul.msk.bf16.vlgmr.msrb.gmra.mxu2 %vm8756_vm12, %v8948_v24 }
 0xda5   : > { %9327 = vmatpush.bf16.msrb.mxu2 %v11301_v10  ;;  %v9530_v10 = vld [vmem:[%s14124_s15 + $0x20] sm:$0xf] }
 0xda9   : > { %9328 = vmatpush.bf16.msrb.mxu2 %v11300_v36 }
 0xdad   : > { %9329 = vmatpush.bf16.msrb.mxu2 %v11299_v37  ;;  %v11317_v37 = vld [vmem:[%s14124_s15 + $0x18] sm:$0xff] }
 0xdb1   : > { %9330 = vmatpush.bf16.msrb.mxu2 %v11298_v46  ;;  %v11316_v46 = vld [vmem:[%s14124_s15 + $0x10] sm:$0xff] }
 0xdb2   : > { %10885 = vmatmul.msk.bf16.gmra.mxu3 %vm8756_vm12, %v9017_v19 }
 0xdb4   : > { %10859 = vmatmul.msk.bf16.gmra.mxu2 %vm8756_vm12, %v8949_v30 }
 0xe04   : > { %v8885_v41 = vpop.f32.mrf.mxu2 }
 0xe05   : > { %v8934_v42 = vpop.f32.mrf.mxu3 }
 0xe06   : > { %v8935_v16 = vadd.f32 %v8934_v42, %v8885_v41 }
 0xe0c   : > { %v8887_v50 = vpop.f32.mrf.mxu2 }
 0xe0d   : > { %v8936_v1 = vpop.f32.mrf.mxu3 }
 0xe0e   : > { %v8937_v32 = vadd.f32 %v8936_v1, %v8887_v50 }
 0xe10   : > { %v9134_v54 = vpop.f32.mrf.mxu1 }
 0xe15   : > { %v8939_v57 = vpop.f32.mrf.mxu3 }
 0xe17   : > { %v8890_v7 = vpop.f32.mrf.mxu2 }
 0xe18   : > { %v9136_v17 = vpop.f32.mrf.mxu1  ;;  %v8940_v52 = vadd.f32 %v8939_v57, %v8890_v7 }
 0xe1d   : > { %v8941_v29 = vpop.f32.mrf.mxu3 }
 0xe1f   : > { %v8892_v11 = vpop.f32.mrf.mxu2 }
 0xe20   : > { %v9139_v23 = vpop.f32.mrf.mxu1  ;;  %v8942_v22 = vadd.f32 %v8941_v29, %v8892_v11 }
 0xe25   : > { %v9066_v13 = vpop.f32.mrf.mxu3 }
 0xe27   : > { %v8998_v9 = vpop.f32.mrf.mxu2 }
 0xe28   : > { %v9008_v14 = vadd.f32 %v8998_v9, %v8935_v16  ;;  %v9141_v35 = vpop.f32.mrf.mxu1  ;;  %v11305_v16 = vld [vmem:[%s14122_s13 + $0x18] sm:$0xff] }
 0xe29   : > { %9447 = vmatpush.bf16.msrb.mxu1 %v11305_v16 }
 0xe2a   : > { %v9076_v56 = vadd.f32 %v9066_v13, %v9008_v14  ;;  %v11309_v13 = vld [vmem:[%s14122_s13 + $0x38] sm:$0xff] }
 0xe2b   : > { %v11313_v14 = vld [vmem:[%s14122_s13 + $0x58] sm:$0xff]  ;;  %9407 = vmatpush.bf16.msrb.mxu3 %v11309_v13 }
 0xe2c   : > { %v9144_v47 = vadd.f32 %v9134_v54, %v9076_v56  ;;  %v11304_v56 = vld [vmem:[%s14122_s13 + $0x10] sm:$0xff] }
 0xe2d   : > { %v9068_v44 = vpop.f32.mrf.mxu3  ;;  %9448 = vmatpush.bf16.msrb.mxu1 %v11304_v56 }
 0xe2e   : > { %v9152_v6 = vadd.f32 %v11377_v0, %v9144_v47  ;;  %v11312_v47 = vld [vmem:[%s14122_s13 + $0x50] sm:$0xff] }
 0xe2f   : > { %v9000_v40 = vpop.f32.mrf.mxu2 }
 0xe30   : > { %v9156_v15 = vmax.f32 %v9152_v6, 0.0  ;;  %v9009_v27 = vadd.f32 %v9000_v40, %v8937_v32  ;;  %v11378_v6 = vld [vmem:[%s14121_s12] ss:$0 sm:$0xff] }
 0xe32   : > { %9160 = vst.msk [vmem:[#allocation10] sm:$0xff] %vm8756_vm12, %v9156_v15  ;;  %v9077_v25 = vadd.f32 %v9068_v44, %v9009_v27  ;;  %v11303_v44 = vld [vmem:[%s14122_s13 + $0x8] sm:$0xff] }
 0xe33   : > { %v11311_v15 = vld [vmem:[%s14122_s13 + $0x48] sm:$0xff]  ;;  %9449 = vmatpush.bf16.msrb.mxu1 %v11303_v44 }
 0xe34   : > { %v9145_v4 = vadd.f32 %v9136_v17, %v9077_v25  ;;  %v11307_v17 = vld [vmem:[%s14122_s13 + $0x28] sm:$0xff] }
 0xe35   : > { %v9071_v38 = vpop.f32.mrf.mxu3 }
 0xe36   : > { %v9153_v28 = vadd.f32 %v11377_v0, %v9145_v4  ;;  %v11306_v4 = vld [vmem:[%s14122_s13 + $0x20] sm:$0xff] }
 0xe37   : > { %v9003_v58 = vpop.f32.mrf.mxu2  ;;  %9450 = vmatpush.bf16.msrb.mxu1 %v11302_v21  ;;  %v9520_v21 = vld [vmem:[%s14125_s16] sm:$0x1] }
 0xe38   : > { %v9157_v12 = vmax.f32 %v9153_v28, 0.0  ;;  %v9010_v48 = vadd.f32 %v9003_v58, %v8940_v52  ;;  %v11310_v52 = vld [vmem:[%s14122_s13 + $0x40] sm:$0xff] }
 0xe3a   : > { %9161 = vst.msk [vmem:[#allocation10 + $0x8] sm:$0xff] %vm8756_vm12, %v9157_v12  ;;  %v9078_v51 = vadd.f32 %v9071_v38, %v9010_v48 }
 0xe3c   : > { %v9146_v53 = vadd.f32 %v9139_v23, %v9078_v51 }
 0xe3d   : > { %v9073_v62 = vpop.f32.mrf.mxu3 }
 0xe3e   : > { %v9154_v63 = vadd.f32 %v11377_v0, %v9146_v53 }
 0xe3f   : > { %v9005_v33 = vpop.f32.mrf.mxu2 }
 0xe40   : > { %v9158_v5 = vmax.f32 %v9154_v63, 0.0  ;;  %v9011_v45 = vadd.f32 %v9005_v33, %v8942_v22  ;;  %v11071_v33 = vld [vmem:[%s14124_s15 + $0x44] sm:$0xf] }
 0xe41   : > { %v9164_v20 = vld [vmem:[#allocation10] ss:$2 sm:$0xff]  ;;  %v9168_v61 = vld [vmem:[#allocation10 + $0x1] ss:$2 sm:$0xff]  ;;  %v9608_v36 = vunpack.c.l.b16 %v11071_v33 }
 0xe42   : > { %v9171_v49 = vmax.f32 %v9164_v20, %v9168_v61  ;;  %9162 = vst.msk [vmem:[#allocation10 + $0x10] sm:$0xff] %vm8756_vm12, %v9158_v5  ;;  %v9079_v26 = vadd.f32 %v9073_v62, %v9011_v45  ;;  %v11097_v5 = vld [vmem:[%s14124_s15 + $0x68] sm:$0xf]  ;;  %v9548_v45 = vunpack.c.l.b16 %v9530_v10 }
 0xe43   : > { %v9667_v20 = vunpack.c.l.b16 %v11097_v5  ;;  %v9613_v62 = vpack.c.b16 %v9608_v36, %v9608_v36 }
 0xe44   : > { %v9147_v3 = vadd.f32 %v9141_v35, %v9079_v26  ;;  %9176 = vst.msk [vmem:[#allocation11 + $0x1] sm:$0xff] %vm8756_vm12, %v9171_v49  ;;  %v9553_v61 = vpack.c.b16 %v9548_v45, %v9548_v45 }
 0xe45   : > { %v9672_v49 = vpack.c.b16 %v9667_v20, %v9667_v20  ;;  %v9622_v35 = vsel %vm4376_vm2, %v9613_v62, 0 }
 0xe46   : > { %v9155_v24 = vadd.f32 %v11377_v0, %v9147_v3  ;;  %v11308_v0 = vld [vmem:[%s14122_s13 + $0x30] sm:$0xff]  ;;  %v9563_v26 = vsel %vm4376_vm2, %v9553_v61, 0  ;;  %9627 = vmatpush.bf16.msra.mxu1 %v9622_v35 }
 0xe47   : > { %9408 = vmatpush.bf16.msrb.mxu3 %v11308_v0  ;;  %v9681_v3 = vsel %vm4376_vm2, %v9672_v49, 0  ;;  %vm9558_vm2 = vcmask 588800  }
 0xe48   : > { %v9159_v2 = vmax.f32 %v9155_v24, 0.0  ;;  %v11321_v24 = vld [vmem:[%s14124_s15 + $0x3c] sm:$0xff] }
 0xe4a   : > { %9163 = vst.msk [vmem:[#allocation10 + $0x18] sm:$0x3] %vm8815_vm14, %v9159_v2  ;;  %v11325_v2 = vld [vmem:[%s14124_s15 + $0x60] sm:$0xff]  ;;  %9628 = vmatpush.bf16.msra.mxu1 %v11321_v24 }
 0xe4b   : > { %v9190_v30 = vld [vmem:[#allocation11 + $0x1] sm:$0xff]  ;;  %9409 = vmatpush.bf16.msrb.mxu3 %v11307_v17 }
 0xe4c   : > { %v9179_v42 = vld [vmem:[#allocation11] sm:$0xff] }
 0xe4f   : > { %9410 = vmatpush.bf16.msrb.mxu3 %v11306_v4 }
 0xe51   : > { %v9166_v39 = vld [vmem:[#allocation10 + $0x10] ss:$2 sm:$0x1f]  ;;  %v9170_v19 = vld [vmem:[#allocation10 + $0x11] ss:$2 sm:$0x1f] }
 0xe52   : > { %v9172_v8 = vmax.f32 %v9166_v39, %v9170_v19  ;;  %v11320_v39 = vld [vmem:[%s14124_s15 + $0x34] sm:$0xff] }
 0xe53   : > { %v11324_v19 = vld [vmem:[%s14124_s15 + $0x58] sm:$0xff]  ;;  %9629 = vmatpush.bf16.msra.mxu1 %v11320_v39 }
 0xe54   : > { %9178 = vst.msk [vmem:[#allocation11 + $0x9] sm:$0x1f] %vm9177_vm0, %v9172_v8  ;;  %v11315_v8 = vld [vmem:[%s14124_s15 + $0x8] sm:$0xff] }
 0xe5b   : > { %v9191_v41 = vld [vmem:[#allocation11 + $0x9] sm:$0x1f] }
 0xe5c   : > { %v9180_v1 = vld [vmem:[#allocation11 + $0x8] sm:$0x1f]  ;;  %v9192_v50 = vpack.c.bf16 %v9191_v41, %v9190_v30  ;;  %v11319_v30 = vld [vmem:[%s14124_s15 + $0x2c] sm:$0xff] }
 0xe5d   : > { %v9181_v57 = vpack.c.bf16 %v9180_v1, %v9179_v42  ;;  %v9284_v7 = vld [vmem:[#allocation11 + $0x2] sm:$0xff]  ;;  %v9285_v29 = vld [vmem:[#allocation11 + $0xa] sm:$0x1f]  ;;  %v11323_v41 = vld [vmem:[%s14124_s15 + $0x50] sm:$0xff]  ;;  %9630 = vmatpush.bf16.msra.mxu1 %v11319_v30 }
 0xe5e   : > { %10936 = vmatmul.msk.bf16.vlgmr.msra.gmra.mxu2 %vm8756_vm12, %v9192_v50  ;;  %v9286_v11 = vpack.c.bf16 %v9285_v29, %v9284_v7  ;;  %v11314_v1 = vld [vmem:[%s14124_s15] sm:$0xff]  ;;  %v11329_v7 = vld [vmem:[%s14126_s17 + $0x18] sm:$0xff] }
 0xe5f   : > { %10953 = vmatmul.msk.bf16.vlgmr.msra.gmra.mxu3 %vm8756_vm12, %v9181_v57  ;;  %9498 = vmatpush.bf16.msra.mxu2 %v11313_v14  ;;  %v11318_v50 = vld [vmem:[%s14124_s15 + $0x24] sm:$0xff] }
 0xe60   : > { %9568 = vmatpush.bf16.msra.mxu3 %v9563_v26  ;;  %v11322_v57 = vld [vmem:[%s14124_s15 + $0x48] sm:$0xff] }
 0xe61   : > { %9631 = vmatpush.bf16.msra.mxu1 %v11318_v50 }
 0xe63   : > { %9499 = vmatpush.bf16.msra.mxu2 %v11312_v47 }
 0xe64   : > { %9569 = vmatpush.bf16.msra.mxu3 %v11317_v37 }
 0xe67   : > { %9500 = vmatpush.bf16.msra.mxu2 %v11311_v15  ;;  %v11328_v15 = vld [vmem:[%s14126_s17 + $0x10] sm:$0xff] }
 0xe68   : > { %9570 = vmatpush.bf16.msra.mxu3 %v11316_v46 }
 0xe6b   : > { %9501 = vmatpush.bf16.msra.mxu2 %v11310_v52 }
 0xe6c   : > { %9571 = vmatpush.bf16.msra.mxu3 %v11315_v8 }
 0xe6e   : > { %10978 = vmatmul.msk.bf16.vlgmr.msrb.gmra.mxu2 %vm8756_vm12, %v9286_v11 }
 0xe6f   : > { %9686 = vmatpush.bf16.msrb.mxu2 %v9681_v3 }
 0xe70   : > { %9572 = vmatpush.bf16.msra.mxu3 %v11314_v1 }
 0xe73   : > { %9687 = vmatpush.bf16.msrb.mxu2 %v11325_v2 }
 0xe77   : > { %9688 = vmatpush.bf16.msrb.mxu2 %v11324_v19 }
 0xe7b   : > { %9689 = vmatpush.bf16.msrb.mxu2 %v11323_v41 }
 0xe7f   : > { %9690 = vmatpush.bf16.msrb.mxu2 %v11322_v57 }
 0xee1   : > { %v9238_v60 = vpop.f32.mrf.mxu2 }
 0xee2   : > { %v9279_v9 = vpop.f32.mrf.mxu3 }
 0xee3   : > { %v9280_v32 = vadd.f32 %v9279_v9, %v9238_v60 }
 0xee9   : > { %v9240_v54 = vpop.f32.mrf.mxu2 }
 0xeea   : > { %v9281_v59 = vpop.f32.mrf.mxu3 }
 0xeeb   : > { %v9282_v55 = vadd.f32 %v9281_v59, %v9240_v54  ;;  %v11379_v54 = vld [vmem:[%s14123_s14] ss:$0 sm:$0xff] }
 0xef1   : > { %v9332_v40 = vpop.f32.mrf.mxu2 }
 0xef2   : > { %v9337_v27 = vadd.f32 %v9332_v40, %v9280_v32 }
 0xef4   : > { %v9343_v25 = vadd.f32 %v11378_v6, %v9337_v27  ;;  %v11327_v27 = vld [vmem:[%s14126_s17 + $0x8] sm:$0xff] }
 0xef6   : > { %v9345_v28 = vmax.f32 %v9343_v25, 0.0  ;;  %v11326_v25 = vld [vmem:[%s14126_s17] sm:$0xff] }
 0xef8   : > { %9347 = vst.msk [vmem:[#allocation12] sm:$0xff] %vm8756_vm12, %v9345_v28 }
 0xef9   : > { %v9334_v18 = vpop.f32.mrf.mxu2 }
 0xefa   : > { %v9338_v38 = vadd.f32 %v9334_v18, %v9282_v55 }
 0xefc   : > { %v9344_v58 = vadd.f32 %v11378_v6, %v9338_v38 }
 0xefe   : > { %v9346_v12 = vmax.f32 %v9344_v58, 0.0 }
 0xf00   : > { %9348 = vst.msk [vmem:[#allocation12 + $0x8] sm:$0x1f] %vm9177_vm0, %v9346_v12 }
 0xf07   : > { %v9349_v48 = vld [vmem:[#allocation12] ss:$2 sm:$0x3f]  ;;  %v9351_v23 = vld [vmem:[#allocation12 + $0x1] ss:$2 sm:$0x3f] }
 0xf08   : > { %v9352_v51 = vmax.f32 %v9349_v48, %v9351_v23 }
 0xf0a   : > { %9354 = vst.msk [vmem:[#allocation13 + $0x1] sm:$0x3f] %vm8763_vm13, %v9352_v51  ;;  %v9707_v51 = vld [vmem:[%s14127_s18] sm:$0x1] }
 0xf11   : > { %v9365_v43 = vld [vmem:[#allocation13 + $0x1] sm:$0x3f] }
 0xf12   : > { %v9355_v31 = vld [vmem:[#allocation13] sm:$0x3f]  ;;  %v9366_v22 = vpack.c.bf16 %v9365_v43, %v9365_v43 }
 0xf13   : > { %v9456_v53 = vld [vmem:[#allocation13 + $0x2] sm:$0x3f]  ;;  %v9356_v63 = vpack.c.bf16 %v9355_v31, %v9355_v31 }
 0xf14   : > { %v9457_v34 = vpack.c.bf16 %v9456_v53, %v9456_v53  ;;  %11003 = vmatmul.msk.bf16.vlgmr.msrb.gmra.mxu3 %vm8756_vm12, %v9366_v22 }
 0xf15   : > { %11020 = vmatmul.msk.bf16.vlgmr.msrb.gmra.mxu1 %vm8756_vm12, %v9356_v63  ;;  %9739 = vmatpush.bf16.msrb.mxu3 %v11329_v7 }
 0xf16   : > { %11045 = vmatmul.msk.bf16.vlgmr.msra.gmra.mxu2 %vm8756_vm12, %v9457_v34 }
 0xf19   : > { %9740 = vmatpush.bf16.msrb.mxu3 %v11328_v15 }
 0xf1d   : > { %9741 = vmatpush.bf16.msrb.mxu3 %v11327_v27 }
 0xf21   : > { %9742 = vmatpush.bf16.msrb.mxu3 %v11326_v25 }
 0xf92   : > { %v9452_v42 = vpop.f32.mrf.mxu1 }
 0xf97   : > { %v9412_v29 = vpop.f32.mrf.mxu3 }
 0xf98   : > { %v9453_v11 = vadd.f32 %v9452_v42, %v9412_v29 }
 0xf99   : > { %v9503_v60 = vpop.f32.mrf.mxu2 }
 0xf9a   : > { %v9454_v16 = vpop.f32.mrf.mxu1  ;;  %v9507_v13 = vadd.f32 %v9503_v60, %v9453_v11 }
 0xf9c   : > { %v9512_v9 = vadd.f32 %v11379_v54, %v9507_v13 }
 0xf9e   : > { %v9513_v14 = vmax.f32 %v9512_v9, 0.0 }
 0xf9f   : > { %v9414_v56 = vpop.f32.mrf.mxu3 }
 0xfa0   : > { %9515 = vst.msk [vmem:[#allocation14] sm:$0x3f] %vm9514_vm1, %v9513_v14 }
 0xfa1   : > { %v9505_v0 = vpop.f32.mrf.mxu2 }
 0xfa7   : > { %v9516_v47 = vld [vmem:[#allocation14] ss:$2 sm:$0x7]  ;;  %v9518_v32 = vld [vmem:[#allocation14 + $0x1] ss:$2 sm:$0x7] }
 0xfa8   : > { %v9519_v6 = vmax.f32 %v9516_v47, %v9518_v32 }
 0xfaa   : > { %v9521_v44 = vpack.c.bf16 %v9519_v6, %v9519_v6 }
 0xfac   : > { %11062 = vmatmul.msk.bf16.vlgmr.msra.gmra.mxu3 %vm9558_vm2, %v9521_v44  ;;  %v9589_v17 = vshrl.u32 %v9521_v44, 16  ;;  %v9649_v40 = vrot.slane %v9521_v44, 1 }
 0xfae   : > { %11088 = vmatmul.msk.bf16.vlgmr.msra.gmra.mxu1 %vm9558_vm2, %v9589_v17  ;;  %11114 = vmatmul.msk.bf16.vlgmr.msrb.gmra.mxu2 %vm9558_vm2, %v9649_v40 }
0x102b   : > { %v9633_v4 = vpop.f32.mrf.mxu1 }
0x102f   : > { %v9574_v59 = vpop.f32.mrf.mxu3 }
0x1030   : > { %v9578_v52 = vadd.f32 %v9574_v59, %v9520_v21 }
0x1031   : > { %v9692_v28 = vpop.f32.mrf.mxu2 }
0x1032   : > { %v9637_v55 = vadd.f32 %v9633_v4, %v9578_v52 }
0x1033   : > { %v9635_v18 = vpop.f32.mrf.mxu1 }
0x1034   : > { %v9696_v38 = vadd.f32 %v9692_v28, %v9637_v55 }
0x1036   : > { %v9697_v58 = vmax.f32 %v9696_v38, 0.0 }
0x1037   : > { %v9576_v12 = vpop.f32.mrf.mxu3 }
0x1038   : > { %v9698_v48 = vpack.c.bf16 %v9697_v58, %v9697_v58 }
0x1039   : > { %v9694_v23 = vpop.f32.mrf.mxu2 }
0x103a   : > { %11131 = vmatmul.msk.bf16.vlgmr.msrb.gmra.mxu3 %vm8756_vm12, %v9698_v48 }
0x10bd   : > { %v9744_v43 = vpop.f32.mrf.mxu3 }
0x10be   : > { %v9745_v31 = vadd.f32 %v9744_v43, %v9707_v51 }
0x10c0   : > { %9749 = vst.msk [vmem:[%s594_s20] sm:$0x1] %vm9748_vm3, %v9745_v31 }
0x10c1   : > { %11411 = shalt.err (!%p11408_p3)
}
0x10c2   : > { %11333 = dma.vmem_to_hbm [thread:$0]  (%p11587_p5), %s9762_s25, 16, %s9764_s4, %s9751_s28  }
0x10c5   : > { %v9746_v53 = vpop.f32.mrf.mxu3 }
0x10c6 PF: > { %p11339_p4 = scmp.ge.s32.totalorder %s11446_s21, 2  ;;  %s9775_s5 = sand.u32 1, %s11434_s0  }
0x10c7   : > { %s9776_s2 = scalar_lea.sflag [#allocation16], %s9775_s5 }
0x10c8   : > { %p11336_p7 = pnand %p11339_p4, %p11591_p6 }
0x10ca   : > { %p11337_p8 = pneg %p11336_p7 }
0x10cc   : > { %11429 = dma.done.wait (%p11337_p8), %s9776_s2, 16  }
0x10cd   : > { %11431 = vsyncadd (%p11337_p8), %s9776_s2, 4294967280  ;;  %s14200_s21 = sld [smem:[#allocation19_spill]]  ;;  %s14203_s0 = smov %s11438_s30 }
0x10ce   : > { %s14201_s7 = sld [smem:[#allocation18_spill]] }
0x10cf   : > { %s14202_s20 = sld [smem:[#allocation20_spill]] }
0x10d3   : > { %p29_p9 = scmp.ge.s32.totalorder %s14200_s21, 4  }
0x10d4   : > { %s14204_s30 = smov %s14201_s7 }
0x10d5   :  { %31 = sbr.rel (!%p29_p9) target bundleno = 13 (0xd), region = 1065 }
0x10da   :  { %9781 = vsyncpa [#allocation16], 1 }
0x10db   :  { %9783 = vsyncpa [#allocation16 + $0x1], 1 }

</bundles_post_ra>
